<compile_context>
chip_gen: v7x
topology: tpu7x:2x2x1
jax: 0.10.0
libtpu: 0.0.40
codegen_flags: <defaults>
</compile_context>

<pallas_src>
import functools

import jax
import jax.numpy as jnp
import numpy as np
from jax.experimental import pallas as pl
from jax.experimental.pallas import tpu as pltpu

_BN_EPS = 1e-5
_LANES = 128   # channels padded up to a multiple of this (lane width)
_W_OFF = 16    # interior column offset in the halo scratch -> bf16 (16,128)-tile aligned


def _conv_block_kernel(x_ref, w_ref, gamma_ref, beta_ref, o_ref, pad_ref, *, pool: bool):
    """Fused ConvBlock forward.

    x_ref:     (N, H, W, cin)  f32   network input at its TRUE channel width
    w_ref:     (num_conv, 9, Cp, Cp) bf16  per-layer per-tap weights (in-ch rows, out-ch cols)
    gamma_ref: (num_conv, Cp)  f32   BN weight (zero in padded lanes)
    beta_ref:  (num_conv, Cp)  f32   BN bias   (zero in padded lanes)
    o_ref:     (N, Ho, Wo, Cp) f32   lane-dense output
    pad_ref:   VMEM (N, H+2, W+2*_W_OFF, Cp) bf16  halo / activation scratch
    """
    N, H0, W0, cin = x_ref.shape
    num_conv = w_ref.shape[0]
    Cp = w_ref.shape[-1]

    # Zero the halo scratch ONCE: halo ring + gutters + padded channel lanes.
    pad_ref[...] = jnp.zeros(pad_ref.shape, pad_ref.dtype)

    # Layer-0 input: lane-widen cin -> Cp by storing into the already-zero interior
    # (down-cast to bf16 fuses into this store).
    pad_ref[:, 1:H0 + 1, _W_OFF:_W_OFF + W0, :cin] = x_ref[...].astype(pad_ref.dtype)

    H, W = H0, W0
    cur = None                                  # f32 activations of the previous layer
    for layer in range(num_conv):
        M = N * H * W

        if layer > 0:
            if pool:
                # Interior shrank after pooling: re-zero ONLY the stale bottom ring row
                # and right ring column surrounding the new (smaller) interior.
                pad_ref[:, H + 1:H + 2, _W_OFF - 1:_W_OFF + W + 1, :] = jnp.zeros(
                    (N, 1, W + 2, Cp), pad_ref.dtype)
                pad_ref[:, 0:H + 2, _W_OFF + W:_W_OFF + W + 1, :] = jnp.zeros(
                    (N, H + 2, 1, Cp), pad_ref.dtype)
            # Single bf16 interior store per layer (the only full-size activation store).
            pad_ref[:, 1:H + 1, _W_OFF:_W_OFF + W, :] = cur.astype(pad_ref.dtype)

        # ---- 3x3 conv (padding=1) == 9 accumulating K=Cp MXU matmuls, no im2col copy ----
        y = None
        for ky in range(3):
            for kx in range(3):
                c0 = _W_OFF - 1 + kx
                patch = pad_ref[:, ky:ky + H, c0:c0 + W, :].reshape(M, Cp)   # bf16
                d = jnp.dot(patch, w_ref[layer, ky * 3 + kx],
                            preferred_element_type=jnp.float32)
                y = d if y is None else y + d
        # NOTE: conv bias intentionally omitted — it cancels exactly under the
        # training-mode batch-mean subtraction below.

        # ---- BatchNorm2d (training batch stats), affine fused with ReLU ----
        mean = jnp.mean(y, axis=0, keepdims=True)
        centered = y - mean
        var = jnp.mean(centered * centered, axis=0, keepdims=True)
        scale = gamma_ref[layer:layer + 1, :] * jax.lax.rsqrt(var + _BN_EPS)
        y = jnp.maximum(centered * scale + beta_ref[layer:layer + 1, :], 0.0)

        y = y.reshape(N, H, W, Cp)

        # ---- optional MaxPool2d(2,2): pool H first (leading-dim split), then W ----
        if pool:
            y = jnp.max(y.reshape(N, H // 2, 2, W, Cp), axis=2)
            y = jnp.max(y.reshape(N, H // 2, W // 2, 2, Cp), axis=3)
            H //= 2
            W //= 2

        cur = y

    o_ref[...] = cur.astype(o_ref.dtype)


def _round_up(x, m):
    return (x + m - 1) // m * m


def _pack_params(params, cp):
    """Zero-pad channels to cp lanes and pre-cast weights to bf16 (once, host side)."""
    w_taps, gammas, betas = [], [], []
    for (w, b, gamma, beta) in params:
        del b  # conv bias cancels exactly under training-mode BN (see kernel)
        kh, kw, cin, cout = w.shape
        wp = jnp.zeros((kh * kw, cp, cp), jnp.float32)
        wp = wp.at[:, :cin, :cout].set(w.reshape(kh * kw, cin, cout))
        w_taps.append(wp.astype(jnp.bfloat16))
        gammas.append(jnp.zeros((cp,), jnp.float32).at[:cout].set(gamma))
        betas.append(jnp.zeros((cp,), jnp.float32).at[:cout].set(beta))
    return jnp.stack(w_taps), jnp.stack(gammas), jnp.stack(betas)


def _pick_vmem_limit():
    """Size the scoped-VMEM limit per generation (v7x 64 MiB physical, v5e/v6e 128 MiB)."""
    try:
        cap = pltpu.get_tpu_info().vmem_capacity_bytes
    except Exception:
        cap = 64 * 1024 * 1024  # conservative fallback (v7x physical)
    return min(int(cap * 3 // 4), 96 * 1024 * 1024)


def conv_block_forward(params, x_nchw, *, pool: bool):
    """ConvBlock.forward. Input follows the PyTorch NCHW convention."""
    N, cin, H, W = x_nchw.shape
    cout = params[0][0].shape[-1]
    num_conv = len(params)
    Cp = _round_up(max(cin, cout), _LANES)
    if pool:
        assert H % (2 ** num_conv) == 0 and W % (2 ** num_conv) == 0
    Ho = H // (2 ** num_conv) if pool else H
    Wo = W // (2 ** num_conv) if pool else W

    # NCHW -> NHWC at the TRUE channel width; lane-widening happens inside the kernel.
    x = jnp.transpose(x_nchw, (0, 2, 3, 1)).astype(jnp.float32)

    w_taps, gamma, beta = _pack_params(params, Cp)

    pad_shape = (N, H + 2, W + 2 * _W_OFF, Cp)          # bf16 halo/activation scratch
    vmem_limit = _pick_vmem_limit()

    # VMEM sanity budget: scratch + (double-buffered) I/O + rough in-kernel f32 temporaries.
    f32, bf16 = 4, 2
    scratch_bytes = int(np.prod(pad_shape)) * bf16
    io_bytes = 2 * (x.size * f32 + w_taps.size * bf16 + (gamma.size + beta.size) * f32
                    + N * Ho * Wo * Cp * f32)
    act_bytes = 4 * N * H * W * Cp * f32
    assert scratch_bytes + io_bytes + act_bytes < vmem_limit, \
        (scratch_bytes, io_bytes, act_bytes, vmem_limit)

    kernel = functools.partial(_conv_block_kernel, pool=pool)
    out = pl.pallas_call(
        kernel,
        out_shape=jax.ShapeDtypeStruct((N, Ho, Wo, Cp), jnp.float32),
        grid=(1,),
        in_specs=[
            pl.BlockSpec((N, H, W, cin), lambda i: (0, 0, 0, 0)),
            pl.BlockSpec((num_conv, 9, Cp, Cp), lambda i: (0, 0, 0, 0)),
            pl.BlockSpec((num_conv, Cp), lambda i: (0, 0)),
            pl.BlockSpec((num_conv, Cp), lambda i: (0, 0)),
        ],
        out_specs=pl.BlockSpec((N, Ho, Wo, Cp), lambda i: (0, 0, 0, 0)),
        scratch_shapes=[pltpu.VMEM(pad_shape, jnp.bfloat16)],
        compiler_params=pltpu.CompilerParams(
            dimension_semantics=("arbitrary",),
            vmem_limit_bytes=vmem_limit,
        ),
    )(x, w_taps, gamma, beta)

    out = out[:, :, :, :cout]                       # drop lane padding
    return jnp.transpose(out, (0, 3, 1, 2))         # back to NCHW


def init_conv_block_params(key, in_features, out_features, num_conv):
    """Deterministic synthetic parameters (shapes match nn.Conv2d / nn.BatchNorm2d)."""
    features = [in_features] + [out_features] * num_conv
    params = []
    for i in range(num_conv):
        key, k1, k2, k3, k4 = jax.random.split(key, 5)
        cin, cout = features[i], features[i + 1]
        bound = 1.0 / np.sqrt(cin * 3 * 3)
        w = jax.random.uniform(k1, (3, 3, cin, cout), jnp.float32, -bound, bound)
        b = jax.random.uniform(k2, (cout,), jnp.float32, -bound, bound)
        gamma = jax.random.uniform(k3, (cout,), jnp.float32, 0.5, 1.5)
        beta = jax.random.uniform(k4, (cout,), jnp.float32, -0.5, 0.5)
        params.append((w, b, gamma, beta))
    return params


# ------------------------- pure-JAX f32 reference (includes the conv bias) --------------
def _reference_forward(params, x_nchw, *, pool: bool):
    x = jnp.transpose(x_nchw, (0, 2, 3, 1))
    for (w, b, gamma, beta) in params:
        y = jax.lax.conv_general_dilated(
            x, w, window_strides=(1, 1), padding=((1, 1), (1, 1)),
            dimension_numbers=("NHWC", "HWIO", "NHWC"),
            preferred_element_type=jnp.float32) + b
        mean = jnp.mean(y, axis=(0, 1, 2), keepdims=True)
        var = jnp.mean(jnp.square(y - mean), axis=(0, 1, 2), keepdims=True)
        y = (y - mean) * jax.lax.rsqrt(var + _BN_EPS) * gamma + beta
        y = jnp.maximum(y, 0.0)
        if pool:
            y = jax.lax.reduce_window(
                y, -jnp.inf, jax.lax.max,
                window_dimensions=(1, 2, 2, 1), window_strides=(1, 2, 2, 1),
                padding="VALID")
        x = y
    return jnp.transpose(x, (0, 3, 1, 2))


if __name__ == "__main__":
    # ConvBlock(in_features=4, out_features=8, num_conv=2), input x: (2, 4, 16, 16) NCHW
    in_features, out_features, num_conv = 4, 8, 2
    N, H, W = 2, 16, 16

    key = jax.random.PRNGKey(0)
    key, kx = jax.random.split(key)
    x = jax.random.normal(kx, (N, in_features, H, W), jnp.float32)
    params = init_conv_block_params(key, in_features, out_features, num_conv)

    for pool in (True, False):
        out = jax.block_until_ready(conv_block_forward(params, x, pool=pool))
        ref = jax.block_until_ready(_reference_forward(params, x, pool=pool))
        hw = H // (2 ** num_conv) if pool else H
        assert out.shape == (N, out_features, hw, hw), out.shape
        # bf16 MXU operands (f32 accumulation): expect ~1e-2 deviation vs the f32 reference.
        np.testing.assert_allclose(np.asarray(out), np.asarray(ref), rtol=5e-2, atol=5e-2)

    print("KERNEL_OK")
</pallas_src>

<mosaic_0001>
module attributes {stable_mosaic.version = 11 : i64} {
  func.func @_conv_block_kernel(%arg0: i32, %arg1: memref<2x16x16x4xf32, #tpu.memory_space<vmem>>, %arg2: memref<2x9x128x128xbf16, #tpu.memory_space<vmem>>, %arg3: memref<2x128xf32, #tpu.memory_space<vmem>>, %arg4: memref<2x128xf32, #tpu.memory_space<vmem>>, %arg5: memref<2x4x4x128xf32, #tpu.memory_space<vmem>>, %arg6: memref<2x18x48x128xbf16, #tpu.memory_space<vmem>>) attributes {dimension_semantics = [#tpu.dimension_semantics<arbitrary>], iteration_bounds = array<i64: 1>, scalar_prefetch = 0 : i64, scratch_operands = 1 : i64, tpu.core_type = #tpu.core_type<tc>, window_params = [{pipeline_mode = #tpu.pipeline_mode<synchronous>, transform_indices = @transform_0, window_bounds = array<i64: 2, 16, 16, 4>}, {pipeline_mode = #tpu.pipeline_mode<synchronous>, transform_indices = @transform_1, window_bounds = array<i64: 2, 9, 128, 128>}, {pipeline_mode = #tpu.pipeline_mode<synchronous>, transform_indices = @transform_2, window_bounds = array<i64: 2, 128>}, {pipeline_mode = #tpu.pipeline_mode<synchronous>, transform_indices = @transform_3, window_bounds = array<i64: 2, 128>}, {pipeline_mode = #tpu.pipeline_mode<synchronous>, transform_indices = @transform_4, window_bounds = array<i64: 2, 4, 4, 128>}]} {
    %cst = arith.constant 0.000000e+00 : bf16
    %0 = vector.broadcast %cst : bf16 to vector<2x18x48x128xbf16>
    %c0 = arith.constant 0 : index
    %c0_0 = arith.constant 0 : index
    %c0_1 = arith.constant 0 : index
    %c0_2 = arith.constant 0 : index
    %1 = vector.load %arg6[%c0, %c0_0, %c0_1, %c0_2] : memref<2x18x48x128xbf16, #tpu.memory_space<vmem>>, vector<2x18x48x128xbf16>
    tpu.vector_store %arg6[%c0, %c0_0, %c0_1, %c0_2], %0 {strides = array<i32>} : memref<2x18x48x128xbf16, #tpu.memory_space<vmem>>, vector<2x18x48x128xbf16>,
    %c0_3 = arith.constant 0 : index
    %c0_4 = arith.constant 0 : index
    %c0_5 = arith.constant 0 : index
    %c0_6 = arith.constant 0 : index
    %2 = vector.load %arg1[%c0_3, %c0_4, %c0_5, %c0_6] : memref<2x16x16x4xf32, #tpu.memory_space<vmem>>, vector<2x16x16x4xf32>
    %3 = arith.truncf %2 : vector<2x16x16x4xf32> to vector<2x16x16x4xbf16>
    %c0_7 = arith.constant 0 : index
    %c1 = arith.constant 1 : index
    %c16 = arith.constant 16 : index
    %c0_8 = arith.constant 0 : index
    %4 = vector.load %arg6[%c0_7, %c1, %c16, %c0_8] : memref<2x18x48x128xbf16, #tpu.memory_space<vmem>>, vector<2x16x16x4xbf16>
    tpu.vector_store %arg6[%c0_7, %c1, %c16, %c0_8], %3 {strides = array<i32>} : memref<2x18x48x128xbf16, #tpu.memory_space<vmem>>, vector<2x16x16x4xbf16>,
    %c0_9 = arith.constant 0 : index
    %c0_10 = arith.constant 0 : index
    %c15 = arith.constant 15 : index
    %c0_11 = arith.constant 0 : index
    %5 = vector.load %arg6[%c0_9, %c0_10, %c15, %c0_11] : memref<2x18x48x128xbf16, #tpu.memory_space<vmem>>, vector<2x16x16x128xbf16>
    %6 = vector.shape_cast %5 : vector<2x16x16x128xbf16> to vector<512x128xbf16>
    %c0_12 = arith.constant 0 : index
    %c0_13 = arith.constant 0 : index
    %c0_14 = arith.constant 0 : index
    %c0_15 = arith.constant 0 : index
    %7 = vector.load %arg2[%c0_12, %c0_13, %c0_14, %c0_15] : memref<2x9x128x128xbf16, #tpu.memory_space<vmem>>, vector<1x1x128x128xbf16>
    %8 = vector.shape_cast %7 : vector<1x1x128x128xbf16> to vector<128x128xbf16>
    %cst_16 = arith.constant dense<0.000000e+00> : vector<512x128xf32>
    %9 = tpu.matmul %6, %8, %cst_16 {dimension_numbers = #tpu.dot_dimension_numbers<[1], [0], [0], [1], [0, 0, 1, 1], [], []>} : vector<512x128xbf16>, vector<128x128xbf16>, vector<512x128xf32> -> vector<512x128xf32>
    %c0_17 = arith.constant 0 : index
    %c0_18 = arith.constant 0 : index
    %c16_19 = arith.constant 16 : index
    %c0_20 = arith.constant 0 : index
    %10 = vector.load %arg6[%c0_17, %c0_18, %c16_19, %c0_20] : memref<2x18x48x128xbf16, #tpu.memory_space<vmem>>, vector<2x16x16x128xbf16>
    %11 = vector.shape_cast %10 : vector<2x16x16x128xbf16> to vector<512x128xbf16>
    %c0_21 = arith.constant 0 : index
    %c1_22 = arith.constant 1 : index
    %c0_23 = arith.constant 0 : index
    %c0_24 = arith.constant 0 : index
    %12 = vector.load %arg2[%c0_21, %c1_22, %c0_23, %c0_24] : memref<2x9x128x128xbf16, #tpu.memory_space<vmem>>, vector<1x1x128x128xbf16>
    %13 = vector.shape_cast %12 : vector<1x1x128x128xbf16> to vector<128x128xbf16>
    %cst_25 = arith.constant dense<0.000000e+00> : vector<512x128xf32>
    %14 = tpu.matmul %11, %13, %cst_25 {dimension_numbers = #tpu.dot_dimension_numbers<[1], [0], [0], [1], [0, 0, 1, 1], [], []>} : vector<512x128xbf16>, vector<128x128xbf16>, vector<512x128xf32> -> vector<512x128xf32>
    %15 = arith.addf %9, %14 : vector<512x128xf32>
    %c0_26 = arith.constant 0 : index
    %c0_27 = arith.constant 0 : index
    %c17 = arith.constant 17 : index
    %c0_28 = arith.constant 0 : index
    %16 = vector.load %arg6[%c0_26, %c0_27, %c17, %c0_28] : memref<2x18x48x128xbf16, #tpu.memory_space<vmem>>, vector<2x16x16x128xbf16>
    %17 = vector.shape_cast %16 : vector<2x16x16x128xbf16> to vector<512x128xbf16>
    %c0_29 = arith.constant 0 : index
    %c2 = arith.constant 2 : index
    %c0_30 = arith.constant 0 : index
    %c0_31 = arith.constant 0 : index
    %18 = vector.load %arg2[%c0_29, %c2, %c0_30, %c0_31] : memref<2x9x128x128xbf16, #tpu.memory_space<vmem>>, vector<1x1x128x128xbf16>
    %19 = vector.shape_cast %18 : vector<1x1x128x128xbf16> to vector<128x128xbf16>
    %cst_32 = arith.constant dense<0.000000e+00> : vector<512x128xf32>
    %20 = tpu.matmul %17, %19, %cst_32 {dimension_numbers = #tpu.dot_dimension_numbers<[1], [0], [0], [1], [0, 0, 1, 1], [], []>} : vector<512x128xbf16>, vector<128x128xbf16>, vector<512x128xf32> -> vector<512x128xf32>
    %21 = arith.addf %15, %20 : vector<512x128xf32>
    %c0_33 = arith.constant 0 : index
    %c1_34 = arith.constant 1 : index
    %c15_35 = arith.constant 15 : index
    %c0_36 = arith.constant 0 : index
    %22 = vector.load %arg6[%c0_33, %c1_34, %c15_35, %c0_36] : memref<2x18x48x128xbf16, #tpu.memory_space<vmem>>, vector<2x16x16x128xbf16>
    %23 = vector.shape_cast %22 : vector<2x16x16x128xbf16> to vector<512x128xbf16>
    %c0_37 = arith.constant 0 : index
    %c3 = arith.constant 3 : index
    %c0_38 = arith.constant 0 : index
    %c0_39 = arith.constant 0 : index
    %24 = vector.load %arg2[%c0_37, %c3, %c0_38, %c0_39] : memref<2x9x128x128xbf16, #tpu.memory_space<vmem>>, vector<1x1x128x128xbf16>
    %25 = vector.shape_cast %24 : vector<1x1x128x128xbf16> to vector<128x128xbf16>
    %cst_40 = arith.constant dense<0.000000e+00> : vector<512x128xf32>
    %26 = tpu.matmul %23, %25, %cst_40 {dimension_numbers = #tpu.dot_dimension_numbers<[1], [0], [0], [1], [0, 0, 1, 1], [], []>} : vector<512x128xbf16>, vector<128x128xbf16>, vector<512x128xf32> -> vector<512x128xf32>
    %27 = arith.addf %21, %26 : vector<512x128xf32>
    %c0_41 = arith.constant 0 : index
    %c1_42 = arith.constant 1 : index
    %c16_43 = arith.constant 16 : index
    %c0_44 = arith.constant 0 : index
    %28 = vector.load %arg6[%c0_41, %c1_42, %c16_43, %c0_44] : memref<2x18x48x128xbf16, #tpu.memory_space<vmem>>, vector<2x16x16x128xbf16>
    %29 = vector.shape_cast %28 : vector<2x16x16x128xbf16> to vector<512x128xbf16>
    %c0_45 = arith.constant 0 : index
    %c4 = arith.constant 4 : index
    %c0_46 = arith.constant 0 : index
    %c0_47 = arith.constant 0 : index
    %30 = vector.load %arg2[%c0_45, %c4, %c0_46, %c0_47] : memref<2x9x128x128xbf16, #tpu.memory_space<vmem>>, vector<1x1x128x128xbf16>
    %31 = vector.shape_cast %30 : vector<1x1x128x128xbf16> to vector<128x128xbf16>
    %cst_48 = arith.constant dense<0.000000e+00> : vector<512x128xf32>
    %32 = tpu.matmul %29, %31, %cst_48 {dimension_numbers = #tpu.dot_dimension_numbers<[1], [0], [0], [1], [0, 0, 1, 1], [], []>} : vector<512x128xbf16>, vector<128x128xbf16>, vector<512x128xf32> -> vector<512x128xf32>
    %33 = arith.addf %27, %32 : vector<512x128xf32>
    %c0_49 = arith.constant 0 : index
    %c1_50 = arith.constant 1 : index
    %c17_51 = arith.constant 17 : index
    %c0_52 = arith.constant 0 : index
    %34 = vector.load %arg6[%c0_49, %c1_50, %c17_51, %c0_52] : memref<2x18x48x128xbf16, #tpu.memory_space<vmem>>, vector<2x16x16x128xbf16>
    %35 = vector.shape_cast %34 : vector<2x16x16x128xbf16> to vector<512x128xbf16>
    %c0_53 = arith.constant 0 : index
    %c5 = arith.constant 5 : index
    %c0_54 = arith.constant 0 : index
    %c0_55 = arith.constant 0 : index
    %36 = vector.load %arg2[%c0_53, %c5, %c0_54, %c0_55] : memref<2x9x128x128xbf16, #tpu.memory_space<vmem>>, vector<1x1x128x128xbf16>
    %37 = vector.shape_cast %36 : vector<1x1x128x128xbf16> to vector<128x128xbf16>
    %cst_56 = arith.constant dense<0.000000e+00> : vector<512x128xf32>
    %38 = tpu.matmul %35, %37, %cst_56 {dimension_numbers = #tpu.dot_dimension_numbers<[1], [0], [0], [1], [0, 0, 1, 1], [], []>} : vector<512x128xbf16>, vector<128x128xbf16>, vector<512x128xf32> -> vector<512x128xf32>
    %39 = arith.addf %33, %38 : vector<512x128xf32>
    %c0_57 = arith.constant 0 : index
    %c2_58 = arith.constant 2 : index
    %c15_59 = arith.constant 15 : index
    %c0_60 = arith.constant 0 : index
    %40 = vector.load %arg6[%c0_57, %c2_58, %c15_59, %c0_60] : memref<2x18x48x128xbf16, #tpu.memory_space<vmem>>, vector<2x16x16x128xbf16>
    %41 = vector.shape_cast %40 : vector<2x16x16x128xbf16> to vector<512x128xbf16>
    %c0_61 = arith.constant 0 : index
    %c6 = arith.constant 6 : index
    %c0_62 = arith.constant 0 : index
    %c0_63 = arith.constant 0 : index
    %42 = vector.load %arg2[%c0_61, %c6, %c0_62, %c0_63] : memref<2x9x128x128xbf16, #tpu.memory_space<vmem>>, vector<1x1x128x128xbf16>
    %43 = vector.shape_cast %42 : vector<1x1x128x128xbf16> to vector<128x128xbf16>
    %cst_64 = arith.constant dense<0.000000e+00> : vector<512x128xf32>
    %44 = tpu.matmul %41, %43, %cst_64 {dimension_numbers = #tpu.dot_dimension_numbers<[1], [0], [0], [1], [0, 0, 1, 1], [], []>} : vector<512x128xbf16>, vector<128x128xbf16>, vector<512x128xf32> -> vector<512x128xf32>
    %45 = arith.addf %39, %44 : vector<512x128xf32>
    %c0_65 = arith.constant 0 : index
    %c2_66 = arith.constant 2 : index
    %c16_67 = arith.constant 16 : index
    %c0_68 = arith.constant 0 : index
    %46 = vector.load %arg6[%c0_65, %c2_66, %c16_67, %c0_68] : memref<2x18x48x128xbf16, #tpu.memory_space<vmem>>, vector<2x16x16x128xbf16>
    %47 = vector.shape_cast %46 : vector<2x16x16x128xbf16> to vector<512x128xbf16>
    %c0_69 = arith.constant 0 : index
    %c7 = arith.constant 7 : index
    %c0_70 = arith.constant 0 : index
    %c0_71 = arith.constant 0 : index
    %48 = vector.load %arg2[%c0_69, %c7, %c0_70, %c0_71] : memref<2x9x128x128xbf16, #tpu.memory_space<vmem>>, vector<1x1x128x128xbf16>
    %49 = vector.shape_cast %48 : vector<1x1x128x128xbf16> to vector<128x128xbf16>
    %cst_72 = arith.constant dense<0.000000e+00> : vector<512x128xf32>
    %50 = tpu.matmul %47, %49, %cst_72 {dimension_numbers = #tpu.dot_dimension_numbers<[1], [0], [0], [1], [0, 0, 1, 1], [], []>} : vector<512x128xbf16>, vector<128x128xbf16>, vector<512x128xf32> -> vector<512x128xf32>
    %51 = arith.addf %45, %50 : vector<512x128xf32>
    %c0_73 = arith.constant 0 : index
    %c2_74 = arith.constant 2 : index
    %c17_75 = arith.constant 17 : index
    %c0_76 = arith.constant 0 : index
    %52 = vector.load %arg6[%c0_73, %c2_74, %c17_75, %c0_76] : memref<2x18x48x128xbf16, #tpu.memory_space<vmem>>, vector<2x16x16x128xbf16>
    %53 = vector.shape_cast %52 : vector<2x16x16x128xbf16> to vector<512x128xbf16>
    %c0_77 = arith.constant 0 : index
    %c8 = arith.constant 8 : index
    %c0_78 = arith.constant 0 : index
    %c0_79 = arith.constant 0 : index
    %54 = vector.load %arg2[%c0_77, %c8, %c0_78, %c0_79] : memref<2x9x128x128xbf16, #tpu.memory_space<vmem>>, vector<1x1x128x128xbf16>
    %55 = vector.shape_cast %54 : vector<1x1x128x128xbf16> to vector<128x128xbf16>
    %cst_80 = arith.constant dense<0.000000e+00> : vector<512x128xf32>
    %56 = tpu.matmul %53, %55, %cst_80 {dimension_numbers = #tpu.dot_dimension_numbers<[1], [0], [0], [1], [0, 0, 1, 1], [], []>} : vector<512x128xbf16>, vector<128x128xbf16>, vector<512x128xf32> -> vector<512x128xf32>
    %57 = arith.addf %51, %56 : vector<512x128xf32>
    %cst_81 = arith.constant dense<0.000000e+00> : vector<128xf32>
    %58 = vector.multi_reduction <add>, %57, %cst_81 [0] : vector<512x128xf32> to vector<128xf32>
    %59 = vector.shape_cast %58 : vector<128xf32> to vector<1x128xf32>
    %cst_82 = arith.constant 5.120000e+02 : f32
    %60 = vector.broadcast %cst_82 : f32 to vector<1x128xf32>
    %61 = arith.divf %59, %60 : vector<1x128xf32>
    %62 = vector.broadcast %61 : vector<1x128xf32> to vector<512x128xf32>
    %63 = arith.subf %57, %62 : vector<512x128xf32>
    %64 = arith.mulf %63, %63 : vector<512x128xf32>
    %cst_83 = arith.constant dense<0.000000e+00> : vector<128xf32>
    %65 = vector.multi_reduction <add>, %64, %cst_83 [0] : vector<512x128xf32> to vector<128xf32>
    %66 = vector.shape_cast %65 : vector<128xf32> to vector<1x128xf32>
    %cst_84 = arith.constant 5.120000e+02 : f32
    %67 = vector.broadcast %cst_84 : f32 to vector<1x128xf32>
    %68 = arith.divf %66, %67 : vector<1x128xf32>
    %c0_85 = arith.constant 0 : index
    %c0_86 = arith.constant 0 : index
    %69 = vector.load %arg3[%c0_85, %c0_86] : memref<2x128xf32, #tpu.memory_space<vmem>>, vector<1x128xf32>
    %cst_87 = arith.constant 9.99999974E-6 : f32
    %70 = vector.broadcast %cst_87 : f32 to vector<1x128xf32>
    %71 = arith.addf %68, %70 : vector<1x128xf32>
    %72 = math.rsqrt %71 : vector<1x128xf32>
    %73 = arith.mulf %69, %72 : vector<1x128xf32>
    %74 = vector.broadcast %73 : vector<1x128xf32> to vector<512x128xf32>
    %75 = arith.mulf %63, %74 : vector<512x128xf32>
    %c0_88 = arith.constant 0 : index
    %c0_89 = arith.constant 0 : index
    %76 = vector.load %arg4[%c0_88, %c0_89] : memref<2x128xf32, #tpu.memory_space<vmem>>, vector<1x128xf32>
    %77 = vector.broadcast %76 : vector<1x128xf32> to vector<512x128xf32>
    %78 = arith.addf %75, %77 : vector<512x128xf32>
    %cst_90 = arith.constant 0.000000e+00 : f32
    %79 = vector.broadcast %cst_90 : f32 to vector<512x128xf32>
    %80 = arith.maximumf %78, %79 : vector<512x128xf32>
    %81 = vector.shape_cast %80 : vector<512x128xf32> to vector<2x16x16x128xf32>
    %82 = vector.shape_cast %81 : vector<2x16x16x128xf32> to vector<2x8x2x16x128xf32>
    %cst_91 = arith.constant dense<0xFF800000> : vector<2x8x16x128xf32>
    %83 = vector.multi_reduction <maximumf>, %82, %cst_91 [2] : vector<2x8x2x16x128xf32> to vector<2x8x16x128xf32>
    %84 = vector.shape_cast %83 : vector<2x8x16x128xf32> to vector<2x8x8x2x128xf32>
    %cst_92 = arith.constant dense<0xFF800000> : vector<2x8x8x128xf32>
    %85 = vector.multi_reduction <maximumf>, %84, %cst_92 [3] : vector<2x8x8x2x128xf32> to vector<2x8x8x128xf32>
    %cst_93 = arith.constant 0.000000e+00 : bf16
    %86 = vector.broadcast %cst_93 : bf16 to vector<2x1x10x128xbf16>
    %c0_94 = arith.constant 0 : index
    %c9 = arith.constant 9 : index
    %c15_95 = arith.constant 15 : index
    %c0_96 = arith.constant 0 : index
    %87 = vector.load %arg6[%c0_94, %c9, %c15_95, %c0_96] : memref<2x18x48x128xbf16, #tpu.memory_space<vmem>>, vector<2x1x10x128xbf16>
    tpu.vector_store %arg6[%c0_94, %c9, %c15_95, %c0_96], %86 {strides = array<i32>} : memref<2x18x48x128xbf16, #tpu.memory_space<vmem>>, vector<2x1x10x128xbf16>,
    %cst_97 = arith.constant 0.000000e+00 : bf16
    %88 = vector.broadcast %cst_97 : bf16 to vector<2x10x1x128xbf16>
    %c0_98 = arith.constant 0 : index
    %c0_99 = arith.constant 0 : index
    %c24 = arith.constant 24 : index
    %c0_100 = arith.constant 0 : index
    %89 = vector.load %arg6[%c0_98, %c0_99, %c24, %c0_100] : memref<2x18x48x128xbf16, #tpu.memory_space<vmem>>, vector<2x10x1x128xbf16>
    tpu.vector_store %arg6[%c0_98, %c0_99, %c24, %c0_100], %88 {strides = array<i32>} : memref<2x18x48x128xbf16, #tpu.memory_space<vmem>>, vector<2x10x1x128xbf16>,
    %90 = arith.truncf %85 : vector<2x8x8x128xf32> to vector<2x8x8x128xbf16>
    %c0_101 = arith.constant 0 : index
    %c1_102 = arith.constant 1 : index
    %c16_103 = arith.constant 16 : index
    %c0_104 = arith.constant 0 : index
    %91 = vector.load %arg6[%c0_101, %c1_102, %c16_103, %c0_104] : memref<2x18x48x128xbf16, #tpu.memory_space<vmem>>, vector<2x8x8x128xbf16>
    tpu.vector_store %arg6[%c0_101, %c1_102, %c16_103, %c0_104], %90 {strides = array<i32>} : memref<2x18x48x128xbf16, #tpu.memory_space<vmem>>, vector<2x8x8x128xbf16>,
    %c0_105 = arith.constant 0 : index
    %c0_106 = arith.constant 0 : index
    %c15_107 = arith.constant 15 : index
    %c0_108 = arith.constant 0 : index
    %92 = vector.load %arg6[%c0_105, %c0_106, %c15_107, %c0_108] : memref<2x18x48x128xbf16, #tpu.memory_space<vmem>>, vector<2x8x8x128xbf16>
    %93 = vector.shape_cast %92 : vector<2x8x8x128xbf16> to vector<128x128xbf16>
    %c1_109 = arith.constant 1 : index
    %c0_110 = arith.constant 0 : index
    %c0_111 = arith.constant 0 : index
    %c0_112 = arith.constant 0 : index
    %94 = vector.load %arg2[%c1_109, %c0_110, %c0_111, %c0_112] : memref<2x9x128x128xbf16, #tpu.memory_space<vmem>>, vector<1x1x128x128xbf16>
    %95 = vector.shape_cast %94 : vector<1x1x128x128xbf16> to vector<128x128xbf16>
    %cst_113 = arith.constant dense<0.000000e+00> : vector<128x128xf32>
    %96 = tpu.matmul %93, %95, %cst_113 {dimension_numbers = #tpu.dot_dimension_numbers<[1], [0], [0], [1], [0, 0, 1, 1], [], []>} : vector<128x128xbf16>, vector<128x128xbf16>, vector<128x128xf32> -> vector<128x128xf32>
    %c0_114 = arith.constant 0 : index
    %c0_115 = arith.constant 0 : index
    %c16_116 = arith.constant 16 : index
    %c0_117 = arith.constant 0 : index
    %97 = vector.load %arg6[%c0_114, %c0_115, %c16_116, %c0_117] : memref<2x18x48x128xbf16, #tpu.memory_space<vmem>>, vector<2x8x8x128xbf16>
    %98 = vector.shape_cast %97 : vector<2x8x8x128xbf16> to vector<128x128xbf16>
    %c1_118 = arith.constant 1 : index
    %c1_119 = arith.constant 1 : index
    %c0_120 = arith.constant 0 : index
    %c0_121 = arith.constant 0 : index
    %99 = vector.load %arg2[%c1_118, %c1_119, %c0_120, %c0_121] : memref<2x9x128x128xbf16, #tpu.memory_space<vmem>>, vector<1x1x128x128xbf16>
    %100 = vector.shape_cast %99 : vector<1x1x128x128xbf16> to vector<128x128xbf16>
    %cst_122 = arith.constant dense<0.000000e+00> : vector<128x128xf32>
    %101 = tpu.matmul %98, %100, %cst_122 {dimension_numbers = #tpu.dot_dimension_numbers<[1], [0], [0], [1], [0, 0, 1, 1], [], []>} : vector<128x128xbf16>, vector<128x128xbf16>, vector<128x128xf32> -> vector<128x128xf32>
    %102 = arith.addf %96, %101 : vector<128x128xf32>
    %c0_123 = arith.constant 0 : index
    %c0_124 = arith.constant 0 : index
    %c17_125 = arith.constant 17 : index
    %c0_126 = arith.constant 0 : index
    %103 = vector.load %arg6[%c0_123, %c0_124, %c17_125, %c0_126] : memref<2x18x48x128xbf16, #tpu.memory_space<vmem>>, vector<2x8x8x128xbf16>
    %104 = vector.shape_cast %103 : vector<2x8x8x128xbf16> to vector<128x128xbf16>
    %c1_127 = arith.constant 1 : index
    %c2_128 = arith.constant 2 : index
    %c0_129 = arith.constant 0 : index
    %c0_130 = arith.constant 0 : index
    %105 = vector.load %arg2[%c1_127, %c2_128, %c0_129, %c0_130] : memref<2x9x128x128xbf16, #tpu.memory_space<vmem>>, vector<1x1x128x128xbf16>
    %106 = vector.shape_cast %105 : vector<1x1x128x128xbf16> to vector<128x128xbf16>
    %cst_131 = arith.constant dense<0.000000e+00> : vector<128x128xf32>
    %107 = tpu.matmul %104, %106, %cst_131 {dimension_numbers = #tpu.dot_dimension_numbers<[1], [0], [0], [1], [0, 0, 1, 1], [], []>} : vector<128x128xbf16>, vector<128x128xbf16>, vector<128x128xf32> -> vector<128x128xf32>
    %108 = arith.addf %102, %107 : vector<128x128xf32>
    %c0_132 = arith.constant 0 : index
    %c1_133 = arith.constant 1 : index
    %c15_134 = arith.constant 15 : index
    %c0_135 = arith.constant 0 : index
    %109 = vector.load %arg6[%c0_132, %c1_133, %c15_134, %c0_135] : memref<2x18x48x128xbf16, #tpu.memory_space<vmem>>, vector<2x8x8x128xbf16>
    %110 = vector.shape_cast %109 : vector<2x8x8x128xbf16> to vector<128x128xbf16>
    %c1_136 = arith.constant 1 : index
    %c3_137 = arith.constant 3 : index
    %c0_138 = arith.constant 0 : index
    %c0_139 = arith.constant 0 : index
    %111 = vector.load %arg2[%c1_136, %c3_137, %c0_138, %c0_139] : memref<2x9x128x128xbf16, #tpu.memory_space<vmem>>, vector<1x1x128x128xbf16>
    %112 = vector.shape_cast %111 : vector<1x1x128x128xbf16> to vector<128x128xbf16>
    %cst_140 = arith.constant dense<0.000000e+00> : vector<128x128xf32>
    %113 = tpu.matmul %110, %112, %cst_140 {dimension_numbers = #tpu.dot_dimension_numbers<[1], [0], [0], [1], [0, 0, 1, 1], [], []>} : vector<128x128xbf16>, vector<128x128xbf16>, vector<128x128xf32> -> vector<128x128xf32>
    %114 = arith.addf %108, %113 : vector<128x128xf32>
    %c0_141 = arith.constant 0 : index
    %c1_142 = arith.constant 1 : index
    %c16_143 = arith.constant 16 : index
    %c0_144 = arith.constant 0 : index
    %115 = vector.load %arg6[%c0_141, %c1_142, %c16_143, %c0_144] : memref<2x18x48x128xbf16, #tpu.memory_space<vmem>>, vector<2x8x8x128xbf16>
    %116 = vector.shape_cast %115 : vector<2x8x8x128xbf16> to vector<128x128xbf16>
    %c1_145 = arith.constant 1 : index
    %c4_146 = arith.constant 4 : index
    %c0_147 = arith.constant 0 : index
    %c0_148 = arith.constant 0 : index
    %117 = vector.load %arg2[%c1_145, %c4_146, %c0_147, %c0_148] : memref<2x9x128x128xbf16, #tpu.memory_space<vmem>>, vector<1x1x128x128xbf16>
    %118 = vector.shape_cast %117 : vector<1x1x128x128xbf16> to vector<128x128xbf16>
    %cst_149 = arith.constant dense<0.000000e+00> : vector<128x128xf32>
    %119 = tpu.matmul %116, %118, %cst_149 {dimension_numbers = #tpu.dot_dimension_numbers<[1], [0], [0], [1], [0, 0, 1, 1], [], []>} : vector<128x128xbf16>, vector<128x128xbf16>, vector<128x128xf32> -> vector<128x128xf32>
    %120 = arith.addf %114, %119 : vector<128x128xf32>
    %c0_150 = arith.constant 0 : index
    %c1_151 = arith.constant 1 : index
    %c17_152 = arith.constant 17 : index
    %c0_153 = arith.constant 0 : index
    %121 = vector.load %arg6[%c0_150, %c1_151, %c17_152, %c0_153] : memref<2x18x48x128xbf16, #tpu.memory_space<vmem>>, vector<2x8x8x128xbf16>
    %122 = vector.shape_cast %121 : vector<2x8x8x128xbf16> to vector<128x128xbf16>
    %c1_154 = arith.constant 1 : index
    %c5_155 = arith.constant 5 : index
    %c0_156 = arith.constant 0 : index
    %c0_157 = arith.constant 0 : index
    %123 = vector.load %arg2[%c1_154, %c5_155, %c0_156, %c0_157] : memref<2x9x128x128xbf16, #tpu.memory_space<vmem>>, vector<1x1x128x128xbf16>
    %124 = vector.shape_cast %123 : vector<1x1x128x128xbf16> to vector<128x128xbf16>
    %cst_158 = arith.constant dense<0.000000e+00> : vector<128x128xf32>
    %125 = tpu.matmul %122, %124, %cst_158 {dimension_numbers = #tpu.dot_dimension_numbers<[1], [0], [0], [1], [0, 0, 1, 1], [], []>} : vector<128x128xbf16>, vector<128x128xbf16>, vector<128x128xf32> -> vector<128x128xf32>
    %126 = arith.addf %120, %125 : vector<128x128xf32>
    %c0_159 = arith.constant 0 : index
    %c2_160 = arith.constant 2 : index
    %c15_161 = arith.constant 15 : index
    %c0_162 = arith.constant 0 : index
    %127 = vector.load %arg6[%c0_159, %c2_160, %c15_161, %c0_162] : memref<2x18x48x128xbf16, #tpu.memory_space<vmem>>, vector<2x8x8x128xbf16>
    %128 = vector.shape_cast %127 : vector<2x8x8x128xbf16> to vector<128x128xbf16>
    %c1_163 = arith.constant 1 : index
    %c6_164 = arith.constant 6 : index
    %c0_165 = arith.constant 0 : index
    %c0_166 = arith.constant 0 : index
    %129 = vector.load %arg2[%c1_163, %c6_164, %c0_165, %c0_166] : memref<2x9x128x128xbf16, #tpu.memory_space<vmem>>, vector<1x1x128x128xbf16>
    %130 = vector.shape_cast %129 : vector<1x1x128x128xbf16> to vector<128x128xbf16>
    %cst_167 = arith.constant dense<0.000000e+00> : vector<128x128xf32>
    %131 = tpu.matmul %128, %130, %cst_167 {dimension_numbers = #tpu.dot_dimension_numbers<[1], [0], [0], [1], [0, 0, 1, 1], [], []>} : vector<128x128xbf16>, vector<128x128xbf16>, vector<128x128xf32> -> vector<128x128xf32>
    %132 = arith.addf %126, %131 : vector<128x128xf32>
    %c0_168 = arith.constant 0 : index
    %c2_169 = arith.constant 2 : index
    %c16_170 = arith.constant 16 : index
    %c0_171 = arith.constant 0 : index
    %133 = vector.load %arg6[%c0_168, %c2_169, %c16_170, %c0_171] : memref<2x18x48x128xbf16, #tpu.memory_space<vmem>>, vector<2x8x8x128xbf16>
    %134 = vector.shape_cast %133 : vector<2x8x8x128xbf16> to vector<128x128xbf16>
    %c1_172 = arith.constant 1 : index
    %c7_173 = arith.constant 7 : index
    %c0_174 = arith.constant 0 : index
    %c0_175 = arith.constant 0 : index
    %135 = vector.load %arg2[%c1_172, %c7_173, %c0_174, %c0_175] : memref<2x9x128x128xbf16, #tpu.memory_space<vmem>>, vector<1x1x128x128xbf16>
    %136 = vector.shape_cast %135 : vector<1x1x128x128xbf16> to vector<128x128xbf16>
    %cst_176 = arith.constant dense<0.000000e+00> : vector<128x128xf32>
    %137 = tpu.matmul %134, %136, %cst_176 {dimension_numbers = #tpu.dot_dimension_numbers<[1], [0], [0], [1], [0, 0, 1, 1], [], []>} : vector<128x128xbf16>, vector<128x128xbf16>, vector<128x128xf32> -> vector<128x128xf32>
    %138 = arith.addf %132, %137 : vector<128x128xf32>
    %c0_177 = arith.constant 0 : index
    %c2_178 = arith.constant 2 : index
    %c17_179 = arith.constant 17 : index
    %c0_180 = arith.constant 0 : index
    %139 = vector.load %arg6[%c0_177, %c2_178, %c17_179, %c0_180] : memref<2x18x48x128xbf16, #tpu.memory_space<vmem>>, vector<2x8x8x128xbf16>
    %140 = vector.shape_cast %139 : vector<2x8x8x128xbf16> to vector<128x128xbf16>
    %c1_181 = arith.constant 1 : index
    %c8_182 = arith.constant 8 : index
    %c0_183 = arith.constant 0 : index
    %c0_184 = arith.constant 0 : index
    %141 = vector.load %arg2[%c1_181, %c8_182, %c0_183, %c0_184] : memref<2x9x128x128xbf16, #tpu.memory_space<vmem>>, vector<1x1x128x128xbf16>
    %142 = vector.shape_cast %141 : vector<1x1x128x128xbf16> to vector<128x128xbf16>
    %cst_185 = arith.constant dense<0.000000e+00> : vector<128x128xf32>
    %143 = tpu.matmul %140, %142, %cst_185 {dimension_numbers = #tpu.dot_dimension_numbers<[1], [0], [0], [1], [0, 0, 1, 1], [], []>} : vector<128x128xbf16>, vector<128x128xbf16>, vector<128x128xf32> -> vector<128x128xf32>
    %144 = arith.addf %138, %143 : vector<128x128xf32>
    %cst_186 = arith.constant dense<0.000000e+00> : vector<128xf32>
    %145 = vector.multi_reduction <add>, %144, %cst_186 [0] : vector<128x128xf32> to vector<128xf32>
    %146 = vector.shape_cast %145 : vector<128xf32> to vector<1x128xf32>
    %cst_187 = arith.constant 1.280000e+02 : f32
    %147 = vector.broadcast %cst_187 : f32 to vector<1x128xf32>
    %148 = arith.divf %146, %147 : vector<1x128xf32>
    %149 = vector.broadcast %148 : vector<1x128xf32> to vector<128x128xf32>
    %150 = arith.subf %144, %149 : vector<128x128xf32>
    %151 = arith.mulf %150, %150 : vector<128x128xf32>
    %cst_188 = arith.constant dense<0.000000e+00> : vector<128xf32>
    %152 = vector.multi_reduction <add>, %151, %cst_188 [0] : vector<128x128xf32> to vector<128xf32>
    %153 = vector.shape_cast %152 : vector<128xf32> to vector<1x128xf32>
    %cst_189 = arith.constant 1.280000e+02 : f32
    %154 = vector.broadcast %cst_189 : f32 to vector<1x128xf32>
    %155 = arith.divf %153, %154 : vector<1x128xf32>
    %c1_190 = arith.constant 1 : index
    %c0_191 = arith.constant 0 : index
    %156 = vector.load %arg3[%c1_190, %c0_191] : memref<2x128xf32, #tpu.memory_space<vmem>>, vector<1x128xf32>
    %cst_192 = arith.constant 9.99999974E-6 : f32
    %157 = vector.broadcast %cst_192 : f32 to vector<1x128xf32>
    %158 = arith.addf %155, %157 : vector<1x128xf32>
    %159 = math.rsqrt %158 : vector<1x128xf32>
    %160 = arith.mulf %156, %159 : vector<1x128xf32>
    %161 = vector.broadcast %160 : vector<1x128xf32> to vector<128x128xf32>
    %162 = arith.mulf %150, %161 : vector<128x128xf32>
    %c1_193 = arith.constant 1 : index
    %c0_194 = arith.constant 0 : index
    %163 = vector.load %arg4[%c1_193, %c0_194] : memref<2x128xf32, #tpu.memory_space<vmem>>, vector<1x128xf32>
    %164 = vector.broadcast %163 : vector<1x128xf32> to vector<128x128xf32>
    %165 = arith.addf %162, %164 : vector<128x128xf32>
    %cst_195 = arith.constant 0.000000e+00 : f32
    %166 = vector.broadcast %cst_195 : f32 to vector<128x128xf32>
    %167 = arith.maximumf %165, %166 : vector<128x128xf32>
    %168 = vector.shape_cast %167 : vector<128x128xf32> to vector<2x8x8x128xf32>
    %169 = vector.shape_cast %168 : vector<2x8x8x128xf32> to vector<2x4x2x8x128xf32>
    %cst_196 = arith.constant dense<0xFF800000> : vector<2x4x8x128xf32>
    %170 = vector.multi_reduction <maximumf>, %169, %cst_196 [2] : vector<2x4x2x8x128xf32> to vector<2x4x8x128xf32>
    %171 = vector.shape_cast %170 : vector<2x4x8x128xf32> to vector<2x4x4x2x128xf32>
    %cst_197 = arith.constant dense<0xFF800000> : vector<2x4x4x128xf32>
    %172 = vector.multi_reduction <maximumf>, %171, %cst_197 [3] : vector<2x4x4x2x128xf32> to vector<2x4x4x128xf32>
    %c0_198 = arith.constant 0 : index
    %c0_199 = arith.constant 0 : index
    %c0_200 = arith.constant 0 : index
    %c0_201 = arith.constant 0 : index
    %173 = vector.load %arg5[%c0_198, %c0_199, %c0_200, %c0_201] : memref<2x4x4x128xf32, #tpu.memory_space<vmem>>, vector<2x4x4x128xf32>
    tpu.vector_store %arg5[%c0_198, %c0_199, %c0_200, %c0_201], %172 {strides = array<i32>} : memref<2x4x4x128xf32, #tpu.memory_space<vmem>>, vector<2x4x4x128xf32>,
    return
  }
  func.func @transform_0(%arg0: i32) -> (i32, i32, i32, i32) {
    %c0_i32 = arith.constant 0 : i32
    %c0_i32_0 = arith.constant 0 : i32
    %c0_i32_1 = arith.constant 0 : i32
    %c0_i32_2 = arith.constant 0 : i32
    %c0_i32_3 = arith.constant 0 : i32
    return %c0_i32, %c0_i32_0, %c0_i32_1, %c0_i32_2 : i32, i32, i32, i32
  }
  func.func @transform_1(%arg0: i32) -> (i32, i32, i32, i32) {
    %c0_i32 = arith.constant 0 : i32
    %c0_i32_0 = arith.constant 0 : i32
    %c0_i32_1 = arith.constant 0 : i32
    %c0_i32_2 = arith.constant 0 : i32
    %c0_i32_3 = arith.constant 0 : i32
    return %c0_i32, %c0_i32_0, %c0_i32_1, %c0_i32_2 : i32, i32, i32, i32
  }
  func.func @transform_2(%arg0: i32) -> (i32, i32) {
    %c0_i32 = arith.constant 0 : i32
    %c0_i32_0 = arith.constant 0 : i32
    %c0_i32_1 = arith.constant 0 : i32
    return %c0_i32, %c0_i32_0 : i32, i32
  }
  func.func @transform_3(%arg0: i32) -> (i32, i32) {
    %c0_i32 = arith.constant 0 : i32
    %c0_i32_0 = arith.constant 0 : i32
    %c0_i32_1 = arith.constant 0 : i32
    return %c0_i32, %c0_i32_0 : i32, i32
  }
  func.func @transform_4(%arg0: i32) -> (i32, i32, i32, i32) {
    %c0_i32 = arith.constant 0 : i32
    %c0_i32_0 = arith.constant 0 : i32
    %c0_i32_1 = arith.constant 0 : i32
    %c0_i32_2 = arith.constant 0 : i32
    %c0_i32_3 = arith.constant 0 : i32
    return %c0_i32, %c0_i32_0, %c0_i32_1, %c0_i32_2 : i32, i32, i32, i32
  }
}

</mosaic_0001>

<bundles_post_ra>
// kernel: tpu_custom_call.1
= control target key start
LH: loop header
LB: loop body
LE: loop exit
PB: predicated region body
PF: predicated region fallthrough
CT: control target
= control target key end

     0   :  { %9 = vsyncpa [#allocation4], 0  ;;  %s22857_s0 = inlined_call_operand.vmem [shape: f32[2,16,16,4], index: 0, kind: input, shape index: {}]   ;;  %s22858_s1 = inlined_call_operand.hbm [shape: bf16[2,9,128,128], index: 1, kind: input, shape index: {}]   ;;  %s22859_s2 = inlined_call_operand.vmem [shape: f32[2,128], index: 2, kind: input, shape index: {}]   ;;  %s22860_s3 = inlined_call_operand.vmem [shape: f32[2,128], index: 3, kind: input, shape index: {}]   ;;  %s22861_s4 = inlined_call_operand.hbm [shape: f32[2,4,4,128], index: 4, kind: output, shape index: {}]  }
   0x1   :  { %10 = vsyncpa [#allocation5], 0  ;;  %s17011_s15 = smov [#allocation3]   ;;  %s16963_s19 = scalar_lea.hbm %s22858_s1, 18432 }
   0x2   :  { %s18_s16 = sshll.u32 %s17011_s15, 4  ;;  %p16964_p0 = scmp.ne.s32.totalorder %s22858_s1, %s16963_s19  ;;  %s19_s16 = int_to_ptr.vmem [resolvable:$true] %s18_s16 }
   0x3   :  { %p16967_p1 = scmp.lt.u32.totalorder %s16963_s19, %s22858_s1 }
   0x5   :  { %p16969_p2 = pnand %p16967_p1, %p16964_p0 }
   0x7   :  { %16972 = shalt.err (!%p16969_p2)
}
   0x8   :  { %s16973_s24 = scalar_lea.vmem %s19_s16, 18432  ;;  %p16978_p4 = scmp.lt.s32.totalorder %s19_s16, %s19_s16 }
   0x9   :  { %p16974_p3 = scmp.ne.s32.totalorder %s19_s16, %s16973_s24  ;;  %p16979_p5 = scmp.lt.s32.totalorder %s16973_s24, %s16973_s24 }
   0xb   :  { %p16980_p6 = por %p16979_p5, %p16978_p4 }
   0xd   :  { %p16981_p7 = pnand %p16980_p6, %p16974_p3 }
   0xf   :  { %16984 = shalt.err (!%p16981_p7)
}
  0x10   :  { %s17012_s25 = smov 64   ;;  %s17013_s26 = smov 4  }
  0x11   :  { %24 = dma.hbm_to_vmem [thread:$0]  %s22858_s1, 18432, %s19_s16, [#allocation4], %s17012_s25, %s17012_s25, %s17013_s26  }
  0x12   :  { %17007 = dma.done.wait [#allocation4], 18432  }
  0x13   :  { %17008 = vsyncadd [#allocation4], 4294948864  ;;  %v17014_v0 = vmov 0   ;;  %v16576_v1 = vld [vmem:[#allocation3 + $0x40] sm:$0xff]   ;;  %v16578_v3 = vld [vmem:[#allocation3 + $0x48] sm:$0xff]   ;;  %vm238_vm0 = vcmask 31744  }
  0x14   :  { %34 = vst [vmem:[#allocation2 + $0x8] sm:$0xff] %v17014_v0  ;;  %14922 = vmatprep.mubr.bf16.mxu1 %v17014_v0  ;;  %33 = vst [vmem:[#allocation2] sm:$0xff] %v17014_v0  ;;  %v16577_v2 = vld [vmem:[#allocation3 + $0xc0] sm:$0xff]   ;;  %14906 = vmatprep.subr.bf16.mxu1 %v16576_v1  ;;  %v16579_v4 = vld [vmem:[#allocation3 + $0xc8] sm:$0xff]   ;;  %vm335_vm1 = vsmask.f32 256 }
  0x15   :  { %35 = vst [vmem:[#allocation2 + $0x10] sm:$0xff] %v17014_v0  ;;  %36 = vst [vmem:[#allocation2 + $0x18] sm:$0xff] %v17014_v0  ;;  %15146 = vmatprep.subr.bf16.mxu0 %v16577_v2  ;;  %14907 = vmatpush3.bf16.msra.mxu1 %v16576_v1  ;;  %v16580_v5 = vld [vmem:[#allocation3 + $0x50] sm:$0xff]   ;;  %v16582_v7 = vld [vmem:[#allocation3 + $0x58] sm:$0xff]   ;;  %vm8902_vm2 = vsmask.f32 4352 }
  0x16   :  { %37 = vst [vmem:[#allocation2 + $0x20] sm:$0xff] %v17014_v0  ;;  %38 = vst [vmem:[#allocation2 + $0x28] sm:$0xff] %v17014_v0  ;;  %15147 = vmatpush3.bf16.msra.mxu0 %v16577_v2  ;;  %14908 = vmatprep.subr.bf16.mxu1 %v16578_v3  ;;  %v16581_v6 = vld [vmem:[#allocation3 + $0xd0] sm:$0xff]   ;;  %v16583_v8 = vld [vmem:[#allocation3 + $0xd8] sm:$0xff]   ;;  %vm8913_vm3 = vcmask 1044484   ;;  %vm8895_vm6 = vcmask 1047559  }
  0x17   :  { %39 = vst [vmem:[#allocation2 + $0x30] sm:$0xff] %v17014_v0  ;;  %40 = vst [vmem:[#allocation2 + $0x38] sm:$0xff] %v17014_v0  ;;  %15148 = vmatprep.subr.bf16.mxu0 %v16579_v4  ;;  %v16584_v9 = vld [vmem:[#allocation3 + $0x60] sm:$0xff]   ;;  %v16586_v11 = vld [vmem:[#allocation3 + $0x68] sm:$0xff]   ;;  %vm1523_vm5 = vsmask.f32 7424 }
  0x18   :  { %41 = vst [vmem:[#allocation2 + $0x40] sm:$0xff] %v17014_v0  ;;  %42 = vst [vmem:[#allocation2 + $0x48] sm:$0xff] %v17014_v0  ;;  %v16585_v10 = vld [vmem:[#allocation3 + $0xe0] sm:$0xff]   ;;  %v142_v13 = vld [vmem:[%s22857_s0 + $0x8] sm:$0xff]  ;;  %vm8896_vm7 = vsmask.f32 7966 }
  0x19   :  { %43 = vst [vmem:[#allocation2 + $0x50] sm:$0xff] %v17014_v0  ;;  %44 = vst [vmem:[#allocation2 + $0x58] sm:$0xff] %v17014_v0  ;;  %14909 = vmatpush3.bf16.msra.mxu1 %v16578_v3  ;;  %v141_v12 = vld [vmem:[%s22857_s0] sm:$0xff]  ;;  %v16587_v14 = vld [vmem:[#allocation3 + $0xe8] sm:$0xff]   ;;  %vm8901_vm9 = vcmask 1044480   ;;  %vm7997_vm11 = vcmask 1041408  }
  0x1a   :  { %45 = vst [vmem:[#allocation2 + $0x60] sm:$0xff] %v17014_v0  ;;  %46 = vst [vmem:[#allocation2 + $0x68] sm:$0xff] %v17014_v0  ;;  %15149 = vmatpush3.bf16.msra.mxu0 %v16579_v4  ;;  %14910 = vmatprep.subr.bf16.mxu1 %v16580_v5  ;;  %v205_v15 = vpack.c.bf16 %v142_v13, %v141_v12  ;;  %v143_v16 = vld [vmem:[%s22857_s0 + $0x10] sm:$0xff]  ;;  %v144_v17 = vld [vmem:[%s22857_s0 + $0x18] sm:$0xff]  ;;  %vm9359_vm12 = vcmask 1041409   ;;  %vm9361_vm13 = vcmask 1042434  }
  0x1b   :  { %47 = vst [vmem:[#allocation2 + $0x70] sm:$0xff] %v17014_v0  ;;  %48 = vst [vmem:[#allocation2 + $0x78] sm:$0xff] %v17014_v0  ;;  %15150 = vmatprep.subr.bf16.mxu0 %v16581_v6  ;;  %v16588_v18 = vld [vmem:[#allocation3 + $0x70] sm:$0xff]   ;;  %v206_v19 = vpack.c.bf16 %v144_v17, %v143_v16  ;;  %v145_v21 = vld [vmem:[%s22857_s0 + $0x20] sm:$0xff]  ;;  %vm9363_vm14 = vcmask 1043459   ;;  %vm9367_vm15 = vcmask 1045509  }
  0x1c   :  { %49 = vst [vmem:[#allocation2 + $0x80] sm:$0xff] %v17014_v0  ;;  %50 = vst [vmem:[#allocation2 + $0x88] sm:$0xff] %v17014_v0  ;;  %v2358_v20 = vld [vmem:[#allocation2 + $0x18] sm:$0x80]  ;;  %v146_v22 = vld [vmem:[%s22857_s0 + $0x28] sm:$0xff] }
  0x1d   :  { %51 = vst [vmem:[#allocation2 + $0x90] sm:$0xff] %v17014_v0  ;;  %52 = vst [vmem:[#allocation2 + $0x98] sm:$0xff] %v17014_v0  ;;  %14911 = vmatpush3.bf16.msra.mxu1 %v16580_v5  ;;  %v207_v24 = vpack.c.bf16 %v146_v22, %v145_v21  ;;  %v147_v25 = vld [vmem:[%s22857_s0 + $0x30] sm:$0xff]  ;;  %v148_v26 = vld [vmem:[%s22857_s0 + $0x38] sm:$0xff]  ;;  %v2423_v30 = vshrl.u32 %v2358_v20, 16 }
  0x1e   :  { %53 = vst [vmem:[#allocation2 + $0xa0] sm:$0xff] %v17014_v0  ;;  %54 = vst [vmem:[#allocation2 + $0xa8] sm:$0xff] %v17014_v0  ;;  %15151 = vmatpush3.bf16.msra.mxu0 %v16581_v6  ;;  %14912 = vmatprep.subr.bf16.mxu1 %v16582_v7  ;;  %v2360_v23 = vld [vmem:[#allocation2 + $0x30] sm:$0x80]  ;;  %v208_v28 = vpack.c.bf16 %v148_v26, %v147_v25  ;;  %v16590_v29 = vld [vmem:[#allocation3 + $0x78] sm:$0xff]  }
  0x1f   :  { %55 = vst [vmem:[#allocation2 + $0xb0] sm:$0xff] %v17014_v0  ;;  %56 = vst [vmem:[#allocation2 + $0xb8] sm:$0xff] %v17014_v0  ;;  %15152 = vmatprep.subr.bf16.mxu0 %v16583_v8  ;;  %v16589_v27 = vld [vmem:[#allocation3 + $0xf0] sm:$0xff]   ;;  %v149_v31 = vld [vmem:[%s22857_s0 + $0x40] sm:$0xff]  ;;  %v2435_v33 = vshrl.u32 %v2360_v23, 16  ;;  %v2425_v44 = vrot.slane %v2423_v30, 7 }
  0x20   :  { %57 = vst [vmem:[#allocation2 + $0xc0] sm:$0xff] %v17014_v0  ;;  %58 = vst [vmem:[#allocation2 + $0xc8] sm:$0xff] %v17014_v0  ;;  %v150_v32 = vld [vmem:[%s22857_s0 + $0x48] sm:$0xff]  ;;  %v151_v36 = vld [vmem:[%s22857_s0 + $0x50] sm:$0xff] }
  0x21   :  { %59 = vst [vmem:[#allocation2 + $0xd0] sm:$0xff] %v17014_v0  ;;  %60 = vst [vmem:[#allocation2 + $0xd8] sm:$0xff] %v17014_v0  ;;  %14913 = vmatpush3.bf16.msra.mxu1 %v16582_v7  ;;  %v2362_v34 = vld [vmem:[#allocation2 + $0x48] sm:$0x80]  ;;  %v209_v35 = vpack.c.bf16 %v150_v32, %v149_v31  ;;  %v152_v37 = vld [vmem:[%s22857_s0 + $0x58] sm:$0xff]  ;;  %v2437_v52 = vrot.slane %v2435_v33, 7 }
  0x22   :  { %61 = vst [vmem:[#allocation2 + $0xe0] sm:$0xff] %v17014_v0  ;;  %62 = vst [vmem:[#allocation2 + $0xe8] sm:$0xff] %v17014_v0  ;;  %15153 = vmatpush3.bf16.msra.mxu0 %v16583_v8  ;;  %14914 = vmatprep.subr.bf16.mxu1 %v16584_v9  ;;  %v16591_v38 = vld [vmem:[#allocation3 + $0xf8] sm:$0xff]   ;;  %v210_v39 = vpack.c.bf16 %v152_v37, %v151_v36  ;;  %v17204_v40 = vld [vmem:[#allocation2 + $0x60] sm:$0x80]  ;;  %v2447_v45 = vshrl.u32 %v2362_v34, 16 }
  0x23   :  { %63 = vst [vmem:[#allocation2 + $0xf0] sm:$0xff] %v17014_v0  ;;  %64 = vst [vmem:[#allocation2 + $0xf8] sm:$0xff] %v17014_v0  ;;  %15154 = vmatprep.subr.bf16.mxu0 %v16585_v10  ;;  %v153_v41 = vld [vmem:[%s22857_s0 + $0x60] sm:$0xff]  ;;  %v154_v42 = vld [vmem:[%s22857_s0 + $0x68] sm:$0xff]  ;;  %v2459_v60 = vshrl.u32 %v17204_v40, 16 }
  0x24   :  { %65 = vst [vmem:[#allocation2 + $0x100] sm:$0xff] %v17014_v0  ;;  %66 = vst [vmem:[#allocation2 + $0x108] sm:$0xff] %v17014_v0  ;;  %v211_v46 = vpack.c.bf16 %v154_v42, %v153_v41  ;;  %v155_v47 = vld [vmem:[%s22857_s0 + $0x70] sm:$0xff]  ;;  %v156_v48 = vld [vmem:[%s22857_s0 + $0x78] sm:$0xff]  ;;  %v2449_v63 = vrot.slane %v2447_v45, 7 }
  0x25   :  { %67 = vst [vmem:[#allocation2 + $0x110] sm:$0xff] %v17014_v0  ;;  %68 = vst [vmem:[#allocation2 + $0x118] sm:$0xff] %v17014_v0  ;;  %14915 = vmatpush3.bf16.msra.mxu1 %v16584_v9  ;;  %v16592_v53 = vld [vmem:[#allocation3 + $0x100] sm:$0xff]   ;;  %v212_v54 = vpack.c.bf16 %v156_v48, %v155_v47  ;;  %v2366_v57 = vld [vmem:[#allocation2 + $0x78] sm:$0x80]  ;;  %v2461_v31 = vrot.slane %v2459_v60, 7 }
  0x26   :  { %69 = vst [vmem:[#allocation2 + $0x120] sm:$0xff] %v17014_v0  ;;  %70 = vst [vmem:[#allocation2 + $0x128] sm:$0xff] %v17014_v0  ;;  %15155 = vmatpush3.bf16.msra.mxu0 %v16585_v10  ;;  %14916 = vmatprep.subr.bf16.mxu1 %v16586_v11  ;;  %v157_v61 = vld [vmem:[%s22857_s0 + $0x80] sm:$0xff]  ;;  %v158_v3 = vld [vmem:[%s22857_s0 + $0x88] sm:$0xff]  ;;  %v2471_v6 = vshrl.u32 %v2366_v57, 16 }
  0x27   :  { %71 = vst [vmem:[#allocation2 + $0x130] sm:$0xff] %v17014_v0  ;;  %72 = vst [vmem:[#allocation2 + $0x138] sm:$0xff] %v17014_v0  ;;  %15156 = vmatprep.subr.bf16.mxu0 %v16587_v14  ;;  %v213_v7 = vpack.c.bf16 %v158_v3, %v157_v61  ;;  %v159_v8 = vld [vmem:[%s22857_s0 + $0x90] sm:$0xff]  ;;  %v160_v9 = vld [vmem:[%s22857_s0 + $0x98] sm:$0xff] }
  0x28   :  { %73 = vst [vmem:[#allocation2 + $0x140] sm:$0xff] %v17014_v0  ;;  %74 = vst [vmem:[#allocation2 + $0x148] sm:$0xff] %v17014_v0  ;;  %v16593_v17 = vld [vmem:[#allocation3 + $0x108] sm:$0xff]   ;;  %v2368_v23 = vld [vmem:[#allocation2 + $0x90] sm:$0x80]  ;;  %v2473_v36 = vrot.slane %v2471_v6, 7 }
  0x29   :  { %75 = vst [vmem:[#allocation2 + $0x150] sm:$0xff] %v17014_v0  ;;  %76 = vst [vmem:[#allocation2 + $0x158] sm:$0xff] %v17014_v0  ;;  %14917 = vmatpush3.bf16.msra.mxu1 %v16586_v11  ;;  %v16594_v26 = vld [vmem:[#allocation3 + $0x110] sm:$0xff]   ;;  %v166_v40 = vld [vmem:[%s22857_s0 + $0xc8] sm:$0xff]  ;;  %v2483_v42 = vshrl.u32 %v2368_v23, 16 }
  0x2a   :  { %77 = vst [vmem:[#allocation2 + $0x160] sm:$0xff] %v17014_v0  ;;  %78 = vst [vmem:[#allocation2 + $0x168] sm:$0xff] %v17014_v0  ;;  %15157 = vmatpush3.bf16.msra.mxu0 %v16587_v14  ;;  %14918 = vmatprep.subr.bf16.mxu1 %v16588_v18  ;;  %v214_v14 = vpack.c.bf16 %v160_v9, %v159_v8  ;;  %v163_v34 = vld [vmem:[%s22857_s0 + $0xb0] sm:$0xff]  ;;  %v16595_v45 = vld [vmem:[#allocation3 + $0x118] sm:$0xff]  }
  0x2b   :  { %79 = vst [vmem:[#allocation2 + $0x170] sm:$0xff] %v17014_v0  ;;  %80 = vst [vmem:[#allocation2 + $0x178] sm:$0xff] %v17014_v0  ;;  %15158 = vmatprep.subr.bf16.mxu0 %v16589_v27  ;;  %v170_v60 = vld [vmem:[%s22857_s0 + $0xe8] sm:$0xff]  ;;  %v16596_v9 = vld [vmem:[#allocation3 + $0x120] sm:$0xff]  }
  0x2c   :  { %81 = vst [vmem:[#allocation2 + $0x180] sm:$0xff] %v17014_v0  ;;  %82 = vst [vmem:[#allocation2 + $0x188] sm:$0xff] %v17014_v0 }
  0x2d   :  { %83 = vst [vmem:[#allocation2 + $0x190] sm:$0xff] %v17014_v0  ;;  %84 = vst [vmem:[#allocation2 + $0x198] sm:$0xff] %v17014_v0  ;;  %14919 = vmatpush3.bf16.msra.mxu1 %v16588_v18 }
  0x2e   :  { %86 = vst [vmem:[#allocation2 + $0x1a8] sm:$0xff] %v17014_v0  ;;  %87 = vst [vmem:[#allocation2 + $0x1b0] sm:$0xff] %v17014_v0  ;;  %15159 = vmatpush3.bf16.msra.mxu0 %v16589_v27  ;;  %14920 = vmatprep.subr.bf16.mxu1 %v16590_v29 }
  0x2f   :  { %88 = vst [vmem:[#allocation2 + $0x1b8] sm:$0xff] %v17014_v0  ;;  %89 = vst [vmem:[#allocation2 + $0x1c0] sm:$0xff] %v17014_v0  ;;  %15160 = vmatprep.subr.bf16.mxu0 %v16591_v38 }
  0x30   :  { %90 = vst [vmem:[#allocation2 + $0x1c8] sm:$0xff] %v17014_v0  ;;  %91 = vst [vmem:[#allocation2 + $0x1d0] sm:$0xff] %v17014_v0 }
  0x31   :  { %92 = vst [vmem:[#allocation2 + $0x1d8] sm:$0xff] %v17014_v0  ;;  %93 = vst [vmem:[#allocation2 + $0x1e0] sm:$0xff] %v17014_v0  ;;  %14921 = vmatpush3.bf16.msra.mxu1 %v16590_v29  ;;  %v162_v29 = vld [vmem:[%s22857_s0 + $0xa8] sm:$0xff] }
  0x32   :  { %94 = vst [vmem:[#allocation2 + $0x1e8] sm:$0xff] %v17014_v0  ;;  %95 = vst [vmem:[#allocation2 + $0x1f0] sm:$0xff] %v17014_v0  ;;  %15161 = vmatpush3.bf16.msra.mxu0 %v16591_v38 }
  0x33   :  { %96 = vst [vmem:[#allocation2 + $0x1f8] sm:$0xff] %v17014_v0  ;;  %97 = vst [vmem:[#allocation2 + $0x200] sm:$0xff] %v17014_v0  ;;  %15226 = vmatprep.subr.bf16.mxu0 %v16592_v53 }
  0x34   :  { %98 = vst [vmem:[#allocation2 + $0x208] sm:$0xff] %v17014_v0  ;;  %99 = vst [vmem:[#allocation2 + $0x210] sm:$0xff] %v17014_v0 }
  0x35   :  { %100 = vst [vmem:[#allocation2 + $0x218] sm:$0xff] %v17014_v0  ;;  %101 = vst [vmem:[#allocation2 + $0x220] sm:$0xff] %v17014_v0 }
  0x36   :  { %102 = vst [vmem:[#allocation2 + $0x228] sm:$0xff] %v17014_v0  ;;  %103 = vst [vmem:[#allocation2 + $0x230] sm:$0xff] %v17014_v0 }
  0x37   :  { %104 = vst [vmem:[#allocation2 + $0x238] sm:$0xff] %v17014_v0  ;;  %105 = vst [vmem:[#allocation2 + $0x240] sm:$0xff] %v17014_v0 }
  0x38   :  { %106 = vst [vmem:[#allocation2 + $0x248] sm:$0xff] %v17014_v0  ;;  %107 = vst [vmem:[#allocation2 + $0x250] sm:$0xff] %v17014_v0 }
  0x39   :  { %108 = vst [vmem:[#allocation2 + $0x258] sm:$0xff] %v17014_v0  ;;  %109 = vst [vmem:[#allocation2 + $0x260] sm:$0xff] %v17014_v0 }
  0x3a   :  { %110 = vst [vmem:[#allocation2 + $0x268] sm:$0xff] %v17014_v0  ;;  %111 = vst [vmem:[#allocation2 + $0x270] sm:$0xff] %v17014_v0 }
  0x3b   :  { %112 = vst [vmem:[#allocation2 + $0x278] sm:$0xff] %v17014_v0  ;;  %113 = vst [vmem:[#allocation2 + $0x280] sm:$0xff] %v17014_v0 }
  0x3c   :  { %114 = vst [vmem:[#allocation2 + $0x288] sm:$0xff] %v17014_v0  ;;  %115 = vst [vmem:[#allocation2 + $0x290] sm:$0xff] %v17014_v0 }
  0x3d   :  { %116 = vst [vmem:[#allocation2 + $0x298] sm:$0xff] %v17014_v0  ;;  %117 = vst [vmem:[#allocation2 + $0x2a0] sm:$0xff] %v17014_v0 }
  0x3e   :  { %118 = vst [vmem:[#allocation2 + $0x2a8] sm:$0xff] %v17014_v0  ;;  %119 = vst [vmem:[#allocation2 + $0x2b0] sm:$0xff] %v17014_v0 }
  0x3f   :  { %120 = vst [vmem:[#allocation2 + $0x2b8] sm:$0xff] %v17014_v0  ;;  %121 = vst [vmem:[#allocation2 + $0x2c0] sm:$0xff] %v17014_v0 }
  0x40   :  { %122 = vst [vmem:[#allocation2 + $0x2c8] sm:$0xff] %v17014_v0  ;;  %123 = vst [vmem:[#allocation2 + $0x2d0] sm:$0xff] %v17014_v0 }
  0x41   :  { %124 = vst [vmem:[#allocation2 + $0x2d8] sm:$0xff] %v17014_v0  ;;  %125 = vst [vmem:[#allocation2 + $0x2e0] sm:$0xff] %v17014_v0 }
  0x42   :  { %126 = vst [vmem:[#allocation2 + $0x2e8] sm:$0xff] %v17014_v0  ;;  %127 = vst [vmem:[#allocation2 + $0x2f0] sm:$0xff] %v17014_v0 }
  0x43   :  { %128 = vst [vmem:[#allocation2 + $0x2f8] sm:$0xff] %v17014_v0  ;;  %129 = vst [vmem:[#allocation2 + $0x300] sm:$0xff] %v17014_v0 }
  0x44   :  { %130 = vst [vmem:[#allocation2 + $0x308] sm:$0xff] %v17014_v0  ;;  %131 = vst [vmem:[#allocation2 + $0x310] sm:$0xff] %v17014_v0 }
  0x45   :  { %132 = vst [vmem:[#allocation2 + $0x318] sm:$0xff] %v17014_v0  ;;  %133 = vst [vmem:[#allocation2 + $0x320] sm:$0xff] %v17014_v0 }
  0x46   :  { %134 = vst [vmem:[#allocation2 + $0x328] sm:$0xff] %v17014_v0  ;;  %135 = vst [vmem:[#allocation2 + $0x330] sm:$0xff] %v17014_v0 }
  0x47   :  { %136 = vst [vmem:[#allocation2 + $0x338] sm:$0xff] %v17014_v0  ;;  %137 = vst [vmem:[#allocation2 + $0x340] sm:$0xff] %v17014_v0 }
  0x48   :  { %138 = vst [vmem:[#allocation2 + $0x348] sm:$0xff] %v17014_v0  ;;  %140 = vst [vmem:[#allocation2 + $0x358] sm:$0xff] %v17014_v0 }
  0x49   :  { %239 = vst.msk [vmem:[#allocation2 + $0x20] sm:$0xff] %vm238_vm0, %v205_v15  ;;  %240 = vst.msk [vmem:[#allocation2 + $0x38] sm:$0xff] %vm238_vm0, %v206_v19 }
  0x4a   :  { %241 = vst.msk [vmem:[#allocation2 + $0x50] sm:$0xff] %vm238_vm0, %v207_v24  ;;  %242 = vst.msk [vmem:[#allocation2 + $0x68] sm:$0xff] %vm238_vm0, %v208_v28  ;;  %v2370_v24 = vld [vmem:[#allocation2 + $0xa8] sm:$0x80]  ;;  %v161_v28 = vld [vmem:[%s22857_s0 + $0xa0] sm:$0xff] }
  0x4b   :  { %243 = vst.msk [vmem:[#allocation2 + $0x80] sm:$0xff] %vm238_vm0, %v209_v35  ;;  %244 = vst.msk [vmem:[#allocation2 + $0x98] sm:$0xff] %vm238_vm0, %v210_v39  ;;  %v164_v35 = vld [vmem:[%s22857_s0 + $0xb8] sm:$0xff]  ;;  %v165_v39 = vld [vmem:[%s22857_s0 + $0xc0] sm:$0xff]  ;;  %v215_v41 = vpack.c.bf16 %v162_v29, %v161_v28 }
  0x4c   :  { %245 = vst.msk [vmem:[#allocation2 + $0xb0] sm:$0xff] %vm238_vm0, %v211_v46  ;;  %246 = vst.msk [vmem:[#allocation2 + $0xc8] sm:$0xff] %vm238_vm0, %v212_v54  ;;  %v216_v46 = vpack.c.bf16 %v164_v35, %v163_v34  ;;  %v177_v28 = vld [vmem:[%s22857_s0 + $0x120] sm:$0xff]  ;;  %v178_v35 = vld [vmem:[%s22857_s0 + $0x128] sm:$0xff] }
  0x4d   :  { %247 = vst.msk [vmem:[#allocation2 + $0xe0] sm:$0xff] %vm238_vm0, %v213_v7  ;;  %248 = vst.msk [vmem:[#allocation2 + $0xf8] sm:$0xff] %vm238_vm0, %v214_v14 }
  0x4e   :  { %249 = vst.msk [vmem:[#allocation2 + $0x110] sm:$0xff] %vm238_vm0, %v215_v41  ;;  %250 = vst.msk [vmem:[#allocation2 + $0x128] sm:$0xff] %vm238_vm0, %v216_v46  ;;  %v2376_v41 = vld [vmem:[#allocation2 + $0xf0] sm:$0x80] }
  0x4f   :  { %vm17625_vm4 = vmand %vm8913_vm3, %vm8902_vm2 }
  0x50   :  { %v17213_v43 = vld [vmem:[#allocation2 + $0x20] sm:$0xff]  ;;  %v17224_v51 = vld [vmem:[#allocation2 + $0x38] sm:$0xff]  ;;  %vm17837_vm8 = vmand %vm8895_vm6, %vm8896_vm7 }
  0x51   :  { %v2427_v49 = vshrl.u32 %v17213_v43, 16  ;;  %v2430_v50 = vshll.u32 %v17213_v43, 16  ;;  %v2439_v55 = vshrl.u32 %v17224_v51, 16  ;;  %v2442_v56 = vshll.u32 %v17224_v51, 16  ;;  %v17229_v59 = vld [vmem:[#allocation2 + $0x50] sm:$0xff]  ;;  %v17238_v2 = vld [vmem:[#allocation2 + $0x68] sm:$0xff]  ;;  %14923 = vmatmul.mubr.bf16.vlgmr.msra.gmra.mrb[0].mxu1 %v17213_v43  ;;  %vm18272_vm10 = vmand %vm8901_vm9, %vm8902_vm2 }
  0x52   :  { %v2451_v0 = vshrl.u32 %v17229_v59, 16  ;;  %v2454_v1 = vshll.u32 %v17229_v59, 16  ;;  %v2463_v5 = vshrl.u32 %v17238_v2, 16  ;;  %v2466_v12 = vshll.u32 %v17238_v2, 16  ;;  %v17253_v13 = vld [vmem:[#allocation2 + $0x80] sm:$0xff]  ;;  %v17259_v20 = vld [vmem:[#allocation2 + $0x98] sm:$0xff]  ;;  %14926 = vmatprep.mubr.bf16.mxu1 %v17224_v51 }
  0x53   :  { %v2429_v58 = vrot.slane %v2427_v49, 7  ;;  %v2441_v62 = vrot.slane %v2439_v55, 7  ;;  %v2475_v18 = vshrl.u32 %v17253_v13, 16  ;;  %v2478_v19 = vshll.u32 %v17253_v13, 16  ;;  %v17266_v27 = vld [vmem:[#allocation2 + $0xb0] sm:$0xff]  ;;  %v17300_v57 = vld [vmem:[#allocation2 + $0xc8] sm:$0xff] }
  0x54   :  { %v2453_v11 = vrot.slane %v2451_v0, 7  ;;  %v2465_v16 = vrot.slane %v2463_v5, 7  ;;  %v2487_v33 = vshrl.u32 %v17259_v20, 16  ;;  %v2499_v38 = vshrl.u32 %v17266_v27, 16  ;;  %v17310_v61 = vld [vmem:[#allocation2 + $0xe0] sm:$0xff]  ;;  %v172_v5 = vld [vmem:[%s22857_s0 + $0xf8] sm:$0xff] }
  0x55   :  { %v17243_v4 = vor.u32 %v2430_v50, %v2429_v58  ;;  %v2444_v10 = vor.u32 %v2442_v56, %v2441_v62  ;;  %v2477_v25 = vrot.slane %v2475_v18, 7  ;;  %v2490_v49 = vshll.u32 %v17259_v20, 16  ;;  %v169_v58 = vld [vmem:[%s22857_s0 + $0xe0] sm:$0xff]  ;;  %v171_v62 = vld [vmem:[%s22857_s0 + $0xf0] sm:$0xff] }
  0x56   :  { %v2456_v22 = vor.u32 %v2454_v1, %v2453_v11  ;;  %v2468_v32 = vor.u32 %v2466_v12, %v2465_v16  ;;  %v2489_v48 = vrot.slane %v2487_v33, 7  ;;  %v217_v50 = vpack.c.bf16 %v166_v40, %v165_v39  ;;  %v2372_v0 = vld [vmem:[#allocation2 + $0xc0] sm:$0x80]  ;;  %v2374_v1 = vld [vmem:[#allocation2 + $0xd8] sm:$0x80]  ;;  %v174_v16 = vld [vmem:[%s22857_s0 + $0x108] sm:$0xff] }
  0x57   :  { %v2433_v15 = vsel %vm335_vm1, %v2425_v44, %v17243_v4  ;;  %v2445_v21 = vsel %vm335_vm1, %v2437_v52, %v2444_v10  ;;  %v2480_v37 = vor.u32 %v2478_v19, %v2477_v25  ;;  %v2495_v44 = vshrl.u32 %v2370_v24, 16  ;;  %v167_v52 = vld [vmem:[%s22857_s0 + $0xd0] sm:$0xff]  ;;  %v173_v11 = vld [vmem:[%s22857_s0 + $0x100] sm:$0xff]  ;;  %v176_v19 = vld [vmem:[%s22857_s0 + $0x118] sm:$0xff] }
  0x58   :  { %15162 = vmatprep.mubr.bf16.mxu0 %v2433_v15  ;;  %v2457_v30 = vsel %vm335_vm1, %v2449_v63, %v2456_v22  ;;  %v2469_v47 = vsel %vm335_vm1, %v2461_v31, %v2468_v32  ;;  %v2501_v55 = vrot.slane %v2499_v38, 7  ;;  %v2502_v56 = vshll.u32 %v17266_v27, 16  ;;  %251 = vst.msk [vmem:[#allocation2 + $0x140] sm:$0xff] %vm238_vm0, %v217_v50  ;;  %v17348_v32 = vld [vmem:[#allocation2 + $0xf8] sm:$0xff]  ;;  %v16597_v33 = vld [vmem:[#allocation3 + $0x128] sm:$0xff]   ;;  %v17352_v34 = vld [vmem:[#allocation2 + $0x110] sm:$0xff] }
  0x59   :  { %15163 = vmatmul.mubr.bf16.vlgmr.msra.gmra.mrb[0].mxu0 %v2445_v21  ;;  %v2481_v54 = vsel %vm335_vm1, %v2473_v36, %v2480_v37  ;;  %14927 = vmatmul.mubr.bf16.gmra.mrb[4].mxu1 %v17229_v59  ;;  %v2485_v63 = vrot.slane %v2483_v42, 7  ;;  %v2492_v6 = vor.u32 %v2490_v49, %v2489_v48  ;;  %v2497_v7 = vrot.slane %v2495_v44, 7  ;;  %v179_v36 = vld [vmem:[%s22857_s0 + $0x130] sm:$0xff]  ;;  %v180_v38 = vld [vmem:[%s22857_s0 + $0x138] sm:$0xff]  ;;  %v2378_v49 = vld [vmem:[#allocation2 + $0x108] sm:$0x80] }
  0x5a   :  { %15227 = vmatpush3.bf16.msra.mxu0 %v16592_v53  ;;  %15166 = vmatprep.mubr.bf16.mxu0 %v2457_v30  ;;  %v168_v53 = vld [vmem:[%s22857_s0 + $0xd8] sm:$0xff]  ;;  %v2511_v8 = vshrl.u32 %v17300_v57, 16  ;;  %v219_v10 = vpack.c.bf16 %v170_v60, %v169_v58  ;;  %v17324_v12 = vor.u32 %v2502_v56, %v2501_v55  ;;  %v2523_v14 = vshrl.u32 %v17310_v61, 16  ;;  %v16598_v48 = vld [vmem:[#allocation3 + $0x130] sm:$0xff]   ;;  %v17372_v50 = vld [vmem:[#allocation2 + $0x128] sm:$0xff] }
  0x5b   :  { %15228 = vmatprep.subr.bf16.mxu0 %v16593_v17  ;;  %14930 = vmatprep.mubr.bf16.mxu1 %v17238_v2  ;;  %v218_v3 = vpack.c.bf16 %v168_v53, %v167_v52  ;;  %v220_v15 = vpack.c.bf16 %v172_v5, %v171_v62  ;;  %v221_v18 = vpack.c.bf16 %v174_v16, %v173_v11  ;;  %v2507_v21 = vshrl.u32 %v2372_v0, 16  ;;  %v16599_v52 = vld [vmem:[#allocation3 + $0x138] sm:$0xff]   ;;  %v181_v60 = vld [vmem:[%s22857_s0 + $0x140] sm:$0xff]  ;;  %v182_v62 = vld [vmem:[%s22857_s0 + $0x148] sm:$0xff] }
  0x5c   :  { %253 = vst.msk [vmem:[#allocation2 + $0x170] sm:$0xff] %vm238_vm0, %v219_v10  ;;  %v2493_v23 = vsel %vm335_vm1, %v2485_v63, %v2492_v6  ;;  %v2513_v24 = vrot.slane %v2511_v8, 7  ;;  %v2514_v25 = vshll.u32 %v17300_v57, 16  ;;  %v2505_v29 = vsel %vm335_vm1, %v2497_v7, %v17324_v12  ;;  %v183_v63 = vld [vmem:[%s22857_s0 + $0x150] sm:$0xff]  ;;  %v17391_v6 = vld [vmem:[#allocation2 + $0x120] sm:$0x80] }
  0x5d   :  { %252 = vst.msk [vmem:[#allocation2 + $0x158] sm:$0xff] %vm238_vm0, %v218_v3  ;;  %254 = vst.msk [vmem:[#allocation2 + $0x188] sm:$0xff] %vm238_vm0, %v220_v15  ;;  %v2525_v30 = vrot.slane %v2523_v14, 7  ;;  %v2526_v31 = vshll.u32 %v17310_v61, 16  ;;  %v223_v37 = vpack.c.bf16 %v178_v35, %v177_v28  ;;  %v2509_v39 = vrot.slane %v2507_v21, 7  ;;  %v184_v7 = vld [vmem:[%s22857_s0 + $0x158] sm:$0xff] }
  0x5e   :  { %15229 = vmatpush3.bf16.msra.mxu0 %v16593_v17  ;;  %v175_v17 = vld [vmem:[%s22857_s0 + $0x110] sm:$0xff]  ;;  %255 = vst.msk [vmem:[#allocation2 + $0x1d0] sm:$0xff] %vm238_vm0, %v221_v18  ;;  %v17364_v40 = vor.u32 %v2514_v25, %v2513_v24  ;;  %v2535_v42 = vshrl.u32 %v17348_v32, 16  ;;  %v224_v44 = vpack.c.bf16 %v180_v38, %v179_v36  ;;  %v2538_v56 = vshll.u32 %v17348_v32, 16  ;;  %v185_v8 = vld [vmem:[%s22857_s0 + $0x160] sm:$0xff]  ;;  %v188_v14 = vld [vmem:[%s22857_s0 + $0x178] sm:$0xff] }
  0x5f   :  { %15230 = vmatprep.subr.bf16.mxu0 %v16594_v26  ;;  %v222_v22 = vpack.c.bf16 %v176_v19, %v175_v17  ;;  %v17367_v46 = vor.u32 %v2526_v31, %v2525_v30  ;;  %257 = vst.msk [vmem:[#allocation2 + $0x200] sm:$0xff] %vm238_vm0, %v223_v37  ;;  %v17377_v58 = vld [vmem:[#allocation2 + $0x140] sm:$0xff]  ;;  %v2550_v5 = vshll.u32 %v17352_v34, 16  ;;  %v17403_v10 = vld [vmem:[#allocation2 + $0x138] sm:$0x80]  ;;  %v187_v11 = vld [vmem:[%s22857_s0 + $0x170] sm:$0xff]  ;;  %v225_v15 = vpack.c.bf16 %v182_v62, %v181_v60 }
  0x60   :  { %258 = vst.msk [vmem:[#allocation2 + $0x218] sm:$0xff] %vm238_vm0, %v224_v44  ;;  %v2517_v53 = vsel %vm335_vm1, %v2509_v39, %v17364_v40  ;;  %v2537_v55 = vrot.slane %v2535_v42, 7  ;;  %v16601_v16 = vld [vmem:[#allocation3] sm:$0xff]   ;;  %v2559_v19 = vshrl.u32 %v17372_v50, 16  ;;  %v226_v21 = vpack.c.bf16 %v184_v7, %v183_v63  ;;  %v192_v35 = vld [vmem:[%s22857_s0 + $0x198] sm:$0xff]  ;;  %v194_v44 = vld [vmem:[%s22857_s0 + $0x1a8] sm:$0xff] }
  0x61   :  { %15167 = vmatmul.mubr.bf16.gmra.mrb[4].mxu0 %v2469_v47  ;;  %256 = vst.msk [vmem:[#allocation2 + $0x1e8] sm:$0xff] %vm238_vm0, %v222_v22  ;;  %14931 = vmatmul.mubr.bf16.gmra.mrb[8].mxu1 %v17253_v13  ;;  %v2547_v47 = vshrl.u32 %v17352_v34, 16  ;;  %v189_v22 = vld [vmem:[%s22857_s0 + $0x180] sm:$0xff]  ;;  %259 = vst.msk [vmem:[#allocation2 + $0x230] sm:$0xff] %vm238_vm0, %v225_v15  ;;  %v2555_v30 = vshrl.u32 %v17391_v6, 16  ;;  %v2562_v36 = vshll.u32 %v17372_v50, 16  ;;  %v228_v39 = vpack.c.bf16 %v188_v14, %v187_v11 }
  0x62   :  { %15170 = vmatprep.mubr.bf16.mxu0 %v2481_v54  ;;  %15231 = vmatpush3.bf16.msra.mxu0 %v16594_v26  ;;  %v2519_v26 = vshrl.u32 %v2374_v1, 16  ;;  %v2531_v54 = vshrl.u32 %v2376_v41, 16  ;;  %v2543_v1 = vshrl.u32 %v2378_v49, 16  ;;  %v17412_v18 = vor.u32 %v2538_v56, %v2537_v55  ;;  %v17425_v28 = vld [vmem:[#allocation3 + $0x140] sm:$0xff]   ;;  %260 = vst.msk [vmem:[#allocation2 + $0x248] sm:$0xff] %vm238_vm0, %v226_v21  ;;  %v16604_v60 = vld [vmem:[#allocation3 + $0x10] sm:$0xff]  }
  0x63   :  { %15232 = vmatprep.subr.bf16.mxu0 %v16595_v45  ;;  %14934 = vmatprep.mubr.bf16.mxu1 %v17259_v20  ;;  %v2549_v3 = vrot.slane %v2547_v47, 7  ;;  %v2567_v37 = vshrl.u32 %v17403_v10, 16  ;;  %v193_v42 = vld [vmem:[%s22857_s0 + $0x1a0] sm:$0xff]  ;;  %v2561_v47 = vrot.slane %v2559_v19, 7  ;;  %v2574_v56 = vshll.u32 %v17377_v58, 16  ;;  %262 = vst.msk [vmem:[#allocation2 + $0x278] sm:$0xff] %vm238_vm0, %v228_v39 }
  0x64   :  { %v2533_v17 = vrot.slane %v2531_v54, 7  ;;  %v2545_v24 = vrot.slane %v2543_v1, 7  ;;  %14986 = vmatprep.subr.bf16.mxu1 %v16601_v16  ;;  %v17437_v38 = vld [vmem:[#allocation2 + $0x158] sm:$0xff]  ;;  %v2384_v62 = vld [vmem:[#allocation2 + $0x150] sm:$0x80]  ;;  %v198_v1 = vld [vmem:[%s22857_s0 + $0x1c8] sm:$0xff] }
  0x65   :  { %v17421_v25 = vor.u32 %v2550_v5, %v2549_v3  ;;  %14987 = vmatpush3.bf16.msra.mxu1 %v16601_v16  ;;  %v196_v63 = vld [vmem:[%s22857_s0 + $0x1b8] sm:$0xff]  ;;  %v2386_v3 = vld [vmem:[#allocation2 + $0x168] sm:$0x80]  ;;  %v2557_v7 = vrot.slane %v2555_v30, 7  ;;  %v2569_v10 = vrot.slane %v2567_v37, 7  ;;  %v199_v16 = vld [vmem:[%s22857_s0 + $0x1d0] sm:$0xff] }
  0x66   :  { %15233 = vmatpush3.bf16.msra.mxu0 %v16595_v45  ;;  %v2521_v45 = vrot.slane %v2519_v26, 7  ;;  %v2571_v26 = vshrl.u32 %v17377_v58, 16  ;;  %v16605_v15 = vld [vmem:[#allocation3 + $0x18] sm:$0xff]   ;;  %v2591_v19 = vshrl.u32 %v2386_v3, 16  ;;  %v202_v30 = vld [vmem:[%s22857_s0 + $0x1e8] sm:$0xff]  ;;  %v16606_v37 = vld [vmem:[#allocation3 + $0x20] sm:$0xff]  }
  0x67   :  { %15234 = vmatprep.subr.bf16.mxu0 %v16596_v9  ;;  %v2553_v54 = vsel %vm335_vm1, %v2545_v24, %v17421_v25  ;;  %v200_v21 = vld [vmem:[%s22857_s0 + $0x1d8] sm:$0xff]  ;;  %vm9654_vm2 = vsmask.f32 4368 }
  0x68   :  { %v2529_v0 = vsel %vm335_vm1, %v2521_v45, %v17367_v46  ;;  %v2541_v45 = vsel %vm335_vm1, %v2533_v17, %v17412_v18  ;;  %v2573_v55 = vrot.slane %v2571_v26, 7  ;;  %v2579_v17 = vshrl.u32 %v2384_v62, 16 }
  0x69   :  { %15171 = vmatmul.mubr.bf16.gmra.mrb[8].mxu0 %v2493_v23  ;;  %14935 = vmatmul.mubr.bf16.gmra.mrb[12].mxu1 %v17266_v27  ;;  %v190_v23 = vld [vmem:[%s22857_s0 + $0x188] sm:$0xff]  ;;  %v2586_v26 = vshll.u32 %v17437_v38, 16 }
  0x6a   :  { %15174 = vmatprep.mubr.bf16.mxu0 %v2505_v29  ;;  %15235 = vmatpush3.bf16.msra.mxu0 %v16596_v9  ;;  %v186_v9 = vld [vmem:[%s22857_s0 + $0x168] sm:$0xff]  ;;  %v229_v41 = vpack.c.bf16 %v190_v23, %v189_v22  ;;  %v17475_v11 = vor.u32 %v2574_v56, %v2573_v55  ;;  %v201_v22 = vld [vmem:[%s22857_s0 + $0x1e0] sm:$0xff] }
  0x6b   :  { %15236 = vmatprep.subr.bf16.mxu0 %v16597_v33  ;;  %14938 = vmatprep.mubr.bf16.mxu1 %v17300_v57  ;;  %v16603_v29 = vld [vmem:[#allocation3 + $0x8] sm:$0xff]   ;;  %v227_v31 = vpack.c.bf16 %v186_v9, %v185_v8  ;;  %v17472_v8 = vor.u32 %v2562_v36, %v2561_v47  ;;  %v2583_v9 = vshrl.u32 %v17437_v38, 16  ;;  %v235_v39 = vpack.c.bf16 %v202_v30, %v201_v22  ;;  %v16610_v22 = vld [vmem:[#allocation3 + $0x38] sm:$0xff]  }
  0x6c   :  { %14988 = vmatprep.subr.bf16.mxu1 %v16603_v29  ;;  %263 = vst.msk [vmem:[#allocation2 + $0x290] sm:$0xff] %vm238_vm0, %v229_v41  ;;  %v17498_v36 = vld [vmem:[#allocation2 + $0x188] sm:$0xff]  ;;  %v17501_v41 = vld [vmem:[#allocation2 + $0x1d0] sm:$0xff]  ;;  %v2593_v47 = vrot.slane %v2591_v19, 7  ;;  %v2392_v19 = vld [vmem:[#allocation2 + $0x1e0] sm:$0x80] }
  0x6d   :  { %261 = vst.msk [vmem:[#allocation2 + $0x260] sm:$0xff] %vm238_vm0, %v227_v31  ;;  %14989 = vmatpush3.bf16.msra.mxu1 %v16603_v29  ;;  %v2565_v23 = vsel %vm335_vm1, %v2557_v7, %v17472_v8  ;;  %v2585_v24 = vrot.slane %v2583_v9, 7  ;;  %v234_v29 = vpack.c.bf16 %v200_v21, %v199_v16  ;;  %v2577_v31 = vsel %vm335_vm1, %v2569_v10, %v17475_v11  ;;  %v16608_v55 = vld [vmem:[#allocation3 + $0x28] sm:$0xff]   ;;  %v16609_v7 = vld [vmem:[#allocation3 + $0x30] sm:$0xff]   ;;  %v17521_v9 = vld [vmem:[#allocation2 + $0x200] sm:$0xff] }
  0x6e   :  { %15237 = vmatpush3.bf16.msra.mxu0 %v16597_v33  ;;  %v191_v33 = vld [vmem:[%s22857_s0 + $0x190] sm:$0xff]  ;;  %14990 = vmatprep.subr.bf16.mxu1 %v16604_v60  ;;  %269 = vst.msk [vmem:[#allocation2 + $0x320] sm:$0xff] %vm238_vm0, %v235_v39  ;;  %v2390_v56 = vld [vmem:[#allocation2 + $0x1c8] sm:$0x80]  ;;  %v2643_v21 = vshrl.u32 %v17521_v9, 16  ;;  %v17533_v39 = vld [vmem:[#allocation2 + $0x218] sm:$0xff] }
  0x6f   :  { %15238 = vmatprep.subr.bf16.mxu0 %v16598_v48  ;;  %v230_v49 = vpack.c.bf16 %v192_v35, %v191_v33  ;;  %268 = vst.msk [vmem:[#allocation2 + $0x308] sm:$0xff] %vm238_vm0, %v234_v29 }
  0x71   :  { %15175 = vmatmul.mubr.bf16.gmra.mrb[12].mxu0 %v2517_v53  ;;  %v231_v53 = vpack.c.bf16 %v194_v44, %v193_v42  ;;  %14939 = vmatmul.mubr.bf16.gmra.mrb[16].mxu1 %v17310_v61  ;;  %264 = vst.msk [vmem:[#allocation2 + $0x2a8] sm:$0xff] %vm238_vm0, %v230_v49  ;;  %v2581_v42 = vrot.slane %v2579_v17, 7  ;;  %v17506_v44 = vor.u32 %v2586_v26, %v2585_v24  ;;  %v2627_v26 = vshrl.u32 %v2392_v19, 16  ;;  %v16602_v19 = vld [vmem:[#allocation3 + $0x148] sm:$0xff]  }
  0x72   :  { %15178 = vmatprep.mubr.bf16.mxu0 %v2529_v0  ;;  %15239 = vmatpush3.bf16.msra.mxu0 %v16598_v48  ;;  %v17447_v48 = vld [vmem:[#allocation2 + $0x170] sm:$0xff]  ;;  %v197_v0 = vld [vmem:[%s22857_s0 + $0x1c0] sm:$0xff] }
  0x73   :  { %15240 = vmatprep.subr.bf16.mxu0 %v16599_v52  ;;  %265 = vst.msk [vmem:[#allocation2 + $0x2c0] sm:$0xff] %vm238_vm0, %v231_v53  ;;  %14942 = vmatprep.mubr.bf16.mxu1 %v17348_v32  ;;  %v233_v6 = vpack.c.bf16 %v198_v1, %v197_v0  ;;  %v2595_v14 = vshrl.u32 %v17447_v48, 16  ;;  %v2598_v35 = vshll.u32 %v17447_v48, 16  ;;  %v2388_v53 = vld [vmem:[#allocation2 + $0x180] sm:$0x80]  ;;  %v2615_v1 = vshrl.u32 %v2390_v56, 16 }
  0x74   :  { %14991 = vmatpush3.bf16.msra.mxu1 %v16604_v60  ;;  %v2589_v60 = vsel %vm335_vm1, %v2581_v42, %v17506_v44  ;;  %v17536_v42 = vld [vmem:[#allocation2 + $0x8] sm:$0xff] }
  0x75   :  { %267 = vst.msk [vmem:[#allocation2 + $0x2f0] sm:$0xff] %vm238_vm0, %v233_v6  ;;  %v2597_v33 = vrot.slane %v2595_v14, 7  ;;  %14992 = vmatprep.subr.bf16.mxu1 %v16605_v15  ;;  %v17518_v6 = vld [vmem:[#allocation2 + $0x1e8] sm:$0xff]  ;;  %v2617_v16 = vrot.slane %v2615_v1, 7  ;;  %v204_v1 = vld [vmem:[%s22857_s0 + $0x1f8] sm:$0xff] }
  0x76   :  { %15241 = vmatpush3.bf16.msra.mxu0 %v16599_v52  ;;  %v195_v52 = vld [vmem:[%s22857_s0 + $0x1b0] sm:$0xff]  ;;  %v2634_v30 = vshll.u32 %v17518_v6, 16 }
  0x77   :  { %15306 = vmatprep.subr.bf16.mxu0 %v17425_v28  ;;  %v232_v5 = vpack.c.bf16 %v196_v63, %v195_v52  ;;  %v17509_v49 = vor.u32 %v2598_v35, %v2597_v33  ;;  %v2603_v52 = vshrl.u32 %v2388_v53, 16  ;;  %v2610_v63 = vshll.u32 %v17498_v36, 16  ;;  %v2396_v53 = vld [vmem:[#allocation2 + $0x210] sm:$0x80] }
  0x78   :  { %14993 = vmatpush3.bf16.msra.mxu1 %v16605_v15  ;;  %v2631_v15 = vshrl.u32 %v17518_v6, 16  ;;  %v2645_v35 = vrot.slane %v2643_v21, 7  ;;  %v16607_v21 = vld [vmem:[#allocation3 + $0x150] sm:$0xff]  }
  0x79   :  { %15179 = vmatmul.mubr.bf16.gmra.mrb[16].mxu0 %v2541_v45  ;;  %266 = vst.msk [vmem:[#allocation2 + $0x2d8] sm:$0xff] %vm238_vm0, %v232_v5  ;;  %14943 = vmatmul.mubr.bf16.gmra.mrb[20].mxu1 %v17352_v34  ;;  %v2607_v45 = vshrl.u32 %v17498_v36, 16  ;;  %v2601_v0 = vsel %vm335_vm1, %v2593_v47, %v17509_v49  ;;  %v2622_v5 = vshll.u32 %v17501_v41, 16  ;;  %v2605_v10 = vrot.slane %v2603_v52, 7 }
  0x7a   :  { %15182 = vmatprep.mubr.bf16.mxu0 %v2553_v54  ;;  %14946 = vmatprep.mubr.bf16.mxu1 %v17372_v50  ;;  %v2619_v54 = vshrl.u32 %v17501_v41, 16  ;;  %v2633_v29 = vrot.slane %v2631_v15, 7  ;;  %v17565_v15 = vld [vmem:[#allocation2 + $0x230] sm:$0xff] }
  0x7b   :  { %14994 = vmatprep.subr.bf16.mxu1 %v16606_v37  ;;  %v2609_v62 = vrot.slane %v2607_v45, 7  ;;  %v2629_v45 = vrot.slane %v2627_v26, 7  ;;  %v17586_v26 = vld [vmem:[#allocation3 + $0x80] sm:$0xff]  }
  0x7c   :  { %14995 = vmatpush3.bf16.msra.mxu1 %v16606_v37  ;;  %v2621_v3 = vrot.slane %v2619_v54, 7  ;;  %v2646_v37 = vshll.u32 %v17521_v9, 16  ;;  %v17539_v47 = vor.u32 %v2634_v30, %v2633_v29  ;;  %v2655_v54 = vshrl.u32 %v17533_v39, 16  ;;  %v16615_v30 = vld [vmem:[#allocation3 + $0x178] sm:$0xff]  }
  0x7d   :  { %14996 = vmatprep.subr.bf16.mxu1 %v16608_v55  ;;  %v2612_v14 = vor.u32 %v2610_v63, %v2609_v62  ;;  %v2658_v63 = vshll.u32 %v17533_v39, 16 }
  0x7e   :  { %v17525_v17 = vor.u32 %v2622_v5, %v2621_v3  ;;  %v17542_v56 = vor.u32 %v2646_v37, %v2645_v35  ;;  %v2637_v52 = vsel %vm335_vm1, %v2629_v45, %v17539_v47  ;;  %v2657_v62 = vrot.slane %v2655_v54, 7  ;;  %v17605_v37 = vld [vmem:[#allocation2 + $0x2f0] sm:$0xff]  ;;  %v17607_v45 = vld [vmem:[#allocation2 + $0x308] sm:$0xff] }
  0x7f   :  { %v2613_v24 = vsel %vm335_vm1, %v2605_v10, %v2612_v14 }
  0x80   :  { %14997 = vmatpush3.bf16.msra.mxu1 %v16608_v55  ;;  %v17558_v10 = vor.u32 %v2658_v63, %v2657_v62  ;;  %v17595_v29 = vld [vmem:[#allocation2 + $0x2d8] sm:$0xff] }
  0x81   :  { %15183 = vmatmul.mubr.bf16.gmra.mrb[20].mxu0 %v2565_v23  ;;  %14947 = vmatmul.mubr.bf16.gmra.mrb[24].mxu1 %v17377_v58  ;;  %v2394_v23 = vld [vmem:[#allocation2 + $0x1f8] sm:$0x80] }
  0x82   :  { %15186 = vmatprep.mubr.bf16.mxu0 %v2577_v31  ;;  %14950 = vmatprep.mubr.bf16.mxu1 %v17437_v38  ;;  %v2625_v31 = vsel %vm335_vm1, %v2617_v16, %v17525_v17  ;;  %v2639_v33 = vshrl.u32 %v2394_v23, 16  ;;  %v17567_v16 = vld [vmem:[#allocation2 + $0x248] sm:$0xff]  ;;  %v16611_v23 = vld [vmem:[#allocation3 + $0x158] sm:$0xff]  }
  0x83   :  { %14998 = vmatprep.subr.bf16.mxu1 %v16609_v7 }
  0x84   :  { %14999 = vmatpush3.bf16.msra.mxu1 %v16609_v7  ;;  %v2641_v55 = vrot.slane %v2639_v33, 7  ;;  %v344_v33 = vshll.u32 %v17536_v42, 16 }
  0x85   :  { %15000 = vmatprep.subr.bf16.mxu1 %v16610_v22 }
  0x86   :  { %v2649_v3 = vsel %vm335_vm1, %v2641_v55, %v17542_v56  ;;  %v273_v55 = vld [vmem:[#allocation2 + $0x18] sm:$0x80] }
  0x87   :  { %v349_v62 = vshrl.u32 %v273_v55, 16 }
  0x88   :  { %15001 = vmatpush3.bf16.msra.mxu1 %v16610_v22  ;;  %v17574_v22 = vld [vmem:[#allocation2 + $0x260] sm:$0xff] }
  0x89   :  { %15187 = vmatmul.mubr.bf16.gmra.mrb[24].mxu0 %v2589_v60  ;;  %14951 = vmatmul.mubr.bf16.gmra.mrb[28].mxu1 %v17447_v48  ;;  %v2651_v60 = vshrl.u32 %v2396_v53, 16 }
  0x8a   :  { %15190 = vmatprep.mubr.bf16.mxu0 %v2601_v0  ;;  %14954 = vmatprep.mubr.bf16.mxu1 %v17536_v42  ;;  %v203_v0 = vld [vmem:[%s22857_s0 + $0x1f0] sm:$0xff] }
  0x8b   :  { %v236_v5 = vpack.c.bf16 %v204_v1, %v203_v0  ;;  %v2653_v7 = vrot.slane %v2651_v60, 7  ;;  %15066 = vmatprep.subr.bf16.mxu1 %v17586_v26  ;;  %v275_v60 = vld [vmem:[#allocation2 + $0x30] sm:$0x80] }
  0x8c   :  { %v361_v1 = vshrl.u32 %v275_v60, 16  ;;  %v8918_v60 = vld [vmem:[#allocation2 + $0x20] sm:$0x10] }
  0x8d   :  { %270 = vst.msk [vmem:[#allocation2 + $0x338] sm:$0xff] %vm238_vm0, %v236_v5  ;;  %v2661_v14 = vsel %vm335_vm1, %v2653_v7, %v17558_v10  ;;  %v16942_v5 = vld [vmem:[#allocation2 + $0x50] sm:$0xff]  ;;  %vm9369_vm0 = vcmask 1046534  }
  0x8e   :  { %v377_v7 = vshrl.u32 %v16942_v5, 16 }
  0x91   :  { %15191 = vmatmul.mubr.bf16.gmra.mrb[28].mxu0 %v2613_v24  ;;  %14955 = vmatmul.mubr.bf16.gmra.mrb[32].mxu1 %v17501_v41  ;;  %v16613_v24 = vld [vmem:[#allocation3 + $0x168] sm:$0xff]  }
  0x92   :  { %15194 = vmatprep.mubr.bf16.mxu0 %v2625_v31  ;;  %14958 = vmatprep.mubr.bf16.mxu1 %v17518_v6  ;;  %v17602_v31 = vld [vmem:[#allocation3 + $0x180] sm:$0xff]  }
  0x99   :  { %15195 = vmatmul.mubr.bf16.gmra.mrb[32].mxu0 %v2637_v52  ;;  %14959 = vmatmul.mubr.bf16.gmra.mrb[36].mxu1 %v17521_v9  ;;  %v17616_v52 = vld [vmem:[#allocation2 + $0x320] sm:$0xff] }
  0x9a   :  { %15198 = vmatprep.mubr.bf16.mxu0 %v2649_v3  ;;  %14962 = vmatprep.mubr.bf16.mxu1 %v17533_v39  ;;  %v277_v3 = vld [vmem:[#allocation2 + $0x48] sm:$0x80] }
  0xa1   :  { %15199 = vmatmul.mubr.bf16.gmra.mrb[36].mxu0 %v2661_v14  ;;  %14963 = vmatmul.mubr.bf16.gmra.mrb[40].mxu1 %v17565_v15  ;;  %v16943_v14 = vld [vmem:[#allocation2 + $0x68] sm:$0xff] }
  0xa2   :  { %15242 = vmatprep.mubr.bf16.mxu0 %v17213_v43  ;;  %14966 = vmatprep.mubr.bf16.mxu1 %v17567_v16  ;;  %v17576_v43 = vld [vmem:[#allocation2 + $0x278] sm:$0xff] }
  0xa9   :  { %15243 = vmatmul.mubr.bf16.vlgmr.msra.gmra.mrb[0].mxu0 %v17224_v51  ;;  %14967 = vmatmul.mubr.bf16.gmra.mrb[44].mxu1 %v17574_v22  ;;  %v16612_v51 = vld [vmem:[#allocation3 + $0x160] sm:$0xff]  }
  0xaa   :  { %15307 = vmatpush3.bf16.msra.mxu0 %v17425_v28  ;;  %15246 = vmatprep.mubr.bf16.mxu0 %v17229_v59  ;;  %v17582_v59 = vld [vmem:[#allocation2 + $0x290] sm:$0xff]  ;;  %v17584_v28 = vld [vmem:[#allocation2 + $0x2a8] sm:$0xff] }
  0xab   :  { %15308 = vmatprep.subr.bf16.mxu0 %v16602_v19  ;;  %14970 = vmatprep.mubr.bf16.mxu1 %v17576_v43 }
  0xae   :  { %15309 = vmatpush3.bf16.msra.mxu0 %v16602_v19  ;;  %v389_v19 = vshrl.u32 %v16943_v14, 16 }
  0xaf   :  { %15310 = vmatprep.subr.bf16.mxu0 %v16607_v21 }
  0xb1   :  { %15247 = vmatmul.mubr.bf16.gmra.mrb[4].mxu0 %v17238_v2  ;;  %14971 = vmatmul.mubr.bf16.gmra.mrb[48].mxu1 %v17582_v59  ;;  %v16614_v2 = vld [vmem:[#allocation3 + $0x170] sm:$0xff]  }
  0xb2   :  { %15250 = vmatprep.mubr.bf16.mxu0 %v17253_v13  ;;  %15311 = vmatpush3.bf16.msra.mxu0 %v16607_v21  ;;  %v17593_v13 = vld [vmem:[#allocation2 + $0x2c0] sm:$0xff]  ;;  %v363_v21 = vrot.slane %v361_v1, 7 }
  0xb3   :  { %15312 = vmatprep.subr.bf16.mxu0 %v16611_v23  ;;  %14974 = vmatprep.mubr.bf16.mxu1 %v17584_v28  ;;  %v17635_v1 = vld [vmem:[#allocation2 + $0x20] sm:$0xff] }
  0xb6   :  { %15313 = vmatpush3.bf16.msra.mxu0 %v16611_v23 }
  0xb7   :  { %15314 = vmatprep.subr.bf16.mxu0 %v16612_v51 }
  0xb9   :  { %15251 = vmatmul.mubr.bf16.gmra.mrb[8].mxu0 %v17259_v20  ;;  %14975 = vmatmul.mubr.bf16.gmra.mrb[52].mxu1 %v17593_v13  ;;  %v341_v20 = vshrl.u32 %v17536_v42, 16 }
  0xba   :  { %15254 = vmatprep.mubr.bf16.mxu0 %v17266_v27  ;;  %15315 = vmatpush3.bf16.msra.mxu0 %v16612_v51  ;;  %v271_v27 = vld [vmem:[#allocation2] sm:$0x80]  ;;  %v8915_v51 = vld [vmem:[#allocation2 + $0x8] sm:$0x10] }
  0xbb   :  { %15316 = vmatprep.subr.bf16.mxu0 %v16613_v24  ;;  %14978 = vmatprep.mubr.bf16.mxu1 %v17595_v29  ;;  %v343_v35 = vrot.slane %v341_v20, 7  ;;  %v337_v53 = vshrl.u32 %v271_v27, 16  ;;  %v373_v20 = vshrl.u32 %v277_v3, 16  ;;  %v380_v27 = vshll.u32 %v16942_v5, 16  ;;  %v281_v5 = vld [vmem:[#allocation2 + $0x78] sm:$0x80] }
  0xbd   :  { %v339_v42 = vrot.slane %v337_v53, 7  ;;  %v17614_v54 = vor.u32 %v344_v33, %v343_v35  ;;  %v391_v53 = vrot.slane %v389_v19, 7 }
  0xbe   :  { %15317 = vmatpush3.bf16.msra.mxu0 %v16613_v24  ;;  %v279_v24 = vld [vmem:[#allocation2 + $0x60] sm:$0x80] }
  0xbf   :  { %15318 = vmatprep.subr.bf16.mxu0 %v16614_v2  ;;  %v347_v0 = vsel %vm335_vm1, %v339_v42, %v17614_v54  ;;  %v385_v35 = vshrl.u32 %v279_v24, 16  ;;  %v16944_v42 = vld [vmem:[#allocation2 + $0x80] sm:$0xff] }
  0xc0   :  { %v401_v55 = vshrl.u32 %v16944_v42, 16  ;;  %v404_v19 = vshll.u32 %v16944_v42, 16 }
  0xc1   :  { %15255 = vmatmul.mubr.bf16.gmra.mrb[12].mxu0 %v17300_v57  ;;  %14979 = vmatmul.mubr.bf16.gmra.mrb[56].mxu1 %v17605_v37  ;;  %v16941_v57 = vld [vmem:[#allocation2 + $0x38] sm:$0xff] }
  0xc2   :  { %15258 = vmatprep.mubr.bf16.mxu0 %v17310_v61  ;;  %15319 = vmatpush3.bf16.msra.mxu0 %v16614_v2  ;;  %v365_v61 = vshrl.u32 %v16941_v57, 16 }
  0xc3   :  { %15320 = vmatprep.subr.bf16.mxu0 %v16615_v30  ;;  %14982 = vmatprep.mubr.bf16.mxu1 %v17607_v45 }
  0xc4   :  { %v367_v63 = vrot.slane %v365_v61, 7  ;;  %v16619_v61 = vld [vmem:[#allocation3 + $0x88] sm:$0xff]  }
  0xc6   :  { %15321 = vmatpush3.bf16.msra.mxu0 %v16615_v30 }
  0xc7   :  { %15386 = vmatprep.subr.bf16.mxu0 %v17602_v31 }
  0xc9   :  { %15259 = vmatmul.mubr.bf16.gmra.mrb[16].mxu0 %v17348_v32  ;;  %v368_v32 = vshll.u32 %v16941_v57, 16  ;;  %14983 = vmatmul.mubr.bf16.gmra.mrb[60].mxu1 %v17616_v52  ;;  %v392_v57 = vshll.u32 %v16943_v14, 16  ;;  %v403_v14 = vrot.slane %v401_v55, 7 }
  0xca   :  { %15262 = vmatprep.mubr.bf16.mxu0 %v17352_v34  ;;  %15002 = vmatprep.mubr.bf16.mxu1 %v347_v0  ;;  %v351_v34 = vrot.slane %v349_v62, 7  ;;  %v375_v62 = vrot.slane %v373_v20, 7 }
  0xcb   :  { %v370_v23 = vor.u32 %v368_v32, %v367_v63  ;;  %v8919_v32 = vsel %vm17625_vm4, 0, %v8918_v60  ;;  %v394_v3 = vor.u32 %v392_v57, %v391_v53  ;;  %v406_v20 = vor.u32 %v404_v19, %v403_v14  ;;  %v16622_v53 = vld [vmem:[#allocation3 + $0xa0] sm:$0xff]  }
  0xcc   :  { %v359_v30 = vsel %vm335_vm1, %v351_v34, %v17243_v4  ;;  %v16945_v4 = vld [vmem:[#allocation2 + $0x98] sm:$0xff]  ;;  %v387_v34 = vrot.slane %v385_v35, 7  ;;  %8920 = vst [vmem:[#allocation2 + $0x20] sm:$0x10] %v8919_v32  ;;  %v287_v35 = vld [vmem:[#allocation2 + $0xc0] sm:$0x80] }
  0xcd   :  { %v371_v33 = vsel %vm335_vm1, %v363_v21, %v370_v23  ;;  %v413_v0 = vshrl.u32 %v16945_v4, 16  ;;  %v416_v21 = vshll.u32 %v16945_v4, 16  ;;  %v433_v55 = vshrl.u32 %v287_v35, 16  ;;  %v16625_v4 = vld [vmem:[#allocation3 + $0xb0] sm:$0xff]  }
  0xcf   :  { %v435_v60 = vrot.slane %v433_v55, 7  ;;  %v305_v55 = vld [vmem:[#allocation2 + $0x1c8] sm:$0x80] }
  0xd1   :  { %15263 = vmatmul.mubr.bf16.gmra.mrb[20].mxu0 %v17372_v50  ;;  %v8916_v50 = vsel %vm17625_vm4, 0, %v8915_v51  ;;  %15003 = vmatmul.mubr.bf16.vlgmr.msra.gmra.mrb[0].mxu1 %v359_v30  ;;  %v397_v51 = vshrl.u32 %v281_v5, 16  ;;  %v395_v30 = vsel %vm335_vm1, %v387_v34, %v394_v3  ;;  %v443_v3 = vsel %vm335_vm1, %v435_v60, %v17364_v40 }
  0xd2   :  { %15266 = vmatprep.mubr.bf16.mxu0 %v17377_v58  ;;  %v379_v58 = vrot.slane %v377_v7, 7  ;;  %8917 = vst [vmem:[#allocation2 + $0x8] sm:$0x10] %v8916_v50  ;;  %15006 = vmatprep.mubr.bf16.mxu1 %v371_v33  ;;  %v283_v7 = vld [vmem:[#allocation2 + $0x90] sm:$0x80]  ;;  %v415_v50 = vrot.slane %v413_v0, 7 }
  0xd3   :  { %15067 = vmatpush3.bf16.msra.mxu1 %v17586_v26  ;;  %v409_v24 = vshrl.u32 %v283_v7, 16  ;;  %v399_v26 = vrot.slane %v397_v51, 7  ;;  %v285_v33 = vld [vmem:[#allocation2 + $0xa8] sm:$0x80]  ;;  %v297_v51 = vld [vmem:[#allocation2 + $0x138] sm:$0x80] }
  0xd4   :  { %v382_v63 = vor.u32 %v380_v27, %v379_v58  ;;  %15068 = vmatprep.subr.bf16.mxu1 %v16619_v61  ;;  %v418_v27 = vor.u32 %v416_v21, %v415_v50  ;;  %v293_v7 = vld [vmem:[#allocation2 + $0x108] sm:$0x80]  ;;  %v17659_v21 = vld [vmem:[#allocation3 + $0xc0] sm:$0xff]   ;;  %v689_v60 = vshrl.u32 %v17605_v37, 16 }
  0xd5   :  { %v411_v58 = vrot.slane %v409_v24, 7  ;;  %v407_v57 = vsel %vm335_vm1, %v399_v26, %v406_v20  ;;  %v469_v14 = vshrl.u32 %v293_v7, 16  ;;  %v301_v20 = vld [vmem:[#allocation2 + $0x168] sm:$0x80] }
  0xd6   :  { %v383_v23 = vsel %vm335_vm1, %v375_v62, %v382_v63  ;;  %v289_v62 = vld [vmem:[#allocation2 + $0xd8] sm:$0x80]  ;;  %v291_v63 = vld [vmem:[#allocation2 + $0xf0] sm:$0x80]  ;;  %v17696_v7 = vrot.slane %v689_v60, 7 }
  0xd7   :  { %15069 = vmatpush3.bf16.msra.mxu1 %v16619_v61  ;;  %v421_v61 = vshrl.u32 %v285_v33, 16  ;;  %v419_v42 = vsel %vm335_vm1, %v411_v58, %v418_v27  ;;  %v445_v32 = vshrl.u32 %v289_v62, 16  ;;  %v457_v34 = vshrl.u32 %v291_v63, 16  ;;  %v303_v58 = vld [vmem:[#allocation2 + $0x1b0] sm:$0x80] }
  0xd8   :  { %v517_v33 = vshrl.u32 %v301_v20, 16  ;;  %v529_v35 = vshrl.u32 %v303_v58, 16  ;;  %v2682_v62 = vshll.u32 %v17567_v16, 16  ;;  %v3676_v20 = vld [vmem:[#allocation2 + $0x38] sm:$0xff]  ;;  %v315_v60 = vld [vmem:[#allocation2 + $0x240] sm:$0x80] }
  0xd9   :  { %15267 = vmatmul.mubr.bf16.gmra.mrb[24].mxu0 %v17437_v38  ;;  %v16620_v38 = vld [vmem:[#allocation3 + $0x90] sm:$0xff]   ;;  %15007 = vmatmul.mubr.bf16.gmra.mrb[4].mxu1 %v383_v23  ;;  %v459_v5 = vrot.slane %v457_v34, 7 }
  0xda   :  { %15270 = vmatprep.mubr.bf16.mxu0 %v17447_v48  ;;  %15070 = vmatprep.subr.bf16.mxu1 %v16620_v38  ;;  %v16621_v48 = vld [vmem:[#allocation3 + $0x98] sm:$0xff]  }
  0xdb   :  { %15010 = vmatprep.mubr.bf16.mxu1 %v395_v30  ;;  %15071 = vmatpush3.bf16.msra.mxu1 %v16620_v38  ;;  %v295_v38 = vld [vmem:[#allocation2 + $0x120] sm:$0x80]  ;;  %v467_v40 = vsel %vm335_vm1, %v459_v5, %v17412_v18  ;;  %v493_v18 = vshrl.u32 %v297_v51, 16  ;;  %v313_v51 = vld [vmem:[#allocation2 + $0x228] sm:$0x80] }
  0xdc   :  { %15072 = vmatprep.subr.bf16.mxu1 %v16621_v48  ;;  %v481_v19 = vshrl.u32 %v295_v38, 16  ;;  %v701_v38 = vshrl.u32 %v17607_v45, 16 }
  0xde   :  { %v483_v23 = vrot.slane %v481_v19, 7  ;;  %v3741_v19 = vshll.u32 %v17635_v1, 16 }
  0xdf   :  { %15073 = vmatpush3.bf16.msra.mxu1 %v16621_v48  ;;  %v495_v48 = vrot.slane %v493_v18, 7  ;;  %v716_v18 = vshll.u32 %v17616_v52, 16 }
  0xe0   :  { %15074 = vmatprep.subr.bf16.mxu1 %v16622_v53  ;;  %v491_v30 = vsel %vm335_vm1, %v483_v23, %v17472_v8  ;;  %v653_v8 = vshrl.u32 %v17584_v28, 16  ;;  %v3675_v23 = vld [vmem:[#allocation2 + $0x28] sm:$0x1] }
  0xe1   :  { %15271 = vmatmul.mubr.bf16.gmra.mrb[28].mxu0 %v17498_v36  ;;  %v16624_v36 = vld [vmem:[#allocation3 + $0xa8] sm:$0xff]   ;;  %15011 = vmatmul.mubr.bf16.gmra.mrb[8].mxu1 %v407_v57  ;;  %v503_v27 = vsel %vm335_vm1, %v495_v48, %v17475_v11  ;;  %v677_v57 = vshrl.u32 %v17595_v29, 16  ;;  %v531_v11 = vrot.slane %v529_v35, 7  ;;  %v3739_v48 = vshrl.u32 %v17635_v1, 16  ;;  %v3678_v35 = vld [vmem:[#allocation2 + $0x50] sm:$0xff] }
  0xe2   :  { %15274 = vmatprep.mubr.bf16.mxu0 %v17501_v41  ;;  %15014 = vmatprep.mubr.bf16.mxu1 %v419_v42  ;;  %v423_v41 = vrot.slane %v421_v61, 7  ;;  %v519_v61 = vrot.slane %v517_v33, 7  ;;  %v2679_v42 = vshrl.u32 %v17567_v16, 16  ;;  %v17684_v63 = vrot.slane %v653_v8, 7 }
  0xe3   :  { %15075 = vmatpush3.bf16.msra.mxu1 %v16622_v53  ;;  %v665_v53 = vshrl.u32 %v17593_v13, 16  ;;  %v17690_v34 = vrot.slane %v677_v57, 7  ;;  %v539_v5 = vsel %vm335_vm1, %v531_v11, %v17614_v54  ;;  %v3746_v33 = vshll.u32 %v3675_v23, 16  ;;  %v2421_v23 = vld [vmem:[#allocation2 + $0x338] sm:$0xff] }
  0xe4   :  { %15076 = vmatprep.subr.bf16.mxu1 %v16624_v36  ;;  %v431_v0 = vsel %vm335_vm1, %v423_v41, %v17324_v12  ;;  %v668_v41 = vshll.u32 %v17593_v13, 16  ;;  %v596_v11 = vshll.u32 %v17565_v15, 16  ;;  %v3765_v1 = vshll.u32 %v3678_v35, 16 }
  0xe7   :  { %15077 = vmatpush3.bf16.msra.mxu1 %v16624_v36  ;;  %v307_v36 = vld [vmem:[#allocation2 + $0x1e0] sm:$0x80] }
  0xe8   :  { %15078 = vmatprep.subr.bf16.mxu1 %v16625_v4 }
  0xe9   :  { %15275 = vmatmul.mubr.bf16.gmra.mrb[32].mxu0 %v17518_v6  ;;  %v16626_v6 = vld [vmem:[#allocation3 + $0xb8] sm:$0xff]   ;;  %15015 = vmatmul.mubr.bf16.gmra.mrb[12].mxu1 %v431_v0  ;;  %v680_v0 = vshll.u32 %v17595_v29, 16 }
  0xea   :  { %15278 = vmatprep.mubr.bf16.mxu0 %v17521_v9  ;;  %15018 = vmatprep.mubr.bf16.mxu1 %v443_v3  ;;  %v447_v9 = vrot.slane %v445_v32, 7  ;;  %v692_v32 = vshll.u32 %v17605_v37, 16  ;;  %v527_v3 = vsel %vm335_vm1, %v519_v61, %v17509_v49  ;;  %v3753_v61 = vshll.u32 %v3676_v20, 16 }
  0xeb   :  { %15079 = vmatpush3.bf16.msra.mxu1 %v16625_v4  ;;  %v17686_v4 = vrot.slane %v665_v53, 7  ;;  %v3677_v53 = vld [vmem:[#allocation2 + $0x40] sm:$0x1] }
  0xec   :  { %15080 = vmatprep.subr.bf16.mxu1 %v16626_v6  ;;  %v455_v12 = vsel %vm335_vm1, %v447_v9, %v17367_v46  ;;  %v299_v46 = vld [vmem:[#allocation2 + $0x150] sm:$0x80]  ;;  %v553_v9 = vshrl.u32 %v307_v36, 16 }
  0xed   :  { %v505_v50 = vshrl.u32 %v299_v46, 16  ;;  %v704_v46 = vshll.u32 %v17607_v45, 16 }
  0xee   :  { %v555_v49 = vrot.slane %v553_v9, 7  ;;  %v3748_v9 = vrot.slane %v3746_v33, 1  ;;  %v3681_v33 = vld [vmem:[#allocation2 + $0x70] sm:$0x1] }
  0xef   :  { %15081 = vmatpush3.bf16.msra.mxu1 %v16626_v6  ;;  %v507_v26 = vrot.slane %v505_v50, 7  ;;  %v541_v6 = vshrl.u32 %v305_v55, 16  ;;  %v8948_v55 = vld [vmem:[#allocation2 + $0x1d0] sm:$0x10] }
  0xf0   :  { %15914 = vmatprep.subr.bf16.mxu1 %v17659_v21  ;;  %v563_v8 = vsel %vm335_vm1, %v555_v49, %v17539_v47  ;;  %v3763_v49 = vshrl.u32 %v3678_v35, 16 }
  0xf1   :  { %15279 = vmatmul.mubr.bf16.gmra.mrb[36].mxu0 %v17533_v39  ;;  %15019 = vmatmul.mubr.bf16.gmra.mrb[16].mxu1 %v455_v12  ;;  %v471_v39 = vrot.slane %v469_v14, 7  ;;  %v309_v12 = vld [vmem:[#allocation2 + $0x1f8] sm:$0x80]  ;;  %v543_v14 = vrot.slane %v541_v6, 7  ;;  %v8949_v6 = vsel %vm17625_vm4, 0, %v8948_v55  ;;  %v620_v55 = vshll.u32 %v17574_v22, 16 }
  0xf2   :  { %15282 = vmatprep.mubr.bf16.mxu0 %v17565_v15  ;;  %15022 = vmatprep.mubr.bf16.mxu1 %v467_v40  ;;  %v311_v40 = vld [vmem:[#allocation2 + $0x210] sm:$0x80]  ;;  %v565_v50 = vshrl.u32 %v309_v12, 16  ;;  %v3679_v12 = vld [vmem:[#allocation2 + $0x58] sm:$0x1] }
  0xf3   :  { %v479_v24 = vsel %vm335_vm1, %v471_v39, %v17421_v25  ;;  %v515_v25 = vsel %vm335_vm1, %v507_v26, %v17506_v44  ;;  %v656_v44 = vshll.u32 %v17584_v28, 16  ;;  %v8945_v39 = vld [vmem:[#allocation2 + $0x1b8] sm:$0x10]  ;;  %v593_v26 = vshrl.u32 %v17565_v15, 16 }
  0xf4   :  { %v8946_v54 = vsel %vm17625_vm4, 0, %v8945_v39  ;;  %v551_v58 = vsel %vm335_vm1, %v543_v14, %v17525_v17  ;;  %v567_v57 = vrot.slane %v565_v50, 7  ;;  %v3751_v15 = vshrl.u32 %v3676_v20, 16  ;;  %v17722_v14 = vld [vmem:[#allocation2 + $0x68] sm:$0xff]  ;;  %v317_v50 = vld [vmem:[#allocation2 + $0x258] sm:$0x80] }
  0xf5   :  { %8947 = vst [vmem:[#allocation2 + $0x1b8] sm:$0x10] %v8946_v54  ;;  %v595_v17 = vrot.slane %v593_v26, 7  ;;  %v607_v39 = vrot.slane %v2679_v42, 7  ;;  %v3767_v54 = vrot.slane %v3765_v1, 1  ;;  %v617_v26 = vshrl.u32 %v17574_v22, 16 }
  0xf6   :  { %v3777_v20 = vshll.u32 %v17722_v14, 16  ;;  %v613_v1 = vshrl.u32 %v317_v50, 16 }
  0xf7   :  { %v598_v35 = vor.u32 %v596_v11, %v595_v17  ;;  %v619_v17 = vrot.slane %v617_v26, 7 }
  0xf9   :  { %15283 = vmatmul.mubr.bf16.gmra.mrb[40].mxu0 %v17567_v16  ;;  %15023 = vmatmul.mubr.bf16.gmra.mrb[20].mxu1 %v479_v24  ;;  %v713_v24 = vshrl.u32 %v17616_v52, 16  ;;  %v3779_v16 = vrot.slane %v3777_v20, 1 }
  0xfa   :  { %15286 = vmatprep.mubr.bf16.mxu0 %v17574_v22  ;;  %15026 = vmatprep.mubr.bf16.mxu1 %v491_v30  ;;  %v577_v30 = vshrl.u32 %v311_v40, 16  ;;  %v3755_v40 = vrot.slane %v3753_v61, 1  ;;  %v641_v22 = vshrl.u32 %v17582_v59, 16 }
  0xfc   :  { %v579_v36 = vrot.slane %v577_v30, 7  ;;  %v575_v30 = vsel %vm335_vm1, %v567_v57, %v17542_v56  ;;  %v17738_v56 = vor.u32 %v2682_v62, %v607_v39  ;;  %v629_v57 = vshrl.u32 %v17576_v43, 16  ;;  %v3684_v39 = vld [vmem:[#allocation2 + $0x98] sm:$0xff] }
  0xfd   :  { %v3782_v62 = vshll.u32 %v3681_v33, 16  ;;  %v3801_v26 = vshll.u32 %v3684_v39, 16 }
  0xff   :  { %v3784_v20 = vrot.slane %v3782_v62, 1 }
 0x101   :  { %15287 = vmatmul.mubr.bf16.gmra.mrb[44].mxu0 %v17576_v43  ;;  %15027 = vmatmul.mubr.bf16.gmra.mrb[24].mxu1 %v503_v27  ;;  %v3743_v27 = vrot.slane %v3741_v19, 1  ;;  %v3758_v19 = vshll.u32 %v3677_v53, 16 }
 0x102   :  { %15290 = vmatprep.mubr.bf16.mxu0 %v17582_v59  ;;  %15030 = vmatprep.mubr.bf16.mxu1 %v515_v25  ;;  %v589_v25 = vshrl.u32 %v313_v51, 16  ;;  %v601_v51 = vshrl.u32 %v315_v60, 16  ;;  %v3775_v60 = vshrl.u32 %v17722_v14, 16 }
 0x103   :  { %v17720_v47 = vor.u32 %v3743_v27, %v3739_v48  ;;  %v3770_v48 = vshll.u32 %v3679_v12, 16  ;;  %v587_v27 = vsel %vm335_vm1, %v579_v36, %v17558_v10  ;;  %v3760_v53 = vrot.slane %v3758_v19, 1  ;;  %v3683_v36 = vld [vmem:[#allocation2 + $0x88] sm:$0x1] }
 0x104   :  { %v603_v61 = vrot.slane %v601_v51, 7  ;;  %v17741_v10 = vor.u32 %v3767_v54, %v3763_v49  ;;  %v631_v12 = vrot.slane %v629_v57, 7  ;;  %v3794_v19 = vshll.u32 %v3683_v36, 16  ;;  %v17748_v51 = vld [vmem:[#allocation2 + $0xb0] sm:$0xff] }
 0x105   :  { %v3749_v42 = vsel %vm1523_vm5, %v17720_v47, %v3748_v9  ;;  %v3772_v11 = vrot.slane %v3770_v48, 1  ;;  %v615_v48 = vrot.slane %v613_v1, 7  ;;  %v17758_v33 = vor.u32 %v3779_v16, %v3775_v60  ;;  %v17764_v60 = vld [vmem:[#allocation2 + $0xc8] sm:$0xff] }
 0x106   :  { %v611_v54 = vsel %vm335_vm1, %v603_v61, %v17738_v56  ;;  %v3796_v61 = vrot.slane %v3794_v19, 1  ;;  %v643_v1 = vrot.slane %v641_v22, 7  ;;  %v644_v36 = vshll.u32 %v17582_v59, 16  ;;  %v16627_v22 = vld [vmem:[#allocation3 + $0x198] sm:$0xff]  }
 0x109   :  { %15291 = vmatmul.mubr.bf16.gmra.mrb[48].mxu0 %v17584_v28  ;;  %15031 = vmatmul.mubr.bf16.gmra.mrb[28].mxu1 %v527_v3  ;;  %v17715_v3 = vld [vmem:[#allocation2 + $0x1d0] sm:$0xff]  ;;  %v329_v28 = vld [vmem:[#allocation2 + $0x2e8] sm:$0x80] }
 0x10a   :  { %15294 = vmatprep.mubr.bf16.mxu0 %v17593_v13  ;;  %15034 = vmatprep.mubr.bf16.mxu1 %v539_v5  ;;  %v591_v5 = vrot.slane %v589_v25, 7  ;;  %8950 = vst [vmem:[#allocation2 + $0x1d0] sm:$0x10] %v8949_v6  ;;  %v319_v25 = vld [vmem:[#allocation2 + $0x270] sm:$0x80] }
 0x10b   :  { %v625_v9 = vshrl.u32 %v319_v25, 16 }
 0x10c   :  { %v599_v49 = vsel %vm335_vm1, %v591_v5, %v598_v35  ;;  %v622_v5 = vor.u32 %v620_v55, %v619_v17  ;;  %v3687_v55 = vld [vmem:[#allocation2 + $0xb8] sm:$0x1]  ;;  %v3799_v17 = vshrl.u32 %v3684_v39, 16 }
 0x10d   :  { %v627_v25 = vrot.slane %v625_v9, 7  ;;  %v3818_v19 = vshll.u32 %v3687_v55, 16 }
 0x10e   :  { %v623_v16 = vsel %vm335_vm1, %v615_v48, %v622_v5  ;;  %v327_v48 = vld [vmem:[#allocation2 + $0x2d0] sm:$0x80] }
 0x111   :  { %15295 = vmatmul.mubr.bf16.gmra.mrb[52].mxu0 %v17595_v29  ;;  %15035 = vmatmul.mubr.bf16.gmra.mrb[32].mxu1 %v551_v58  ;;  %v3682_v58 = vld [vmem:[#allocation2 + $0x80] sm:$0xff] }
 0x112   :  { %15298 = vmatprep.mubr.bf16.mxu0 %v17605_v37  ;;  %15038 = vmatprep.mubr.bf16.mxu1 %v563_v8  ;;  %v17734_v8 = vor.u32 %v3755_v40, %v3751_v15  ;;  %v3789_v6 = vshll.u32 %v3682_v58, 16  ;;  %v632_v15 = vshll.u32 %v17576_v43, 16  ;;  %v3787_v40 = vshrl.u32 %v3682_v58, 16  ;;  %v3685_v58 = vld [vmem:[#allocation2 + $0xa0] sm:$0x1] }
 0x113   :  { %v3773_v43 = vsel %vm1523_vm5, %v17741_v10, %v3772_v11  ;;  %v16623_v11 = vld [vmem:[#allocation3 + $0x190] sm:$0xff]   ;;  %v3806_v62 = vshll.u32 %v3685_v58, 16  ;;  %v3823_v58 = vshrl.u32 %v17764_v60, 16 }
 0x114   :  { %v3761_v14 = vsel %vm1523_vm5, %v17734_v8, %v3760_v53  ;;  %v3791_v50 = vrot.slane %v3789_v6, 1  ;;  %v323_v53 = vld [vmem:[#allocation2 + $0x2a0] sm:$0x80]  ;;  %v3803_v6 = vrot.slane %v3801_v26, 1  ;;  %v3691_v26 = vld [vmem:[#allocation2 + $0xe8] sm:$0x1] }
 0x115   :  { %v649_v9 = vshrl.u32 %v323_v53, 16  ;;  %v673_v53 = vshrl.u32 %v327_v48, 16 }
 0x116   :  { %v17760_v57 = vor.u32 %v3791_v50, %v3787_v40  ;;  %v3785_v40 = vsel %vm1523_vm5, %v17758_v33, %v3784_v20  ;;  %v646_v50 = vor.u32 %v644_v36, %v643_v1  ;;  %v3842_v1 = vshll.u32 %v3691_v26, 16  ;;  %v3692_v36 = vld [vmem:[#allocation2 + $0xf8] sm:$0xff] }
 0x117   :  { %v651_v5 = vrot.slane %v649_v9, 7  ;;  %v703_v9 = vrot.slane %v701_v38, 7  ;;  %v17807_v38 = vrot.slane %v713_v24, 7 }
 0x118   :  { %v3797_v39 = vsel %vm1523_vm5, %v17760_v57, %v3796_v61 }
 0x119   :  { %15299 = vmatmul.mubr.bf16.gmra.mrb[56].mxu0 %v17607_v45  ;;  %15039 = vmatmul.mubr.bf16.gmra.mrb[36].mxu1 %v575_v30  ;;  %v16618_v30 = vld [vmem:[#allocation3 + $0x188] sm:$0xff]   ;;  %v17843_v45 = vld [vmem:[#allocation3 + $0x1c0] sm:$0xff]  }
 0x11a   :  { %15302 = vmatprep.mubr.bf16.mxu0 %v17616_v52  ;;  %15042 = vmatprep.mubr.bf16.mxu1 %v587_v27  ;;  %v3813_v27 = vshll.u32 %v17748_v51, 16 }
 0x121   :  { %15303 = vmatmul.mubr.bf16.gmra.mrb[60].mxu0 %v2421_v23  ;;  %v321_v23 = vld [vmem:[#allocation2 + $0x288] sm:$0x80]  ;;  %15043 = vmatmul.mubr.bf16.gmra.mrb[40].mxu1 %v599_v49  ;;  %v3690_v49 = vld [vmem:[#allocation2 + $0xe0] sm:$0xff] }
 0x122   :  { %15322 = vmatprep.mubr.bf16.mxu0 %v3749_v42  ;;  %15046 = vmatprep.mubr.bf16.mxu1 %v611_v54  ;;  %v634_v42 = vor.u32 %v632_v15, %v631_v12  ;;  %v637_v35 = vshrl.u32 %v321_v23, 16  ;;  %v3815_v15 = vrot.slane %v3813_v27, 1  ;;  %v325_v12 = vld [vmem:[#allocation2 + $0x2b8] sm:$0x80]  ;;  %v3825_v23 = vshll.u32 %v17764_v60, 16  ;;  %v16629_v60 = vld [vmem:[#allocation3 + $0x1a8] sm:$0xff]  }
 0x123   :  { %v661_v20 = vshrl.u32 %v325_v12, 16  ;;  %v3837_v27 = vshll.u32 %v3690_v49, 16  ;;  %v3835_v61 = vshrl.u32 %v3690_v49, 16  ;;  %v17797_v12 = vor.u32 %v668_v41, %v17686_v4  ;;  %v331_v49 = vld [vmem:[#allocation2 + $0x300] sm:$0x80] }
 0x124   :  { %v635_v59 = vsel %vm335_vm1, %v627_v25, %v634_v42  ;;  %v639_v54 = vrot.slane %v637_v35, 7  ;;  %v3827_v25 = vrot.slane %v3825_v23, 1  ;;  %v16628_v35 = vld [vmem:[#allocation3 + $0x1a0] sm:$0xff]   ;;  %v675_v4 = vrot.slane %v673_v53, 7 }
 0x125   :  { %v3847_v23 = vshrl.u32 %v3692_v36, 16 }
 0x126   :  { %v647_v55 = vsel %vm335_vm1, %v639_v54, %v646_v50  ;;  %v17809_v13 = vor.u32 %v3827_v25, %v3823_v58  ;;  %v333_v25 = vld [vmem:[#allocation2 + $0x318] sm:$0x80] }
 0x129   :  { %15323 = vmatmul.mubr.bf16.vlgmr.msra.gmra.mrb[0].mxu0 %v3761_v14  ;;  %15047 = vmatmul.mubr.bf16.gmra.mrb[44].mxu1 %v623_v16  ;;  %v3689_v14 = vld [vmem:[#allocation2 + $0xd0] sm:$0x1] }
 0x12a   :  { %15387 = vmatpush3.bf16.msra.mxu0 %v17602_v31  ;;  %15326 = vmatprep.mubr.bf16.mxu0 %v3773_v43  ;;  %v3811_v31 = vshrl.u32 %v17748_v51, 16  ;;  %v17776_v51 = vor.u32 %v656_v44, %v17684_v63  ;;  %v3808_v43 = vrot.slane %v3806_v62, 1  ;;  %v3820_v63 = vrot.slane %v3818_v19, 1  ;;  %v3693_v19 = vld [vmem:[#allocation2 + $0x100] sm:$0x1] }
 0x12b   :  { %15388 = vmatprep.subr.bf16.mxu0 %v16618_v30  ;;  %15050 = vmatprep.mubr.bf16.mxu1 %v635_v59  ;;  %v3830_v42 = vshll.u32 %v3689_v14, 16  ;;  %v663_v59 = vrot.slane %v661_v20, 7  ;;  %v16630_v14 = vld [vmem:[#allocation3 + $0x1b0] sm:$0xff]   ;;  %v3854_v50 = vshll.u32 %v3693_v19, 16  ;;  %v709_v19 = vshrl.u32 %v333_v25, 16 }
 0x12c   :  { %v17781_v44 = vor.u32 %v3815_v15, %v3811_v31  ;;  %v3839_v31 = vrot.slane %v3837_v27, 1  ;;  %v3849_v15 = vshll.u32 %v3692_v36, 16 }
 0x12d   :  { %v3832_v41 = vrot.slane %v3830_v42, 1  ;;  %v671_v48 = vsel %vm335_vm1, %v663_v59, %v17797_v12  ;;  %v17827_v42 = vor.u32 %v692_v32, %v17696_v7  ;;  %v3856_v53 = vrot.slane %v3854_v50, 1  ;;  %v1460_v32 = vld [vmem:[#allocation2 + $0x10] sm:$0x1]  ;;  %v16947_v7 = vld [vmem:[#allocation2] sm:$0xff]  ;;  %v3700_v50 = vld [vmem:[#allocation2 + $0x158] sm:$0xff] }
 0x12e   :  { %15389 = vmatpush3.bf16.msra.mxu0 %v16618_v30  ;;  %v17778_v30 = vor.u32 %v3803_v6, %v3799_v17  ;;  %v685_v17 = vshrl.u32 %v329_v28, 16  ;;  %v17784_v6 = vld [vmem:[#allocation2 + $0x110] sm:$0xff]  ;;  %v3821_v16 = vsel %vm1523_vm5, %v17781_v44, %v3820_v63  ;;  %v17811_v29 = vor.u32 %v3839_v31, %v3835_v61  ;;  %v16631_v28 = vld [vmem:[#allocation3 + $0x1b8] sm:$0xff]  }
 0x12f   :  { %15390 = vmatprep.subr.bf16.mxu0 %v16623_v11  ;;  %v3851_v54 = vrot.slane %v3849_v15, 1  ;;  %v3859_v24 = vshrl.u32 %v17784_v6, 16  ;;  %v3833_v20 = vsel %vm1523_vm5, %v17809_v13, %v3832_v41  ;;  %v3697_v61 = vld [vmem:[#allocation2 + $0x130] sm:$0x1] }
 0x130   :  { %v3809_v62 = vsel %vm1523_vm5, %v17778_v30, %v3808_v43  ;;  %v697_v43 = vshrl.u32 %v331_v49, 16  ;;  %v3878_v41 = vshll.u32 %v3697_v61, 16  ;;  %v3703_v61 = vld [vmem:[#allocation2 + $0x178] sm:$0x1] }
 0x131   :  { %15327 = vmatmul.mubr.bf16.gmra.mrb[4].mxu0 %v3785_v40  ;;  %15051 = vmatmul.mubr.bf16.gmra.mrb[48].mxu1 %v647_v55  ;;  %v17802_v40 = vor.u32 %v680_v0, %v17690_v34  ;;  %v3844_v0 = vrot.slane %v3842_v1, 1  ;;  %v687_v34 = vrot.slane %v685_v17, 7  ;;  %v3698_v1 = vld [vmem:[#allocation2 + $0x140] sm:$0xff]  ;;  %v8898_v55 = vld [vmem:[#allocation2 + $0xd8] sm:$0x80]  ;;  %v17834_v17 = vor.u32 %v704_v46, %v703_v9 }
 0x132   :  { %15330 = vmatprep.mubr.bf16.mxu0 %v3797_v39  ;;  %15391 = vmatpush3.bf16.msra.mxu0 %v16623_v11  ;;  %v659_v11 = vsel %vm335_vm1, %v651_v5, %v17776_v51  ;;  %v3861_v39 = vshll.u32 %v17784_v6, 16  ;;  %v17816_v5 = vld [vmem:[#allocation2 + $0x128] sm:$0xff]  ;;  %v699_v37 = vrot.slane %v697_v43, 7  ;;  %v1527_v6 = vshll.u32 %v16947_v7, 16  ;;  %v17845_v46 = vld [vmem:[#allocation2 + $0xd8] sm:$0x80] }
 0x133   :  { %15392 = vmatprep.subr.bf16.mxu0 %v16627_v22  ;;  %15054 = vmatprep.mubr.bf16.mxu1 %v659_v11  ;;  %v683_v58 = vsel %vm335_vm1, %v675_v4, %v17802_v40  ;;  %v3845_v63 = vsel %vm1523_vm5, %v17811_v29, %v3844_v0  ;;  %v3873_v36 = vshll.u32 %v17816_v5, 16  ;;  %v8899_v9 = vsel %vm17837_vm8, 0, %v8898_v55 }
 0x134   :  { %v3863_v26 = vrot.slane %v3861_v39, 1  ;;  %v695_v15 = vsel %vm335_vm1, %v687_v34, %v17827_v42  ;;  %v3871_v49 = vshrl.u32 %v17816_v5, 16  ;;  %8900 = vst [vmem:[#allocation2 + $0xd8] sm:$0x80] %v8899_v9  ;;  %v1525_v4 = vshrl.u32 %v16947_v7, 16 }
 0x135   :  { %v3875_v39 = vrot.slane %v3873_v36, 1  ;;  %v1532_v0 = vshll.u32 %v1460_v32, 16  ;;  %v3880_v5 = vrot.slane %v3878_v41, 1  ;;  %v3895_v55 = vshrl.u32 %v3700_v50, 16 }
 0x136   :  { %15393 = vmatpush3.bf16.msra.mxu0 %v16627_v22  ;;  %v3695_v22 = vld [vmem:[#allocation2 + $0x118] sm:$0x1]  ;;  %v17841_v31 = vor.u32 %v3863_v26, %v3859_v24  ;;  %v3702_v24 = vld [vmem:[#allocation2 + $0x170] sm:$0xff]  ;;  %v711_v26 = vrot.slane %v709_v19, 7 }
 0x137   :  { %15394 = vmatprep.subr.bf16.mxu0 %v16628_v35  ;;  %v3866_v27 = vshll.u32 %v3695_v22, 16  ;;  %v1529_v22 = vrot.slane %v1527_v6, 1  ;;  %v1534_v25 = vrot.slane %v1532_v0, 1  ;;  %v3907_v6 = vshrl.u32 %v3702_v24, 16 }
 0x139   :  { %15331 = vmatmul.mubr.bf16.gmra.mrb[8].mxu0 %v3809_v62  ;;  %15055 = vmatmul.mubr.bf16.gmra.mrb[52].mxu1 %v671_v48  ;;  %v3699_v62 = vld [vmem:[#allocation2 + $0x148] sm:$0x1]  ;;  %v17862_v48 = vor.u32 %v716_v18, %v17807_v38 }
 0x13a   :  { %15334 = vmatprep.mubr.bf16.mxu0 %v3821_v16  ;;  %15395 = vmatpush3.bf16.msra.mxu0 %v16628_v35  ;;  %v17829_v35 = vor.u32 %v3851_v54, %v3847_v23  ;;  %v3885_v16 = vshll.u32 %v3698_v1, 16  ;;  %v707_v23 = vsel %vm335_vm1, %v699_v37, %v17834_v17  ;;  %v3890_v54 = vshll.u32 %v3699_v62, 16 }
 0x13b   :  { %15396 = vmatprep.subr.bf16.mxu0 %v16629_v60  ;;  %15058 = vmatprep.mubr.bf16.mxu1 %v683_v58  ;;  %v3701_v58 = vld [vmem:[#allocation2 + $0x160] sm:$0x1]  ;;  %v719_v38 = vsel %vm335_vm1, %v711_v26, %v17862_v48  ;;  %v3914_v62 = vshll.u32 %v3703_v61, 16 }
 0x13c   :  { %v3857_v59 = vsel %vm1523_vm5, %v17829_v35, %v3856_v53  ;;  %v3887_v43 = vrot.slane %v3885_v16, 1  ;;  %v1464_v53 = vld [vmem:[#allocation2 + $0x40] sm:$0x1]  ;;  %v3892_v18 = vrot.slane %v3890_v54, 1  ;;  %v3902_v37 = vshll.u32 %v3701_v58, 16 }
 0x13d   :  { %v1556_v7 = vshll.u32 %v1464_v53, 16  ;;  %v1468_v54 = vld [vmem:[#allocation2 + $0x70] sm:$0x1]  ;;  %v3931_v58 = vshrl.u32 %v17715_v3, 16 }
 0x13e   :  { %15397 = vmatpush3.bf16.msra.mxu0 %v16629_v60  ;;  %v3868_v60 = vrot.slane %v3866_v27, 1  ;;  %v3897_v27 = vshll.u32 %v3700_v50, 16  ;;  %v3904_v0 = vrot.slane %v3902_v37, 1  ;;  %v3707_v50 = vld [vmem:[#allocation2 + $0x1d8] sm:$0x1]  ;;  %v1580_v53 = vshll.u32 %v1468_v54, 16 }
 0x13f   :  { %15398 = vmatprep.subr.bf16.mxu0 %v16630_v14  ;;  %v3938_v61 = vshll.u32 %v3707_v50, 16  ;;  %v1470_v37 = vld [vmem:[#allocation2 + $0x88] sm:$0x1] }
 0x140   :  { %v3869_v34 = vsel %vm1523_vm5, %v17841_v31, %v3868_v60  ;;  %v3899_v32 = vrot.slane %v3897_v27, 1 }
 0x141   :  { %15335 = vmatmul.mubr.bf16.gmra.mrb[12].mxu0 %v3833_v20  ;;  %15059 = vmatmul.mubr.bf16.gmra.mrb[56].mxu1 %v695_v15  ;;  %v1462_v20 = vld [vmem:[#allocation2 + $0x28] sm:$0x1] }
 0x142   :  { %15338 = vmatprep.mubr.bf16.mxu0 %v3845_v63  ;;  %15399 = vmatpush3.bf16.msra.mxu0 %v16630_v14  ;;  %v3883_v14 = vshrl.u32 %v3698_v1, 16  ;;  %v17866_v63 = vor.u32 %v1529_v22, %v1525_v4  ;;  %v3909_v1 = vshll.u32 %v3702_v24, 16  ;;  %v1544_v36 = vshll.u32 %v1462_v20, 16  ;;  %v3704_v15 = vld [vmem:[#allocation2 + $0x188] sm:$0xff] }
 0x143   :  { %15400 = vmatprep.subr.bf16.mxu0 %v16631_v28  ;;  %15062 = vmatprep.mubr.bf16.mxu1 %v707_v23  ;;  %v3921_v41 = vshll.u32 %v3704_v15, 16  ;;  %v17878_v4 = vor.u32 %v3899_v32, %v3895_v55  ;;  %v1558_v23 = vrot.slane %v1556_v7, 1  ;;  %v3919_v24 = vshrl.u32 %v3704_v15, 16  ;;  %v3709_v7 = vld [vmem:[#allocation2 + $0x1f0] sm:$0x1] }
 0x144   :  { %v17868_v52 = vor.u32 %v3887_v43, %v3883_v14  ;;  %v1535_v16 = vsel %vm1523_vm5, %v17866_v63, %v1534_v25  ;;  %v3911_v9 = vrot.slane %v3909_v1, 1  ;;  %v1546_v19 = vrot.slane %v1544_v36, 1  ;;  %v3710_v36 = vld [vmem:[#allocation2 + $0x200] sm:$0xff] }
 0x145   :  { %v3916_v14 = vrot.slane %v3914_v62, 1  ;;  %v3923_v20 = vrot.slane %v3921_v41, 1  ;;  %v3905_v27 = vsel %vm1523_vm5, %v17878_v4, %v3904_v0  ;;  %v1559_v25 = vsel %vm1523_vm5, %v17734_v8, %v1558_v23  ;;  %v3712_v0 = vld [vmem:[#allocation2 + $0x218] sm:$0xff] }
 0x146   :  { %15401 = vmatpush3.bf16.msra.mxu0 %v16631_v28  ;;  %v17864_v28 = vor.u32 %v3875_v39, %v3871_v49  ;;  %v1466_v49 = vld [vmem:[#allocation2 + $0x58] sm:$0x1]  ;;  %v3705_v39 = vld [vmem:[#allocation2 + $0x190] sm:$0x1]  ;;  %v17880_v22 = vor.u32 %v3911_v9, %v3907_v6  ;;  %v1582_v32 = vrot.slane %v1580_v53, 1  ;;  %v3940_v62 = vrot.slane %v3938_v61, 1 }
 0x147   :  { %15466 = vmatprep.subr.bf16.mxu0 %v17843_v45  ;;  %v1568_v43 = vshll.u32 %v1466_v49, 16  ;;  %v3926_v26 = vshll.u32 %v3705_v39, 16  ;;  %v3924_v55 = vor.u32 %v3923_v20, %v3919_v24  ;;  %v16948_v9 = vld [vmem:[#allocation3 + $0xc8] sm:$0xff]   ;;  %v1592_v15 = vshll.u32 %v1470_v37, 16  ;;  %v16949_v24 = vld [vmem:[#allocation3 + $0xd0] sm:$0xff]  }
 0x148   :  { %v3881_v60 = vsel %vm1523_vm5, %v17864_v28, %v3880_v5  ;;  %v1547_v5 = vsel %vm1523_vm5, %v17720_v47, %v1546_v19  ;;  %v3917_v1 = vsel %vm1523_vm5, %v17880_v22, %v3916_v14  ;;  %v3711_v19 = vld [vmem:[#allocation2 + $0x208] sm:$0x1]  ;;  %v3950_v41 = vshll.u32 %v3709_v7, 16  ;;  %v1474_v20 = vld [vmem:[#allocation2 + $0xb8] sm:$0x1] }
 0x149   :  { %15339 = vmatmul.mubr.bf16.gmra.mrb[16].mxu0 %v3857_v59  ;;  %v3893_v59 = vsel %vm1523_vm5, %v17868_v52, %v3892_v18  ;;  %15063 = vmatmul.mubr.bf16.gmra.mrb[60].mxu1 %v719_v38  ;;  %v3708_v38 = vld [vmem:[#allocation2 + $0x1e8] sm:$0xff]  ;;  %v1570_v47 = vrot.slane %v1568_v43, 1  ;;  %v3955_v54 = vshrl.u32 %v3710_v36, 16  ;;  %v3962_v43 = vshll.u32 %v3711_v19, 16  ;;  %v1476_v53 = vld [vmem:[#allocation2 + $0xd0] sm:$0x1] }
 0x14a   :  { %15342 = vmatprep.mubr.bf16.mxu0 %v3869_v34  ;;  %15082 = vmatprep.mubr.bf16.mxu1 %v1535_v16  ;;  %v3933_v34 = vshll.u32 %v17715_v3, 16  ;;  %v3928_v3 = vrot.slane %v3926_v26, 1  ;;  %v3945_v6 = vshll.u32 %v3708_v38, 16  ;;  %v3957_v16 = vshll.u32 %v3710_v36, 16  ;;  %v3714_v26 = vld [vmem:[#allocation2 + $0x230] sm:$0xff]  ;;  %v16950_v36 = vld [vmem:[#allocation3 + $0xd8] sm:$0xff]  }
 0x14b   :  { %v1571_v49 = vsel %vm1523_vm5, %v17741_v10, %v1570_v47  ;;  %v3969_v10 = vshll.u32 %v3712_v0, 16  ;;  %v3715_v61 = vld [vmem:[#allocation2 + $0x238] sm:$0x1]  ;;  %v1616_v47 = vshll.u32 %v1474_v20, 16  ;;  %v1628_v7 = vshll.u32 %v1476_v53, 16 }
 0x14c   :  { %v3935_v18 = vrot.slane %v3933_v34, 1  ;;  %v3929_v39 = vsel %vm1523_vm5, %v3924_v55, %v3928_v3  ;;  %v3947_v23 = vrot.slane %v3945_v6, 1  ;;  %v3959_v34 = vrot.slane %v3957_v16, 1 }
 0x14d   :  { %v3967_v55 = vshrl.u32 %v3712_v0, 16  ;;  %v3971_v3 = vrot.slane %v3969_v10, 1  ;;  %v3979_v6 = vshrl.u32 %v3714_v26, 16  ;;  %v3717_v0 = vld [vmem:[#allocation2 + $0x250] sm:$0x1] }
 0x14e   :  { %v17893_v8 = vor.u32 %v3935_v18, %v3931_v58  ;;  %v3713_v58 = vld [vmem:[#allocation2 + $0x220] sm:$0x1]  ;;  %v3964_v18 = vrot.slane %v3962_v43, 1  ;;  %v3998_v20 = vshll.u32 %v3717_v0, 16 }
 0x14f   :  { %v3974_v37 = vshll.u32 %v3713_v58, 16 }
 0x150   :  { %v3941_v50 = vsel %vm1523_vm5, %v17893_v8, %v3940_v62  ;;  %v3986_v62 = vshll.u32 %v3715_v61, 16  ;;  %v3720_v61 = vld [vmem:[#allocation2 + $0x278] sm:$0xff] }
 0x151   :  { %15343 = vmatmul.mubr.bf16.gmra.mrb[20].mxu0 %v3881_v60  ;;  %15083 = vmatmul.mubr.bf16.vlgmr.msra.gmra.mrb[0].mxu1 %v1547_v5  ;;  %v1472_v60 = vld [vmem:[#allocation2 + $0xa0] sm:$0x1]  ;;  %v1594_v5 = vrot.slane %v1592_v15, 1  ;;  %v1478_v15 = vld [vmem:[#allocation2 + $0xe8] sm:$0x1] }
 0x152   :  { %15346 = vmatprep.mubr.bf16.mxu0 %v3893_v59  ;;  %15086 = vmatprep.mubr.bf16.mxu1 %v1559_v25  ;;  %v3943_v59 = vshrl.u32 %v3708_v38, 16  ;;  %v1604_v14 = vshll.u32 %v1472_v60, 16  ;;  %v3981_v38 = vshll.u32 %v3714_v26, 16  ;;  %v3716_v60 = vld [vmem:[#allocation2 + $0x248] sm:$0xff]  ;;  %v3988_v43 = vrot.slane %v3986_v62, 1 }
 0x153   :  { %15922 = vmatpush3.bf16.msra.mxu1 %v17659_v21  ;;  %v1583_v21 = vsel %vm1523_vm5, %v17758_v33, %v1582_v32  ;;  %v1595_v32 = vsel %vm1523_vm5, %v17760_v57, %v1594_v5  ;;  %v3993_v57 = vshll.u32 %v3716_v60, 16  ;;  %v3991_v10 = vshrl.u32 %v3716_v60, 16  ;;  %v16952_v26 = vld [vmem:[#allocation3 + $0xe8] sm:$0xff]   ;;  %v1484_v60 = vld [vmem:[#allocation2 + $0x130] sm:$0x1] }
 0x154   :  { %15915 = vmatprep.subr.bf16.mxu1 %v16948_v9  ;;  %v17902_v33 = vor.u32 %v3947_v23, %v3943_v59  ;;  %v1606_v25 = vrot.slane %v1604_v14, 1  ;;  %v3983_v19 = vrot.slane %v3981_v38, 1  ;;  %v17914_v23 = vor.u32 %v3971_v3, %v3967_v55  ;;  %v3722_v55 = vld [vmem:[#allocation2 + $0x290] sm:$0xff] }
 0x155   :  { %v1630_v14 = vrot.slane %v1628_v7, 1  ;;  %v3995_v5 = vrot.slane %v3993_v57, 1  ;;  %v4000_v7 = vrot.slane %v3998_v20, 1  ;;  %v4027_v0 = vshrl.u32 %v3722_v55, 16 }
 0x157   :  { %15923 = vmatpush3.bf16.msra.mxu1 %v16948_v9  ;;  %v1607_v9 = vsel %vm1523_vm5, %v17778_v30, %v1606_v25  ;;  %v3976_v30 = vrot.slane %v3974_v37, 1  ;;  %v1631_v38 = vsel %vm1523_vm5, %v17809_v13, %v1630_v14  ;;  %v16953_v37 = vld [vmem:[#allocation3 + $0xf0] sm:$0xff]   ;;  %v17926_v62 = vor.u32 %v3995_v5, %v3991_v10 }
 0x158   :  { %15916 = vmatprep.subr.bf16.mxu1 %v16949_v24 }
 0x159   :  { %15347 = vmatmul.mubr.bf16.gmra.mrb[24].mxu0 %v3905_v27  ;;  %15087 = vmatmul.mubr.bf16.gmra.mrb[4].mxu1 %v1571_v49  ;;  %v3952_v27 = vrot.slane %v3950_v41, 1  ;;  %v3718_v49 = vld [vmem:[#allocation2 + $0x260] sm:$0xff]  ;;  %v1618_v41 = vrot.slane %v1616_v47, 1  ;;  %v1482_v47 = vld [vmem:[#allocation2 + $0x118] sm:$0x1] }
 0x15a   :  { %15350 = vmatprep.mubr.bf16.mxu0 %v3917_v1  ;;  %15090 = vmatprep.mubr.bf16.mxu1 %v1583_v21  ;;  %v17904_v1 = vor.u32 %v3959_v34, %v3955_v54  ;;  %v1480_v21 = vld [vmem:[#allocation2 + $0x100] sm:$0x1]  ;;  %v3719_v54 = vld [vmem:[#allocation2 + $0x268] sm:$0x1]  ;;  %v17916_v34 = vor.u32 %v3983_v19, %v3979_v6  ;;  %v1664_v19 = vshll.u32 %v1482_v47, 16 }
 0x15b   :  { %15924 = vmatpush3.bf16.msra.mxu1 %v16949_v24  ;;  %v3953_v16 = vsel %vm1523_vm5, %v17902_v33, %v3952_v27  ;;  %v1640_v24 = vshll.u32 %v1478_v15, 16  ;;  %v1652_v58 = vshll.u32 %v1480_v21, 16  ;;  %v4003_v27 = vshrl.u32 %v3718_v49, 16  ;;  %v3721_v6 = vld [vmem:[#allocation2 + $0x280] sm:$0x1] }
 0x15c   :  { %15917 = vmatprep.subr.bf16.mxu1 %v16950_v36  ;;  %v3965_v59 = vsel %vm1523_vm5, %v17904_v1, %v3964_v18  ;;  %v1619_v25 = vsel %vm1523_vm5, %v17781_v44, %v1618_v41  ;;  %v4010_v53 = vshll.u32 %v3719_v54, 16  ;;  %v3977_v18 = vsel %vm1523_vm5, %v17914_v23, %v3976_v30  ;;  %v3727_v47 = vld [vmem:[#allocation2 + $0x2c8] sm:$0x1] }
 0x15d   :  { %v3989_v3 = vsel %vm1523_vm5, %v17916_v34, %v3988_v43  ;;  %v1642_v44 = vrot.slane %v1640_v24, 1  ;;  %v1654_v13 = vrot.slane %v1652_v58, 1  ;;  %v4022_v41 = vshll.u32 %v3721_v6, 16  ;;  %v3724_v24 = vld [vmem:[#allocation2 + $0x2a8] sm:$0xff] }
 0x15e   :  { %v1676_v30 = vshll.u32 %v1484_v60, 16  ;;  %v4001_v54 = vsel %vm1523_vm5, %v17926_v62, %v4000_v7  ;;  %v1666_v5 = vrot.slane %v1664_v19, 1  ;;  %v4041_v20 = vshll.u32 %v3724_v24, 16 }
 0x15f   :  { %15925 = vmatpush3.bf16.msra.mxu1 %v16950_v36  ;;  %v1643_v21 = vsel %vm1523_vm5, %v17811_v29, %v1642_v44  ;;  %v1486_v29 = vld [vmem:[#allocation2 + $0x148] sm:$0x1] }
 0x161   :  { %15351 = vmatmul.mubr.bf16.gmra.mrb[28].mxu0 %v3929_v39  ;;  %v16951_v39 = vld [vmem:[#allocation3 + $0xe0] sm:$0xff]   ;;  %15091 = vmatmul.mubr.bf16.gmra.mrb[8].mxu1 %v1595_v32  ;;  %v4017_v32 = vshll.u32 %v3720_v61, 16 }
 0x162   :  { %15354 = vmatprep.mubr.bf16.mxu0 %v3941_v50  ;;  %15918 = vmatprep.subr.bf16.mxu1 %v16951_v39  ;;  %v4005_v50 = vshll.u32 %v3718_v49, 16  ;;  %v16954_v49 = vld [vmem:[#allocation3 + $0xf8] sm:$0xff]  }
 0x163   :  { %15094 = vmatprep.mubr.bf16.mxu1 %v1607_v9  ;;  %15926 = vmatpush3.bf16.msra.mxu1 %v16951_v39  ;;  %v4029_v9 = vshll.u32 %v3722_v55, 16  ;;  %v4015_v39 = vshrl.u32 %v3720_v61, 16  ;;  %v4019_v57 = vrot.slane %v4017_v32, 1  ;;  %v1667_v55 = vsel %vm1523_vm5, %v17841_v31, %v1666_v5  ;;  %v3730_v31 = vld [vmem:[#allocation2 + $0x2f0] sm:$0xff]  ;;  %v3731_v5 = vld [vmem:[#allocation2 + $0x2f8] sm:$0x1] }
 0x164   :  { %15919 = vmatprep.subr.bf16.mxu1 %v16952_v26  ;;  %v4007_v36 = vrot.slane %v4005_v50, 1  ;;  %v1655_v50 = vsel %vm1523_vm5, %v17829_v35, %v1654_v13  ;;  %v3728_v13 = vld [vmem:[#allocation2 + $0x2d8] sm:$0xff] }
 0x165   :  { %v4031_v43 = vrot.slane %v4029_v9, 1  ;;  %v17938_v58 = vor.u32 %v4019_v57, %v4015_v39  ;;  %v1490_v57 = vld [vmem:[#allocation2 + $0x178] sm:$0x1] }
 0x166   :  { %v17928_v15 = vor.u32 %v4007_v36, %v4003_v27  ;;  %v4024_v27 = vrot.slane %v4022_v41, 1  ;;  %v1688_v36 = vshll.u32 %v1486_v29, 16  ;;  %v4065_v41 = vshll.u32 %v3728_v13, 16 }
 0x167   :  { %15927 = vmatpush3.bf16.msra.mxu1 %v16952_v26  ;;  %v3726_v26 = vld [vmem:[#allocation2 + $0x2c0] sm:$0xff]  ;;  %v17940_v35 = vor.u32 %v4031_v43, %v4027_v0  ;;  %v8907_v0 = vld [vmem:[#allocation2 + $0x288] sm:$0x80] }
 0x168   :  { %15920 = vmatprep.subr.bf16.mxu1 %v16953_v37  ;;  %v4025_v44 = vsel %vm1523_vm5, %v17938_v58, %v4024_v27  ;;  %v1690_v19 = vrot.slane %v1688_v36, 1  ;;  %v3729_v43 = vld [vmem:[#allocation2 + $0x2e0] sm:$0x1]  ;;  %v4063_v27 = vshrl.u32 %v3728_v13, 16  ;;  %v4075_v36 = vshrl.u32 %v3730_v31, 16 }
 0x169   :  { %15355 = vmatmul.mubr.bf16.gmra.mrb[32].mxu0 %v3953_v16  ;;  %15095 = vmatmul.mubr.bf16.gmra.mrb[12].mxu1 %v1619_v25  ;;  %v3723_v16 = vld [vmem:[#allocation2 + $0x298] sm:$0x1]  ;;  %v1678_v25 = vrot.slane %v1676_v30, 1  ;;  %v17954_v30 = vld [vmem:[#allocation2 + $0x288] sm:$0x80] }
 0x16a   :  { %15358 = vmatprep.mubr.bf16.mxu0 %v3965_v59  ;;  %15098 = vmatprep.mubr.bf16.mxu1 %v1631_v38  ;;  %v4012_v59 = vrot.slane %v4010_v53, 1  ;;  %v4034_v14 = vshll.u32 %v3723_v16, 16  ;;  %v3725_v53 = vld [vmem:[#allocation2 + $0x2b0] sm:$0x1]  ;;  %v4053_v38 = vshll.u32 %v3726_v26, 16  ;;  %v4051_v16 = vshrl.u32 %v3726_v26, 16 }
 0x16b   :  { %15928 = vmatpush3.bf16.msra.mxu1 %v16953_v37  ;;  %v4043_v37 = vrot.slane %v4041_v20, 1  ;;  %v4046_v32 = vshll.u32 %v3725_v53, 16  ;;  %v1679_v7 = vsel %vm1523_vm5, %v17864_v28, %v1678_v25  ;;  %v1712_v26 = vshll.u32 %v1490_v57, 16 }
 0x16c   :  { %15921 = vmatprep.subr.bf16.mxu1 %v16954_v49  ;;  %v4013_v10 = vsel %vm1523_vm5, %v17928_v15, %v4012_v59  ;;  %v4036_v61 = vrot.slane %v4034_v14, 1  ;;  %v4055_v9 = vrot.slane %v4053_v38, 1  ;;  %v4058_v59 = vshll.u32 %v3727_v47, 16 }
 0x16d   :  { %v4048_v39 = vrot.slane %v4046_v32, 1  ;;  %v8908_v14 = vsel %vm17837_vm8, 0, %v8907_v0  ;;  %v1691_v29 = vsel %vm1523_vm5, %v17868_v52, %v1690_v19  ;;  %v4067_v25 = vrot.slane %v4065_v41, 1  ;;  %v3734_v52 = vld [vmem:[#allocation2 + $0x320] sm:$0xff]  ;;  %v3735_v19 = vld [vmem:[#allocation2 + $0x328] sm:$0x1] }
 0x16e   :  { %v4037_v60 = vsel %vm1523_vm5, %v17940_v35, %v4036_v61  ;;  %v4070_v53 = vshll.u32 %v3729_v43, 16  ;;  %v4099_v43 = vshrl.u32 %v3734_v52, 16 }
 0x16f   :  { %15929 = vmatpush3.bf16.msra.mxu1 %v16954_v49  ;;  %v17968_v32 = vor.u32 %v4067_v25, %v4063_v27  ;;  %v1498_v27 = vld [vmem:[#allocation2 + $0x208] sm:$0x1] }
 0x171   :  { %15359 = vmatmul.mubr.bf16.gmra.mrb[36].mxu0 %v3977_v18  ;;  %15099 = vmatmul.mubr.bf16.gmra.mrb[16].mxu1 %v1643_v21  ;;  %v1488_v18 = vld [vmem:[#allocation2 + $0x160] sm:$0x1]  ;;  %v17952_v21 = vld [vmem:[#allocation2 + $0x288] sm:$0x80] }
 0x172   :  { %15362 = vmatprep.mubr.bf16.mxu0 %v3989_v3  ;;  %15102 = vmatprep.mubr.bf16.mxu1 %v1655_v50  ;;  %v4039_v3 = vshrl.u32 %v3724_v24, 16  ;;  %v1700_v6 = vshll.u32 %v1488_v18, 16  ;;  %v4060_v50 = vrot.slane %v4058_v59, 1  ;;  %v1492_v24 = vld [vmem:[#allocation2 + $0x1c0] sm:$0x1]  ;;  %v3732_v18 = vld [vmem:[#allocation2 + $0x308] sm:$0xff] }
 0x173   :  { %8909 = vst [vmem:[#allocation2 + $0x288] sm:$0x80] %v8908_v14  ;;  %v1724_v61 = vshll.u32 %v1492_v24, 16 }
 0x174   :  { %v17950_v49 = vor.u32 %v4043_v37, %v4039_v3  ;;  %v1702_v28 = vrot.slane %v1700_v6, 1  ;;  %v1714_v3 = vrot.slane %v1712_v26, 1  ;;  %v4089_v37 = vshll.u32 %v3732_v18, 16  ;;  %v3733_v6 = vld [vmem:[#allocation2 + $0x310] sm:$0x1]  ;;  %v3736_v26 = vld [vmem:[#allocation2 + $0x338] sm:$0xff] }
 0x175   :  { %v4094_v41 = vshll.u32 %v3733_v6, 16  ;;  %v17993_v6 = vld [vmem:[#allocation2 + $0x50] sm:$0xff] }
 0x176   :  { %v4049_v20 = vsel %vm1523_vm5, %v17950_v49, %v4048_v39  ;;  %v1703_v11 = vsel %vm1523_vm5, %v17878_v4, %v1702_v28  ;;  %v4072_v4 = vrot.slane %v4070_v53, 1  ;;  %v1715_v59 = vsel %vm1523_vm5, %v17880_v22, %v1714_v3  ;;  %v17980_v22 = vld [vmem:[#allocation2 + $0x38] sm:$0xff] }
 0x177   :  { %v4087_v39 = vshrl.u32 %v3732_v18, 16  ;;  %v4091_v57 = vrot.slane %v4089_v37, 1  ;;  %v1500_v18 = vld [vmem:[#allocation2 + $0x220] sm:$0x1] }
 0x178   :  { %v4073_v0 = vsel %vm1523_vm5, %v17968_v32, %v4072_v4 }
 0x179   :  { %15363 = vmatmul.mubr.bf16.gmra.mrb[40].mxu0 %v4001_v54  ;;  %15103 = vmatmul.mubr.bf16.gmra.mrb[20].mxu1 %v1667_v55  ;;  %v17958_v54 = vor.u32 %v4055_v9, %v4051_v16  ;;  %v4082_v55 = vshll.u32 %v3731_v5, 16  ;;  %v1496_v16 = vld [vmem:[#allocation2 + $0x1f0] sm:$0x1]  ;;  %v4101_v9 = vshll.u32 %v3734_v52, 16  ;;  %v4111_v52 = vshrl.u32 %v3736_v26, 16 }
 0x17a   :  { %15366 = vmatprep.mubr.bf16.mxu0 %v4013_v10  ;;  %15106 = vmatprep.mubr.bf16.mxu1 %v1679_v7  ;;  %v4077_v10 = vshll.u32 %v3730_v31, 16  ;;  %v1494_v7 = vld [vmem:[#allocation2 + $0x1d8] sm:$0x1]  ;;  %v1748_v14 = vshll.u32 %v1496_v16, 16 }
 0x17b   :  { %v4061_v38 = vsel %vm1523_vm5, %v17958_v54, %v4060_v50  ;;  %v1736_v31 = vshll.u32 %v1494_v7, 16  ;;  %v4103_v24 = vrot.slane %v4101_v9, 1  ;;  %v1772_v7 = vshll.u32 %v1500_v18, 16 }
 0x17c   :  { %v4079_v47 = vrot.slane %v4077_v10, 1  ;;  %v4106_v10 = vshll.u32 %v3735_v19, 16  ;;  %v17998_v19 = vld [vmem:[#allocation2 + $0x68] sm:$0xff] }
 0x17d   :  { %v1738_v5 = vrot.slane %v1736_v31, 1  ;;  %v17984_v25 = vor.u32 %v4103_v24, %v4099_v43  ;;  %v4666_v43 = vshrl.u32 %v17998_v19, 16 }
 0x17e   :  { %v17970_v13 = vor.u32 %v4079_v47, %v4075_v36  ;;  %v4108_v53 = vrot.slane %v4106_v10, 1  ;;  %v1760_v36 = vshll.u32 %v1498_v27, 16  ;;  %v4573_v47 = vld [vmem:[#allocation2 + $0x30] sm:$0x80]  ;;  %v4577_v10 = vld [vmem:[#allocation2 + $0x60] sm:$0x80] }
 0x17f   :  { %v4638_v16 = vshrl.u32 %v4573_v47, 16  ;;  %v4657_v27 = vshll.u32 %v17993_v6, 16  ;;  %v18012_v47 = vld [vmem:[#allocation2 + $0x98] sm:$0xff] }
 0x181   :  { %15367 = vmatmul.mubr.bf16.gmra.mrb[44].mxu0 %v4025_v44  ;;  %15107 = vmatmul.mubr.bf16.gmra.mrb[24].mxu1 %v1691_v29  ;;  %v1726_v44 = vrot.slane %v1724_v61, 1  ;;  %v17982_v29 = vor.u32 %v4091_v57, %v4087_v39  ;;  %v3737_v61 = vld [vmem:[#allocation2 + $0x340] sm:$0x1]  ;;  %v1774_v57 = vrot.slane %v1772_v7, 1 }
 0x182   :  { %15370 = vmatprep.mubr.bf16.mxu0 %v4037_v60  ;;  %15110 = vmatprep.mubr.bf16.mxu1 %v1703_v11  ;;  %v4084_v60 = vrot.slane %v4082_v55, 1  ;;  %v4113_v11 = vshll.u32 %v3736_v26, 16  ;;  %v1739_v55 = vsel %vm1523_vm5, %v17893_v8, %v1738_v5  ;;  %v1762_v8 = vrot.slane %v1760_v36, 1 }
 0x183   :  { %v1727_v28 = vsel %vm1523_vm5, %v17866_v63, %v1726_v44  ;;  %v1750_v63 = vrot.slane %v1748_v14, 1  ;;  %v4118_v44 = vshll.u32 %v3737_v61, 16  ;;  %v18008_v61 = vld [vmem:[#allocation2 + $0x80] sm:$0xff]  ;;  %v4668_v36 = vrot.slane %v4666_v43, 7 }
 0x184   :  { %v4085_v50 = vsel %vm1523_vm5, %v17970_v13, %v4084_v60  ;;  %v4115_v4 = vrot.slane %v4113_v11, 1  ;;  %v4109_v60 = vsel %vm1523_vm5, %v17984_v25, %v4108_v53  ;;  %v1763_v24 = vsel %vm1523_vm5, %v17904_v1, %v1762_v8  ;;  %v4581_v8 = vld [vmem:[#allocation2 + $0x90] sm:$0x80] }
 0x185   :  { %v1751_v37 = vsel %vm1523_vm5, %v17902_v33, %v1750_v63  ;;  %v4654_v33 = vshrl.u32 %v17993_v6, 16  ;;  %v4120_v39 = vrot.slane %v4118_v44, 1  ;;  %v1775_v11 = vsel %vm1523_vm5, %v17914_v23, %v1774_v57 }
 0x186   :  { %v4116_v31 = vor.u32 %v4115_v4, %v4111_v52  ;;  %v4669_v1 = vshll.u32 %v17998_v19, 16  ;;  %v4678_v23 = vshrl.u32 %v18008_v61, 16  ;;  %v4686_v43 = vshrl.u32 %v4581_v8, 16 }
 0x188   :  { %v4121_v63 = vsel %vm1523_vm5, %v4116_v31, %v4120_v39  ;;  %v4671_v7 = vor.u32 %v4669_v1, %v4668_v36  ;;  %v4680_v39 = vrot.slane %v4678_v23, 7  ;;  %v1512_v36 = vld [vmem:[#allocation2 + $0x2b0] sm:$0x1] }
 0x189   :  { %15371 = vmatmul.mubr.bf16.gmra.mrb[48].mxu0 %v4049_v20  ;;  %15111 = vmatmul.mubr.bf16.gmra.mrb[28].mxu1 %v1715_v59  ;;  %v4096_v20 = vrot.slane %v4094_v41, 1  ;;  %v4645_v59 = vshll.u32 %v17980_v22, 16  ;;  %v1502_v41 = vld [vmem:[#allocation2 + $0x238] sm:$0x1] }
 0x18a   :  { %15374 = vmatprep.mubr.bf16.mxu0 %v4061_v38  ;;  %15114 = vmatprep.mubr.bf16.mxu1 %v1727_v28  ;;  %v4642_v38 = vshrl.u32 %v17980_v22, 16  ;;  %v4640_v28 = vrot.slane %v4638_v16, 7  ;;  %v1784_v26 = vshll.u32 %v1502_v41, 16  ;;  %v1508_v16 = vld [vmem:[#allocation2 + $0x280] sm:$0x1] }
 0x18b   :  { %v4097_v3 = vsel %vm1523_vm5, %v17982_v29, %v4096_v20  ;;  %v4656_v20 = vrot.slane %v4654_v33, 7 }
 0x18c   :  { %v4644_v9 = vrot.slane %v4642_v38, 7  ;;  %v4662_v38 = vshrl.u32 %v4577_v10, 16  ;;  %v4693_v10 = vshll.u32 %v18012_v47, 16 }
 0x18d   :  { %v4659_v52 = vor.u32 %v4657_v27, %v4656_v20 }
 0x18e   :  { %v4647_v14 = vor.u32 %v4645_v59, %v4644_v9  ;;  %v4664_v44 = vrot.slane %v4662_v38, 7  ;;  %v4690_v9 = vshrl.u32 %v18012_v47, 16 }
 0x190   :  { %v4648_v18 = vsel %vm335_vm1, %v4640_v28, %v4647_v14  ;;  %v1820_v28 = vshll.u32 %v1508_v16, 16  ;;  %v18022_v14 = vld [vmem:[#allocation2 + $0xb0] sm:$0xff] }
 0x191   :  { %15375 = vmatmul.mubr.bf16.gmra.mrb[52].mxu0 %v4073_v0  ;;  %15115 = vmatmul.mubr.bf16.gmra.mrb[32].mxu1 %v1739_v55  ;;  %v4575_v0 = vld [vmem:[#allocation2 + $0x48] sm:$0x80]  ;;  %v1786_v55 = vrot.slane %v1784_v26, 1 }
 0x192   :  { %15378 = vmatprep.mubr.bf16.mxu0 %v4085_v50  ;;  %15118 = vmatprep.mubr.bf16.mxu1 %v1751_v37  ;;  %v1504_v50 = vld [vmem:[#allocation2 + $0x250] sm:$0x1]  ;;  %v4650_v5 = vshrl.u32 %v4575_v0, 16  ;;  %v1506_v37 = vld [vmem:[#allocation2 + $0x268] sm:$0x1]  ;;  %v4681_v0 = vshll.u32 %v18008_v61, 16 }
 0x193   :  { %v1796_v53 = vshll.u32 %v1504_v50, 16  ;;  %v1808_v59 = vshll.u32 %v1506_v37, 16  ;;  %v1787_v33 = vsel %vm1523_vm5, %v17916_v34, %v1786_v55  ;;  %v4672_v50 = vsel %vm335_vm1, %v4664_v44, %v4671_v7  ;;  %v16633_v26 = vld [vmem:[#allocation3 + $0x1c8] sm:$0xff]   ;;  %v16634_v55 = vld [vmem:[#allocation3 + $0x1d0] sm:$0xff]  }
 0x194   :  { %v4683_v27 = vor.u32 %v4681_v0, %v4680_v39  ;;  %v1514_v0 = vld [vmem:[#allocation2 + $0x2c8] sm:$0x1] }
 0x195   :  { %v1798_v4 = vrot.slane %v1796_v53, 1  ;;  %v1810_v34 = vrot.slane %v1808_v59, 1  ;;  %v4583_v53 = vld [vmem:[#allocation2 + $0xa8] sm:$0x80] }
 0x196   :  { %v4698_v23 = vshrl.u32 %v4583_v53, 16 }
 0x197   :  { %v1799_v57 = vsel %vm1523_vm5, %v17926_v62, %v1798_v4  ;;  %v4702_v62 = vshrl.u32 %v18022_v14, 16  ;;  %v4705_v4 = vshll.u32 %v18022_v14, 16 }
 0x199   :  { %15379 = vmatmul.mubr.bf16.gmra.mrb[56].mxu0 %v4097_v3  ;;  %15119 = vmatmul.mubr.bf16.gmra.mrb[36].mxu1 %v1763_v24  ;;  %v4652_v3 = vrot.slane %v4650_v5, 7  ;;  %v4692_v24 = vrot.slane %v4690_v9, 7  ;;  %v18026_v5 = vld [vmem:[#allocation2 + $0xc8] sm:$0xff] }
 0x19a   :  { %15382 = vmatprep.mubr.bf16.mxu0 %v4109_v60  ;;  %15122 = vmatprep.mubr.bf16.mxu1 %v1775_v11  ;;  %v4579_v60 = vld [vmem:[#allocation2 + $0x78] sm:$0x80]  ;;  %v1510_v11 = vld [vmem:[#allocation2 + $0x298] sm:$0x1]  ;;  %v4714_v1 = vshrl.u32 %v18026_v5, 16  ;;  %v4717_v8 = vshll.u32 %v18026_v5, 16 }
 0x19b   :  { %v4660_v31 = vsel %vm335_vm1, %v4652_v3, %v4659_v52  ;;  %v4674_v41 = vshrl.u32 %v4579_v60, 16  ;;  %v4695_v38 = vor.u32 %v4693_v10, %v4692_v24  ;;  %v1811_v3 = vsel %vm1523_vm5, %v17928_v15, %v1810_v34  ;;  %v4585_v52 = vld [vmem:[#allocation2 + $0xc0] sm:$0x80]  ;;  %v1516_v24 = vld [vmem:[#allocation2 + $0x2e0] sm:$0x1] }
 0x19c   :  { %v1832_v37 = vshll.u32 %v1510_v11, 16  ;;  %v1844_v60 = vshll.u32 %v1512_v36, 16  ;;  %v4710_v9 = vshrl.u32 %v4585_v52, 16  ;;  %v4716_v59 = vrot.slane %v4714_v1, 7  ;;  %v18039_v15 = vld [vmem:[#allocation2 + $0xe0] sm:$0xff]  ;;  %v18049_v11 = vld [vmem:[#allocation2 + $0x110] sm:$0xff] }
 0x19d   :  { %v4676_v20 = vrot.slane %v4674_v41, 7  ;;  %v4589_v34 = vld [vmem:[#allocation2 + $0xf0] sm:$0x80]  ;;  %v1868_v36 = vshll.u32 %v1516_v24, 16  ;;  %v16637_v52 = vld [vmem:[#allocation3 + $0x1e8] sm:$0xff]  }
 0x19e   :  { %v1834_v39 = vrot.slane %v1832_v37, 1  ;;  %v1846_v41 = vrot.slane %v1844_v60, 1  ;;  %v18057_v37 = vld [vmem:[#allocation2 + $0x128] sm:$0xff] }
 0x19f   :  { %v4684_v44 = vsel %vm335_vm1, %v4676_v20, %v4683_v27  ;;  %v1856_v27 = vshll.u32 %v1514_v0, 16  ;;  %v1522_v24 = vld [vmem:[#allocation2 + $0x328] sm:$0x1] }
 0x1a0   :  { %v1847_v53 = vsel %vm1523_vm5, %v17950_v49, %v1846_v41  ;;  %v4593_v41 = vld [vmem:[#allocation2 + $0x120] sm:$0x80] }
 0x1a1   :  { %15383 = vmatmul.mubr.bf16.gmra.mrb[60].mxu0 %v4121_v63  ;;  %15123 = vmatmul.mubr.bf16.gmra.mrb[40].mxu1 %v1787_v33  ;;  %v1822_v63 = vrot.slane %v1820_v28, 1  ;;  %v16635_v33 = vld [vmem:[#allocation3 + $0x1d8] sm:$0xff]   ;;  %v4726_v28 = vshrl.u32 %v18039_v15, 16  ;;  %v1858_v49 = vrot.slane %v1856_v27, 1 }
 0x1a2   :  { %15402 = vmatprep.mubr.bf16.mxu0 %v4648_v18  ;;  %15126 = vmatprep.mubr.bf16.mxu1 %v1799_v57  ;;  %v4688_v18 = vrot.slane %v4686_v43, 7  ;;  %v4700_v57 = vrot.slane %v4698_v23, 7  ;;  %v4719_v43 = vor.u32 %v4717_v8, %v4716_v59  ;;  %v1518_v23 = vld [vmem:[#allocation2 + $0x2f8] sm:$0x1]  ;;  %v4762_v59 = vshrl.u32 %v18057_v37, 16  ;;  %v16638_v8 = vld [vmem:[#allocation3 + $0x1f0] sm:$0xff]  }
 0x1a3   :  { %v1823_v7 = vsel %vm1523_vm5, %v17938_v58, %v1822_v63  ;;  %v4722_v63 = vshrl.u32 %v17845_v46, 16  ;;  %v4750_v46 = vshrl.u32 %v18049_v11, 16  ;;  %v1859_v0 = vsel %vm1523_vm5, %v17958_v54, %v1858_v49  ;;  %v16639_v27 = vld [vmem:[#allocation3 + $0x1f8] sm:$0xff]  }
 0x1a4   :  { %v4696_v16 = vsel %vm335_vm1, %v4688_v18, %v4695_v38  ;;  %v4728_v18 = vrot.slane %v4726_v28, 7  ;;  %v4729_v38 = vshll.u32 %v18039_v15, 16 }
 0x1a9   :  { %15403 = vmatmul.mubr.bf16.vlgmr.msra.gmra.mrb[0].mxu0 %v4660_v31  ;;  %15127 = vmatmul.mubr.bf16.gmra.mrb[44].mxu1 %v1811_v3  ;;  %v18041_v31 = vld [vmem:[#allocation2 + $0xf8] sm:$0xff] }
 0x1aa   :  { %15467 = vmatpush3.bf16.msra.mxu0 %v17843_v45  ;;  %15406 = vmatprep.mubr.bf16.mxu0 %v4672_v50  ;;  %v4704_v45 = vrot.slane %v4702_v62, 7  ;;  %v4712_v50 = vrot.slane %v4710_v9, 7  ;;  %v4738_v10 = vshrl.u32 %v18041_v31, 16  ;;  %v1835_v62 = vsel %vm1523_vm5, %v17940_v35, %v1834_v39  ;;  %v1520_v9 = vld [vmem:[#allocation2 + $0x310] sm:$0x1] }
 0x1ab   :  { %15468 = vmatprep.subr.bf16.mxu0 %v16633_v26  ;;  %15130 = vmatprep.mubr.bf16.mxu1 %v1823_v7  ;;  %v4741_v35 = vshll.u32 %v18041_v31, 16  ;;  %v1870_v7 = vrot.slane %v1868_v36, 1 }
 0x1ac   :  { %v4707_v58 = vor.u32 %v4705_v4, %v4704_v45  ;;  %v4720_v1 = vsel %vm335_vm1, %v4712_v50, %v4719_v43  ;;  %v4740_v3 = vrot.slane %v4738_v10, 7  ;;  %v4591_v45 = vld [vmem:[#allocation2 + $0x108] sm:$0x80]  ;;  %v4724_v4 = vrot.slane %v4722_v63, 7  ;;  %v18066_v10 = vld [vmem:[#allocation2 + $0x140] sm:$0xff] }
 0x1ad   :  { %v4746_v39 = vshrl.u32 %v4591_v45, 16  ;;  %v1871_v50 = vsel %vm1523_vm5, %v17968_v32, %v1870_v7  ;;  %v1892_v43 = vshll.u32 %v1520_v9, 16  ;;  %v1904_v32 = vshll.u32 %v1522_v24, 16  ;;  %v16956_v24 = vld [vmem:[#allocation2 + $0x260] sm:$0xff] }
 0x1ae   :  { %15469 = vmatpush3.bf16.msra.mxu0 %v16633_v26  ;;  %v16636_v26 = vld [vmem:[#allocation3 + $0x1e0] sm:$0xff]   ;;  %v4708_v20 = vsel %vm335_vm1, %v4700_v57, %v4707_v58  ;;  %v4752_v57 = vrot.slane %v4750_v46, 7  ;;  %v4753_v58 = vshll.u32 %v18049_v11, 16  ;;  %v2398_v46 = vld [vmem:[#allocation2 + $0x228] sm:$0x80]  ;;  %v4777_v9 = vshll.u32 %v18066_v10, 16 }
 0x1af   :  { %15470 = vmatprep.subr.bf16.mxu0 %v16634_v55  ;;  %v4748_v63 = vrot.slane %v4746_v39, 7  ;;  %v1894_v36 = vrot.slane %v1892_v43, 1  ;;  %v1906_v7 = vrot.slane %v1904_v32, 1 }
 0x1b1   :  { %15407 = vmatmul.mubr.bf16.gmra.mrb[4].mxu0 %v4684_v44  ;;  %15131 = vmatmul.mubr.bf16.gmra.mrb[48].mxu1 %v1835_v62  ;;  %v4731_v44 = vor.u32 %v4729_v38, %v4728_v18  ;;  %v4764_v62 = vrot.slane %v4762_v59, 7  ;;  %v18070_v18 = vld [vmem:[#allocation2 + $0x158] sm:$0xff]  ;;  %v4774_v38 = vshrl.u32 %v18066_v10, 16  ;;  %v1895_v59 = vsel %vm1523_vm5, %v17982_v29, %v1894_v36  ;;  %v2400_v29 = vld [vmem:[#allocation2 + $0x240] sm:$0x80] }
 0x1b2   :  { %15410 = vmatprep.mubr.bf16.mxu0 %v4696_v16  ;;  %15471 = vmatpush3.bf16.msra.mxu0 %v16634_v55  ;;  %v4734_v55 = vshrl.u32 %v4589_v34, 16  ;;  %v4743_v16 = vor.u32 %v4741_v35, %v4740_v3  ;;  %v4758_v34 = vshrl.u32 %v4593_v41, 16  ;;  %v4786_v49 = vshrl.u32 %v18070_v18, 16 }
 0x1b3   :  { %15472 = vmatprep.subr.bf16.mxu0 %v16635_v33  ;;  %15134 = vmatprep.mubr.bf16.mxu1 %v1847_v53  ;;  %v4732_v28 = vsel %vm335_vm1, %v4724_v4, %v4731_v44  ;;  %v4755_v53 = vor.u32 %v4753_v58, %v4752_v57  ;;  %v4597_v44 = vld [vmem:[#allocation2 + $0x150] sm:$0x80]  ;;  %v2675_v36 = vshrl.u32 %v2400_v29, 16  ;;  %v18100_v29 = vld [vmem:[#allocation2] sm:$0xff] }
 0x1b4   :  { %v4736_v60 = vrot.slane %v4734_v55, 7  ;;  %v16955_v55 = vld [vmem:[#allocation2 + $0x230] sm:$0xff]  ;;  %v4760_v35 = vrot.slane %v4758_v34, 7  ;;  %v4788_v41 = vrot.slane %v4786_v49, 7  ;;  %v2694_v49 = vshll.u32 %v16956_v24, 16 }
 0x1b5   :  { %v2667_v3 = vshrl.u32 %v16955_v55, 16  ;;  %v4756_v4 = vsel %vm335_vm1, %v4748_v63, %v4755_v53  ;;  %v2670_v39 = vshll.u32 %v16955_v55, 16  ;;  %v18082_v57 = vld [vmem:[#allocation2 + $0x170] sm:$0xff]  ;;  %v1907_v63 = vsel %vm1523_vm5, %v17984_v25, %v1906_v7 }
 0x1b6   :  { %15473 = vmatpush3.bf16.msra.mxu0 %v16635_v33  ;;  %v1880_v33 = vshll.u32 %v1518_v23, 16  ;;  %v18074_v23 = vld [vmem:[#allocation3 + $0x200] sm:$0xff]   ;;  %v4798_v43 = vshrl.u32 %v18082_v57, 16  ;;  %v4801_v55 = vshll.u32 %v18082_v57, 16 }
 0x1b7   :  { %15474 = vmatprep.subr.bf16.mxu0 %v16636_v26 }
 0x1b8   :  { %v1882_v54 = vrot.slane %v1880_v33, 1  ;;  %v2669_v33 = vrot.slane %v2667_v3, 7  ;;  %v4601_v3 = vld [vmem:[#allocation2 + $0x180] sm:$0x80] }
 0x1b9   :  { %15411 = vmatmul.mubr.bf16.gmra.mrb[8].mxu0 %v4708_v20  ;;  %v4765_v20 = vshll.u32 %v18057_v37, 16  ;;  %15135 = vmatmul.mubr.bf16.gmra.mrb[52].mxu1 %v1859_v0  ;;  %v4789_v0 = vshll.u32 %v18070_v18, 16  ;;  %v4806_v25 = vshrl.u32 %v4601_v3, 16  ;;  %v2711_v3 = vshrl.u32 %v17952_v21, 16 }
 0x1ba   :  { %15414 = vmatprep.mubr.bf16.mxu0 %v4720_v1  ;;  %15475 = vmatpush3.bf16.msra.mxu0 %v16636_v26  ;;  %v4744_v26 = vsel %vm335_vm1, %v4736_v60, %v4743_v16  ;;  %v4595_v1 = vld [vmem:[#allocation2 + $0x138] sm:$0x80]  ;;  %v1883_v45 = vsel %vm1523_vm5, %v17970_v13, %v1882_v54  ;;  %v4776_v16 = vrot.slane %v4774_v38, 7  ;;  %v4782_v13 = vshrl.u32 %v4597_v44, 16 }
 0x1bb   :  { %15476 = vmatprep.subr.bf16.mxu0 %v16637_v52  ;;  %15138 = vmatprep.mubr.bf16.mxu1 %v1871_v50  ;;  %v4770_v60 = vshrl.u32 %v4595_v1, 16  ;;  %v4599_v50 = vld [vmem:[#allocation2 + $0x168] sm:$0x80]  ;;  %v2402_v54 = vld [vmem:[#allocation2 + $0x258] sm:$0x80]  ;;  %v4791_v32 = vor.u32 %v4789_v0, %v4788_v41 }
 0x1bc   :  { %v4784_v53 = vrot.slane %v4782_v13, 7  ;;  %v4794_v1 = vshrl.u32 %v4599_v50, 16  ;;  %v2404_v41 = vld [vmem:[#allocation2 + $0x270] sm:$0x80]  ;;  %v4603_v0 = vld [vmem:[#allocation2 + $0x198] sm:$0x80] }
 0x1bd   :  { %v4772_v34 = vrot.slane %v4770_v60, 7  ;;  %v4822_v50 = vshrl.u32 %v18100_v29, 16 }
 0x1be   :  { %15477 = vmatpush3.bf16.msra.mxu0 %v16637_v52  ;;  %v4767_v52 = vor.u32 %v4765_v20, %v4764_v62  ;;  %v4779_v62 = vor.u32 %v4777_v9, %v4776_v16  ;;  %v4792_v44 = vsel %vm335_vm1, %v4784_v53, %v4791_v32  ;;  %v2677_v16 = vrot.slane %v2675_v36, 7  ;;  %v16957_v9 = vld [vmem:[#allocation2 + $0x278] sm:$0xff]  ;;  %v4605_v53 = vld [vmem:[#allocation2 + $0x1e0] sm:$0x80] }
 0x1bf   :  { %15478 = vmatprep.subr.bf16.mxu0 %v16638_v8  ;;  %v4818_v36 = vshrl.u32 %v4603_v0, 16 }
 0x1c0   :  { %v4768_v58 = vsel %vm335_vm1, %v4760_v35, %v4767_v52  ;;  %v4800_v35 = vrot.slane %v4798_v43, 7  ;;  %v2687_v52 = vshrl.u32 %v2402_v54, 16  ;;  %v16959_v43 = vld [vmem:[#allocation2 + $0x290] sm:$0xff] }
 0x1c1   :  { %15415 = vmatmul.mubr.bf16.gmra.mrb[12].mxu0 %v4732_v28  ;;  %15139 = vmatmul.mubr.bf16.gmra.mrb[56].mxu1 %v1883_v45  ;;  %v18087_v28 = vld [vmem:[#allocation2 + $0x188] sm:$0xff]  ;;  %v4780_v45 = vsel %vm335_vm1, %v4772_v34, %v4779_v62  ;;  %v4820_v21 = vrot.slane %v4818_v36, 7  ;;  %v18127_v36 = vld [vmem:[#allocation2 + $0x230] sm:$0xff] }
 0x1c2   :  { %15418 = vmatprep.mubr.bf16.mxu0 %v4744_v26  ;;  %15479 = vmatpush3.bf16.msra.mxu0 %v16638_v8  ;;  %v2663_v8 = vshrl.u32 %v2398_v46, 16  ;;  %v2691_v26 = vshrl.u32 %v16956_v24, 16  ;;  %v4810_v38 = vshrl.u32 %v18087_v28, 16  ;;  %v4813_v60 = vshll.u32 %v18087_v28, 16 }
 0x1c3   :  { %15480 = vmatprep.subr.bf16.mxu0 %v16639_v27  ;;  %15142 = vmatprep.mubr.bf16.mxu1 %v1895_v59  ;;  %v2703_v59 = vshrl.u32 %v16957_v9, 16  ;;  %v2715_v24 = vshrl.u32 %v16959_v43, 16 }
 0x1c4   :  { %v2665_v20 = vrot.slane %v2663_v8, 7  ;;  %v2693_v46 = vrot.slane %v2691_v26, 7  ;;  %v4812_v7 = vrot.slane %v4810_v38, 7  ;;  %v18098_v8 = vld [vmem:[#allocation2 + $0x1e8] sm:$0xff]  ;;  %v4808_v26 = vrot.slane %v4806_v25, 7 }
 0x1c5   :  { %v4834_v62 = vshrl.u32 %v18098_v8, 16  ;;  %v2705_v54 = vrot.slane %v2703_v59, 7 }
 0x1c6   :  { %15481 = vmatpush3.bf16.msra.mxu0 %v16639_v27  ;;  %v2672_v27 = vor.u32 %v2670_v39, %v2669_v33  ;;  %v4796_v33 = vrot.slane %v4794_v1, 7  ;;  %v4803_v39 = vor.u32 %v4801_v55, %v4800_v35  ;;  %v2696_v13 = vor.u32 %v2694_v49, %v2693_v46  ;;  %v18110_v46 = vld [vmem:[#allocation2 + $0x200] sm:$0xff] }
 0x1c7   :  { %15546 = vmatprep.subr.bf16.mxu0 %v18074_v23  ;;  %v4815_v34 = vor.u32 %v4813_v60, %v4812_v7  ;;  %v4825_v1 = vshll.u32 %v18100_v29, 16  ;;  %v4824_v55 = vrot.slane %v4822_v50, 7  ;;  %v2717_v35 = vrot.slane %v2715_v24, 7  ;;  %v18114_v7 = vld [vmem:[#allocation2 + $0x218] sm:$0xff] }
 0x1c8   :  { %v4804_v32 = vsel %vm335_vm1, %v4796_v33, %v4803_v39  ;;  %v4830_v49 = vshrl.u32 %v4605_v53, 16  ;;  %v4846_v60 = vshrl.u32 %v18110_v46, 16  ;;  %v2408_v33 = vld [vmem:[#allocation2 + $0x2a0] sm:$0x80]  ;;  %v4607_v39 = vld [vmem:[#allocation2 + $0x1f8] sm:$0x80] }
 0x1c9   :  { %15419 = vmatmul.mubr.bf16.gmra.mrb[16].mxu0 %v4756_v4  ;;  %v2673_v4 = vsel %vm335_vm1, %v2665_v20, %v2672_v27  ;;  %15143 = vmatmul.mubr.bf16.gmra.mrb[60].mxu1 %v1907_v63  ;;  %v2685_v20 = vsel %vm335_vm1, %v2677_v16, %v17738_v56  ;;  %v2699_v27 = vshrl.u32 %v2404_v41, 16  ;;  %v2706_v63 = vshll.u32 %v16957_v9, 16  ;;  %v2410_v41 = vld [vmem:[#allocation2 + $0x2b8] sm:$0x80] }
 0x1ca   :  { %15422 = vmatprep.mubr.bf16.mxu0 %v4768_v58  ;;  %15202 = vmatprep.mubr.bf16.mxu1 %v2673_v4  ;;  %v2689_v58 = vrot.slane %v2687_v52, 7  ;;  %v2718_v52 = vshll.u32 %v16959_v43, 16  ;;  %v4816_v56 = vsel %vm335_vm1, %v4808_v26, %v4815_v34  ;;  %v4837_v4 = vshll.u32 %v18098_v8, 16  ;;  %v4609_v43 = vld [vmem:[#allocation2 + $0x210] sm:$0x80] }
 0x1cb   :  { %v2708_v25 = vor.u32 %v2706_v63, %v2705_v54  ;;  %v18117_v16 = vor.u32 %v4825_v1, %v4824_v55  ;;  %v2713_v9 = vrot.slane %v2711_v3, 7  ;;  %v4858_v0 = vshrl.u32 %v18114_v7, 16  ;;  %v18129_v1 = vld [vmem:[#allocation2 + $0x248] sm:$0xff] }
 0x1cc   :  { %v2697_v38 = vsel %vm335_vm1, %v2689_v58, %v2696_v13  ;;  %v2720_v59 = vor.u32 %v2718_v52, %v2717_v35  ;;  %v4832_v58 = vrot.slane %v4830_v49, 7  ;;  %v2723_v24 = vshrl.u32 %v2408_v33, 16  ;;  %v2412_v52 = vld [vmem:[#allocation2 + $0x2d0] sm:$0x80]  ;;  %v4611_v49 = vld [vmem:[#allocation2 + $0x228] sm:$0x80] }
 0x1cd   :  { %v4842_v26 = vshrl.u32 %v4607_v39, 16  ;;  %v4848_v34 = vrot.slane %v4846_v60, 7  ;;  %v2735_v54 = vshrl.u32 %v2410_v41, 16  ;;  %v4854_v53 = vshrl.u32 %v4609_v43, 16 }
 0x1ce   :  { %v2725_v55 = vrot.slane %v2723_v24, 7  ;;  %v4882_v60 = vshrl.u32 %v18129_v1, 16  ;;  %v4866_v39 = vshrl.u32 %v4611_v49, 16  ;;  %v4873_v41 = vshll.u32 %v18127_v36, 16 }
 0x1cf   :  { %v4844_v3 = vrot.slane %v4842_v26, 7 }
 0x1d0   :  { %v4884_v26 = vrot.slane %v4882_v60, 7 }
 0x1d1   :  { %15423 = vmatmul.mubr.bf16.gmra.mrb[20].mxu0 %v4780_v45  ;;  %v4836_v45 = vrot.slane %v4834_v62, 7  ;;  %15203 = vmatmul.mubr.bf16.vlgmr.msra.gmra.mrb[40].mxu1 %v2685_v20  ;;  %v4849_v62 = vshll.u32 %v18110_v46, 16  ;;  %v4828_v20 = vsel %vm335_vm1, %v4820_v21, %v18117_v16  ;;  %v2747_v21 = vshrl.u32 %v2412_v52, 16  ;;  %v4617_v52 = vld [vmem:[#allocation2 + $0x270] sm:$0x80] }
 0x1d2   :  { %15426 = vmatprep.mubr.bf16.mxu0 %v4792_v44  ;;  %v2701_v44 = vrot.slane %v2699_v27, 7  ;;  %15206 = vmatprep.mubr.bf16.mxu1 %v2697_v38  ;;  %v2721_v27 = vsel %vm335_vm1, %v2713_v9, %v2720_v59  ;;  %v4861_v38 = vshll.u32 %v18114_v7, 16  ;;  %v4613_v9 = vld [vmem:[#allocation2 + $0x240] sm:$0x80]  ;;  %v2733_v59 = vsel %vm335_vm1, %v2725_v55, %v17776_v51  ;;  %v2418_v55 = vld [vmem:[#allocation2 + $0x318] sm:$0x80] }
 0x1d3   :  { %v4839_v13 = vor.u32 %v4837_v4, %v4836_v45  ;;  %v4851_v35 = vor.u32 %v4849_v62, %v4848_v34  ;;  %v4870_v45 = vshrl.u32 %v18127_v36, 16  ;;  %v4856_v4 = vrot.slane %v4854_v53, 7  ;;  %v18143_v62 = vld [vmem:[#allocation2 + $0x278] sm:$0xff] }
 0x1d4   :  { %v2709_v50 = vsel %vm335_vm1, %v2701_v44, %v2708_v25  ;;  %v2414_v25 = vld [vmem:[#allocation2 + $0x2e8] sm:$0x80]  ;;  %v4878_v24 = vshrl.u32 %v4613_v9, 16  ;;  %v4885_v34 = vshll.u32 %v18129_v1, 16  ;;  %v2749_v51 = vrot.slane %v2747_v21, 7 }
 0x1d5   :  { %v4840_v63 = vsel %vm335_vm1, %v4832_v58, %v4839_v13  ;;  %v4852_v33 = vsel %vm335_vm1, %v4844_v3, %v4851_v35  ;;  %v4872_v13 = vrot.slane %v4870_v45, 7  ;;  %v4615_v53 = vld [vmem:[#allocation2 + $0x258] sm:$0x80]  ;;  %v4906_v3 = vshrl.u32 %v18143_v62, 16 }
 0x1d6   :  { %v2757_v35 = vsel %vm335_vm1, %v2749_v51, %v17802_v40  ;;  %v4890_v49 = vshrl.u32 %v4615_v53, 16  ;;  %v2783_v60 = vshrl.u32 %v2418_v55, 16  ;;  %v4902_v9 = vshrl.u32 %v4617_v52, 16  ;;  %v18157_v40 = vld [vmem:[#allocation2 + $0x2a8] sm:$0xff] }
 0x1d7   :  { %v4914_v55 = vshrl.u32 %v17954_v30, 16 }
 0x1d9   :  { %15427 = vmatmul.mubr.bf16.gmra.mrb[24].mxu0 %v4804_v32  ;;  %v4860_v32 = vrot.slane %v4858_v0, 7  ;;  %15207 = vmatmul.mubr.bf16.gmra.mrb[44].mxu1 %v2709_v50  ;;  %v2759_v0 = vshrl.u32 %v2414_v25, 16  ;;  %v18139_v50 = vld [vmem:[#allocation2 + $0x260] sm:$0xff]  ;;  %v4916_v30 = vrot.slane %v4914_v55, 7 }
 0x1da   :  { %15430 = vmatprep.mubr.bf16.mxu0 %v4816_v56  ;;  %15210 = vmatprep.mubr.bf16.mxu1 %v2721_v27  ;;  %v2737_v56 = vrot.slane %v2735_v54, 7  ;;  %v4875_v27 = vor.u32 %v4873_v41, %v4872_v13 }
 0x1db   :  { %v4863_v44 = vor.u32 %v4861_v38, %v4860_v32  ;;  %v2761_v54 = vrot.slane %v2759_v0, 7  ;;  %v4880_v32 = vrot.slane %v4878_v24, 7  ;;  %v4887_v38 = vor.u32 %v4885_v34, %v4884_v26  ;;  %v2420_v24 = vld [vmem:[#allocation2 + $0x330] sm:$0x80] }
 0x1dc   :  { %v2745_v58 = vsel %vm335_vm1, %v2737_v56, %v17797_v12  ;;  %v4894_v12 = vshrl.u32 %v18139_v50, 16  ;;  %v4892_v0 = vrot.slane %v4890_v49, 7  ;;  %v4904_v34 = vrot.slane %v4902_v9, 7 }
 0x1dd   :  { %v4864_v43 = vsel %vm335_vm1, %v4856_v4, %v4863_v44  ;;  %v4897_v4 = vshll.u32 %v18139_v50, 16  ;;  %v2769_v25 = vsel %vm335_vm1, %v2761_v54, %v17827_v42  ;;  %v4888_v21 = vsel %vm335_vm1, %v4880_v32, %v4887_v38 }
 0x1de   :  { %v4896_v45 = vrot.slane %v4894_v12, 7  ;;  %v2785_v42 = vrot.slane %v2783_v60, 7  ;;  %v4930_v12 = vshrl.u32 %v18157_v40, 16  ;;  %v2795_v32 = vshrl.u32 %v2420_v24, 16 }
 0x1e0   :  { %v2793_v38 = vsel %vm335_vm1, %v2785_v42, %v17862_v48  ;;  %v4932_v49 = vrot.slane %v4930_v12, 7  ;;  %v2797_v48 = vrot.slane %v2795_v32, 7  ;;  %v18181_v12 = vld [vmem:[#allocation2 + $0x2f0] sm:$0xff] }
 0x1e1   :  { %15431 = vmatmul.mubr.bf16.gmra.mrb[28].mxu0 %v4828_v20  ;;  %15211 = vmatmul.mubr.bf16.gmra.mrb[48].mxu1 %v2733_v59  ;;  %v4868_v20 = vrot.slane %v4866_v39, 7  ;;  %v4908_v59 = vrot.slane %v4906_v3, 7  ;;  %v18155_v39 = vld [vmem:[#allocation2 + $0x290] sm:$0xff] }
 0x1e2   :  { %15434 = vmatprep.mubr.bf16.mxu0 %v4840_v63  ;;  %15214 = vmatprep.mubr.bf16.mxu1 %v2745_v58  ;;  %v2416_v63 = vld [vmem:[#allocation2 + $0x300] sm:$0x80]  ;;  %v16960_v58 = vld [vmem:[#allocation2 + $0x338] sm:$0xff]  ;;  %v4918_v26 = vshrl.u32 %v18155_v39, 16 }
 0x1e3   :  { %v2771_v56 = vshrl.u32 %v2416_v63, 16  ;;  %v4876_v44 = vsel %vm335_vm1, %v4868_v20, %v4875_v27  ;;  %v2799_v13 = vshrl.u32 %v16960_v58, 16  ;;  %v2802_v20 = vshll.u32 %v16960_v58, 16  ;;  %v4621_v27 = vld [vmem:[#allocation2 + $0x2a0] sm:$0x80] }
 0x1e4   :  { %v4920_v3 = vrot.slane %v4918_v26, 7  ;;  %v4625_v58 = vld [vmem:[#allocation2 + $0x2d0] sm:$0x80] }
 0x1e5   :  { %v2773_v41 = vrot.slane %v2771_v56, 7  ;;  %v2801_v54 = vrot.slane %v2799_v13, 7  ;;  %v4926_v56 = vshrl.u32 %v4621_v27, 16  ;;  %v4950_v26 = vshrl.u32 %v4625_v58, 16 }
 0x1e7   :  { %v2781_v63 = vsel %vm335_vm1, %v2773_v41, %v17834_v17  ;;  %v18172_v17 = vld [vmem:[#allocation2 + $0x2d8] sm:$0xff] }
 0x1e9   :  { %15435 = vmatmul.mubr.bf16.gmra.mrb[32].mxu0 %v4852_v33  ;;  %v4909_v33 = vshll.u32 %v18143_v62, 16  ;;  %15215 = vmatmul.mubr.bf16.gmra.mrb[52].mxu1 %v2757_v35  ;;  %v4921_v35 = vshll.u32 %v18155_v39, 16 }
 0x1ea   :  { %15438 = vmatprep.mubr.bf16.mxu0 %v4864_v43  ;;  %15218 = vmatprep.mubr.bf16.mxu1 %v2769_v25  ;;  %v4899_v43 = vor.u32 %v4897_v4, %v4896_v45  ;;  %v4933_v45 = vshll.u32 %v18157_v40, 16  ;;  %v18170_v4 = vld [vmem:[#allocation2 + $0x2c0] sm:$0xff] }
 0x1eb   :  { %v4911_v51 = vor.u32 %v4909_v33, %v4908_v59  ;;  %v4923_v25 = vor.u32 %v4921_v35, %v4920_v3  ;;  %v4942_v60 = vshrl.u32 %v18170_v4, 16  ;;  %v4623_v59 = vld [vmem:[#allocation2 + $0x2b8] sm:$0x80]  ;;  %v4954_v33 = vshrl.u32 %v18172_v17, 16  ;;  %v4629_v3 = vld [vmem:[#allocation2 + $0x300] sm:$0x80] }
 0x1ec   :  { %v4900_v53 = vsel %vm335_vm1, %v4892_v0, %v4899_v43  ;;  %v4935_v9 = vor.u32 %v4933_v45, %v4932_v49  ;;  %v4938_v0 = vshrl.u32 %v4623_v59, 16  ;;  %v4945_v42 = vshll.u32 %v18170_v4, 16 }
 0x1ed   :  { %v4912_v52 = vsel %vm335_vm1, %v4904_v34, %v4911_v51  ;;  %v4924_v41 = vsel %vm335_vm1, %v4916_v30, %v4923_v25  ;;  %v4944_v43 = vrot.slane %v4942_v60, 7  ;;  %v4956_v34 = vrot.slane %v4954_v33, 7  ;;  %v18191_v25 = vld [vmem:[#allocation2 + $0x320] sm:$0xff]  ;;  %v18193_v60 = vld [vmem:[#allocation2 + $0x338] sm:$0xff] }
 0x1ee   :  { %v4957_v51 = vshll.u32 %v18172_v17, 16  ;;  %v4940_v27 = vrot.slane %v4938_v0, 7  ;;  %v4969_v49 = vshll.u32 %v18181_v12, 16  ;;  %v4990_v59 = vshrl.u32 %v18191_v25, 16  ;;  %v4633_v0 = vld [vmem:[#allocation2 + $0x330] sm:$0x80] }
 0x1f0   :  { %v4959_v32 = vor.u32 %v4957_v51, %v4956_v34  ;;  %v4998_v51 = vshrl.u32 %v4633_v0, 16 }
 0x1f1   :  { %15439 = vmatmul.mubr.bf16.gmra.mrb[36].mxu0 %v4876_v44  ;;  %15219 = vmatmul.mubr.bf16.gmra.mrb[56].mxu1 %v2781_v63  ;;  %v2804_v44 = vor.u32 %v2802_v20, %v2801_v54  ;;  %v18183_v20 = vld [vmem:[#allocation2 + $0x308] sm:$0xff]  ;;  %v4947_v54 = vor.u32 %v4945_v42, %v4944_v43  ;;  %v4966_v63 = vshrl.u32 %v18181_v12, 16 }
 0x1f2   :  { %15442 = vmatprep.mubr.bf16.mxu0 %v4888_v21  ;;  %15222 = vmatprep.mubr.bf16.mxu1 %v2793_v38  ;;  %v4928_v21 = vrot.slane %v4926_v56, 7  ;;  %v4627_v38 = vld [vmem:[#allocation2 + $0x2e8] sm:$0x80]  ;;  %v4978_v55 = vshrl.u32 %v18183_v20, 16  ;;  %v4981_v30 = vshll.u32 %v18183_v20, 16 }
 0x1f3   :  { %v2805_v13 = vsel %vm335_vm1, %v2797_v48, %v2804_v44  ;;  %v4948_v35 = vsel %vm335_vm1, %v4940_v27, %v4947_v54  ;;  %v4968_v56 = vrot.slane %v4966_v63, 7  ;;  %v4974_v44 = vshrl.u32 %v4629_v3, 16 }
 0x1f4   :  { %v4936_v24 = vsel %vm335_vm1, %v4928_v21, %v4935_v9  ;;  %v4980_v48 = vrot.slane %v4978_v55, 7  ;;  %v22863_v54 = vshll.u32 %v18193_v60, 16  ;;  %v4635_v55 = vld [vmem:[#allocation2 + $0x348] sm:$0x80] }
 0x1f5   :  { %v4971_v9 = vor.u32 %v4969_v49, %v4968_v56  ;;  %v4976_v33 = vrot.slane %v4974_v44, 7  ;;  %v18210_v44 = vld [vmem:[#allocation2 + $0x38] sm:$0xff] }
 0x1f6   :  { %v4983_v58 = vor.u32 %v4981_v30, %v4980_v48  ;;  %v16641_v30 = vld [vmem:[#allocation3 + $0x208] sm:$0xff]  }
 0x1f8   :  { %v4984_v34 = vsel %vm335_vm1, %v4976_v33, %v4983_v58 }
 0x1f9   :  { %15443 = vmatmul.mubr.bf16.gmra.mrb[40].mxu0 %v4900_v53  ;;  %15223 = vmatmul.mubr.bf16.gmra.mrb[60].mxu1 %v2805_v13  ;;  %v4952_v53 = vrot.slane %v4950_v26, 7  ;;  %v4631_v13 = vld [vmem:[#allocation2 + $0x318] sm:$0x80]  ;;  %v4993_v26 = vshll.u32 %v18191_v25, 16 }
 0x1fa   :  { %15446 = vmatprep.mubr.bf16.mxu0 %v4912_v52  ;;  %v4962_v52 = vshrl.u32 %v4627_v38, 16  ;;  %v4986_v42 = vshrl.u32 %v4631_v13, 16  ;;  %v18229_v13 = vld [vmem:[#allocation2 + $0x68] sm:$0xff] }
 0x1fb   :  { %v4960_v45 = vsel %vm335_vm1, %v4952_v53, %v4959_v32  ;;  %v5000_v32 = vrot.slane %v4998_v51, 7 }
 0x1fc   :  { %v4964_v21 = vrot.slane %v4962_v52, 7  ;;  %v4988_v63 = vrot.slane %v4986_v42, 7  ;;  %v18235_v42 = vld [vmem:[#allocation2 + $0x80] sm:$0xff] }
 0x1fe   :  { %v4972_v43 = vsel %vm335_vm1, %v4964_v21, %v4971_v9  ;;  %v8924_v21 = vld [vmem:[#allocation2 + $0x50] sm:$0x10] }
 0x1ff   :  { %v18217_v9 = vld [vmem:[#allocation2 + $0x50] sm:$0xff] }
 0x201   :  { %15447 = vmatmul.mubr.bf16.gmra.mrb[44].mxu0 %v4924_v41  ;;  %v22862_v41 = vshrl.u32 %v18193_v60, 16 }
 0x202   :  { %15450 = vmatprep.mubr.bf16.mxu0 %v4936_v24  ;;  %v4992_v24 = vrot.slane %v4990_v59, 7 }
 0x203   :  { %v5004_v27 = vrot.slane %v22862_v41, 7 }
 0x204   :  { %v4995_v53 = vor.u32 %v4993_v26, %v4992_v24 }
 0x205   :  { %v5007_v38 = vor.u32 %v22863_v54, %v5004_v27  ;;  %v8957_v54 = vld [vmem:[#allocation2 + $0x218] sm:$0x10] }
 0x206   :  { %v4996_v3 = vsel %vm335_vm1, %v4988_v63, %v4995_v53  ;;  %v18247_v53 = vld [vmem:[#allocation2 + $0x98] sm:$0xff] }
 0x207   :  { %v5008_v52 = vsel %vm335_vm1, %v5000_v32, %v5007_v38  ;;  %v8936_v38 = vld [vmem:[#allocation2 + $0xb0] sm:$0x10] }
 0x209   :  { %15451 = vmatmul.mubr.bf16.gmra.mrb[48].mxu0 %v4948_v35  ;;  %v5010_v35 = vshrl.u32 %v4635_v55, 16  ;;  %v18253_v55 = vld [vmem:[#allocation2 + $0xb0] sm:$0xff] }
 0x20a   :  { %15454 = vmatprep.mubr.bf16.mxu0 %v4960_v45  ;;  %v8921_v45 = vld [vmem:[#allocation2 + $0x38] sm:$0x10] }
 0x20b   :  { %v5012_v56 = vrot.slane %v5010_v35, 7  ;;  %v8922_v48 = vsel %vm17625_vm4, 0, %v8921_v45 }
 0x20c   :  { %8923 = vst [vmem:[#allocation2 + $0x38] sm:$0x10] %v8922_v48  ;;  %v18265_v48 = vld [vmem:[#allocation2 + $0xc8] sm:$0xff] }
 0x20d   :  { %v5020_v49 = vsel %vm335_vm1, %v5012_v56, %v18117_v16  ;;  %v16642_v16 = vld [vmem:[#allocation3 + $0x210] sm:$0xff]  }
 0x211   :  { %15455 = vmatmul.mubr.bf16.gmra.mrb[52].mxu0 %v4972_v43  ;;  %v8930_v43 = vld [vmem:[#allocation2 + $0x80] sm:$0x10] }
 0x212   :  { %15458 = vmatprep.mubr.bf16.mxu0 %v4984_v34  ;;  %v8931_v24 = vsel %vm17625_vm4, 0, %v8930_v43  ;;  %v16644_v34 = vld [vmem:[#allocation3 + $0x220] sm:$0xff]  }
 0x213   :  { %8932 = vst [vmem:[#allocation2 + $0x80] sm:$0x10] %v8931_v24 }
 0x219   :  { %15459 = vmatmul.mubr.bf16.gmra.mrb[56].mxu0 %v4996_v3  ;;  %v8937_v3 = vsel %vm17625_vm4, 0, %v8936_v38 }
 0x21a   :  { %15462 = vmatprep.mubr.bf16.mxu0 %v5008_v52  ;;  %v16646_v52 = vld [vmem:[#allocation3 + $0x230] sm:$0xff]   ;;  %8938 = vst [vmem:[#allocation2 + $0xb0] sm:$0x10] %v8937_v3 }
 0x221   :  { %15463 = vmatmul.mubr.bf16.gmra.mrb[60].mxu0 %v5020_v49 }
 0x222   :  { %15482 = vmatprep.mubr.bf16.mxu0 %v17980_v22  ;;  %v8925_v22 = vsel %vm17625_vm4, 0, %v8924_v21  ;;  %v8904_v21 = vld [vmem:[#allocation2 + $0xe0] sm:$0x1f] }
 0x223   :  { %8926 = vst [vmem:[#allocation2 + $0x50] sm:$0x10] %v8925_v22  ;;  %v5954_v22 = vshrl.u32 %v18210_v44, 16 }
 0x224   :  { %v18221_v59 = vpop.f32.mrb[0].mxu1 }
 0x225   :  { %v18223_v33 = vpop.f32.mrb[1].mxu1 }
 0x226   :  { %v18225_v58 = vpop.f32.mrb[2].mxu1 }
 0x229   :  { %15483 = vmatmul.mubr.bf16.vlgmr.msra.gmra.mrb[0].mxu0 %v17993_v6  ;;  %v18227_v6 = vpop.f32.mrb[3].mxu1 }
 0x22a   :  { %15547 = vmatpush3.bf16.msra.mxu0 %v18074_v23  ;;  %15486 = vmatprep.mubr.bf16.mxu0 %v17998_v19  ;;  %v8927_v23 = vld [vmem:[#allocation2 + $0x68] sm:$0x10]  ;;  %v16643_v19 = vld [vmem:[#allocation3 + $0x218] sm:$0xff]  }
 0x22b   :  { %15548 = vmatprep.subr.bf16.mxu0 %v16641_v30  ;;  %v8928_v0 = vsel %vm17625_vm4, 0, %v8927_v23  ;;  %v18278_v23 = vld [vmem:[#allocation2 + $0xe0] sm:$0xff] }
 0x22c   :  { %8929 = vst [vmem:[#allocation2 + $0x68] sm:$0x10] %v8928_v0  ;;  %v18239_v26 = vpop.f32.mrb[4].mxu1 }
 0x22d   :  { %v18241_v51 = vpop.f32.mrb[5].mxu1 }
 0x22e   :  { %15549 = vmatpush3.bf16.msra.mxu0 %v16641_v30  ;;  %v18243_v27 = vpop.f32.mrb[6].mxu1 }
 0x22f   :  { %15550 = vmatprep.subr.bf16.mxu0 %v16642_v16  ;;  %v18245_v63 = vpop.f32.mrb[7].mxu1 }
 0x231   :  { %15487 = vmatmul.mubr.bf16.gmra.mrb[4].mxu0 %v18008_v61  ;;  %v8933_v61 = vld [vmem:[#allocation2 + $0x98] sm:$0x10] }
 0x232   :  { %15490 = vmatprep.mubr.bf16.mxu0 %v18012_v47  ;;  %15551 = vmatpush3.bf16.msra.mxu0 %v16642_v16  ;;  %v16645_v47 = vld [vmem:[#allocation3 + $0x228] sm:$0xff]   ;;  %v8934_v32 = vsel %vm17625_vm4, 0, %v8933_v61 }
 0x233   :  { %15552 = vmatprep.subr.bf16.mxu0 %v16643_v19  ;;  %8935 = vst [vmem:[#allocation2 + $0x98] sm:$0x10] %v8934_v32 }
 0x234   :  { %v18257_v35 = vpop.f32.mrb[8].mxu1 }
 0x235   :  { %v18259_v56 = vpop.f32.mrb[9].mxu1 }
 0x236   :  { %15553 = vmatpush3.bf16.msra.mxu0 %v16643_v19  ;;  %v18261_v49 = vpop.f32.mrb[10].mxu1  ;;  %v8905_v19 = vsel %vm18272_vm10, 0, %v8904_v21  ;;  %v18324_v21 = vld [vmem:[#allocation2 + $0x1e8] sm:$0xff] }
 0x237   :  { %15554 = vmatprep.subr.bf16.mxu0 %v16644_v34  ;;  %v18263_v45 = vpop.f32.mrb[11].mxu1  ;;  %8906 = vst [vmem:[#allocation2 + $0xe0] sm:$0x1f] %v8905_v19 }
 0x239   :  { %15491 = vmatmul.mubr.bf16.gmra.mrb[8].mxu0 %v18022_v14  ;;  %v8939_v14 = vld [vmem:[#allocation2 + $0xc8] sm:$0x10] }
 0x23a   :  { %15494 = vmatprep.mubr.bf16.mxu0 %v18026_v5  ;;  %15555 = vmatpush3.bf16.msra.mxu0 %v16644_v34  ;;  %v16647_v5 = vld [vmem:[#allocation3 + $0x238] sm:$0xff]   ;;  %v8940_v30 = vsel %vm17625_vm4, 0, %v8939_v14 }
 0x23b   :  { %15556 = vmatprep.subr.bf16.mxu0 %v16645_v47  ;;  %8941 = vst [vmem:[#allocation2 + $0xc8] sm:$0x10] %v8940_v30 }
 0x23c   :  { %v18276_v16 = vpop.f32.mrb[12].mxu1 }
 0x23d   :  { %v18282_v0 = vpop.f32.mrb[13].mxu1 }
 0x23e   :  { %15557 = vmatpush3.bf16.msra.mxu0 %v16645_v47  ;;  %v8942_v24 = vld [vmem:[#allocation2 + $0xe0] sm:$0x10] }
 0x23f   :  { %15558 = vmatprep.subr.bf16.mxu0 %v16646_v52  ;;  %v8943_v61 = vsel %vm17625_vm4, 0, %v8942_v24 }
 0x240   :  { %8944 = vst [vmem:[#allocation2 + $0xe0] sm:$0x10] %v8943_v61  ;;  %v8954_v61 = vld [vmem:[#allocation2 + $0x200] sm:$0x10] }
 0x241   :  { %15495 = vmatmul.mubr.bf16.gmra.mrb[12].mxu0 %v18039_v15  ;;  %v18284_v15 = vpop.f32.mrb[14].mxu1  ;;  %v8955_v41 = vsel %vm17625_vm4, 0, %v8954_v61  ;;  %v18354_v61 = vld [vmem:[#allocation2 + $0x230] sm:$0xff] }
 0x242   :  { %15498 = vmatprep.mubr.bf16.mxu0 %v18041_v31  ;;  %15559 = vmatpush3.bf16.msra.mxu0 %v16646_v52  ;;  %v18286_v31 = vpop.f32.mrb[15].mxu1 }
 0x243   :  { %15560 = vmatprep.subr.bf16.mxu0 %v16647_v5 }
 0x244   :  { %v18290_v43 = vpop.f32.mrb[16].mxu1 }
 0x245   :  { %v18292_v34 = vpop.f32.mrb[17].mxu1 }
 0x246   :  { %15561 = vmatpush3.bf16.msra.mxu0 %v16647_v5  ;;  %v18296_v47 = vpop.f32.mrb[18].mxu1 }
 0x247   :  { %v18298_v32 = vpop.f32.mrb[19].mxu1 }
 0x249   :  { %15499 = vmatmul.mubr.bf16.gmra.mrb[16].mxu0 %v18049_v11 }
 0x24a   :  { %15502 = vmatprep.mubr.bf16.mxu0 %v18057_v37 }
 0x24c   :  { %v18302_v11 = vpop.f32.mrb[20].mxu1 }
 0x24d   :  { %v18304_v37 = vpop.f32.mrb[21].mxu1 }
 0x24e   :  { %v18306_v38 = vpop.f32.mrb[22].mxu1 }
 0x24f   :  { %v18308_v3 = vpop.f32.mrb[23].mxu1 }
 0x251   :  { %15503 = vmatmul.mubr.bf16.gmra.mrb[20].mxu0 %v18066_v10 }
 0x252   :  { %15506 = vmatprep.mubr.bf16.mxu0 %v18070_v18  ;;  %v8951_v18 = vld [vmem:[#allocation2 + $0x1e8] sm:$0x10] }
 0x254   :  { %v18312_v52 = vpop.f32.mrb[24].mxu1 }
 0x255   :  { %v18314_v14 = vpop.f32.mrb[25].mxu1 }
 0x256   :  { %v18316_v5 = vpop.f32.mrb[26].mxu1 }
 0x257   :  { %v18318_v10 = vpop.f32.mrb[27].mxu1 }
 0x259   :  { %15507 = vmatmul.mubr.bf16.gmra.mrb[24].mxu0 %v18082_v57  ;;  %v8952_v57 = vsel %vm17625_vm4, 0, %v8951_v18  ;;  %v18342_v18 = vld [vmem:[#allocation2 + $0x218] sm:$0xff] }
 0x25a   :  { %15510 = vmatprep.mubr.bf16.mxu0 %v18087_v28  ;;  %8953 = vst [vmem:[#allocation2 + $0x1e8] sm:$0x10] %v8952_v57  ;;  %v8958_v57 = vsel %vm17625_vm4, 0, %v8957_v54  ;;  %v18360_v54 = vld [vmem:[#allocation2 + $0x248] sm:$0xff] }
 0x25b   :  { %8959 = vst [vmem:[#allocation2 + $0x218] sm:$0x10] %v8958_v57 }
 0x25c   :  { %v18322_v30 = vpop.f32.mrb[28].mxu1 }
 0x25d   :  { %23048 = vst [vmem:[#allocation9_spill] sm:$0xff] %v18322_v30  ;;  %v18328_v28 = vpop.f32.mrb[29].mxu1 }
 0x25e   :  { %23049 = vst [vmem:[#allocation10_spill] sm:$0xff] %v18328_v28  ;;  %v18330_v19 = vpop.f32.mrb[30].mxu1 }
 0x25f   :  { %23050 = vst [vmem:[#allocation11_spill] sm:$0xff] %v18330_v19  ;;  %v18332_v24 = vpop.f32.mrb[31].mxu1  ;;  %v8960_v19 = vld [vmem:[#allocation2 + $0x230] sm:$0x10] }
 0x260   :  { %23051 = vst [vmem:[#allocation12_spill] sm:$0xff] %v18332_v24 }
 0x261   :  { %15511 = vmatmul.mubr.bf16.gmra.mrb[28].mxu0 %v18100_v29 }
 0x262   :  { %15514 = vmatprep.mubr.bf16.mxu0 %v18098_v8  ;;  %v18336_v8 = vld [vmem:[#allocation2 + $0x200] sm:$0xff] }
 0x263   :  { %8956 = vst [vmem:[#allocation2 + $0x200] sm:$0x10] %v8955_v41  ;;  %v8961_v41 = vsel %vm17625_vm4, 0, %v8960_v19  ;;  %v18372_v19 = vld [vmem:[#allocation2 + $0x260] sm:$0xff] }
 0x264   :  { %v18340_v30 = vpop.f32.mrb[32].mxu1  ;;  %8962 = vst [vmem:[#allocation2 + $0x230] sm:$0x10] %v8961_v41 }
 0x265   :  { %23052 = vst [vmem:[#allocation13_spill] sm:$0xff] %v18340_v30  ;;  %v18346_v24 = vpop.f32.mrb[33].mxu1  ;;  %v8963_v30 = vld [vmem:[#allocation2 + $0x248] sm:$0x10] }
 0x266   :  { %23053 = vst [vmem:[#allocation14_spill] sm:$0xff] %v18346_v24  ;;  %v8964_v57 = vsel %vm17625_vm4, 0, %v8963_v30  ;;  %v18376_v30 = vld [vmem:[#allocation2 + $0x278] sm:$0xff]  ;;  %v5896_v24 = vld [vmem:[#allocation2 + $0x88] sm:$0x1] }
 0x267   :  { %8965 = vst [vmem:[#allocation2 + $0x248] sm:$0x10] %v8964_v57 }
 0x269   :  { %15515 = vmatmul.mubr.bf16.gmra.mrb[32].mxu0 %v18110_v46  ;;  %v18348_v46 = vpop.f32.mrb[34].mxu1 }
 0x26a   :  { %15518 = vmatprep.mubr.bf16.mxu0 %v18114_v7  ;;  %23054 = vst [vmem:[#allocation15_spill] sm:$0xff] %v18348_v46  ;;  %v18350_v7 = vpop.f32.mrb[35].mxu1  ;;  %v8966_v46 = vld [vmem:[#allocation2 + $0x260] sm:$0x10] }
 0x26b   :  { %23055 = vst [vmem:[#allocation16_spill] sm:$0xff] %v18350_v7  ;;  %v8967_v41 = vsel %vm17625_vm4, 0, %v8966_v46 }
 0x26c   :  { %v18358_v28 = vpop.f32.mrb[36].mxu1  ;;  %8968 = vst [vmem:[#allocation2 + $0x260] sm:$0x10] %v8967_v41 }
 0x26d   :  { %23056 = vst [vmem:[#allocation17_spill] sm:$0xff] %v18358_v28  ;;  %v18364_v7 = vpop.f32.mrb[37].mxu1  ;;  %v8969_v28 = vld [vmem:[#allocation2 + $0x278] sm:$0x10] }
 0x26e   :  { %23057 = vst [vmem:[#allocation18_spill] sm:$0xff] %v18364_v7  ;;  %v8970_v57 = vsel %vm17625_vm4, 0, %v8969_v28 }
 0x26f   :  { %8971 = vst [vmem:[#allocation2 + $0x278] sm:$0x10] %v8970_v57  ;;  %v5892_v57 = vld [vmem:[#allocation2 + $0x58] sm:$0x1] }
 0x271   :  { %15519 = vmatmul.mubr.bf16.gmra.mrb[36].mxu0 %v18127_v36  ;;  %v18366_v36 = vpop.f32.mrb[38].mxu1 }
 0x272   :  { %15522 = vmatprep.mubr.bf16.mxu0 %v18129_v1  ;;  %23058 = vst [vmem:[#allocation19_spill] sm:$0xff] %v18366_v36  ;;  %v18368_v1 = vpop.f32.mrb[39].mxu1 }
 0x273   :  { %23059 = vst [vmem:[#allocation20_spill] sm:$0xff] %v18368_v1  ;;  %v8910_v1 = vld [vmem:[#allocation2 + $0x290] sm:$0x1f] }
 0x279   :  { %15523 = vmatmul.mubr.bf16.gmra.mrb[40].mxu0 %v18139_v50  ;;  %v18382_v50 = vld [vmem:[#allocation2 + $0x290] sm:$0xff] }
 0x27a   :  { %15526 = vmatprep.mubr.bf16.mxu0 %v18143_v62  ;;  %v8911_v62 = vsel %vm18272_vm10, 0, %v8910_v1 }
 0x27b   :  { %8912 = vst [vmem:[#allocation2 + $0x290] sm:$0x1f] %v8911_v62  ;;  %v5894_v62 = vld [vmem:[#allocation2 + $0x70] sm:$0x1] }
 0x281   :  { %15527 = vmatmul.mubr.bf16.gmra.mrb[44].mxu0 %v18155_v39  ;;  %v5956_v39 = vshll.u32 %v18210_v44, 16 }
 0x282   :  { %15530 = vmatprep.mubr.bf16.mxu0 %v18157_v40  ;;  %v8972_v46 = vld [vmem:[#allocation2 + $0x290] sm:$0x10]  ;;  %v5890_v40 = vld [vmem:[#allocation2 + $0x40] sm:$0x1] }
 0x283   :  { %v8973_v28 = vsel %vm17625_vm4, 0, %v8972_v46  ;;  %v5958_v1 = vrot.slane %v5956_v39, 1  ;;  %v5961_v41 = vshll.u32 %v5890_v40, 16  ;;  %v5978_v39 = vshrl.u32 %v18229_v13, 16 }
 0x284   :  { %8974 = vst [vmem:[#allocation2 + $0x290] sm:$0x10] %v8973_v28  ;;  %v5973_v28 = vshll.u32 %v5892_v57, 16  ;;  %vm10333_vm4 = vsmask.f32 7440 }
 0x285   :  { %v5959_v2 = vor.u32 %v5958_v1, %v5954_v22  ;;  %v5992_v1 = vshll.u32 %v18235_v42, 16 }
 0x286   :  { %v5975_v22 = vrot.slane %v5973_v28, 1 }
 0x289   :  { %15531 = vmatmul.mubr.bf16.gmra.mrb[48].mxu0 %v18170_v4  ;;  %v5968_v4 = vshll.u32 %v18217_v9, 16 }
 0x28a   :  { %15534 = vmatprep.mubr.bf16.mxu0 %v18172_v17  ;;  %v5963_v17 = vrot.slane %v5961_v41, 1 }
 0x28b   :  { %v5970_v46 = vrot.slane %v5968_v4, 1  ;;  %v5898_v4 = vld [vmem:[#allocation2 + $0xa0] sm:$0x1] }
 0x28c   :  { %v5964_v44 = vsel %vm1523_vm5, %v5959_v2, %v5963_v17  ;;  %v5990_v2 = vshrl.u32 %v18235_v42, 16  ;;  %v5997_v17 = vshll.u32 %v5896_v24, 16  ;;  %v6028_v42 = vshll.u32 %v18265_v48, 16 }
 0x28e   :  { %v5999_v28 = vrot.slane %v5997_v17, 1 }
 0x291   :  { %15535 = vmatmul.mubr.bf16.gmra.mrb[52].mxu0 %v18181_v12  ;;  %v5980_v12 = vshll.u32 %v18229_v13, 16  ;;  %v5994_v13 = vrot.slane %v5992_v1, 1 }
 0x292   :  { %15538 = vmatprep.mubr.bf16.mxu0 %v18183_v20  ;;  %v5966_v20 = vshrl.u32 %v18217_v9, 16  ;;  %v6004_v9 = vshll.u32 %v18247_v53, 16 }
 0x293   :  { %v5982_v40 = vrot.slane %v5980_v12, 1 }
 0x294   :  { %v5971_v36 = vor.u32 %v5970_v46, %v5966_v20  ;;  %v6009_v20 = vshll.u32 %v5898_v4, 16  ;;  %v5995_v46 = vor.u32 %v5994_v13, %v5990_v2  ;;  %v6026_v2 = vshrl.u32 %v18265_v48, 16 }
 0x295   :  { %v5983_v41 = vor.u32 %v5982_v40, %v5978_v39  ;;  %v6030_v13 = vrot.slane %v6028_v42, 1 }
 0x296   :  { %v5976_v57 = vsel %vm1523_vm5, %v5971_v36, %v5975_v22  ;;  %v6011_v36 = vrot.slane %v6009_v20, 1  ;;  %v6000_v1 = vsel %vm1523_vm5, %v5995_v46, %v5999_v28  ;;  %v6040_v20 = vshll.u32 %v18278_v23, 16 }
 0x297   :  { %v6031_v46 = vor.u32 %v6030_v13, %v6026_v2  ;;  %v5907_v13 = vld [vmem:[#allocation2 + $0x110] sm:$0xff] }
 0x299   :  { %15539 = vmatmul.mubr.bf16.gmra.mrb[56].mxu0 %v18191_v25  ;;  %v5985_v25 = vshll.u32 %v5894_v62, 16  ;;  %v6006_v62 = vrot.slane %v6004_v9, 1 }
 0x29a   :  { %15542 = vmatprep.mubr.bf16.mxu0 %v18193_v60 }
 0x29b   :  { %v5987_v7 = vrot.slane %v5985_v25, 1  ;;  %v5900_v25 = vld [vmem:[#allocation2 + $0xb8] sm:$0x1] }
 0x29c   :  { %v6021_v4 = vshll.u32 %v5900_v25, 16 }
 0x29d   :  { %v5988_v12 = vsel %vm1523_vm5, %v5983_v41, %v5987_v7  ;;  %v5902_v7 = vld [vmem:[#allocation2 + $0xd0] sm:$0x1]  ;;  %v6014_v41 = vshrl.u32 %v18253_v55, 16 }
 0x29e   :  { %v6033_v17 = vshll.u32 %v5902_v7, 16  ;;  %v6038_v7 = vshrl.u32 %v18278_v23, 16 }
 0x2a0   :  { %v6035_v28 = vrot.slane %v6033_v17, 1  ;;  %v5909_v17 = vld [vmem:[#allocation2 + $0x128] sm:$0xff] }
 0x2a1   :  { %15543 = vmatmul.mubr.bf16.gmra.mrb[60].mxu0 %v18100_v29  ;;  %v6002_v29 = vshrl.u32 %v18247_v53, 16  ;;  %v6076_v23 = vshll.u32 %v5909_v17, 16 }
 0x2a2   :  { %15562 = vmatprep.mubr.bf16.mxu0 %v5964_v44  ;;  %v6016_v44 = vshll.u32 %v18253_v55, 16  ;;  %v5904_v55 = vld [vmem:[#allocation2 + $0xe8] sm:$0x1] }
 0x2a3   :  { %v6007_v40 = vor.u32 %v6006_v62, %v6002_v29  ;;  %v6023_v62 = vrot.slane %v6021_v4, 1 }
 0x2a4   :  { %v18409_v39 = vpop.f32.mrb[40].mxu1  ;;  %v6018_v9 = vrot.slane %v6016_v44, 1 }
 0x2a5   :  { %v18412_v24 = vpop.f32.mrb[41].mxu1 }
 0x2a6   :  { %23060 = vst [vmem:[#allocation21_spill] sm:$0xff] %v18412_v24  ;;  %v18414_v22 = vpop.f32.mrb[42].mxu1  ;;  %v6019_v29 = vor.u32 %v6018_v9, %v6014_v41  ;;  %v6045_v41 = vshll.u32 %v5904_v55, 16  ;;  %v6036_v9 = vsel %vm1523_vm5, %v6031_v46, %v6035_v28  ;;  %v5910_v55 = vld [vmem:[#allocation2 + $0x130] sm:$0x1] }
 0x2a7   :  { %23061 = vst [vmem:[#allocation22_spill] sm:$0xff] %v18414_v22  ;;  %v18416_v53 = vpop.f32.mrb[43].mxu1 }
 0x2a8   :  { %23062 = vst [vmem:[#allocation23_spill] sm:$0xff] %v18416_v53  ;;  %v6024_v42 = vsel %vm1523_vm5, %v6019_v29, %v6023_v62  ;;  %v5908_v62 = vld [vmem:[#allocation2 + $0x118] sm:$0x1] }
 0x2a9   :  { %15563 = vmatmul.mubr.bf16.vlgmr.msra.gmra.mrb[0].mxu0 %v5976_v57  ;;  %v6012_v57 = vsel %vm1523_vm5, %v6007_v40, %v6011_v36  ;;  %v5906_v40 = vld [vmem:[#allocation2 + $0x100] sm:$0x1] }
 0x2aa   :  { %15566 = vmatprep.mubr.bf16.mxu0 %v5988_v12  ;;  %v5905_v12 = vld [vmem:[#allocation2 + $0xf8] sm:$0xff]  ;;  %v6057_v2 = vshll.u32 %v5906_v40, 16 }
 0x2ab   :  { %v6052_v44 = vshll.u32 %v5905_v12, 16  ;;  %v6050_v4 = vshrl.u32 %v5905_v12, 16 }
 0x2ac   :  { %v18423_v53 = vpop.f32.mrb[44].mxu1  ;;  %v6059_v29 = vrot.slane %v6057_v2, 1 }
 0x2ad   :  { %23063 = vst [vmem:[#allocation24_spill] sm:$0xff] %v18423_v53  ;;  %v18425_v25 = vpop.f32.mrb[45].mxu1  ;;  %v6047_v53 = vrot.slane %v6045_v41, 1  ;;  %v6078_v41 = vrot.slane %v6076_v23, 1 }
 0x2ae   :  { %23064 = vst [vmem:[#allocation25_spill] sm:$0xff] %v18425_v25  ;;  %v18427_v36 = vpop.f32.mrb[46].mxu1 }
 0x2af   :  { %23065 = vst [vmem:[#allocation26_spill] sm:$0xff] %v18427_v36  ;;  %v18429_v48 = vpop.f32.mrb[47].mxu1  ;;  %v6064_v36 = vshll.u32 %v5907_v13, 16 }
 0x2b0   :  { %23066 = vst [vmem:[#allocation27_spill] sm:$0xff] %v18429_v48 }
 0x2b1   :  { %15567 = vmatmul.mubr.bf16.gmra.mrb[4].mxu0 %v6000_v1  ;;  %v6042_v1 = vrot.slane %v6040_v20, 1  ;;  %v6066_v40 = vrot.slane %v6064_v36, 1 }
 0x2b2   :  { %15570 = vmatprep.mubr.bf16.mxu0 %v6012_v57  ;;  %v6054_v57 = vrot.slane %v6052_v44, 1  ;;  %v6062_v44 = vshrl.u32 %v5907_v13, 16  ;;  %v5914_v13 = vld [vmem:[#allocation2 + $0x160] sm:$0x1] }
 0x2b3   :  { %v6043_v25 = vor.u32 %v6042_v1, %v6038_v7  ;;  %v6074_v1 = vshrl.u32 %v5909_v17, 16 }
 0x2b4   :  { %v18434_v22 = vpop.f32.mrb[48].mxu1  ;;  %v6055_v48 = vor.u32 %v6054_v57, %v6050_v4  ;;  %v5911_v4 = vld [vmem:[#allocation2 + $0x140] sm:$0xff]  ;;  %v5913_v57 = vld [vmem:[#allocation2 + $0x158] sm:$0xff]  ;;  %v6067_v2 = vor.u32 %v6066_v40, %v6062_v44 }
 0x2b5   :  { %23067 = vst [vmem:[#allocation28_spill] sm:$0xff] %v18434_v22  ;;  %v18436_v20 = vpop.f32.mrb[49].mxu1  ;;  %v6048_v28 = vsel %vm1523_vm5, %v6043_v25, %v6047_v53  ;;  %v6088_v22 = vshll.u32 %v5911_v4, 16  ;;  %v5912_v53 = vld [vmem:[#allocation2 + $0x148] sm:$0x1]  ;;  %v6100_v25 = vshll.u32 %v5913_v57, 16 }
 0x2b6   :  { %23068 = vst [vmem:[#allocation29_spill] sm:$0xff] %v18436_v20  ;;  %v18438_v46 = vpop.f32.mrb[50].mxu1  ;;  %v6060_v7 = vsel %vm1523_vm5, %v6055_v48, %v6059_v29  ;;  %v6098_v44 = vshrl.u32 %v5913_v57, 16 }
 0x2b7   :  { %23069 = vst [vmem:[#allocation30_spill] sm:$0xff] %v18438_v46  ;;  %v18440_v12 = vpop.f32.mrb[51].mxu1  ;;  %v6090_v23 = vrot.slane %v6088_v22, 1  ;;  %v6102_v40 = vrot.slane %v6100_v25, 1 }
 0x2b8   :  { %23070 = vst [vmem:[#allocation31_spill] sm:$0xff] %v18440_v12  ;;  %v6079_v12 = vor.u32 %v6078_v41, %v6074_v1  ;;  %v5917_v1 = vld [vmem:[#allocation2 + $0x188] sm:$0xff] }
 0x2b9   :  { %15571 = vmatmul.mubr.bf16.gmra.mrb[8].mxu0 %v6024_v42  ;;  %v6069_v42 = vshll.u32 %v5908_v62, 16  ;;  %v6086_v62 = vshrl.u32 %v5911_v4, 16  ;;  %v6124_v4 = vshll.u32 %v5917_v1, 16 }
 0x2ba   :  { %15574 = vmatprep.mubr.bf16.mxu0 %v6036_v9  ;;  %v6081_v9 = vshll.u32 %v5910_v55, 16  ;;  %v6093_v55 = vshll.u32 %v5912_v53, 16 }
 0x2bb   :  { %v6071_v20 = vrot.slane %v6069_v42, 1  ;;  %v6105_v42 = vshll.u32 %v5914_v13, 16  ;;  %v6091_v41 = vor.u32 %v6090_v23, %v6086_v62  ;;  %v6122_v62 = vshrl.u32 %v5917_v1, 16 }
 0x2bc   :  { %v18444_v46 = vpop.f32.mrb[52].mxu1  ;;  %v6083_v24 = vrot.slane %v6081_v9, 1  ;;  %v6095_v9 = vrot.slane %v6093_v55, 1  ;;  %v6126_v23 = vrot.slane %v6124_v4, 1 }
 0x2bd   :  { %23071 = vst [vmem:[#allocation32_spill] sm:$0xff] %v18444_v46  ;;  %v18446_v36 = vpop.f32.mrb[53].mxu1  ;;  %v6072_v29 = vsel %vm1523_vm5, %v6067_v2, %v6071_v20  ;;  %v6107_v46 = vrot.slane %v6105_v42, 1  ;;  %v5916_v20 = vld [vmem:[#allocation2 + $0x178] sm:$0x1] }
 0x2be   :  { %23072 = vst [vmem:[#allocation33_spill] sm:$0xff] %v18446_v36  ;;  %v18448_v48 = vpop.f32.mrb[54].mxu1  ;;  %v5918_v2 = vld [vmem:[#allocation2 + $0x190] sm:$0x1]  ;;  %v6096_v57 = vsel %vm1523_vm5, %v6091_v41, %v6095_v9  ;;  %v6117_v13 = vshll.u32 %v5916_v20, 16 }
 0x2bf   :  { %23073 = vst [vmem:[#allocation34_spill] sm:$0xff] %v18448_v48  ;;  %v18450_v17 = vpop.f32.mrb[55].mxu1  ;;  %v6129_v55 = vshll.u32 %v5918_v2, 16  ;;  %v5922_v41 = vld [vmem:[#allocation2 + $0x1f0] sm:$0x1] }
 0x2c0   :  { %23074 = vst [vmem:[#allocation35_spill] sm:$0xff] %v18450_v17  ;;  %v6103_v17 = vor.u32 %v6102_v40, %v6098_v44  ;;  %v6119_v44 = vrot.slane %v6117_v13, 1  ;;  %v16961_v40 = vld [vmem:[#allocation2] sm:$0xff] }
 0x2c1   :  { %15575 = vmatmul.mubr.bf16.gmra.mrb[12].mxu0 %v6048_v28  ;;  %v6084_v28 = vsel %vm1523_vm5, %v6079_v12, %v6083_v24  ;;  %v6136_v42 = vshll.u32 %v16961_v40, 16  ;;  %v6134_v9 = vshrl.u32 %v16961_v40, 16 }
 0x2c2   :  { %15578 = vmatprep.mubr.bf16.mxu0 %v6060_v7  ;;  %v5915_v7 = vld [vmem:[#allocation2 + $0x170] sm:$0xff] }
 0x2c3   :  { %v6112_v36 = vshll.u32 %v5915_v7, 16  ;;  %v6110_v53 = vshrl.u32 %v5915_v7, 16  ;;  %v6148_v7 = vshll.u32 %v18324_v21, 16  ;;  %v6138_v20 = vrot.slane %v6136_v42, 1 }
 0x2c4   :  { %v18454_v48 = vpop.f32.mrb[56].mxu1  ;;  %v6170_v42 = vshrl.u32 %v18342_v18, 16 }
 0x2c5   :  { %23075 = vst [vmem:[#allocation36_spill] sm:$0xff] %v18454_v48  ;;  %v18456_v22 = vpop.f32.mrb[57].mxu1  ;;  %v6114_v25 = vrot.slane %v6112_v36, 1  ;;  %v5920_v48 = vld [vmem:[#allocation2 + $0x1a8] sm:$0x1]  ;;  %v18476_v13 = vor.u32 %v6138_v20, %v6134_v9  ;;  %v6184_v20 = vshll.u32 %v18354_v61, 16 }
 0x2c6   :  { %23076 = vst [vmem:[#allocation37_spill] sm:$0xff] %v18456_v22  ;;  %v18458_v24 = vpop.f32.mrb[58].mxu1  ;;  %v6141_v4 = vshll.u32 %v5920_v48, 16 }
 0x2c7   :  { %23077 = vst [vmem:[#allocation38_spill] sm:$0xff] %v18458_v24  ;;  %v18460_v12 = vpop.f32.mrb[59].mxu1  ;;  %v6127_v24 = vor.u32 %v6126_v23, %v6122_v62  ;;  %v6160_v62 = vshll.u32 %v18336_v8, 16 }
 0x2c8   :  { %23078 = vst [vmem:[#allocation39_spill] sm:$0xff] %v18460_v12  ;;  %v6131_v12 = vrot.slane %v6129_v55, 1 }
 0x2c9   :  { %15579 = vmatmul.mubr.bf16.gmra.mrb[16].mxu0 %v6072_v29  ;;  %v6108_v29 = vsel %vm1523_vm5, %v6103_v17, %v6107_v46 }
 0x2ca   :  { %15582 = vmatprep.mubr.bf16.mxu0 %v6084_v28  ;;  %v6115_v28 = vor.u32 %v6114_v25, %v6110_v53  ;;  %v6132_v2 = vsel %vm1523_vm5, %v6127_v24, %v6131_v12  ;;  %v6150_v53 = vrot.slane %v6148_v7, 1  ;;  %v6153_v25 = vshll.u32 %v5922_v41, 16 }
 0x2cb   :  { %v6162_v24 = vrot.slane %v6160_v62, 1 }
 0x2cc   :  { %v18464_v22 = vpop.f32.mrb[60].mxu1  ;;  %v6120_v1 = vsel %vm1523_vm5, %v6115_v28, %v6119_v44  ;;  %v6155_v55 = vrot.slane %v6153_v25, 1  ;;  %v6172_v28 = vshll.u32 %v18342_v18, 16  ;;  %v5926_v44 = vld [vmem:[#allocation2 + $0x220] sm:$0x1]  ;;  %v6182_v25 = vshrl.u32 %v18354_v61, 16 }
 0x2cd   :  { %v18467_v36 = vpop.f32.mrb[61].mxu1  ;;  %v6177_v41 = vshll.u32 %v5926_v44, 16  ;;  %v5934_v61 = vld [vmem:[#allocation2 + $0x280] sm:$0x1] }
 0x2ce   :  { %v18469_v46 = vpop.f32.mrb[62].mxu1  ;;  %v6174_v7 = vrot.slane %v6172_v28, 1 }
 0x2cf   :  { %v18471_v17 = vpop.f32.mrb[63].mxu1 }
 0x2d0   :  { %23079 = vst [vmem:[#allocation40_spill] sm:$0xff] %v18471_v17  ;;  %v5924_v17 = vld [vmem:[#allocation2 + $0x208] sm:$0x1] }
 0x2d1   :  { %15583 = vmatmul.mubr.bf16.gmra.mrb[20].mxu0 %v6096_v57  ;;  %v6146_v57 = vshrl.u32 %v18324_v21, 16  ;;  %v6158_v21 = vshrl.u32 %v18336_v8, 16  ;;  %v6165_v12 = vshll.u32 %v5924_v17, 16  ;;  %v5930_v8 = vld [vmem:[#allocation2 + $0x250] sm:$0x1] }
 0x2d2   :  { %15586 = vmatprep.mubr.bf16.mxu0 %v6108_v29  ;;  %v6143_v29 = vrot.slane %v6141_v4, 1  ;;  %v6175_v4 = vor.u32 %v6174_v7, %v6170_v42  ;;  %v6201_v28 = vshll.u32 %v5930_v8, 16  ;;  %v6220_v42 = vshll.u32 %v18376_v30, 16 }
 0x2d3   :  { %v6151_v23 = vor.u32 %v6150_v53, %v6146_v57  ;;  %v6167_v9 = vrot.slane %v6165_v12, 1  ;;  %v5928_v57 = vld [vmem:[#allocation2 + $0x238] sm:$0x1]  ;;  %v6196_v53 = vshll.u32 %v18360_v54, 16 }
 0x2d4   :  { %v6144_v48 = vsel %vm1523_vm5, %v18476_v13, %v6143_v29  ;;  %v6186_v29 = vrot.slane %v6184_v20, 1  ;;  %v6189_v18 = vshll.u32 %v5928_v57, 16  ;;  %v6203_v12 = vrot.slane %v6201_v28, 1  ;;  %v5937_v57 = vld [vmem:[#allocation2 + $0x2a8] sm:$0xff] }
 0x2d5   :  { %v6156_v40 = vsel %vm1523_vm5, %v6151_v23, %v6155_v55  ;;  %v6194_v23 = vshrl.u32 %v18360_v54, 16  ;;  %v6198_v55 = vrot.slane %v6196_v53, 1  ;;  %v6218_v20 = vshrl.u32 %v18376_v30, 16 }
 0x2d6   :  { %v6187_v44 = vor.u32 %v6186_v29, %v6182_v25 }
 0x2d9   :  { %15587 = vmatmul.mubr.bf16.gmra.mrb[24].mxu0 %v6120_v1  ;;  %v6163_v1 = vor.u32 %v6162_v24, %v6158_v21  ;;  %v6208_v21 = vshll.u32 %v18372_v19, 16  ;;  %v6199_v24 = vor.u32 %v6198_v55, %v6194_v23  ;;  %v6230_v55 = vshrl.u32 %v18382_v50, 16 }
 0x2da   :  { %15590 = vmatprep.mubr.bf16.mxu0 %v6132_v2  ;;  %v6179_v2 = vrot.slane %v6177_v41, 1  ;;  %v6206_v41 = vshrl.u32 %v18372_v19, 16  ;;  %v5938_v19 = vld [vmem:[#allocation2 + $0x2b0] sm:$0x1] }
 0x2db   :  { %v6168_v17 = vsel %vm1523_vm5, %v6163_v1, %v6167_v9  ;;  %v6210_v1 = vrot.slane %v6208_v21, 1  ;;  %v6204_v9 = vsel %vm1523_vm5, %v6199_v24, %v6203_v12  ;;  %v6249_v24 = vshll.u32 %v5938_v19, 16  ;;  %v5939_v12 = vld [vmem:[#allocation2 + $0x2c0] sm:$0xff] }
 0x2dc   :  { %v6180_v62 = vsel %vm1523_vm5, %v6175_v4, %v6179_v2  ;;  %v6222_v4 = vrot.slane %v6220_v42, 1  ;;  %v6225_v2 = vshll.u32 %v5934_v61, 16 }
 0x2dd   :  { %v6211_v53 = vor.u32 %v6210_v1, %v6206_v41  ;;  %v6251_v1 = vrot.slane %v6249_v24, 1 }
 0x2de   :  { %v6223_v25 = vor.u32 %v6222_v4, %v6218_v20  ;;  %v6227_v29 = vrot.slane %v6225_v2, 1  ;;  %v5942_v20 = vld [vmem:[#allocation2 + $0x2e0] sm:$0x1]  ;;  %v6254_v4 = vshrl.u32 %v5939_v12, 16 }
 0x2e1   :  { %15591 = vmatmul.mubr.bf16.gmra.mrb[28].mxu0 %v6144_v48  ;;  %v6191_v48 = vrot.slane %v6189_v18, 1  ;;  %v5936_v18 = vld [vmem:[#allocation2 + $0x298] sm:$0x1] }
 0x2e2   :  { %15594 = vmatprep.mubr.bf16.mxu0 %v6156_v40  ;;  %v5932_v40 = vld [vmem:[#allocation2 + $0x268] sm:$0x1]  ;;  %v6237_v30 = vshll.u32 %v5936_v18, 16 }
 0x2e3   :  { %v6192_v7 = vsel %vm1523_vm5, %v6187_v44, %v6191_v48  ;;  %v6213_v54 = vshll.u32 %v5932_v40, 16  ;;  %v6228_v44 = vsel %vm1523_vm5, %v6223_v25, %v6227_v29  ;;  %v6242_v48 = vshrl.u32 %v5937_v57, 16  ;;  %v5941_v40 = vld [vmem:[#allocation2 + $0x2d8] sm:$0xff]  ;;  %v5943_v29 = vld [vmem:[#allocation2 + $0x2f0] sm:$0xff]  ;;  %v5945_v18 = vld [vmem:[#allocation2 + $0x308] sm:$0xff] }
 0x2e4   :  { %v6239_v61 = vrot.slane %v6237_v30, 1  ;;  %v6273_v25 = vshll.u32 %v5942_v20, 16  ;;  %v5944_v30 = vld [vmem:[#allocation2 + $0x2f8] sm:$0x1]  ;;  %v6278_v24 = vshrl.u32 %v5943_v29, 16 }
 0x2e5   :  { %v6215_v8 = vrot.slane %v6213_v54, 1  ;;  %v5940_v54 = vld [vmem:[#allocation2 + $0x2c8] sm:$0x1] }
 0x2e7   :  { %v6216_v23 = vsel %vm1523_vm5, %v6211_v53, %v6215_v8  ;;  %v6261_v53 = vshll.u32 %v5940_v54, 16  ;;  %v6266_v8 = vshrl.u32 %v5941_v40, 16 }
 0x2e9   :  { %15595 = vmatmul.mubr.bf16.gmra.mrb[32].mxu0 %v6168_v17  ;;  %v6232_v17 = vshll.u32 %v18382_v50, 16  ;;  %v6263_v19 = vrot.slane %v6261_v53, 1  ;;  %v5950_v53 = vld [vmem:[#allocation2 + $0x340] sm:$0x1] }
 0x2ea   :  { %15598 = vmatprep.mubr.bf16.mxu0 %v6180_v62  ;;  %v6244_v62 = vshll.u32 %v5937_v57, 16 }
 0x2eb   :  { %v6234_v28 = vrot.slane %v6232_v17, 1 }
 0x2ec   :  { %v6246_v21 = vrot.slane %v6244_v62, 1 }
 0x2ed   :  { %v6235_v42 = vor.u32 %v6234_v28, %v6230_v55  ;;  %v6275_v28 = vrot.slane %v6273_v25, 1 }
 0x2ee   :  { %v6247_v41 = vor.u32 %v6246_v21, %v6242_v48  ;;  %v5946_v48 = vld [vmem:[#allocation2 + $0x310] sm:$0x1] }
 0x2ef   :  { %v6240_v50 = vsel %vm1523_vm5, %v6235_v42, %v6239_v61  ;;  %v6285_v42 = vshll.u32 %v5944_v30, 16  ;;  %v6290_v61 = vshrl.u32 %v5945_v18, 16 }
 0x2f0   :  { %v6252_v57 = vsel %vm1523_vm5, %v6247_v41, %v6251_v1  ;;  %v6297_v41 = vshll.u32 %v5946_v48, 16  ;;  %v5947_v1 = vld [vmem:[#allocation2 + $0x320] sm:$0xff]  ;;  %v5952_v48 = vld [vmem:[#allocation2 + $0x358] sm:$0x1] }
 0x2f1   :  { %15599 = vmatmul.mubr.bf16.gmra.mrb[36].mxu0 %v6192_v7  ;;  %v6256_v7 = vshll.u32 %v5939_v12, 16  ;;  %v6304_v20 = vshll.u32 %v5947_v1, 16 }
 0x2f2   :  { %15602 = vmatprep.mubr.bf16.mxu0 %v6204_v9  ;;  %v6268_v9 = vshll.u32 %v5941_v40, 16 }
 0x2f3   :  { %v6258_v2 = vrot.slane %v6256_v7, 1 }
 0x2f4   :  { %v6270_v17 = vrot.slane %v6268_v9, 1  ;;  %v6287_v9 = vrot.slane %v6285_v42, 1 }
 0x2f5   :  { %v6259_v62 = vor.u32 %v6258_v2, %v6254_v4  ;;  %v6299_v4 = vrot.slane %v6297_v41, 1  ;;  %v5948_v2 = vld [vmem:[#allocation2 + $0x328] sm:$0x1] }
 0x2f6   :  { %v6271_v55 = vor.u32 %v6270_v17, %v6266_v8  ;;  %v6302_v8 = vshrl.u32 %v5947_v1, 16  ;;  %v6306_v17 = vrot.slane %v6304_v20, 1  ;;  %v6309_v25 = vshll.u32 %v5948_v2, 16 }
 0x2f7   :  { %v6264_v21 = vsel %vm1523_vm5, %v6259_v62, %v6263_v19  ;;  %v6321_v19 = vshll.u32 %v5950_v53, 16 }
 0x2f8   :  { %v6276_v40 = vsel %vm1523_vm5, %v6271_v55, %v6275_v28  ;;  %v6311_v55 = vrot.slane %v6309_v25, 1  ;;  %v23081_v28 = vshrl.u32 %v18193_v60, 16 }
 0x2f9   :  { %15603 = vmatmul.mubr.bf16.gmra.mrb[40].mxu0 %v6216_v23  ;;  %v6280_v23 = vshll.u32 %v5943_v29, 16 }
 0x2fa   :  { %15606 = vmatprep.mubr.bf16.mxu0 %v6228_v44  ;;  %v6292_v44 = vshll.u32 %v5945_v18, 16  ;;  %v23080_v18 = vshll.u32 %v18193_v60, 16 }
 0x2fb   :  { %v6282_v12 = vrot.slane %v6280_v23, 1  ;;  %v6307_v23 = vor.u32 %v6306_v17, %v6302_v8 }
 0x2fc   :  { %v6294_v7 = vrot.slane %v6292_v44, 1  ;;  %v6318_v62 = vrot.slane %v23080_v18, 1  ;;  %v6323_v44 = vrot.slane %v6321_v19, 1 }
 0x2fd   :  { %v6283_v54 = vor.u32 %v6282_v12, %v6278_v24  ;;  %v6333_v24 = vshll.u32 %v5952_v48, 16 }
 0x2fe   :  { %v6319_v30 = vor.u32 %v6318_v62, %v23081_v28 }
 0x2ff   :  { %v6335_v42 = vrot.slane %v6333_v24, 1 }
 0x300   :  { %v6324_v12 = vsel %vm1523_vm5, %v6319_v30, %v6323_v44 }
 0x301   :  { %15607 = vmatmul.mubr.bf16.gmra.mrb[44].mxu0 %v6240_v50  ;;  %v6295_v50 = vor.u32 %v6294_v7, %v6290_v61 }
 0x302   :  { %15610 = vmatprep.mubr.bf16.mxu0 %v6252_v57  ;;  %v6288_v57 = vsel %vm1523_vm5, %v6283_v54, %v6287_v9 }
 0x303   :  { %v6300_v29 = vsel %vm1523_vm5, %v6295_v50, %v6299_v4 }
 0x309   :  { %15611 = vmatmul.mubr.bf16.gmra.mrb[48].mxu0 %v6264_v21  ;;  %v6312_v21 = vsel %vm1523_vm5, %v6307_v23, %v6311_v55 }
 0x30a   :  { %15614 = vmatprep.mubr.bf16.mxu0 %v6276_v40  ;;  %v6336_v40 = vsel %vm1523_vm5, %v18476_v13, %v6335_v42 }
 0x311   :  { %15615 = vmatmul.mubr.bf16.gmra.mrb[52].mxu0 %v6288_v57 }
 0x312   :  { %15618 = vmatprep.mubr.bf16.mxu0 %v6300_v29 }
 0x319   :  { %15619 = vmatmul.mubr.bf16.gmra.mrb[56].mxu0 %v6312_v21 }
 0x31a   :  { %15622 = vmatprep.mubr.bf16.mxu0 %v6324_v12 }
 0x321   :  { %15623 = vmatmul.mubr.bf16.gmra.mrb[60].mxu0 %v6336_v40 }
 0x37c   :  { %v15564_v61 = vpop.f32.mrb[0].mxu0 }
 0x37d   :  { %v18516_v7 = vadd.f32 %v15564_v61, %v18221_v59  ;;  %v6468_v60 = vpop.f32.mrb[1].mxu0 }
 0x37e   :  { %v18519_v41 = vadd.f32 %v6468_v60, %v18223_v33  ;;  %v15565_v1 = vpop.f32.mrb[2].mxu0 }
 0x37f   :  { %v18522_v54 = vadd.f32 %v15565_v1, %v18225_v58  ;;  %v6471_v9 = vpop.f32.mrb[3].mxu0 }
 0x380   :  { %v18525_v20 = vadd.f32 %v6471_v9, %v18227_v6 }
 0x382   :  { %v6787_v13 = vadd.f32 %v18525_v20, %v18519_v41 }
 0x384   :  { %v6788_v50 = vadd.f32 %v18516_v7, %v6787_v13  ;;  %v15568_v4 = vpop.f32.mrb[4].mxu0 }
 0x385   :  { %v18531_v59 = vadd.f32 %v15568_v4, %v18239_v26  ;;  %v6484_v2 = vpop.f32.mrb[5].mxu0 }
 0x386   :  { %v18534_v33 = vadd.f32 %v6484_v2, %v18241_v51  ;;  %v6789_v58 = vadd.f32 %v18522_v54, %v6788_v50  ;;  %v15569_v53 = vpop.f32.mrb[6].mxu0 }
 0x387   :  { %v18538_v57 = vadd.f32 %v15569_v53, %v18243_v27  ;;  %v6487_v6 = vpop.f32.mrb[7].mxu0 }
 0x388   :  { %v6790_v8 = vadd.f32 %v18534_v33, %v6789_v58  ;;  %v18542_v17 = vadd.f32 %v6487_v6, %v18245_v63 }
 0x38a   :  { %v6791_v25 = vadd.f32 %v18542_v17, %v6790_v8 }
 0x38c   :  { %v6792_v26 = vadd.f32 %v18531_v59, %v6791_v25  ;;  %v15572_v29 = vpop.f32.mrb[8].mxu0 }
 0x38d   :  { %v18547_v51 = vadd.f32 %v15572_v29, %v18257_v35  ;;  %v6500_v18 = vpop.f32.mrb[9].mxu0 }
 0x38e   :  { %v18550_v62 = vadd.f32 %v6500_v18, %v18259_v56  ;;  %v6793_v27 = vadd.f32 %v18538_v57, %v6792_v26  ;;  %v15573_v19 = vpop.f32.mrb[10].mxu0 }
 0x38f   :  { %v18554_v23 = vadd.f32 %v15573_v19, %v18261_v49  ;;  %v6503_v63 = vpop.f32.mrb[11].mxu0 }
 0x390   :  { %v6794_v55 = vadd.f32 %v18550_v62, %v6793_v27  ;;  %v18558_v28 = vadd.f32 %v6503_v63, %v18263_v45 }
 0x392   :  { %v6795_v30 = vadd.f32 %v18558_v28, %v6794_v55 }
 0x394   :  { %v6796_v35 = vadd.f32 %v18547_v51, %v6795_v30  ;;  %v15576_v44 = vpop.f32.mrb[12].mxu0 }
 0x395   :  { %v18563_v56 = vadd.f32 %v15576_v44, %v18276_v16  ;;  %v6516_v48 = vpop.f32.mrb[13].mxu0 }
 0x396   :  { %v18566_v21 = vadd.f32 %v6516_v48, %v18282_v0  ;;  %v6797_v49 = vadd.f32 %v18554_v23, %v6796_v35  ;;  %v15577_v24 = vpop.f32.mrb[14].mxu0 }
 0x397   :  { %v18570_v12 = vadd.f32 %v15577_v24, %v18284_v15  ;;  %v6519_v45 = vpop.f32.mrb[15].mxu0 }
 0x398   :  { %v6798_v42 = vadd.f32 %v18566_v21, %v6797_v49  ;;  %v18574_v40 = vadd.f32 %v6519_v45, %v18286_v31  ;;  %v23084_v45 = vld [vmem:[#allocation9_spill] sm:$0xff] }
 0x39a   :  { %v6799_v61 = vadd.f32 %v18574_v40, %v6798_v42 }
 0x39c   :  { %v6800_v16 = vadd.f32 %v18563_v56, %v6799_v61  ;;  %v15580_v60 = vpop.f32.mrb[16].mxu0  ;;  %v23086_v61 = vld [vmem:[#allocation10_spill] sm:$0xff] }
 0x39d   :  { %v18579_v0 = vadd.f32 %v15580_v60, %v18290_v43  ;;  %v6532_v1 = vpop.f32.mrb[17].mxu0 }
 0x39e   :  { %v18582_v9 = vadd.f32 %v6532_v1, %v18292_v34  ;;  %v6801_v15 = vadd.f32 %v18570_v12, %v6800_v16  ;;  %v15581_v13 = vpop.f32.mrb[18].mxu0  ;;  %v23088_v1 = vld [vmem:[#allocation11_spill] sm:$0xff] }
 0x39f   :  { %v18586_v50 = vadd.f32 %v15581_v13, %v18296_v47  ;;  %v6535_v31 = vpop.f32.mrb[19].mxu0 }
 0x3a0   :  { %v6802_v4 = vadd.f32 %v18582_v9, %v6801_v15  ;;  %v18590_v2 = vadd.f32 %v6535_v31, %v18298_v32  ;;  %v23090_v31 = vld [vmem:[#allocation12_spill] sm:$0xff] }
 0x3a2   :  { %v6803_v58 = vadd.f32 %v18590_v2, %v6802_v4 }
 0x3a4   :  { %v6804_v43 = vadd.f32 %v18579_v0, %v6803_v58  ;;  %v15584_v53 = vpop.f32.mrb[20].mxu0 }
 0x3a5   :  { %v18595_v34 = vadd.f32 %v15584_v53, %v18302_v11  ;;  %v6548_v6 = vpop.f32.mrb[21].mxu0 }
 0x3a6   :  { %v18598_v8 = vadd.f32 %v6548_v6, %v18304_v37  ;;  %v6805_v47 = vadd.f32 %v18586_v50, %v6804_v43  ;;  %v15585_v25 = vpop.f32.mrb[22].mxu0  ;;  %v23092_v6 = vld [vmem:[#allocation13_spill] sm:$0xff] }
 0x3a7   :  { %v18602_v26 = vadd.f32 %v15585_v25, %v18306_v38  ;;  %v6551_v32 = vpop.f32.mrb[23].mxu0 }
 0x3a8   :  { %v6806_v29 = vadd.f32 %v18598_v8, %v6805_v47  ;;  %v18606_v18 = vadd.f32 %v6551_v32, %v18308_v3  ;;  %v23094_v32 = vld [vmem:[#allocation14_spill] sm:$0xff] }
 0x3aa   :  { %v6807_v27 = vadd.f32 %v18606_v18, %v6806_v29 }
 0x3ac   :  { %v6808_v11 = vadd.f32 %v18595_v34, %v6807_v27  ;;  %v15588_v19 = vpop.f32.mrb[24].mxu0 }
 0x3ad   :  { %v18611_v37 = vadd.f32 %v15588_v19, %v18312_v52  ;;  %v6564_v63 = vpop.f32.mrb[25].mxu0  ;;  %v23096_v19 = vld [vmem:[#allocation15_spill] sm:$0xff] }
 0x3ae   :  { %v18614_v55 = vadd.f32 %v6564_v63, %v18314_v14  ;;  %v6809_v38 = vadd.f32 %v18602_v26, %v6808_v11  ;;  %v15589_v30 = vpop.f32.mrb[26].mxu0 }
 0x3af   :  { %23082 = vst [vmem:[#allocation41_spill] sm:$0xff] %v18611_v37  ;;  %v18618_v35 = vadd.f32 %v15589_v30, %v18316_v5  ;;  %v6567_v3 = vpop.f32.mrb[27].mxu0 }
 0x3b0   :  { %v6810_v44 = vadd.f32 %v18614_v55, %v6809_v38  ;;  %v18622_v48 = vadd.f32 %v6567_v3, %v18318_v10  ;;  %v23098_v3 = vld [vmem:[#allocation16_spill] sm:$0xff] }
 0x3b1   :  { %23083 = vst [vmem:[#allocation42_spill] sm:$0xff] %v18618_v35 }
 0x3b2   :  { %v6811_v49 = vadd.f32 %v18622_v48, %v6810_v44 }
 0x3b4   :  { %v6812_v52 = vadd.f32 %v18611_v37, %v6811_v49  ;;  %v15592_v24 = vpop.f32.mrb[28].mxu0 }
 0x3b5   :  { %v18627_v14 = vadd.f32 %v15592_v24, %v23084_v45  ;;  %v6580_v42 = vpop.f32.mrb[29].mxu0  ;;  %v23100_v45 = vld [vmem:[#allocation17_spill] sm:$0xff] }
 0x3b6   :  { %v18630_v16 = vadd.f32 %v6580_v42, %v23086_v61  ;;  %v6813_v5 = vadd.f32 %v18618_v35, %v6812_v52  ;;  %v15593_v60 = vpop.f32.mrb[30].mxu0 }
 0x3b7   :  { %23085 = vst [vmem:[#allocation9_spill] sm:$0xff] %v18627_v14  ;;  %v18634_v15 = vadd.f32 %v15593_v60, %v23088_v1  ;;  %v6583_v10 = vpop.f32.mrb[31].mxu0 }
 0x3b8   :  { %23087 = vst [vmem:[#allocation10_spill] sm:$0xff] %v18630_v16  ;;  %v6814_v13 = vadd.f32 %v18630_v16, %v6813_v5  ;;  %v18638_v4 = vadd.f32 %v6583_v10, %v23090_v31  ;;  %v23102_v5 = vld [vmem:[#allocation18_spill] sm:$0xff] }
 0x3b9   :  { %23089 = vst [vmem:[#allocation11_spill] sm:$0xff] %v18634_v15 }
 0x3ba   :  { %23091 = vst [vmem:[#allocation12_spill] sm:$0xff] %v18638_v4  ;;  %v6815_v58 = vadd.f32 %v18638_v4, %v6814_v13  ;;  %v23104_v13 = vld [vmem:[#allocation19_spill] sm:$0xff] }
 0x3bb   :  { %v23131_v4 = vld [vmem:[#allocation39_spill] sm:$0xff] }
 0x3bc   :  { %v6816_v43 = vadd.f32 %v18627_v14, %v6815_v58  ;;  %v15596_v53 = vpop.f32.mrb[32].mxu0  ;;  %v23130_v14 = vld [vmem:[#allocation38_spill] sm:$0xff] }
 0x3bd   :  { %v18643_v47 = vadd.f32 %v15596_v53, %v23092_v6  ;;  %v6596_v25 = vpop.f32.mrb[33].mxu0  ;;  %v23106_v53 = vld [vmem:[#allocation20_spill] sm:$0xff] }
 0x3be   :  { %v18646_v29 = vadd.f32 %v6596_v25, %v23094_v32  ;;  %v6817_v27 = vadd.f32 %v18634_v15, %v6816_v43  ;;  %v15597_v11 = vpop.f32.mrb[34].mxu0 }
 0x3bf   :  { %23093 = vst [vmem:[#allocation13_spill] sm:$0xff] %v18643_v47  ;;  %v18650_v63 = vadd.f32 %v15597_v11, %v23096_v19  ;;  %v6599_v38 = vpop.f32.mrb[35].mxu0 }
 0x3c0   :  { %23095 = vst [vmem:[#allocation14_spill] sm:$0xff] %v18646_v29  ;;  %v6818_v30 = vadd.f32 %v18646_v29, %v6817_v27  ;;  %v18654_v44 = vadd.f32 %v6599_v38, %v23098_v3  ;;  %v23109_v38 = vld [vmem:[#allocation21_spill] sm:$0xff] }
 0x3c1   :  { %23097 = vst [vmem:[#allocation15_spill] sm:$0xff] %v18650_v63 }
 0x3c2   :  { %23099 = vst [vmem:[#allocation16_spill] sm:$0xff] %v18654_v44  ;;  %v6819_v49 = vadd.f32 %v18654_v44, %v6818_v30  ;;  %v23127_v44 = vld [vmem:[#allocation35_spill] sm:$0xff] }
 0x3c4   :  { %v6820_v52 = vadd.f32 %v18643_v47, %v6819_v49  ;;  %v15600_v24 = vpop.f32.mrb[36].mxu0 }
 0x3c5   :  { %v18659_v42 = vadd.f32 %v15600_v24, %v23100_v45  ;;  %v6612_v61 = vpop.f32.mrb[37].mxu0 }
 0x3c6   :  { %v18662_v60 = vadd.f32 %v6612_v61, %v23102_v5  ;;  %v6821_v1 = vadd.f32 %v18650_v63, %v6820_v52  ;;  %v15601_v10 = vpop.f32.mrb[38].mxu0  ;;  %v23111_v52 = vld [vmem:[#allocation22_spill] sm:$0xff]  ;;  %v23113_v5 = vld [vmem:[#allocation23_spill] sm:$0xff] }
 0x3c7   :  { %23101 = vst [vmem:[#allocation17_spill] sm:$0xff] %v18659_v42  ;;  %v18666_v31 = vadd.f32 %v15601_v10, %v23104_v13  ;;  %v6615_v58 = vpop.f32.mrb[39].mxu0 }
 0x3c8   :  { %23103 = vst [vmem:[#allocation18_spill] sm:$0xff] %v18662_v60  ;;  %v6822_v43 = vadd.f32 %v18662_v60, %v6821_v1  ;;  %v18670_v6 = vadd.f32 %v6615_v58, %v23106_v53  ;;  %v23115_v58 = vld [vmem:[#allocation24_spill] sm:$0xff]  ;;  %v23125_v60 = vld [vmem:[#allocation33_spill] sm:$0xff] }
 0x3c9   :  { %23105 = vst [vmem:[#allocation19_spill] sm:$0xff] %v18666_v31 }
 0x3ca   :  { %23107 = vst [vmem:[#allocation20_spill] sm:$0xff] %v18670_v6  ;;  %v6823_v25 = vadd.f32 %v18670_v6, %v6822_v43 }
 0x3cc   :  { %v6824_v32 = vadd.f32 %v18659_v42, %v6823_v25  ;;  %v15604_v27 = vpop.f32.mrb[40].mxu0  ;;  %v23116_v25 = vld [vmem:[#allocation25_spill] sm:$0xff]  ;;  %v23123_v42 = vld [vmem:[#allocation31_spill] sm:$0xff] }
 0x3cd   :  { %v18675_v11 = vadd.f32 %v15604_v27, %v18409_v39  ;;  %v6628_v19 = vpop.f32.mrb[41].mxu0 }
 0x3ce   :  { %v18678_v30 = vadd.f32 %v6628_v19, %v23109_v38  ;;  %v6825_v3 = vadd.f32 %v18666_v31, %v6824_v32  ;;  %v15605_v49 = vpop.f32.mrb[42].mxu0  ;;  %v23118_v38 = vld [vmem:[#allocation26_spill] sm:$0xff] }
 0x3cf   :  { %23108 = vst [vmem:[#allocation43_spill] sm:$0xff] %v18675_v11  ;;  %v18682_v24 = vadd.f32 %v15605_v49, %v23111_v52  ;;  %v6631_v45 = vpop.f32.mrb[43].mxu0 }
 0x3d0   :  { %23110 = vst [vmem:[#allocation21_spill] sm:$0xff] %v18678_v30  ;;  %v6826_v61 = vadd.f32 %v18678_v30, %v6825_v3  ;;  %v18686_v1 = vadd.f32 %v6631_v45, %v23113_v5  ;;  %v23119_v45 = vld [vmem:[#allocation27_spill] sm:$0xff]  ;;  %v23122_v30 = vld [vmem:[#allocation30_spill] sm:$0xff] }
 0x3d1   :  { %23112 = vst [vmem:[#allocation22_spill] sm:$0xff] %v18682_v24 }
 0x3d2   :  { %23114 = vst [vmem:[#allocation23_spill] sm:$0xff] %v18686_v1  ;;  %v6827_v10 = vadd.f32 %v18686_v1, %v6826_v61 }
 0x3d4   :  { %v6828_v39 = vadd.f32 %v18675_v11, %v6827_v10  ;;  %v15608_v13 = vpop.f32.mrb[44].mxu0 }
 0x3d5   :  { %v18691_v43 = vadd.f32 %v15608_v13, %v23115_v58  ;;  %v6644_v53 = vpop.f32.mrb[45].mxu0  ;;  %v23120_v58 = vld [vmem:[#allocation28_spill] sm:$0xff] }
 0x3d6   :  { %v18694_v32 = vadd.f32 %v6644_v53, %v23116_v25  ;;  %v6829_v27 = vadd.f32 %v18682_v24, %v6828_v39  ;;  %v15609_v19 = vpop.f32.mrb[46].mxu0  ;;  %v23121_v53 = vld [vmem:[#allocation29_spill] sm:$0xff] }
 0x3d7   :  { %v18698_v3 = vadd.f32 %v15609_v19, %v23118_v38  ;;  %v6647_v49 = vpop.f32.mrb[47].mxu0 }
 0x3d8   :  { %23117 = vst [vmem:[#allocation24_spill] sm:$0xff] %v18694_v32  ;;  %v6830_v52 = vadd.f32 %v18694_v32, %v6829_v27  ;;  %v15977_v61 = vadd.f32 %v6647_v49, %v23119_v45  ;;  %v23124_v45 = vld [vmem:[#allocation32_spill] sm:$0xff] }
 0x3da   :  { %v6831_v5 = vadd.f32 %v15977_v61, %v6830_v52 }
 0x3dc   :  { %v6832_v10 = vadd.f32 %v18691_v43, %v6831_v5  ;;  %v15612_v13 = vpop.f32.mrb[48].mxu0 }
 0x3dd   :  { %v15978_v11 = vadd.f32 %v15612_v13, %v23120_v58  ;;  %v6660_v1 = vpop.f32.mrb[49].mxu0 }
 0x3de   :  { %v15979_v25 = vadd.f32 %v6660_v1, %v23121_v53  ;;  %v6833_v39 = vadd.f32 %v18698_v3, %v6832_v10  ;;  %v15613_v24 = vpop.f32.mrb[50].mxu0  ;;  %v23126_v1 = vld [vmem:[#allocation34_spill] sm:$0xff] }
 0x3df   :  { %v15980_v19 = vadd.f32 %v15613_v24, %v23122_v30  ;;  %v6663_v38 = vpop.f32.mrb[51].mxu0 }
 0x3e0   :  { %v6834_v31 = vadd.f32 %v15979_v25, %v6833_v39  ;;  %v15981_v27 = vadd.f32 %v6663_v38, %v23123_v42  ;;  %v23128_v42 = vld [vmem:[#allocation36_spill] sm:$0xff]  ;;  %v23129_v38 = vld [vmem:[#allocation37_spill] sm:$0xff] }
 0x3e2   :  { %v6835_v32 = vadd.f32 %v15981_v27, %v6834_v31 }
 0x3e4   :  { %v6836_v49 = vadd.f32 %v15978_v11, %v6835_v32  ;;  %v15616_v52 = vpop.f32.mrb[52].mxu0 }
 0x3e5   :  { %v15982_v5 = vadd.f32 %v15616_v52, %v23124_v45  ;;  %v6676_v6 = vpop.f32.mrb[53].mxu0 }
 0x3e6   :  { %v15983_v13 = vadd.f32 %v6676_v6, %v23125_v60  ;;  %v6837_v58 = vadd.f32 %v15980_v19, %v6836_v49  ;;  %v15617_v63 = vpop.f32.mrb[54].mxu0 }
 0x3e7   :  { %v15984_v53 = vadd.f32 %v15617_v63, %v23126_v1  ;;  %v6679_v10 = vpop.f32.mrb[55].mxu0 }
 0x3e8   :  { %v6838_v47 = vadd.f32 %v15983_v13, %v6837_v58  ;;  %v15985_v30 = vadd.f32 %v6679_v10, %v23127_v44 }
 0x3ea   :  { %v6839_v24 = vadd.f32 %v15985_v30, %v6838_v47 }
 0x3ec   :  { %v6840_v39 = vadd.f32 %v15982_v5, %v6839_v24  ;;  %v15620_v29 = vpop.f32.mrb[56].mxu0 }
 0x3ed   :  { %v15986_v31 = vadd.f32 %v15620_v29, %v23128_v42  ;;  %v6692_v32 = vpop.f32.mrb[57].mxu0 }
 0x3ee   :  { %v15987_v15 = vadd.f32 %v6692_v32, %v23129_v38  ;;  %v6841_v52 = vadd.f32 %v15984_v53, %v6840_v39  ;;  %v15621_v45 = vpop.f32.mrb[58].mxu0  ;;  %v23132_v38 = vld [vmem:[#allocation40_spill] sm:$0xff] }
 0x3ef   :  { %v15988_v60 = vadd.f32 %v15621_v45, %v23130_v14  ;;  %v6695_v6 = vpop.f32.mrb[59].mxu0 }
 0x3f0   :  { %v6842_v49 = vadd.f32 %v15987_v15, %v6841_v52  ;;  %v15989_v63 = vadd.f32 %v6695_v6, %v23131_v4 }
 0x3f2   :  { %v6843_v1 = vadd.f32 %v15989_v63, %v6842_v49 }
 0x3f4   :  { %v6844_v58 = vadd.f32 %v15986_v31, %v6843_v1  ;;  %v15624_v16 = vpop.f32.mrb[60].mxu0 }
 0x3f5   :  { %v15990_v47 = vadd.f32 %v15624_v16, %v18464_v22  ;;  %v6708_v44 = vpop.f32.mrb[61].mxu0 }
 0x3f6   :  { %v15991_v10 = vadd.f32 %v6708_v44, %v18467_v36  ;;  %v6845_v29 = vadd.f32 %v15988_v60, %v6844_v58  ;;  %v15625_v24 = vpop.f32.mrb[62].mxu0 }
 0x3f7   :  { %v15992_v42 = vadd.f32 %v15625_v24, %v18469_v46  ;;  %v6711_v39 = vpop.f32.mrb[63].mxu0 }
 0x3f8   :  { %v6846_v32 = vadd.f32 %v15991_v10, %v6845_v29  ;;  %v15993_v14 = vadd.f32 %v6711_v39, %v23132_v38 }
 0x3fa   :  { %v6847_v45 = vadd.f32 %v15993_v14, %v6846_v32 }
 0x3fc   :  { %v6848_v52 = vadd.f32 %v15990_v47, %v6847_v45 }
 0x3fe   :  { %v6849_v35 = vadd.f32 %v15992_v42, %v6848_v52 }
 0x400   :  { %v6850_v4 = vrot.slane %v6849_v35, 4 }
 0x402   :  { %v6851_v6 = vadd.f32 %v6850_v4, %v6849_v35 }
 0x404   :  { %v6852_v49 = vrot.slane %v6851_v6, 2 }
 0x406   :  { %v6853_v1 = vadd.f32 %v6852_v49, %v6851_v6 }
 0x408   :  { %v6854_v37 = vrot.slane %v6853_v1, 1 }
 0x40a   :  { %v6855_v22 = vadd.f32 %v6854_v37, %v6853_v1 }
 0x40c   :  { %v18720_v16 = vmul.f32 0.001953125, %v6855_v22 }
 0x40e   :  { %v18723_v36 = vsub.f32 %v15977_v61, %v18720_v16  ;;  %v18727_v46 = vsub.f32 %v18691_v43, %v18720_v16  ;;  %v18731_v58 = vsub.f32 %v18698_v3, %v18720_v16  ;;  %v18734_v44 = vsub.f32 %v15979_v25, %v18720_v16 }
 0x40f   :  { %v18737_v35 = vsub.f32 %v15981_v27, %v18720_v16  ;;  %v18740_v37 = vsub.f32 %v15978_v11, %v18720_v16  ;;  %v18743_v61 = vsub.f32 %v15980_v19, %v18720_v16  ;;  %v18746_v29 = vsub.f32 %v15983_v13, %v18720_v16 }
 0x410   :  { %v18749_v43 = vsub.f32 %v15985_v30, %v18720_v16  ;;  %v18752_v3 = vsub.f32 %v15982_v5, %v18720_v16  ;;  %v18755_v25 = vsub.f32 %v15984_v53, %v18720_v16  ;;  %v18758_v27 = vsub.f32 %v15987_v15, %v18720_v16 }
 0x411   :  { %v18761_v11 = vsub.f32 %v15989_v63, %v18720_v16  ;;  %v18764_v19 = vsub.f32 %v15986_v31, %v18720_v16  ;;  %v18767_v13 = vsub.f32 %v15988_v60, %v18720_v16  ;;  %v18770_v30 = vsub.f32 %v15991_v10, %v18720_v16 }
 0x412   :  { %23133 = vst [vmem:[#allocation25_spill] sm:$0xff] %v18752_v3  ;;  %23134 = vst [vmem:[#allocation26_spill] sm:$0xff] %v18755_v25  ;;  %v18773_v5 = vsub.f32 %v15993_v14, %v18720_v16  ;;  %v18776_v53 = vsub.f32 %v15990_v47, %v18720_v16  ;;  %v18779_v15 = vsub.f32 %v15992_v42, %v18720_v16 }
 0x413   :  { %23135 = vst [vmem:[#allocation27_spill] sm:$0xff] %v18758_v27  ;;  %23136 = vst [vmem:[#allocation28_spill] sm:$0xff] %v18761_v11  ;;  %v18783_v63 = vsub.f32 %v18519_v41, %v18720_v16  ;;  %v18787_v31 = vsub.f32 %v18525_v20, %v18720_v16  ;;  %v18791_v60 = vsub.f32 %v18516_v7, %v18720_v16 }
 0x414   :  { %23137 = vst [vmem:[#allocation29_spill] sm:$0xff] %v18764_v19  ;;  %23138 = vst [vmem:[#allocation30_spill] sm:$0xff] %v18767_v13  ;;  %v18799_v24 = vsub.f32 %v18522_v54, %v18720_v16  ;;  %v18803_v41 = vsub.f32 %v18534_v33, %v18720_v16  ;;  %v18809_v7 = vsub.f32 %v18542_v17, %v18720_v16 }
 0x415   :  { %v6922_v10 = vmul.f32 %v18783_v63, %v18783_v63  ;;  %v6923_v47 = vmul.f32 %v18787_v31, %v18787_v31  ;;  %v6924_v20 = vmul.f32 %v18791_v60, %v18791_v60  ;;  %v18815_v54 = vsub.f32 %v18531_v59, %v18720_v16 }
 0x416   :  { %v6925_v39 = vmul.f32 %v18799_v24, %v18799_v24  ;;  %v6926_v33 = vmul.f32 %v18803_v41, %v18803_v41  ;;  %v18821_v14 = vsub.f32 %v18538_v57, %v18720_v16  ;;  %v6927_v17 = vmul.f32 %v18809_v7, %v18809_v7 }
 0x417   :  { %v6986_v42 = vadd.f32 %v6923_v47, %v6922_v10  ;;  %v18827_v52 = vsub.f32 %v18550_v62, %v18720_v16  ;;  %v6928_v59 = vmul.f32 %v18815_v54, %v18815_v54  ;;  %v18833_v6 = vsub.f32 %v18558_v28, %v18720_v16 }
 0x418   :  { %v6929_v57 = vmul.f32 %v18821_v14, %v18821_v14  ;;  %v18839_v1 = vsub.f32 %v18547_v51, %v18720_v16  ;;  %v18845_v10 = vsub.f32 %v18554_v23, %v18720_v16 }
 0x419   :  { %v6987_v32 = vadd.f32 %v6986_v42, %v6924_v20  ;;  %v6930_v62 = vmul.f32 %v18827_v52, %v18827_v52  ;;  %v6931_v28 = vmul.f32 %v18833_v6, %v18833_v6  ;;  %v18851_v20 = vsub.f32 %v18566_v21, %v18720_v16 }
 0x41a   :  { %v6932_v51 = vmul.f32 %v18839_v1, %v18839_v1  ;;  %v6933_v23 = vmul.f32 %v18845_v10, %v18845_v10 }
 0x41b   :  { %v6988_v38 = vadd.f32 %v6987_v32, %v6925_v39  ;;  %v18857_v39 = vsub.f32 %v18574_v40, %v18720_v16  ;;  %v6934_v21 = vmul.f32 %v18851_v20, %v18851_v20 }
 0x41d   :  { %v6989_v45 = vadd.f32 %v6988_v38, %v6926_v33  ;;  %v18863_v33 = vsub.f32 %v18563_v56, %v18720_v16  ;;  %v6935_v40 = vmul.f32 %v18857_v39, %v18857_v39 }
 0x41f   :  { %v6990_v4 = vadd.f32 %v6989_v45, %v6927_v17  ;;  %v18869_v17 = vsub.f32 %v18570_v12, %v18720_v16  ;;  %v6936_v56 = vmul.f32 %v18863_v33, %v18863_v33 }
 0x421   :  { %v6991_v49 = vadd.f32 %v6990_v4, %v6928_v59  ;;  %v18875_v59 = vsub.f32 %v18582_v9, %v18720_v16  ;;  %v6937_v12 = vmul.f32 %v18869_v17, %v18869_v17 }
 0x423   :  { %v6992_v22 = vadd.f32 %v6991_v49, %v6929_v57  ;;  %v18881_v57 = vsub.f32 %v18590_v2, %v18720_v16  ;;  %v6938_v9 = vmul.f32 %v18875_v59, %v18875_v59 }
 0x425   :  { %v6993_v47 = vadd.f32 %v6992_v22, %v6930_v62  ;;  %v18887_v62 = vsub.f32 %v18579_v0, %v18720_v16  ;;  %v6939_v2 = vmul.f32 %v18881_v57, %v18881_v57 }
 0x427   :  { %v6994_v42 = vadd.f32 %v6993_v47, %v6931_v28  ;;  %v18893_v28 = vsub.f32 %v18586_v50, %v18720_v16  ;;  %v6940_v0 = vmul.f32 %v18887_v62, %v18887_v62 }
 0x429   :  { %v6995_v32 = vadd.f32 %v6994_v42, %v6932_v51  ;;  %v18899_v51 = vsub.f32 %v18598_v8, %v18720_v16  ;;  %v6941_v50 = vmul.f32 %v18893_v28, %v18893_v28 }
 0x42b   :  { %v6996_v38 = vadd.f32 %v6995_v32, %v6933_v23  ;;  %v18905_v23 = vsub.f32 %v18606_v18, %v18720_v16  ;;  %v6942_v8 = vmul.f32 %v18899_v51, %v18899_v51 }
 0x42d   :  { %v6997_v45 = vadd.f32 %v6996_v38, %v6934_v21  ;;  %v18911_v21 = vsub.f32 %v18595_v34, %v18720_v16  ;;  %v6943_v18 = vmul.f32 %v18905_v23, %v18905_v23 }
 0x42f   :  { %v6998_v4 = vadd.f32 %v6997_v45, %v6935_v40  ;;  %v18917_v40 = vsub.f32 %v18602_v26, %v18720_v16  ;;  %v6944_v34 = vmul.f32 %v18911_v21, %v18911_v21 }
 0x431   :  { %v6999_v49 = vadd.f32 %v6998_v4, %v6936_v56  ;;  %v18923_v56 = vsub.f32 %v18614_v55, %v18720_v16  ;;  %v6945_v26 = vmul.f32 %v18917_v40, %v18917_v40 }
 0x433   :  { %v7000_v22 = vadd.f32 %v6999_v49, %v6937_v12  ;;  %v18929_v12 = vsub.f32 %v18622_v48, %v18720_v16  ;;  %v6946_v55 = vmul.f32 %v18923_v56, %v18923_v56 }
 0x435   :  { %v7001_v47 = vadd.f32 %v7000_v22, %v6938_v9  ;;  %v23139_v9 = vld [vmem:[#allocation41_spill] sm:$0xff]  ;;  %v6947_v48 = vmul.f32 %v18929_v12, %v18929_v12 }
 0x436   :  { %v18935_v22 = vsub.f32 %v23139_v9, %v18720_v16 }
 0x437   :  { %v7002_v42 = vadd.f32 %v7001_v47, %v6939_v2  ;;  %v23140_v47 = vld [vmem:[#allocation42_spill] sm:$0xff] }
 0x439   :  { %v7003_v32 = vadd.f32 %v7002_v42, %v6940_v0  ;;  %v18941_v0 = vsub.f32 %v23140_v47, %v18720_v16 }
 0x43b   :  { %v7004_v38 = vadd.f32 %v7003_v32, %v6941_v50  ;;  %v23141_v50 = vld [vmem:[#allocation10_spill] sm:$0xff] }
 0x43c   :  { %v18947_v32 = vsub.f32 %v23141_v50, %v18720_v16  ;;  %v23149_v50 = vld [vmem:[#allocation14_spill] sm:$0xff] }
 0x43d   :  { %v7005_v45 = vadd.f32 %v7004_v38, %v6942_v8  ;;  %v6948_v8 = vmul.f32 %v18935_v22, %v18935_v22 }
 0x43e   :  { %23142 = vst [vmem:[#allocation31_spill] sm:$0xff] %v18947_v32  ;;  %v6950_v9 = vmul.f32 %v18947_v32, %v18947_v32 }
 0x43f   :  { %v7006_v4 = vadd.f32 %v7005_v45, %v6943_v18  ;;  %v23143_v18 = vld [vmem:[#allocation12_spill] sm:$0xff] }
 0x440   :  { %v18953_v45 = vsub.f32 %v23143_v18, %v18720_v16  ;;  %v18971_v18 = vsub.f32 %v23149_v50, %v18720_v16  ;;  %v23155_v50 = vld [vmem:[#allocation15_spill] sm:$0xff] }
 0x441   :  { %v7007_v49 = vadd.f32 %v7006_v4, %v6944_v34  ;;  %v6949_v34 = vmul.f32 %v18941_v0, %v18941_v0 }
 0x442   :  { %23144 = vst [vmem:[#allocation32_spill] sm:$0xff] %v18953_v45  ;;  %23150 = vst [vmem:[#allocation35_spill] sm:$0xff] %v18971_v18 }
 0x443   :  { %v7008_v2 = vadd.f32 %v7007_v49, %v6945_v26  ;;  %v23145_v26 = vld [vmem:[#allocation9_spill] sm:$0xff] }
 0x444   :  { %v18959_v49 = vsub.f32 %v23145_v26, %v18720_v16  ;;  %v23151_v26 = vld [vmem:[#allocation16_spill] sm:$0xff] }
 0x445   :  { %v7009_v42 = vadd.f32 %v7008_v2, %v6946_v55  ;;  %v23147_v2 = vld [vmem:[#allocation11_spill] sm:$0xff]  ;;  %v18977_v32 = vsub.f32 %v23151_v26, %v18720_v16  ;;  %v23157_v26 = vld [vmem:[#allocation18_spill] sm:$0xff] }
 0x446   :  { %23146 = vst [vmem:[#allocation33_spill] sm:$0xff] %v18959_v49  ;;  %v18965_v47 = vsub.f32 %v23147_v2, %v18720_v16  ;;  %v23153_v2 = vld [vmem:[#allocation13_spill] sm:$0xff] }
 0x447   :  { %v7010_v38 = vadd.f32 %v7009_v42, %v6947_v48  ;;  %v6951_v48 = vmul.f32 %v18953_v45, %v18953_v45  ;;  %23152 = vst [vmem:[#allocation36_spill] sm:$0xff] %v18977_v32  ;;  %v18983_v45 = vsub.f32 %v23153_v2, %v18720_v16  ;;  %v23159_v2 = vld [vmem:[#allocation20_spill] sm:$0xff] }
 0x448   :  { %23148 = vst [vmem:[#allocation34_spill] sm:$0xff] %v18965_v47 }
 0x449   :  { %v7011_v4 = vadd.f32 %v7010_v38, %v6948_v8  ;;  %v6952_v8 = vmul.f32 %v18959_v49, %v18959_v49  ;;  %23154 = vst [vmem:[#allocation37_spill] sm:$0xff] %v18983_v45  ;;  %v18989_v49 = vsub.f32 %v23155_v50, %v18720_v16  ;;  %v23161_v50 = vld [vmem:[#allocation17_spill] sm:$0xff] }
 0x44b   :  { %v7012_v55 = vadd.f32 %v7011_v4, %v6949_v34  ;;  %v6953_v34 = vmul.f32 %v18965_v47, %v18965_v47  ;;  %23156 = vst [vmem:[#allocation38_spill] sm:$0xff] %v18989_v49  ;;  %v18995_v47 = vsub.f32 %v23157_v26, %v18720_v16  ;;  %v23163_v26 = vld [vmem:[#allocation19_spill] sm:$0xff] }
 0x44d   :  { %v7013_v42 = vadd.f32 %v7012_v55, %v6950_v9  ;;  %v6954_v9 = vmul.f32 %v18971_v18, %v18971_v18  ;;  %23158 = vst [vmem:[#allocation39_spill] sm:$0xff] %v18995_v47  ;;  %v19001_v18 = vsub.f32 %v23159_v2, %v18720_v16  ;;  %v23165_v2 = vld [vmem:[#allocation21_spill] sm:$0xff] }
 0x44f   :  { %v7014_v38 = vadd.f32 %v7013_v42, %v6951_v48  ;;  %v6955_v48 = vmul.f32 %v18977_v32, %v18977_v32  ;;  %23160 = vst [vmem:[#allocation40_spill] sm:$0xff] %v19001_v18  ;;  %v19007_v32 = vsub.f32 %v23161_v50, %v18720_v16  ;;  %v23166_v50 = vld [vmem:[#allocation23_spill] sm:$0xff] }
 0x451   :  { %v7015_v4 = vadd.f32 %v7014_v38, %v6952_v8  ;;  %v6956_v8 = vmul.f32 %v18983_v45, %v18983_v45  ;;  %23162 = vst [vmem:[#allocation41_spill] sm:$0xff] %v19007_v32  ;;  %v19013_v45 = vsub.f32 %v23163_v26, %v18720_v16  ;;  %v23168_v26 = vld [vmem:[#allocation43_spill] sm:$0xff] }
 0x453   :  { %v7016_v55 = vadd.f32 %v7015_v4, %v6953_v34  ;;  %v6957_v34 = vmul.f32 %v18989_v49, %v18989_v49  ;;  %23164 = vst [vmem:[#allocation42_spill] sm:$0xff] %v19013_v45  ;;  %v19019_v49 = vsub.f32 %v23165_v2, %v18720_v16  ;;  %v23169_v2 = vld [vmem:[#allocation22_spill] sm:$0xff] }
 0x455   :  { %v7017_v42 = vadd.f32 %v7016_v55, %v6954_v9  ;;  %v6958_v9 = vmul.f32 %v18995_v47, %v18995_v47  ;;  %v19025_v47 = vsub.f32 %v23166_v50, %v18720_v16  ;;  %v23170_v50 = vld [vmem:[#allocation24_spill] sm:$0xff] }
 0x457   :  { %v7018_v38 = vadd.f32 %v7017_v42, %v6955_v48  ;;  %v6959_v48 = vmul.f32 %v19001_v18, %v19001_v18  ;;  %23167 = vst [vmem:[#allocation10_spill] sm:$0xff] %v19025_v47  ;;  %v19031_v18 = vsub.f32 %v23168_v26, %v18720_v16 }
 0x459   :  { %v7019_v4 = vadd.f32 %v7018_v38, %v6956_v8  ;;  %v6960_v8 = vmul.f32 %v19007_v32, %v19007_v32  ;;  %v19037_v32 = vsub.f32 %v23169_v2, %v18720_v16 }
 0x45b   :  { %v7020_v55 = vadd.f32 %v7019_v4, %v6957_v34  ;;  %v6961_v34 = vmul.f32 %v19013_v45, %v19013_v45  ;;  %v19043_v45 = vsub.f32 %v23170_v50, %v18720_v16  ;;  %v6965_v26 = vmul.f32 %v19037_v32, %v19037_v32 }
 0x45c   :  { %v6968_v16 = vmul.f32 %v18727_v46, %v18727_v46  ;;  %v6969_v50 = vmul.f32 %v18731_v58, %v18731_v58 }
 0x45d   :  { %v7021_v42 = vadd.f32 %v7020_v55, %v6958_v9  ;;  %v6962_v9 = vmul.f32 %v19019_v49, %v19019_v49 }
 0x45f   :  { %v7022_v38 = vadd.f32 %v7021_v42, %v6959_v48  ;;  %v6963_v48 = vmul.f32 %v19025_v47, %v19025_v47  ;;  %v6967_v47 = vmul.f32 %v18723_v36, %v18723_v36 }
 0x461   :  { %v7023_v4 = vadd.f32 %v7022_v38, %v6960_v8  ;;  %v6964_v8 = vmul.f32 %v19031_v18, %v19031_v18 }
 0x463   :  { %v7024_v55 = vadd.f32 %v7023_v4, %v6961_v34  ;;  %v6966_v4 = vmul.f32 %v19043_v45, %v19043_v45 }
 0x465   :  { %v7025_v42 = vadd.f32 %v7024_v55, %v6962_v9 }
 0x467   :  { %v7026_v38 = vadd.f32 %v7025_v42, %v6963_v48  ;;  %v6970_v42 = vmul.f32 %v18734_v44, %v18734_v44 }
 0x469   :  { %v7027_v34 = vadd.f32 %v7026_v38, %v6964_v8  ;;  %v6971_v38 = vmul.f32 %v18737_v35, %v18737_v35 }
 0x46b   :  { %v7028_v2 = vadd.f32 %v7027_v34, %v6965_v26  ;;  %v6972_v34 = vmul.f32 %v18740_v37, %v18740_v37 }
 0x46d   :  { %v7029_v9 = vadd.f32 %v7028_v2, %v6966_v4  ;;  %v6973_v2 = vmul.f32 %v18743_v61, %v18743_v61 }
 0x46f   :  { %v7030_v55 = vadd.f32 %v7029_v9, %v6967_v47  ;;  %v6974_v9 = vmul.f32 %v18746_v29, %v18746_v29 }
 0x471   :  { %v7031_v48 = vadd.f32 %v7030_v55, %v6968_v16  ;;  %v6975_v55 = vmul.f32 %v18749_v43, %v18749_v43 }
 0x473   :  { %v7032_v8 = vadd.f32 %v7031_v48, %v6969_v50  ;;  %v6976_v48 = vmul.f32 %v18752_v3, %v18752_v3 }
 0x475   :  { %v7033_v26 = vadd.f32 %v7032_v8, %v6970_v42  ;;  %v6977_v8 = vmul.f32 %v18755_v25, %v18755_v25  ;;  %v7060_v25 = vlaneseq }
 0x477   :  { %v7034_v4 = vadd.f32 %v7033_v26, %v6971_v38  ;;  %v6978_v26 = vmul.f32 %v18758_v27, %v18758_v27 }
 0x479   :  { %v7035_v47 = vadd.f32 %v7034_v4, %v6972_v34  ;;  %v6979_v4 = vmul.f32 %v18761_v11, %v18761_v11 }
 0x47b   :  { %v7036_v16 = vadd.f32 %v7035_v47, %v6973_v2  ;;  %v6980_v47 = vmul.f32 %v18764_v19, %v18764_v19 }
 0x47d   :  { %v7037_v50 = vadd.f32 %v7036_v16, %v6974_v9  ;;  %v6981_v16 = vmul.f32 %v18767_v13, %v18767_v13 }
 0x47f   :  { %v7038_v42 = vadd.f32 %v7037_v50, %v6975_v55  ;;  %v6982_v50 = vmul.f32 %v18770_v30, %v18770_v30 }
 0x481   :  { %v7039_v38 = vadd.f32 %v7038_v42, %v6976_v48  ;;  %v6983_v42 = vmul.f32 %v18773_v5, %v18773_v5 }
 0x483   :  { %v7040_v34 = vadd.f32 %v7039_v38, %v6977_v8  ;;  %v6984_v38 = vmul.f32 %v18776_v53, %v18776_v53 }
 0x485   :  { %v7041_v2 = vadd.f32 %v7040_v34, %v6978_v26  ;;  %v6985_v34 = vmul.f32 %v18779_v15, %v18779_v15 }
 0x487   :  { %v7042_v9 = vadd.f32 %v7041_v2, %v6979_v4 }
 0x489   :  { %v7043_v55 = vadd.f32 %v7042_v9, %v6980_v47 }
 0x48b   :  { %v7044_v48 = vadd.f32 %v7043_v55, %v6981_v16 }
 0x48d   :  { %v7045_v8 = vadd.f32 %v7044_v48, %v6982_v50  ;;  %v19089_v50 = vshrl.u32 %v7060_v25, 7  ;;  %v17015_v48 = vmov 1983009808   ;;  %v19102_v25 = vld [vmem:[%s22860_s3] ss:$0 sm:$0xff] }
 0x48e   :  { %v7327_v3 = vunpack.c.l.s4 %v17015_v48 }
 0x48f   :  { %v7046_v26 = vadd.f32 %v7045_v8, %v6983_v42  ;;  %23171 = vst [vmem:[#allocation12_spill] sm:$0xff] %v19089_v50  ;;  %v7056_v42 = vld [vmem:[%s22859_s2] sm:$0x1]  ;;  %v22902_v8 = vsub.s32 0, %v19089_v50 }
 0x491   :  { %v7047_v4 = vadd.f32 %v7046_v26, %v6984_v38 }
 0x493   :  { %v7048_v2 = vadd.f32 %v7047_v4, %v6985_v34 }
 0x495   :  { %v7049_v19 = vrot.slane %v7048_v2, 4 }
 0x497   :  { %v7050_v13 = vadd.f32 %v7049_v19, %v7048_v2  ;;  %v7328_v19 = vunpack.c.0.s8 %v7327_v3 }
 0x499   :  { %v7051_v47 = vrot.slane %v7050_v13, 2 }
 0x49b   :  { %v7052_v9 = vadd.f32 %v7051_v47, %v7050_v13 }
 0x49d   :  { %v7053_v11 = vrot.slane %v7052_v9, 1 }
 0x49f   :  { %v7054_v27 = vadd.f32 %v7053_v11, %v7052_v9 }
 0x4a1   :  { %v7055_v16 = vmul.f32 0.001953125, %v7054_v27  ;;  %v19105_v27 = vsub.s32 %v7328_v19, %v19089_v50 }
 0x4a3   :  { %v7057_v55 = vadd.f32 1e-05, %v7055_v16  ;;  %23172 = vst [vmem:[#allocation9_spill] sm:$0xff] %v19105_v27 }
 0x4a5   :  { %16936 = vrsqrt.f32 %v7057_v55 }
 0x4af   :  { %v16937_v38 = vpop.eup %16936 }
 0x4b0   :  { %v7059_v26 = vmul.f32 %v16937_v38, %v7056_v42 }
 0x4b2   :  { %v19097_v11 = vrot.slane %v7059_v26, %v22902_v8 }
 0x4b4   :  { %v7124_v13 = vmul.f32 %v19097_v11, %v18770_v30  ;;  %v7125_v3 = vmul.f32 %v19097_v11, %v18773_v5  ;;  %v7126_v34 = vmul.f32 %v19097_v11, %v18776_v53  ;;  %v7127_v4 = vmul.f32 %v19097_v11, %v18779_v15 }
 0x4b5   :  { %v19117_v2 = vmul.f32 %v19097_v11, %v18783_v63  ;;  %v19121_v47 = vmul.f32 %v19097_v11, %v18787_v31  ;;  %v19125_v30 = vmul.f32 %v19097_v11, %v18791_v60  ;;  %v19129_v5 = vmul.f32 %v19097_v11, %v18799_v24 }
 0x4b6   :  { %v7193_v53 = vadd.f32 %v19102_v25, %v7124_v13  ;;  %v7194_v15 = vadd.f32 %v19102_v25, %v7125_v3  ;;  %v7195_v9 = vadd.f32 %v19102_v25, %v7126_v34  ;;  %v7196_v63 = vadd.f32 %v19102_v25, %v7127_v4 }
 0x4b7   :  { %v19137_v31 = vmul.f32 %v19097_v11, %v18803_v41  ;;  %v19141_v60 = vmul.f32 %v19097_v11, %v18809_v7  ;;  %v19145_v24 = vmul.f32 %v19097_v11, %v18815_v54  ;;  %v19149_v16 = vmul.f32 %v19097_v11, %v18821_v14 }
 0x4b8   :  { %v7257_v55 = vmax.f32 %v7193_v53, 0.0  ;;  %v7258_v48 = vmax.f32 %v7194_v15, 0.0  ;;  %v7259_v42 = vmax.f32 %v7195_v9, 0.0  ;;  %v7260_v38 = vmax.f32 %v7196_v63, 0.0 }
 0x4b9   :  { %v19153_v41 = vmul.f32 %v19097_v11, %v18827_v52  ;;  %v19157_v7 = vmul.f32 %v19097_v11, %v18833_v6  ;;  %v19161_v54 = vmul.f32 %v19097_v11, %v18839_v1  ;;  %v19165_v14 = vmul.f32 %v19097_v11, %v18845_v10 }
 0x4ba   :  { %v7291_v19 = vmax.f32 %v7257_v55, %v7259_v42  ;;  %v7292_v26 = vmax.f32 %v7258_v48, %v7260_v38  ;;  %v19169_v13 = vmul.f32 %v19097_v11, %v18851_v20  ;;  %v19173_v52 = vmul.f32 %v19097_v11, %v18857_v39 }
 0x4bb   :  { %v19177_v6 = vmul.f32 %v19097_v11, %v18863_v33  ;;  %v19181_v1 = vmul.f32 %v19097_v11, %v18869_v17  ;;  %v19185_v10 = vmul.f32 %v19097_v11, %v18875_v59  ;;  %v19189_v20 = vmul.f32 %v19097_v11, %v18881_v57 }
 0x4bc   :  { %23173 = vst [vmem:[#allocation11_spill] sm:$0xff] %v19173_v52  ;;  %v7835_v3 = vcombine.high %v7291_v19, %v7291_v19  ;;  %v7842_v39 = vrot.slane %v7291_v19, %v19105_v27  ;;  %v7852_v34 = vcombine.high %v7292_v26, %v7292_v26  ;;  %v7859_v4 = vrot.slane %v7292_v26, %v19105_v27 }
 0x4bd   :  { %23174 = vst [vmem:[#allocation14_spill] sm:$0xff] %v19177_v6  ;;  %23175 = vst [vmem:[#allocation16_spill] sm:$0xff] %v19181_v1  ;;  %v19195_v33 = vmul.f32 %v19097_v11, %v18887_v62  ;;  %v19199_v17 = vmul.f32 %v19097_v11, %v18893_v28  ;;  %v19203_v59 = vmul.f32 %v19097_v11, %v18899_v51 }
 0x4be   :  { %23176 = vst [vmem:[#allocation13_spill] sm:$0xff] %v19185_v10  ;;  %23177 = vst [vmem:[#allocation15_spill] sm:$0xff] %v19189_v20  ;;  %v19207_v57 = vmul.f32 %v19097_v11, %v18905_v23  ;;  %v7849_v53 = vrot.slane %v7835_v3, %v19105_v27  ;;  %v7850_v15 = vcombine.high %v7842_v39, %v7842_v39  ;;  %v8838_v62 = vsel %vm7997_vm11, %v7842_v39, -inf }
 0x4bf   :  { %23178 = vst [vmem:[#allocation18_spill] sm:$0xff] %v19195_v33  ;;  %23179 = vst [vmem:[#allocation20_spill] sm:$0xff] %v19199_v17  ;;  %v7866_v9 = vrot.slane %v7852_v34, %v19105_v27  ;;  %v7867_v63 = vcombine.high %v7859_v4, %v7859_v4  ;;  %v8866_v55 = vsel %vm7997_vm11, %v7859_v4, -inf  ;;  %v19215_v28 = vmul.f32 %v19097_v11, %v18911_v21 }
 0x4c0   :  { %23180 = vst [vmem:[#allocation17_spill] sm:$0xff] %v19203_v59  ;;  %23181 = vst [vmem:[#allocation19_spill] sm:$0xff] %v19207_v57  ;;  %v19219_v51 = vmul.f32 %v19097_v11, %v18917_v40  ;;  %v7851_v23 = vcombine.high %v7849_v53, %v7849_v53  ;;  %v8839_v42 = vrot.slane %v8838_v62, 4  ;;  %v8845_v38 = vsel %vm7997_vm11, %v7850_v15, -inf }
 0x4c1   :  { %23182 = vst [vmem:[#allocation21_spill] sm:$0xff] %v19215_v28  ;;  %v7868_v48 = vcombine.high %v7866_v9, %v7866_v9  ;;  %v8846_v19 = vrot.slane %v8845_v38, 4  ;;  %v8852_v26 = vsel %vm7997_vm11, %v7849_v53, -inf  ;;  %v8867_v3 = vrot.slane %v8866_v55, 4 }
 0x4c2   :  { %23183 = vst [vmem:[#allocation23_spill] sm:$0xff] %v19219_v51  ;;  %v8873_v39 = vsel %vm7997_vm11, %v7867_v63, -inf  ;;  %v8840_v34 = vmax.f32 %v8838_v62, %v8839_v42  ;;  %v8853_v4 = vrot.slane %v8852_v26, 4  ;;  %v8859_v21 = vsel %vm7997_vm11, %v7851_v23, -inf }
 0x4c3   :  { %v8874_v8 = vrot.slane %v8873_v39, 4  ;;  %v8847_v50 = vmax.f32 %v8845_v38, %v8846_v19  ;;  %v8860_v27 = vrot.slane %v8859_v21, 4  ;;  %v8868_v40 = vmax.f32 %v8866_v55, %v8867_v3 }
 0x4c4   :  { %v8880_v51 = vsel %vm7997_vm11, %v7866_v9, -inf  ;;  %v8841_v28 = vrot.slane %v8840_v34, 2  ;;  %v8854_v57 = vmax.f32 %v8852_v26, %v8853_v4  ;;  %v8887_v20 = vsel %vm7997_vm11, %v7868_v48, -inf }
 0x4c5   :  { %v8875_v59 = vmax.f32 %v8873_v39, %v8874_v8  ;;  %v8881_v15 = vrot.slane %v8880_v51, 4  ;;  %v8848_v17 = vrot.slane %v8847_v50, 2  ;;  %v8861_v33 = vmax.f32 %v8859_v21, %v8860_v27 }
 0x4c6   :  { %v8869_v53 = vrot.slane %v8868_v40, 2  ;;  %v8842_v63 = vmax.f32 %v8840_v34, %v8841_v28  ;;  %v8855_v62 = vrot.slane %v8854_v57, 2  ;;  %v8888_v3 = vrot.slane %v8887_v20, 4 }
 0x4c7   :  { %v8876_v42 = vrot.slane %v8875_v59, 2  ;;  %v8882_v23 = vmax.f32 %v8880_v51, %v8881_v15  ;;  %v8849_v38 = vmax.f32 %v8847_v50, %v8848_v17  ;;  %v8862_v19 = vrot.slane %v8861_v33, 2 }
 0x4c8   :  { %v8870_v55 = vmax.f32 %v8868_v40, %v8869_v53  ;;  %v8843_v9 = vrot.slane %v8842_v63, 1  ;;  %v8856_v26 = vmax.f32 %v8854_v57, %v8855_v62  ;;  %v8889_v10 = vmax.f32 %v8887_v20, %v8888_v3 }
 0x4c9   :  { %v8877_v8 = vmax.f32 %v8875_v59, %v8876_v42  ;;  %v8883_v39 = vrot.slane %v8882_v23, 2  ;;  %v8850_v4 = vrot.slane %v8849_v38, 1  ;;  %v8863_v27 = vmax.f32 %v8861_v33, %v8862_v19 }
 0x4ca   :  { %v8871_v21 = vrot.slane %v8870_v55, 1  ;;  %v8844_v48 = vmax.f32 %v8842_v63, %v8843_v9  ;;  %v8857_v28 = vrot.slane %v8856_v26, 1  ;;  %v8890_v40 = vrot.slane %v8889_v10, 2 }
 0x4cb   :  { %v8878_v34 = vrot.slane %v8877_v8, 1  ;;  %v8884_v1 = vmax.f32 %v8882_v23, %v8883_v39  ;;  %v8851_v51 = vmax.f32 %v8849_v38, %v8850_v4  ;;  %v8864_v50 = vrot.slane %v8863_v27, 1 }
 0x4cc   :  { %v8872_v17 = vmax.f32 %v8870_v55, %v8871_v21  ;;  %v8858_v15 = vmax.f32 %v8856_v26, %v8857_v28  ;;  %v9095_v57 = vpack.c.bf16 %v8844_v48, %v8844_v48  ;;  %v8891_v62 = vmax.f32 %v8889_v10, %v8890_v40  ;;  %v23186_v40 = vld [vmem:[#allocation33_spill] sm:$0xff] }
 0x4cd   :  { %v8879_v53 = vmax.f32 %v8877_v8, %v8878_v34  ;;  %v8885_v6 = vrot.slane %v8884_v1, 1  ;;  %v8865_v59 = vmax.f32 %v8863_v27, %v8864_v50  ;;  %v9096_v42 = vpack.c.bf16 %v8851_v51, %v8851_v51  ;;  %v23184_v34 = vld [vmem:[#allocation31_spill] sm:$0xff] }
 0x4ce   :  { %v9099_v33 = vpack.c.bf16 %v8872_v17, %v8872_v17  ;;  %v9097_v20 = vpack.c.bf16 %v8858_v15, %v8858_v15  ;;  %v9351_v63 = vunpack.c.l.b16 %v9095_v57  ;;  %v8892_v9 = vrot.slane %v8891_v62, 1  ;;  %v23187_v15 = vld [vmem:[#allocation34_spill] sm:$0xff] }
 0x4cf   :  { %v8886_v19 = vmax.f32 %v8884_v1, %v8885_v6  ;;  %v9100_v3 = vpack.c.bf16 %v8879_v53, %v8879_v53  ;;  %v9098_v52 = vpack.c.bf16 %v8865_v59, %v8865_v59  ;;  %v9352_v23 = vunpack.c.l.b16 %v9096_v42  ;;  %v23188_v53 = vld [vmem:[#allocation35_spill] sm:$0xff]  ;;  %v23189_v42 = vld [vmem:[#allocation36_spill] sm:$0xff] }
 0x4d0   :  { %v9355_v39 = vunpack.c.l.b16 %v9099_v33  ;;  %v9353_v4 = vunpack.c.l.b16 %v9097_v20  ;;  %v19229_v26 = vmul.f32 %v19097_v11, %v18923_v56  ;;  %v8893_v8 = vmax.f32 %v8891_v62, %v8892_v9 }
 0x4d1   :  { %v9101_v38 = vpack.c.bf16 %v8886_v19, %v8886_v19  ;;  %v9356_v55 = vunpack.c.l.b16 %v9100_v3  ;;  %v9354_v27 = vunpack.c.l.b16 %v9098_v52  ;;  %v9471_v10 = vsel %vm9359_vm12, %v9352_v23, %v9351_v63  ;;  %v23190_v19 = vld [vmem:[#allocation37_spill] sm:$0xff]  ;;  %v23191_v63 = vld [vmem:[#allocation38_spill] sm:$0xff]  ;;  %v23192_v23 = vld [vmem:[#allocation39_spill] sm:$0xff] }
 0x4d2   :  { %v19234_v6 = vmul.f32 %v19097_v11, %v18929_v12  ;;  %v9472_v21 = vsel %vm9361_vm13, %v9353_v4, %v9471_v10  ;;  %v19239_v48 = vmul.f32 %v19097_v11, %v18935_v22  ;;  %v19243_v28 = vmul.f32 %v19097_v11, %v18941_v0  ;;  %v23185_v12 = vld [vmem:[#allocation32_spill] sm:$0xff]  ;;  %v23195_v10 = vld [vmem:[#allocation42_spill] sm:$0xff] }
 0x4d3   :  { %v9357_v1 = vunpack.c.l.b16 %v9101_v38  ;;  %v9102_v56 = vpack.c.bf16 %v8893_v8, %v8893_v8  ;;  %v9473_v52 = vsel %vm9363_vm14, %v9354_v27, %v9472_v21  ;;  %v19248_v51 = vmul.f32 %v19097_v11, %v23184_v34  ;;  %v23193_v38 = vld [vmem:[#allocation40_spill] sm:$0xff]  ;;  %v23194_v8 = vld [vmem:[#allocation41_spill] sm:$0xff] }
 0x4d4   :  { %v19252_v50 = vmul.f32 %v19097_v11, %v23185_v12  ;;  %v9474_v17 = vsel %vm8913_vm3, %v9355_v39, %v9473_v52  ;;  %v19257_v22 = vmul.f32 %v19097_v11, %v23186_v40  ;;  %v19261_v0 = vmul.f32 %v19097_v11, %v23187_v15  ;;  %v23196_v52 = vld [vmem:[#allocation10_spill] sm:$0xff] }
 0x4d5   :  { %v19265_v57 = vmul.f32 %v19097_v11, %v23188_v53  ;;  %v9358_v59 = vunpack.c.l.b16 %v9102_v56  ;;  %v9475_v62 = vsel %vm9367_vm15, %v9356_v55, %v9474_v17  ;;  %v19270_v33 = vmul.f32 %v19097_v11, %v23189_v42 }
 0x4d6   :  { %v19274_v20 = vmul.f32 %v19097_v11, %v23190_v19  ;;  %v9476_v3 = vsel %vm9369_vm0, %v9357_v1, %v9475_v62  ;;  %v19279_v9 = vmul.f32 %v19097_v11, %v23191_v63  ;;  %v19283_v39 = vmul.f32 %v19097_v11, %v23192_v23  ;;  %v23202_v23 = vld [vmem:[#allocation30_spill] sm:$0xff] }
 0x4d7   :  { %v19287_v4 = vmul.f32 %v19097_v11, %v23193_v38  ;;  %v9477_v55 = vsel %vm8895_vm6, %v9358_v59, %v9476_v3  ;;  %v7102_v27 = vmul.f32 %v19097_v11, %v23194_v8  ;;  %v7103_v1 = vmul.f32 %v19097_v11, %v23195_v10 }
 0x4d8   :  { %v7104_v21 = vmul.f32 %v19097_v11, %v19019_v49  ;;  %v9493_v56 = vpack.c.b16 %v9477_v55, %v9477_v55  ;;  %v7105_v34 = vmul.f32 %v19097_v11, %v23196_v52  ;;  %v7106_v12 = vmul.f32 %v19097_v11, %v19031_v18  ;;  %v23205_v52 = vld [vmem:[#allocation16_spill] sm:$0xff] }
 0x4d9   :  { %v7107_v17 = vmul.f32 %v19097_v11, %v19037_v32  ;;  %v7108_v40 = vmul.f32 %v19097_v11, %v19043_v45  ;;  %v7109_v15 = vmul.f32 %v19097_v11, %v18723_v36  ;;  %v7110_v53 = vmul.f32 %v19097_v11, %v18727_v46 }
 0x4da   :  { %v7111_v49 = vmul.f32 %v19097_v11, %v18731_v58  ;;  %v7112_v59 = vmul.f32 %v19097_v11, %v18734_v44  ;;  %v7113_v18 = vmul.f32 %v19097_v11, %v18737_v35  ;;  %v7114_v32 = vmul.f32 %v19097_v11, %v18740_v37  ;;  %9525 = vst [vmem:[#allocation2 + $0x278] sm:$0xf] %v9493_v56  ;;  %v23197_v58 = vld [vmem:[#allocation25_spill] sm:$0xff]  ;;  %v23198_v44 = vld [vmem:[#allocation26_spill] sm:$0xff]  ;;  %v23199_v35 = vld [vmem:[#allocation27_spill] sm:$0xff] }
 0x4db   :  { %v7115_v45 = vmul.f32 %v19097_v11, %v18743_v61  ;;  %v7116_v36 = vmul.f32 %v19097_v11, %v18746_v29  ;;  %v7117_v46 = vmul.f32 %v19097_v11, %v18749_v43  ;;  %v7118_v62 = vmul.f32 %v19097_v11, %v23197_v58  ;;  %v23200_v37 = vld [vmem:[#allocation28_spill] sm:$0xff]  ;;  %v23201_v61 = vld [vmem:[#allocation29_spill] sm:$0xff]  ;;  %v23204_v56 = vld [vmem:[#allocation14_spill] sm:$0xff] }
 0x4dc   :  { %v7119_v42 = vmul.f32 %v19097_v11, %v23198_v44  ;;  %v7120_v19 = vmul.f32 %v19097_v11, %v23199_v35  ;;  %v7121_v3 = vmul.f32 %v19097_v11, %v23200_v37  ;;  %v7122_v63 = vmul.f32 %v19097_v11, %v23201_v61  ;;  %v23206_v58 = vld [vmem:[#allocation13_spill] sm:$0xff]  ;;  %v23208_v44 = vld [vmem:[#allocation15_spill] sm:$0xff]  ;;  %v23210_v35 = vld [vmem:[#allocation18_spill] sm:$0xff] }
 0x4dd   :  { %v7123_v29 = vmul.f32 %v19097_v11, %v23202_v23  ;;  %v19336_v43 = vadd.f32 %v19102_v25, %v19117_v2  ;;  %v19340_v38 = vadd.f32 %v19102_v25, %v19121_v47  ;;  %v19344_v55 = vadd.f32 %v19102_v25, %v19125_v30  ;;  %v23211_v61 = vld [vmem:[#allocation20_spill] sm:$0xff] }
 0x4de   :  { %v19348_v8 = vadd.f32 %v19102_v25, %v19129_v5  ;;  %v19352_v10 = vadd.f32 %v19102_v25, %v19137_v31  ;;  %v19356_v11 = vadd.f32 %v19102_v25, %v19141_v60  ;;  %v19360_v2 = vadd.f32 %v19102_v25, %v19145_v24 }
 0x4df   :  { %v19364_v47 = vadd.f32 %v19102_v25, %v19149_v16  ;;  %v19368_v30 = vadd.f32 %v19102_v25, %v19153_v41  ;;  %v19372_v5 = vadd.f32 %v19102_v25, %v19157_v7  ;;  %v19376_v31 = vadd.f32 %v19102_v25, %v19161_v54  ;;  %v23203_v16 = vld [vmem:[#allocation11_spill] sm:$0xff] }
 0x4e0   :  { %v19380_v60 = vadd.f32 %v19102_v25, %v19165_v14  ;;  %v19384_v24 = vadd.f32 %v19102_v25, %v19169_v13  ;;  %v19388_v41 = vadd.f32 %v19102_v25, %v23203_v16  ;;  %v19392_v7 = vadd.f32 %v19102_v25, %v23204_v56  ;;  %v23212_v16 = vld [vmem:[#allocation17_spill] sm:$0xff] }
 0x4e1   :  { %v19396_v54 = vadd.f32 %v19102_v25, %v23205_v52  ;;  %v19400_v14 = vadd.f32 %v19102_v25, %v23206_v58  ;;  %v19404_v13 = vadd.f32 %v19102_v25, %v23208_v44  ;;  %v19408_v37 = vadd.f32 %v19102_v25, %v23210_v35  ;;  %v23213_v52 = vld [vmem:[#allocation19_spill] sm:$0xff] }
 0x4e2   :  { %v19412_v23 = vadd.f32 %v19102_v25, %v23211_v61  ;;  %v19416_v56 = vadd.f32 %v19102_v25, %v23212_v16  ;;  %v19420_v58 = vadd.f32 %v19102_v25, %v23213_v52  ;;  %v19432_v61 = vadd.f32 %v19102_v25, %v19229_v26 }
 0x4e3   :  { %23207 = vst [vmem:[#allocation43_spill] sm:$0xff] %v19400_v14  ;;  %23209 = vst [vmem:[#allocation22_spill] sm:$0xff] %v19404_v13  ;;  %v23214_v14 = vld [vmem:[#allocation21_spill] sm:$0xff]  ;;  %v23215_v13 = vld [vmem:[#allocation23_spill] sm:$0xff]  ;;  %v19436_v16 = vadd.f32 %v19102_v25, %v19234_v6  ;;  %v19440_v52 = vadd.f32 %v19102_v25, %v19239_v48  ;;  %v19452_v26 = vadd.f32 %v19102_v25, %v19252_v50 }
 0x4e4   :  { %v19424_v44 = vadd.f32 %v19102_v25, %v23214_v14  ;;  %v19428_v35 = vadd.f32 %v19102_v25, %v23215_v13  ;;  %v19444_v14 = vadd.f32 %v19102_v25, %v19243_v28  ;;  %v19448_v13 = vadd.f32 %v19102_v25, %v19248_v51 }
 0x4e5   :  { %v19456_v6 = vadd.f32 %v19102_v25, %v19257_v22  ;;  %v19460_v48 = vadd.f32 %v19102_v25, %v19261_v0  ;;  %v19464_v28 = vadd.f32 %v19102_v25, %v19265_v57  ;;  %v19468_v51 = vadd.f32 %v19102_v25, %v19270_v33 }
 0x4e6   :  { %v19472_v50 = vadd.f32 %v19102_v25, %v19274_v20  ;;  %v19476_v22 = vadd.f32 %v19102_v25, %v19279_v9  ;;  %v19480_v0 = vadd.f32 %v19102_v25, %v19283_v39  ;;  %v19484_v57 = vadd.f32 %v19102_v25, %v19287_v4 }
 0x4e7   :  { %23216 = vst [vmem:[#allocation24_spill] sm:$0xff] %v19464_v28  ;;  %v19487_v28 = vadd.f32 %v19102_v25, %v7102_v27  ;;  %v19490_v33 = vadd.f32 %v19102_v25, %v7103_v1  ;;  %v19493_v20 = vadd.f32 %v19102_v25, %v7104_v21  ;;  %v19496_v9 = vadd.f32 %v19102_v25, %v7105_v34 }
 0x4e8   :  { %23217 = vst [vmem:[#allocation31_spill] sm:$0xff] %v19476_v22  ;;  %v19499_v22 = vadd.f32 %v19102_v25, %v7106_v12  ;;  %v19502_v39 = vadd.f32 %v19102_v25, %v7107_v17  ;;  %v19505_v4 = vadd.f32 %v19102_v25, %v7108_v40  ;;  %v19508_v27 = vadd.f32 %v19102_v25, %v7109_v15 }
 0x4e9   :  { %v19511_v1 = vadd.f32 %v19102_v25, %v7110_v53  ;;  %v19514_v21 = vadd.f32 %v19102_v25, %v7111_v49  ;;  %v19517_v34 = vadd.f32 %v19102_v25, %v7112_v59  ;;  %v19520_v12 = vadd.f32 %v19102_v25, %v7113_v18 }
 0x4ea   :  { %v19523_v17 = vadd.f32 %v19102_v25, %v7114_v32  ;;  %v19526_v40 = vadd.f32 %v19102_v25, %v7115_v45  ;;  %v19529_v15 = vadd.f32 %v19102_v25, %v7116_v36  ;;  %v19532_v53 = vadd.f32 %v19102_v25, %v7117_v46 }
 0x4eb   :  { %v19535_v49 = vadd.f32 %v19102_v25, %v7118_v62  ;;  %v19538_v59 = vadd.f32 %v19102_v25, %v7119_v42  ;;  %v19541_v18 = vadd.f32 %v19102_v25, %v7120_v19  ;;  %v19544_v32 = vadd.f32 %v19102_v25, %v7121_v3 }
 0x4ec   :  { %v19547_v45 = vadd.f32 %v19102_v25, %v7122_v63  ;;  %v19550_v36 = vadd.f32 %v19102_v25, %v7123_v29  ;;  %v7197_v46 = vmax.f32 %v19336_v43, 0.0  ;;  %v7198_v62 = vmax.f32 %v19340_v38, 0.0 }
 0x4ed   :  { %23218 = vst [vmem:[#allocation32_spill] sm:$0xff] %v19535_v49  ;;  %23219 = vst [vmem:[#allocation33_spill] sm:$0xff] %v19538_v59  ;;  %v7199_v49 = vmax.f32 %v19344_v55, 0.0  ;;  %v7200_v42 = vmax.f32 %v19348_v8, 0.0  ;;  %v7201_v19 = vmax.f32 %v19352_v10, 0.0  ;;  %v7203_v3 = vmax.f32 %v19360_v2, 0.0 }
 0x4ee   :  { %23220 = vst [vmem:[#allocation34_spill] sm:$0xff] %v19541_v18  ;;  %23221 = vst [vmem:[#allocation35_spill] sm:$0xff] %v19544_v32  ;;  %v7202_v18 = vmax.f32 %v19356_v11, 0.0  ;;  %v7204_v63 = vmax.f32 %v19364_v47, 0.0  ;;  %v7206_v25 = vmax.f32 %v19372_v5, 0.0  ;;  %v7207_v29 = vmax.f32 %v19376_v31, 0.0 }
 0x4ef   :  { %23222 = vst [vmem:[#allocation36_spill] sm:$0xff] %v19547_v45  ;;  %23223 = vst [vmem:[#allocation37_spill] sm:$0xff] %v19550_v36  ;;  %v7205_v45 = vmax.f32 %v19368_v30, 0.0  ;;  %v7208_v43 = vmax.f32 %v19380_v60, 0.0  ;;  %v7209_v38 = vmax.f32 %v19384_v24, 0.0  ;;  %v7210_v55 = vmax.f32 %v19388_v41, 0.0 }
 0x4f0   :  { %v7211_v8 = vmax.f32 %v19392_v7, 0.0  ;;  %v7212_v10 = vmax.f32 %v19396_v54, 0.0  ;;  %v23224_v11 = vld [vmem:[#allocation43_spill] sm:$0xff]  ;;  %v23225_v36 = vld [vmem:[#allocation22_spill] sm:$0xff]  ;;  %v7215_v30 = vmax.f32 %v19408_v37, 0.0  ;;  %v7216_v5 = vmax.f32 %v19412_v23, 0.0 }
 0x4f1   :  { %v7213_v2 = vmax.f32 %v23224_v11, 0.0  ;;  %v7214_v47 = vmax.f32 %v23225_v36, 0.0  ;;  %v7217_v31 = vmax.f32 %v19416_v56, 0.0  ;;  %v7218_v60 = vmax.f32 %v19420_v58, 0.0  ;;  %v23226_v32 = vld [vmem:[#allocation24_spill] sm:$0xff]  ;;  %v23227_v59 = vld [vmem:[#allocation31_spill] sm:$0xff] }
 0x4f2   :  { %v7219_v24 = vmax.f32 %v19424_v44, 0.0  ;;  %v7220_v41 = vmax.f32 %v19428_v35, 0.0  ;;  %v7221_v7 = vmax.f32 %v19432_v61, 0.0  ;;  %v7222_v54 = vmax.f32 %v19436_v16, 0.0 }
 0x4f3   :  { %v7223_v11 = vmax.f32 %v19440_v52, 0.0  ;;  %v7224_v36 = vmax.f32 %v19444_v14, 0.0  ;;  %v7225_v37 = vmax.f32 %v19448_v13, 0.0  ;;  %v7226_v23 = vmax.f32 %v19452_v26, 0.0 }
 0x4f4   :  { %v7227_v56 = vmax.f32 %v19456_v6, 0.0  ;;  %v7228_v58 = vmax.f32 %v19460_v48, 0.0  ;;  %v7229_v44 = vmax.f32 %v23226_v32, 0.0  ;;  %v7230_v35 = vmax.f32 %v19468_v51, 0.0 }
 0x4f5   :  { %v7231_v61 = vmax.f32 %v19472_v50, 0.0  ;;  %v7232_v16 = vmax.f32 %v23227_v59, 0.0  ;;  %v7233_v52 = vmax.f32 %v19480_v0, 0.0  ;;  %v7234_v14 = vmax.f32 %v19484_v57, 0.0 }
 0x4f6   :  { %v7235_v13 = vmax.f32 %v19487_v28, 0.0  ;;  %v7236_v26 = vmax.f32 %v19490_v33, 0.0  ;;  %v7237_v6 = vmax.f32 %v19493_v20, 0.0  ;;  %v7238_v48 = vmax.f32 %v19496_v9, 0.0 }
 0x4f7   :  { %v7239_v32 = vmax.f32 %v19499_v22, 0.0  ;;  %v7240_v51 = vmax.f32 %v19502_v39, 0.0  ;;  %v7241_v50 = vmax.f32 %v19505_v4, 0.0  ;;  %v7242_v59 = vmax.f32 %v19508_v27, 0.0  ;;  %v23228_v4 = vld [vmem:[#allocation32_spill] sm:$0xff] }
 0x4f8   :  { %v7243_v0 = vmax.f32 %v19511_v1, 0.0  ;;  %v7244_v57 = vmax.f32 %v19514_v21, 0.0  ;;  %v7245_v28 = vmax.f32 %v19517_v34, 0.0  ;;  %v7246_v33 = vmax.f32 %v19520_v12, 0.0  ;;  %v23229_v1 = vld [vmem:[#allocation33_spill] sm:$0xff]  ;;  %v23230_v34 = vld [vmem:[#allocation34_spill] sm:$0xff] }
 0x4f9   :  { %v7247_v20 = vmax.f32 %v19523_v17, 0.0  ;;  %v7248_v9 = vmax.f32 %v19526_v40, 0.0  ;;  %v7249_v22 = vmax.f32 %v19529_v15, 0.0  ;;  %v7250_v39 = vmax.f32 %v19532_v53, 0.0  ;;  %v23231_v17 = vld [vmem:[#allocation35_spill] sm:$0xff]  ;;  %v23232_v15 = vld [vmem:[#allocation36_spill] sm:$0xff] }
 0x4fa   :  { %v7251_v27 = vmax.f32 %v23228_v4, 0.0  ;;  %v7252_v21 = vmax.f32 %v23229_v1, 0.0  ;;  %v7253_v12 = vmax.f32 %v23230_v34, 0.0  ;;  %v7254_v40 = vmax.f32 %v23231_v17, 0.0  ;;  %v23233_v4 = vld [vmem:[#allocation37_spill] sm:$0xff] }
 0x4fb   :  { %v7255_v53 = vmax.f32 %v23232_v15, 0.0  ;;  %v7256_v1 = vmax.f32 %v23233_v4, 0.0  ;;  %v7261_v34 = vmax.f32 %v7197_v46, %v7199_v49  ;;  %v7262_v17 = vmax.f32 %v7198_v62, %v7200_v42 }
 0x4fc   :  { %v7263_v15 = vmax.f32 %v7201_v19, %v7203_v3  ;;  %v7264_v4 = vmax.f32 %v7202_v18, %v7204_v63  ;;  %v7265_v46 = vmax.f32 %v7205_v45, %v7207_v29  ;;  %v7266_v49 = vmax.f32 %v7206_v25, %v7208_v43 }
 0x4fd   :  { %v7267_v42 = vmax.f32 %v7209_v38, %v7211_v8  ;;  %v7268_v62 = vmax.f32 %v7210_v55, %v7212_v10  ;;  %v19612_v3 = vmax.f32 %v7213_v2, %v7215_v30  ;;  %v19614_v19 = vmax.f32 %v7214_v47, %v7216_v5 }
 0x4fe   :  { %v19616_v18 = vmax.f32 %v7217_v31, %v7219_v24  ;;  %v19618_v63 = vmax.f32 %v7218_v60, %v7220_v41  ;;  %v19620_v29 = vmax.f32 %v7221_v7, %v7223_v11  ;;  %v19622_v45 = vmax.f32 %v7222_v54, %v7224_v36  ;;  %v23234_v36 = vld [vmem:[#allocation9_spill] sm:$0xff] }
 0x4ff   :  { %v19624_v25 = vmax.f32 %v7225_v37, %v7227_v56  ;;  %v19626_v43 = vmax.f32 %v7226_v23, %v7228_v58  ;;  %v19628_v8 = vmax.f32 %v7229_v44, %v7231_v61  ;;  %v19630_v38 = vmax.f32 %v7230_v35, %v7232_v16 }
 0x500   :  { %v19632_v55 = vmax.f32 %v7233_v52, %v7235_v13  ;;  %v19634_v10 = vmax.f32 %v7234_v14, %v7236_v26  ;;  %v19636_v2 = vmax.f32 %v7237_v6, %v7239_v32  ;;  %v19638_v47 = vmax.f32 %v7238_v48, %v7240_v51 }
 0x501   :  { %v19640_v30 = vmax.f32 %v7241_v50, %v7243_v0  ;;  %v19642_v5 = vmax.f32 %v7242_v59, %v7244_v57  ;;  %v19644_v31 = vmax.f32 %v7245_v28, %v7247_v20  ;;  %v19646_v60 = vmax.f32 %v7246_v33, %v7248_v9 }
 0x502   :  { %v19648_v24 = vmax.f32 %v7249_v22, %v7251_v27  ;;  %v19650_v41 = vmax.f32 %v7250_v39, %v7252_v21  ;;  %v19652_v7 = vmax.f32 %v7253_v12, %v7255_v53  ;;  %v19654_v54 = vmax.f32 %v7254_v40, %v7256_v1 }
 0x503   :  { %v7325_v11 = vcombine.high %v7261_v34, %v7261_v34  ;;  %v19657_v37 = vrot.slane %v7261_v34, %v23234_v36  ;;  %v7342_v23 = vcombine.high %v7262_v17, %v7262_v17  ;;  %v19660_v56 = vrot.slane %v7262_v17, %v23234_v36 }
 0x504   :  { %v7359_v58 = vcombine.high %v7263_v15, %v7263_v15  ;;  %v19663_v44 = vrot.slane %v7263_v15, %v23234_v36  ;;  %v7376_v16 = vcombine.high %v7264_v4, %v7264_v4  ;;  %v19671_v52 = vrot.slane %v7264_v4, %v23234_v36 }
 0x505   :  { %v19666_v35 = vrot.slane %v7325_v11, %v23234_v36  ;;  %v19674_v14 = vrot.slane %v7342_v23, %v23234_v36  ;;  %v7393_v50 = vcombine.high %v7265_v46, %v7265_v46  ;;  %v19695_v57 = vrot.slane %v7265_v46, %v23234_v36 }
 0x506   :  { %v19679_v26 = vrot.slane %v7359_v58, %v23234_v36  ;;  %v19686_v32 = vrot.slane %v7376_v16, %v23234_v36  ;;  %v7410_v28 = vcombine.high %v7266_v49, %v7266_v49  ;;  %v19703_v9 = vrot.slane %v7266_v49, %v23234_v36 }
 0x507   :  { %v19700_v20 = vrot.slane %v7393_v50, %v23234_v36  ;;  %v7427_v22 = vcombine.high %v7267_v42, %v7267_v42  ;;  %v19711_v21 = vrot.slane %v7267_v42, %v23234_v36  ;;  %v7444_v12 = vcombine.high %v7268_v62, %v7268_v62 }
 0x508   :  { %v19708_v27 = vrot.slane %v7410_v28, %v23234_v36  ;;  %v19721_v34 = vrot.slane %v7268_v62, %v23234_v36  ;;  %v7461_v46 = vcombine.high %v19612_v3, %v19612_v3  ;;  %v19738_v62 = vrot.slane %v19612_v3, %v23234_v36 }
 0x509   :  { %v19718_v1 = vrot.slane %v7427_v22, %v23234_v36  ;;  %v19728_v4 = vrot.slane %v7444_v12, %v23234_v36  ;;  %v7478_v11 = vcombine.high %v19614_v19, %v19614_v19  ;;  %v19749_v16 = vrot.slane %v19614_v19, %v23234_v36 }
 0x50a   :  { %v19745_v58 = vrot.slane %v7461_v46, %v23234_v36  ;;  %v7495_v50 = vcombine.high %v19616_v18, %v19616_v18  ;;  %v19760_v22 = vrot.slane %v19616_v18, %v23234_v36  ;;  %v7512_v12 = vcombine.high %v19618_v63, %v19618_v63 }
 0x50b   :  { %v19756_v28 = vrot.slane %v7478_v11, %v23234_v36  ;;  %v19773_v11 = vrot.slane %v19618_v63, %v23234_v36  ;;  %v7529_v19 = vcombine.high %v19620_v29, %v19620_v29  ;;  %v19790_v63 = vrot.slane %v19620_v29, %v23234_v36 }
 0x50c   :  { %v19769_v23 = vrot.slane %v7495_v50, %v23234_v36  ;;  %v19780_v42 = vrot.slane %v7512_v12, %v23234_v36  ;;  %v7546_v18 = vcombine.high %v19622_v45, %v19622_v45  ;;  %v19801_v49 = vrot.slane %v19622_v45, %v23234_v36 }
 0x50d   :  { %v19797_v3 = vrot.slane %v7529_v19, %v23234_v36  ;;  %v7563_v46 = vcombine.high %v19624_v25, %v19624_v25  ;;  %v19812_v15 = vrot.slane %v19624_v25, %v23234_v36  ;;  %v7580_v19 = vcombine.high %v19626_v43, %v19626_v43 }
 0x50e   :  { %v19808_v50 = vrot.slane %v7546_v18, %v23234_v36  ;;  %v19825_v18 = vrot.slane %v19626_v43, %v23234_v36  ;;  %v7597_v45 = vcombine.high %v19628_v8, %v19628_v8  ;;  %v19842_v43 = vrot.slane %v19628_v8, %v23234_v36 }
 0x50f   :  { %v19821_v17 = vrot.slane %v7563_v46, %v23234_v36  ;;  %v19832_v53 = vrot.slane %v7580_v19, %v23234_v36  ;;  %v7614_v25 = vcombine.high %v19630_v38, %v19630_v38  ;;  %v19853_v40 = vrot.slane %v19630_v38, %v23234_v36 }
 0x510   :  { %v19849_v29 = vrot.slane %v7597_v45, %v23234_v36  ;;  %v7631_v12 = vcombine.high %v19632_v55, %v19632_v55  ;;  %v19864_v39 = vrot.slane %v19632_v55, %v23234_v36  ;;  %v7648_v45 = vcombine.high %v19634_v10, %v19634_v10 }
 0x511   :  { %v19860_v46 = vrot.slane %v7614_v25, %v23234_v36  ;;  %v19877_v25 = vrot.slane %v19634_v10, %v23234_v36  ;;  %v7665_v38 = vcombine.high %v19636_v2, %v19636_v2  ;;  %v19894_v10 = vrot.slane %v19636_v2, %v23234_v36 }
 0x512   :  { %v19873_v33 = vrot.slane %v7631_v12, %v23234_v36  ;;  %v19884_v51 = vrot.slane %v7648_v45, %v23234_v36  ;;  %v7682_v55 = vcombine.high %v19638_v47, %v19638_v47  ;;  %v19905_v0 = vrot.slane %v19638_v47, %v23234_v36 }
 0x513   :  { %23236 = vst [vmem:[#allocation39_spill] sm:$0xff] %v19877_v25  ;;  %23238 = vst [vmem:[#allocation41_spill] sm:$0xff] %v19894_v10  ;;  %v19901_v8 = vrot.slane %v7665_v38, %v23234_v36  ;;  %v7699_v19 = vcombine.high %v19640_v30, %v19640_v30  ;;  %v19916_v6 = vrot.slane %v19640_v30, %v23234_v36 }
 0x514   :  { %23235 = vst [vmem:[#allocation38_spill] sm:$0xff] %v19873_v33  ;;  %23237 = vst [vmem:[#allocation40_spill] sm:$0xff] %v19884_v51  ;;  %v19912_v12 = vrot.slane %v7682_v55, %v23234_v36  ;;  %v7716_v38 = vcombine.high %v19642_v5, %v19642_v5  ;;  %v19929_v55 = vrot.slane %v19642_v5, %v23234_v36 }
 0x515   :  { %23239 = vst [vmem:[#allocation42_spill] sm:$0xff] %v19901_v8  ;;  %23240 = vst [vmem:[#allocation10_spill] sm:$0xff] %v19905_v0  ;;  %v19925_v59 = vrot.slane %v7699_v19, %v23234_v36  ;;  %v7733_v47 = vcombine.high %v19644_v31, %v19644_v31  ;;  %v19946_v5 = vrot.slane %v19644_v31, %v23234_v36 }
 0x516   :  { %23241 = vst [vmem:[#allocation25_spill] sm:$0xff] %v19912_v12  ;;  %23242 = vst [vmem:[#allocation26_spill] sm:$0xff] %v19916_v6  ;;  %v19936_v13 = vrot.slane %v7716_v38, %v23234_v36  ;;  %v7750_v30 = vcombine.high %v19646_v60, %v19646_v60  ;;  %v19957_v48 = vrot.slane %v19646_v60, %v23234_v36  ;;  %v7998_v38 = vsel %vm7997_vm11, %v19657_v37, -inf }
 0x517   :  { %23243 = vst [vmem:[#allocation27_spill] sm:$0xff] %v19925_v59  ;;  %23244 = vst [vmem:[#allocation28_spill] sm:$0xff] %v19929_v55  ;;  %v19953_v2 = vrot.slane %v7733_v47, %v23234_v36  ;;  %v7767_v45 = vcombine.high %v19648_v24, %v19648_v24  ;;  %v19968_v61 = vrot.slane %v19648_v24, %v23234_v36 }
 0x518   :  { %23245 = vst [vmem:[#allocation29_spill] sm:$0xff] %v19936_v13  ;;  %23246 = vst [vmem:[#allocation30_spill] sm:$0xff] %v19946_v5  ;;  %v19964_v19 = vrot.slane %v7750_v30, %v23234_v36  ;;  %v7784_v47 = vcombine.high %v19650_v41, %v19650_v41  ;;  %v19981_v30 = vrot.slane %v19650_v41, %v23234_v36 }
 0x519   :  { %23247 = vst [vmem:[#allocation11_spill] sm:$0xff] %v19953_v2  ;;  %23248 = vst [vmem:[#allocation14_spill] sm:$0xff] %v19957_v48  ;;  %v19977_v13 = vrot.slane %v7767_v45, %v23234_v36  ;;  %v7801_v60 = vcombine.high %v19652_v7, %v19652_v7  ;;  %v19998_v41 = vrot.slane %v19652_v7, %v23234_v36 }
 0x51a   :  { %23249 = vst [vmem:[#allocation16_spill] sm:$0xff] %v19964_v19  ;;  %23250 = vst [vmem:[#allocation13_spill] sm:$0xff] %v19968_v61  ;;  %v19988_v5 = vrot.slane %v7784_v47, %v23234_v36  ;;  %v7818_v24 = vcombine.high %v19654_v54, %v19654_v54  ;;  %v20009_v61 = vrot.slane %v19654_v54, %v23234_v36  ;;  %v8012_v19 = vsel %vm7997_vm11, %v19666_v35, -inf }
 0x51b   :  { %23251 = vst [vmem:[#allocation15_spill] sm:$0xff] %v19977_v13  ;;  %23252 = vst [vmem:[#allocation18_spill] sm:$0xff] %v19981_v30  ;;  %v20005_v31 = vrot.slane %v7801_v60, %v23234_v36  ;;  %v7999_v30 = vrot.slane %v7998_v38, 4  ;;  %v23258_v47 = vcombine.high %v19657_v37, %v19657_v37  ;;  %v23259_v37 = vcombine.high %v19666_v35, %v19666_v35 }
 0x51c   :  { %23253 = vst [vmem:[#allocation20_spill] sm:$0xff] %v19988_v5  ;;  %23254 = vst [vmem:[#allocation17_spill] sm:$0xff] %v19998_v41  ;;  %v20016_v45 = vrot.slane %v7818_v24, %v23234_v36  ;;  %v8013_v36 = vrot.slane %v8012_v19, 4  ;;  %v8026_v5 = vsel %vm7997_vm11, %v19660_v56, -inf  ;;  %v23260_v54 = vcombine.high %v19660_v56, %v19660_v56 }
 0x51d   :  { %23255 = vst [vmem:[#allocation19_spill] sm:$0xff] %v20005_v31  ;;  %23256 = vst [vmem:[#allocation21_spill] sm:$0xff] %v20009_v61  ;;  %v8005_v60 = vsel %vm7997_vm11, %v23258_v47, -inf  ;;  %v8000_v7 = vmax.f32 %v7998_v38, %v7999_v30  ;;  %v8019_v47 = vsel %vm7997_vm11, %v23259_v37, -inf  ;;  %v8027_v24 = vrot.slane %v8026_v5, 4 }
 0x51e   :  { %23257 = vst [vmem:[#allocation23_spill] sm:$0xff] %v20016_v45  ;;  %v8006_v13 = vrot.slane %v8005_v60, 4  ;;  %v8020_v48 = vrot.slane %v8019_v47, 4  ;;  %v8033_v61 = vsel %vm7997_vm11, %v23260_v54, -inf  ;;  %v8014_v2 = vmax.f32 %v8012_v19, %v8013_v36 }
 0x51f   :  { %v8001_v31 = vrot.slane %v8000_v7, 2  ;;  %v8034_v38 = vrot.slane %v8033_v61, 4  ;;  %v8040_v35 = vsel %vm7997_vm11, %v19674_v14, -inf  ;;  %v8028_v59 = vmax.f32 %v8026_v5, %v8027_v24 }
 0x520   :  { %v8007_v41 = vmax.f32 %v8005_v60, %v8006_v13  ;;  %v8021_v45 = vmax.f32 %v8019_v47, %v8020_v48  ;;  %v23261_v13 = vcombine.high %v19674_v14, %v19674_v14  ;;  %v8015_v55 = vrot.slane %v8014_v2, 2 }
 0x521   :  { %v8002_v37 = vmax.f32 %v8000_v7, %v8001_v31  ;;  %v8035_v56 = vmax.f32 %v8033_v61, %v8034_v38  ;;  %v8041_v12 = vrot.slane %v8040_v35, 4  ;;  %v8029_v8 = vrot.slane %v8028_v59, 2 }
 0x522   :  { %v8008_v30 = vrot.slane %v8007_v41, 2  ;;  %v8047_v60 = vsel %vm7997_vm11, %v23261_v13, -inf  ;;  %v8022_v54 = vrot.slane %v8021_v45, 2  ;;  %v8016_v0 = vmax.f32 %v8014_v2, %v8015_v55 }
 0x523   :  { %v8048_v36 = vrot.slane %v8047_v60, 4  ;;  %v8003_v19 = vrot.slane %v8002_v37, 1  ;;  %v8036_v48 = vrot.slane %v8035_v56, 2  ;;  %v8042_v51 = vmax.f32 %v8040_v35, %v8041_v12 }
 0x524   :  { %v8009_v6 = vmax.f32 %v8007_v41, %v8008_v30  ;;  %v8023_v10 = vmax.f32 %v8021_v45, %v8022_v54  ;;  %v8017_v14 = vrot.slane %v8016_v0, 1  ;;  %v8030_v13 = vmax.f32 %v8028_v59, %v8029_v8 }
 0x525   :  { %v8049_v25 = vmax.f32 %v8047_v60, %v8048_v36  ;;  %v20046_v33 = vmax.f32 %v8002_v37, %v8003_v19  ;;  %v8037_v31 = vmax.f32 %v8035_v56, %v8036_v48  ;;  %v8043_v5 = vrot.slane %v8042_v51, 2 }
 0x526   :  { %v8010_v47 = vrot.slane %v8009_v6, 1  ;;  %v8024_v61 = vrot.slane %v8023_v10, 1  ;;  %v20050_v24 = vmax.f32 %v8016_v0, %v8017_v14  ;;  %v8031_v38 = vrot.slane %v8030_v13, 1 }
 0x527   :  { %v8050_v41 = vrot.slane %v8049_v25, 2  ;;  %v8038_v2 = vrot.slane %v8037_v31, 1  ;;  %v8054_v55 = vsel %vm7997_vm11, %v19663_v44, -inf  ;;  %v8044_v12 = vmax.f32 %v8042_v51, %v8043_v5 }
 0x528   :  { %v20048_v7 = vmax.f32 %v8009_v6, %v8010_v47  ;;  %v20054_v45 = vmax.f32 %v8023_v10, %v8024_v61  ;;  %v8055_v35 = vrot.slane %v8054_v55, 4  ;;  %v20056_v60 = vmax.f32 %v8030_v13, %v8031_v38 }
 0x529   :  { %v8051_v30 = vmax.f32 %v8049_v25, %v8050_v41  ;;  %v20058_v59 = vmax.f32 %v8037_v31, %v8038_v2  ;;  %v23265_v6 = vcombine.high %v19663_v44, %v19663_v44  ;;  %v8068_v8 = vsel %vm7997_vm11, %v19679_v26, -inf }
 0x52a   :  { %23262 = vst [vmem:[#allocation43_spill] sm:$0xff] %v20054_v45  ;;  %23263 = vst [vmem:[#allocation22_spill] sm:$0xff] %v20056_v60  ;;  %v8045_v37 = vrot.slane %v8044_v12, 1  ;;  %v8056_v54 = vmax.f32 %v8054_v55, %v8055_v35  ;;  %v8069_v36 = vrot.slane %v8068_v8, 4  ;;  %v23266_v51 = vcombine.high %v19679_v26, %v19679_v26 }
 0x52b   :  { %23264 = vst [vmem:[#allocation24_spill] sm:$0xff] %v20058_v59  ;;  %v8061_v0 = vsel %vm7997_vm11, %v23265_v6, -inf  ;;  %v8052_v56 = vrot.slane %v8051_v30, 1  ;;  %v8082_v19 = vsel %vm7997_vm11, %v19671_v52, -inf  ;;  %v23267_v44 = vcombine.high %v19671_v52, %v19671_v52 }
 0x52c   :  { %v8062_v10 = vrot.slane %v8061_v0, 4  ;;  %v8075_v25 = vsel %vm7997_vm11, %v23266_v51, -inf  ;;  %v20076_v47 = vmax.f32 %v8044_v12, %v8045_v37  ;;  %v8057_v13 = vrot.slane %v8056_v54, 2 }
 0x52d   :  { %v8089_v48 = vsel %vm7997_vm11, %v23267_v44, -inf  ;;  %v20078_v14 = vmax.f32 %v8051_v30, %v8052_v56  ;;  %v8070_v61 = vmax.f32 %v8068_v8, %v8069_v36  ;;  %v8076_v5 = vrot.slane %v8075_v25, 4 }
 0x52e   :  { %23268 = vst [vmem:[#allocation31_spill] sm:$0xff] %v20076_v47  ;;  %v8063_v31 = vmax.f32 %v8061_v0, %v8062_v10  ;;  %v8083_v41 = vrot.slane %v8082_v19, 4  ;;  %v8090_v26 = vrot.slane %v8089_v48, 4  ;;  %v8058_v38 = vmax.f32 %v8056_v54, %v8057_v13 }
 0x52f   :  { %23269 = vst [vmem:[#allocation32_spill] sm:$0xff] %v20078_v14  ;;  %v8096_v55 = vsel %vm7997_vm11, %v19686_v32, -inf  ;;  %v23270_v52 = vcombine.high %v19686_v32, %v19686_v32  ;;  %v8071_v12 = vrot.slane %v8070_v61, 2  ;;  %v8077_v6 = vmax.f32 %v8075_v25, %v8076_v5 }
 0x530   :  { %v8064_v2 = vrot.slane %v8063_v31, 2  ;;  %v8084_v30 = vmax.f32 %v8082_v19, %v8083_v41  ;;  %v8091_v37 = vmax.f32 %v8089_v48, %v8090_v26  ;;  %v8059_v56 = vrot.slane %v8058_v38, 1 }
 0x531   :  { %v8103_v35 = vsel %vm7997_vm11, %v23270_v52, -inf  ;;  %v8097_v8 = vrot.slane %v8096_v55, 4  ;;  %v8072_v36 = vmax.f32 %v8070_v61, %v8071_v12  ;;  %v8078_v51 = vrot.slane %v8077_v6, 2 }
 0x532   :  { %v8065_v0 = vmax.f32 %v8063_v31, %v8064_v2  ;;  %v8104_v10 = vrot.slane %v8103_v35, 4  ;;  %v8085_v54 = vrot.slane %v8084_v30, 2  ;;  %v8092_v44 = vrot.slane %v8091_v37, 2 }
 0x533   :  { %v20086_v13 = vmax.f32 %v8058_v38, %v8059_v56  ;;  %v8098_v47 = vmax.f32 %v8096_v55, %v8097_v8  ;;  %v8073_v32 = vrot.slane %v8072_v36, 1  ;;  %v8079_v60 = vmax.f32 %v8077_v6, %v8078_v51 }
 0x534   :  { %v8066_v14 = vrot.slane %v8065_v0, 1  ;;  %v8105_v59 = vmax.f32 %v8103_v35, %v8104_v10  ;;  %v8086_v52 = vmax.f32 %v8084_v30, %v8085_v54  ;;  %v8093_v45 = vmax.f32 %v8091_v37, %v8092_v44 }
 0x535   :  { %v8099_v19 = vrot.slane %v8098_v47, 2  ;;  %v8110_v31 = vsel %vm7997_vm11, %v19695_v57, -inf  ;;  %v20092_v61 = vmax.f32 %v8072_v36, %v8073_v32  ;;  %v8080_v5 = vrot.slane %v8079_v60, 1 }
 0x536   :  { %v20088_v25 = vmax.f32 %v8065_v0, %v8066_v14  ;;  %v8106_v48 = vrot.slane %v8105_v59, 2  ;;  %v8087_v41 = vrot.slane %v8086_v52, 1  ;;  %v8094_v26 = vrot.slane %v8093_v45, 1 }
 0x537   :  { %v8100_v38 = vmax.f32 %v8098_v47, %v8099_v19  ;;  %v8111_v55 = vrot.slane %v8110_v31, 4  ;;  %v23271_v35 = vcombine.high %v19695_v57, %v19695_v57  ;;  %v20098_v14 = vmax.f32 %v8079_v60, %v8080_v5 }
 0x538   :  { %v8107_v2 = vmax.f32 %v8105_v59, %v8106_v48  ;;  %v20100_v6 = vmax.f32 %v8086_v52, %v8087_v41  ;;  %v20102_v30 = vmax.f32 %v8093_v45, %v8094_v26  ;;  %v8124_v47 = vsel %vm7997_vm11, %v19700_v20, -inf }
 0x539   :  { %v8117_v12 = vsel %vm7997_vm11, %v23271_v35, -inf  ;;  %v8101_v56 = vrot.slane %v8100_v38, 1  ;;  %v8112_v8 = vmax.f32 %v8110_v31, %v8111_v55  ;;  %v8125_v10 = vrot.slane %v8124_v47, 4 }
 0x53a   :  { %v8118_v37 = vrot.slane %v8117_v12, 4  ;;  %v8108_v0 = vrot.slane %v8107_v2, 1  ;;  %v23272_v57 = vcombine.high %v19700_v20, %v19700_v20  ;;  %v8138_v60 = vsel %vm7997_vm11, %v19703_v9, -inf }
 0x53b   :  { %v20112_v51 = vmax.f32 %v8100_v38, %v8101_v56  ;;  %v8113_v54 = vrot.slane %v8112_v8, 2  ;;  %v8126_v52 = vmax.f32 %v8124_v47, %v8125_v10  ;;  %v8139_v19 = vrot.slane %v8138_v60, 4 }
 0x53c   :  { %v8119_v59 = vmax.f32 %v8117_v12, %v8118_v37  ;;  %v8131_v36 = vsel %vm7997_vm11, %v23272_v57, -inf  ;;  %v20114_v45 = vmax.f32 %v8107_v2, %v8108_v0  ;;  %v23274_v48 = vcombine.high %v19703_v9, %v19703_v9 }
 0x53d   :  { %v8132_v44 = vrot.slane %v8131_v36, 4  ;;  %v8114_v20 = vmax.f32 %v8112_v8, %v8113_v54  ;;  %v8152_v26 = vsel %vm7997_vm11, %v19708_v27, -inf  ;;  %v8127_v55 = vrot.slane %v8126_v52, 2 }
 0x53e   :  { %23273 = vst [vmem:[#allocation33_spill] sm:$0xff] %v20114_v45  ;;  %v8120_v32 = vrot.slane %v8119_v59, 2  ;;  %v8145_v31 = vsel %vm7997_vm11, %v23274_v48, -inf  ;;  %v8140_v2 = vmax.f32 %v8138_v60, %v8139_v19  ;;  %v8153_v35 = vrot.slane %v8152_v26, 4 }
 0x53f   :  { %v8133_v5 = vmax.f32 %v8131_v36, %v8132_v44  ;;  %v8146_v41 = vrot.slane %v8145_v31, 4  ;;  %v8115_v12 = vrot.slane %v8114_v20, 1  ;;  %v23275_v0 = vcombine.high %v19708_v27, %v19708_v27 }
 0x540   :  { %v8121_v38 = vmax.f32 %v8119_v59, %v8120_v32  ;;  %v8128_v10 = vmax.f32 %v8126_v52, %v8127_v55  ;;  %v8141_v8 = vrot.slane %v8140_v2, 2  ;;  %v8154_v57 = vmax.f32 %v8152_v26, %v8153_v35 }
 0x541   :  { %v8134_v37 = vrot.slane %v8133_v5, 2  ;;  %v8147_v56 = vmax.f32 %v8145_v31, %v8146_v41  ;;  %v8159_v9 = vsel %vm7997_vm11, %v23275_v0, -inf  ;;  %v20126_v36 = vmax.f32 %v8114_v20, %v8115_v12 }
 0x542   :  { %v8122_v47 = vrot.slane %v8121_v38, 1  ;;  %v8160_v59 = vrot.slane %v8159_v9, 4  ;;  %v8129_v60 = vrot.slane %v8128_v10, 1  ;;  %v8142_v19 = vmax.f32 %v8140_v2, %v8141_v8 }
 0x543   :  { %v8135_v54 = vmax.f32 %v8133_v5, %v8134_v37  ;;  %v8148_v44 = vrot.slane %v8147_v56, 2  ;;  %v8155_v48 = vrot.slane %v8154_v57, 2  ;;  %v8166_v27 = vsel %vm7997_vm11, %v19711_v21, -inf }
 0x544   :  { %v20128_v32 = vmax.f32 %v8121_v38, %v8122_v47  ;;  %v8161_v45 = vmax.f32 %v8159_v9, %v8160_v59  ;;  %v20132_v0 = vmax.f32 %v8128_v10, %v8129_v60  ;;  %v8143_v52 = vrot.slane %v8142_v19, 1 }
 0x545   :  { %v8136_v31 = vrot.slane %v8135_v54, 1  ;;  %v8149_v41 = vmax.f32 %v8147_v56, %v8148_v44  ;;  %v8156_v26 = vmax.f32 %v8154_v57, %v8155_v48  ;;  %v8167_v20 = vrot.slane %v8166_v27, 4 }
 0x546   :  { %v8162_v35 = vrot.slane %v8161_v45, 2  ;;  %v23276_v38 = vcombine.high %v19711_v21, %v19711_v21  ;;  %v20140_v12 = vmax.f32 %v8142_v19, %v8143_v52  ;;  %v8180_v8 = vsel %vm7997_vm11, %v19718_v1, -inf }
 0x547   :  { %v20134_v55 = vmax.f32 %v8135_v54, %v8136_v31  ;;  %v8150_v5 = vrot.slane %v8149_v41, 1  ;;  %v8157_v37 = vrot.slane %v8156_v26, 1  ;;  %v8168_v56 = vmax.f32 %v8166_v27, %v8167_v20 }
 0x548   :  { %v8173_v2 = vsel %vm7997_vm11, %v23276_v38, -inf  ;;  %v8163_v10 = vmax.f32 %v8161_v45, %v8162_v35  ;;  %v23278_v57 = vcombine.high %v19718_v1, %v19718_v1  ;;  %v8181_v60 = vrot.slane %v8180_v8, 4 }
 0x549   :  { %v8174_v9 = vrot.slane %v8173_v2, 4  ;;  %v20142_v47 = vmax.f32 %v8149_v41, %v8150_v5  ;;  %v20150_v44 = vmax.f32 %v8156_v26, %v8157_v37  ;;  %v8169_v21 = vrot.slane %v8168_v56, 2 }
 0x54a   :  { %v8187_v54 = vsel %vm7997_vm11, %v23278_v57, -inf  ;;  %v8164_v19 = vrot.slane %v8163_v10, 1  ;;  %v8194_v31 = vsel %vm7997_vm11, %v19721_v34, -inf  ;;  %v23280_v45 = vcombine.high %v19721_v34, %v19721_v34 }
 0x54b   :  { %23277 = vst [vmem:[#allocation34_spill] sm:$0xff] %v20142_v47  ;;  %23279 = vst [vmem:[#allocation35_spill] sm:$0xff] %v20150_v44  ;;  %v8175_v59 = vmax.f32 %v8173_v2, %v8174_v9  ;;  %v8188_v48 = vrot.slane %v8187_v54, 4  ;;  %v8170_v27 = vmax.f32 %v8168_v56, %v8169_v21  ;;  %v8182_v1 = vmax.f32 %v8180_v8, %v8181_v60 }
 0x54c   :  { %v8201_v41 = vsel %vm7997_vm11, %v23280_v45, -inf  ;;  %v8195_v20 = vrot.slane %v8194_v31, 4  ;;  %v20158_v5 = vmax.f32 %v8163_v10, %v8164_v19  ;;  %v8208_v38 = vsel %vm7997_vm11, %v19728_v4, -inf }
 0x54d   :  { %v8176_v52 = vrot.slane %v8175_v59, 2  ;;  %v8189_v26 = vmax.f32 %v8187_v54, %v8188_v48  ;;  %v8202_v35 = vrot.slane %v8201_v41, 4  ;;  %v8171_v2 = vrot.slane %v8170_v27, 1 }
 0x54e   :  { %23281 = vst [vmem:[#allocation36_spill] sm:$0xff] %v20158_v5  ;;  %v8183_v9 = vrot.slane %v8182_v1, 2  ;;  %v8196_v57 = vmax.f32 %v8194_v31, %v8195_v20  ;;  %v8209_v34 = vrot.slane %v8208_v38, 4  ;;  %v23282_v56 = vcombine.high %v19728_v4, %v19728_v4 }
 0x54f   :  { %v8177_v37 = vmax.f32 %v8175_v59, %v8176_v52  ;;  %v8190_v44 = vrot.slane %v8189_v26, 2  ;;  %v8203_v47 = vmax.f32 %v8201_v41, %v8202_v35  ;;  %v20166_v21 = vmax.f32 %v8170_v27, %v8171_v2 }
 0x550   :  { %v8215_v8 = vsel %vm7997_vm11, %v23282_v56, -inf  ;;  %v8184_v54 = vmax.f32 %v8182_v1, %v8183_v9  ;;  %v8197_v60 = vrot.slane %v8196_v57, 2  ;;  %v8210_v45 = vmax.f32 %v8208_v38, %v8209_v34 }
 0x551   :  { %23283 = vst [vmem:[#allocation37_spill] sm:$0xff] %v20166_v21  ;;  %v8178_v10 = vrot.slane %v8177_v37, 1  ;;  %v8191_v19 = vmax.f32 %v8189_v26, %v8190_v44  ;;  %v8204_v48 = vrot.slane %v8203_v47, 2  ;;  %v8216_v5 = vrot.slane %v8215_v8, 4 }
 0x552   :  { %v8185_v31 = vrot.slane %v8184_v54, 1  ;;  %v8198_v52 = vmax.f32 %v8196_v57, %v8197_v60  ;;  %v8222_v41 = vsel %vm7997_vm11, %v19738_v62, -inf  ;;  %v8211_v35 = vrot.slane %v8210_v45, 2 }
 0x553   :  { %v20168_v59 = vmax.f32 %v8177_v37, %v8178_v10  ;;  %v8192_v20 = vrot.slane %v8191_v19, 1  ;;  %v8205_v4 = vmax.f32 %v8203_v47, %v8204_v48  ;;  %v8217_v56 = vmax.f32 %v8215_v8, %v8216_v5 }
 0x554   :  { %v20172_v27 = vmax.f32 %v8184_v54, %v8185_v31  ;;  %v8199_v2 = vrot.slane %v8198_v52, 1  ;;  %v8223_v1 = vrot.slane %v8222_v41, 4  ;;  %v23284_v44 = vcombine.high %v19738_v62, %v19738_v62 }
 0x555   :  { %v20178_v38 = vmax.f32 %v8191_v19, %v8192_v20  ;;  %v8206_v37 = vrot.slane %v8205_v4, 1  ;;  %v8212_v9 = vmax.f32 %v8210_v45, %v8211_v35  ;;  %v8218_v57 = vrot.slane %v8217_v56, 2 }
 0x556   :  { %v8229_v26 = vsel %vm7997_vm11, %v23284_v44, -inf  ;;  %v20180_v34 = vmax.f32 %v8198_v52, %v8199_v2  ;;  %v8224_v10 = vmax.f32 %v8222_v41, %v8223_v1  ;;  %v8236_v5 = vsel %vm7997_vm11, %v19745_v58, -inf }
 0x557   :  { %v8230_v47 = vrot.slane %v8229_v26, 4  ;;  %v20184_v8 = vmax.f32 %v8205_v4, %v8206_v37  ;;  %v8213_v54 = vrot.slane %v8212_v9, 1  ;;  %v8219_v60 = vmax.f32 %v8217_v56, %v8218_v57 }
 0x558   :  { %23285 = vst [vmem:[#allocation44_spill] sm:$0xff] %v20180_v34  ;;  %v8237_v48 = vrot.slane %v8236_v5, 4  ;;  %v8225_v62 = vrot.slane %v8224_v10, 2  ;;  %v23287_v19 = vcombine.high %v19745_v58, %v19745_v58  ;;  %v8250_v52 = vsel %vm7997_vm11, %v19749_v16, -inf }
 0x559   :  { %23286 = vst [vmem:[#allocation45_spill] sm:$0xff] %v20184_v8  ;;  %v8231_v31 = vmax.f32 %v8229_v26, %v8230_v47  ;;  %v20192_v41 = vmax.f32 %v8212_v9, %v8213_v54  ;;  %v8220_v20 = vrot.slane %v8219_v60, 1  ;;  %v8251_v44 = vrot.slane %v8250_v52, 4 }
 0x55a   :  { %v8243_v45 = vsel %vm7997_vm11, %v23287_v19, -inf  ;;  %v8238_v35 = vmax.f32 %v8236_v5, %v8237_v48  ;;  %v8226_v4 = vmax.f32 %v8224_v10, %v8225_v62  ;;  %v23289_v56 = vcombine.high %v19749_v16, %v19749_v16 }
 0x55b   :  { %23288 = vst [vmem:[#allocation46_spill] sm:$0xff] %v20192_v41  ;;  %v8244_v2 = vrot.slane %v8243_v45, 4  ;;  %v8232_v1 = vrot.slane %v8231_v31, 2  ;;  %v20198_v37 = vmax.f32 %v8219_v60, %v8220_v20  ;;  %v8252_v9 = vmax.f32 %v8250_v52, %v8251_v44 }
 0x55c   :  { %v8257_v26 = vsel %vm7997_vm11, %v23289_v56, -inf  ;;  %v8239_v58 = vrot.slane %v8238_v35, 2  ;;  %v8227_v19 = vrot.slane %v8226_v4, 1  ;;  %v8264_v5 = vsel %vm7997_vm11, %v19756_v28, -inf }
 0x55d   :  { %v8245_v57 = vmax.f32 %v8243_v45, %v8244_v2  ;;  %v8258_v47 = vrot.slane %v8257_v26, 4  ;;  %v8233_v8 = vmax.f32 %v8231_v31, %v8232_v1  ;;  %v8265_v62 = vrot.slane %v8264_v5, 4 }
 0x55e   :  { %v8240_v54 = vmax.f32 %v8238_v35, %v8239_v58  ;;  %v20202_v41 = vmax.f32 %v8226_v4, %v8227_v19  ;;  %v8253_v34 = vrot.slane %v8252_v9, 2  ;;  %v23291_v60 = vcombine.high %v19756_v28, %v19756_v28 }
 0x55f   :  { %v8246_v10 = vrot.slane %v8245_v57, 2  ;;  %v8259_v48 = vmax.f32 %v8257_v26, %v8258_v47  ;;  %v8234_v16 = vrot.slane %v8233_v8, 1  ;;  %v8266_v52 = vmax.f32 %v8264_v5, %v8265_v62 }
 0x560   :  { %23290 = vst [vmem:[#allocation47_spill] sm:$0xff] %v20202_v41  ;;  %v8271_v45 = vsel %vm7997_vm11, %v23291_v60, -inf  ;;  %v8241_v20 = vrot.slane %v8240_v54, 1  ;;  %v8254_v44 = vmax.f32 %v8252_v9, %v8253_v34  ;;  %v8278_v56 = vsel %vm7997_vm11, %v19760_v22, -inf }
 0x561   :  { %v8247_v2 = vmax.f32 %v8245_v57, %v8246_v10  ;;  %v8260_v31 = vrot.slane %v8259_v48, 2  ;;  %v20208_v1 = vmax.f32 %v8233_v8, %v8234_v16  ;;  %v8272_v35 = vrot.slane %v8271_v45, 4 }
 0x562   :  { %v20212_v4 = vmax.f32 %v8240_v54, %v8241_v20  ;;  %v8267_v47 = vrot.slane %v8266_v52, 2  ;;  %v8255_v19 = vrot.slane %v8254_v44, 1  ;;  %v8279_v41 = vrot.slane %v8278_v56, 4 }
 0x563   :  { %v8248_v26 = vrot.slane %v8247_v2, 1  ;;  %v8261_v58 = vmax.f32 %v8259_v48, %v8260_v31  ;;  %v8273_v28 = vmax.f32 %v8271_v45, %v8272_v35  ;;  %v23292_v57 = vcombine.high %v19760_v22, %v19760_v22 }
 0x564   :  { %v8268_v9 = vmax.f32 %v8266_v52, %v8267_v47  ;;  %v20220_v62 = vmax.f32 %v8254_v44, %v8255_v19  ;;  %v8280_v16 = vmax.f32 %v8278_v56, %v8279_v41  ;;  %v8292_v48 = vsel %vm7997_vm11, %v19769_v23, -inf }
 0x565   :  { %v8285_v5 = vsel %vm7997_vm11, %v23292_v57, -inf  ;;  %v20218_v8 = vmax.f32 %v8247_v2, %v8248_v26  ;;  %v8262_v34 = vrot.slane %v8261_v58, 1  ;;  %v8274_v54 = vrot.slane %v8273_v28, 2 }
 0x566   :  { %v8286_v10 = vrot.slane %v8285_v5, 4  ;;  %23293 = vst [vmem:[#allocation48_spill] sm:$0xff] %v20220_v62  ;;  %v8269_v45 = vrot.slane %v8268_v9, 1  ;;  %v8293_v31 = vrot.slane %v8292_v48, 4  ;;  %v8281_v35 = vrot.slane %v8280_v16, 2 }
 0x567   :  { %v20224_v60 = vmax.f32 %v8261_v58, %v8262_v34  ;;  %v8275_v22 = vmax.f32 %v8273_v28, %v8274_v54  ;;  %v23295_v2 = vcombine.high %v19769_v23, %v19769_v23  ;;  %v8306_v44 = vsel %vm7997_vm11, %v19773_v11, -inf }
 0x568   :  { %v8287_v20 = vmax.f32 %v8285_v5, %v8286_v10  ;;  %v20232_v26 = vmax.f32 %v8268_v9, %v8269_v45  ;;  %v8294_v56 = vmax.f32 %v8292_v48, %v8293_v31  ;;  %v8282_v19 = vmax.f32 %v8280_v16, %v8281_v35 }
 0x569   :  { %23294 = vst [vmem:[#allocation49_spill] sm:$0xff] %v20224_v60  ;;  %v8299_v52 = vsel %vm7997_vm11, %v23295_v2, -inf  ;;  %v8276_v58 = vrot.slane %v8275_v22, 1  ;;  %v8307_v57 = vrot.slane %v8306_v44, 4  ;;  %v23297_v28 = vcombine.high %v19773_v11, %v19773_v11 }
 0x56a   :  { %23296 = vst [vmem:[#allocation50_spill] sm:$0xff] %v20232_v26  ;;  %v8288_v41 = vrot.slane %v8287_v20, 2  ;;  %v8300_v47 = vrot.slane %v8299_v52, 4  ;;  %v8295_v23 = vrot.slane %v8294_v56, 2  ;;  %v8283_v60 = vrot.slane %v8282_v19, 1 }
 0x56b   :  { %v8313_v5 = vsel %vm7997_vm11, %v23297_v28, -inf  ;;  %v20238_v2 = vmax.f32 %v8275_v22, %v8276_v58  ;;  %v8308_v9 = vmax.f32 %v8306_v44, %v8307_v57  ;;  %v8320_v48 = vsel %vm7997_vm11, %v19780_v42, -inf }
 0x56c   :  { %v8289_v34 = vmax.f32 %v8287_v20, %v8288_v41  ;;  %v8301_v10 = vmax.f32 %v8299_v52, %v8300_v47  ;;  %v8314_v54 = vrot.slane %v8313_v5, 4  ;;  %v8296_v31 = vmax.f32 %v8294_v56, %v8295_v23 }
 0x56d   :  { %v20242_v26 = vmax.f32 %v8282_v19, %v8283_v60  ;;  %v8309_v11 = vrot.slane %v8308_v9, 2  ;;  %v8321_v62 = vrot.slane %v8320_v48, 4  ;;  %v23299_v20 = vcombine.high %v19780_v42, %v19780_v42 }
 0x56e   :  { %v8290_v45 = vrot.slane %v8289_v34, 1  ;;  %v8302_v16 = vrot.slane %v8301_v10, 2  ;;  %v8315_v35 = vmax.f32 %v8313_v5, %v8314_v54  ;;  %v8297_v41 = vrot.slane %v8296_v31, 1 }
 0x56f   :  { %23298 = vst [vmem:[#allocation51_spill] sm:$0xff] %v20242_v26  ;;  %v8327_v52 = vsel %vm7997_vm11, %v23299_v20, -inf  ;;  %v8310_v58 = vmax.f32 %v8308_v9, %v8309_v11  ;;  %v8322_v57 = vmax.f32 %v8320_v48, %v8321_v62  ;;  %v8334_v56 = vsel %vm7997_vm11, %v19790_v63, -inf }
 0x570   :  { %v20248_v22 = vmax.f32 %v8289_v34, %v8290_v45  ;;  %v8303_v44 = vmax.f32 %v8301_v10, %v8302_v16  ;;  %v8316_v47 = vrot.slane %v8315_v35, 2  ;;  %v8328_v28 = vrot.slane %v8327_v52, 4 }
 0x571   :  { %v20252_v60 = vmax.f32 %v8296_v31, %v8297_v41  ;;  %v8335_v23 = vrot.slane %v8334_v56, 4  ;;  %v8311_v54 = vrot.slane %v8310_v58, 1  ;;  %v8323_v42 = vrot.slane %v8322_v57, 2 }
 0x572   :  { %v8304_v19 = vrot.slane %v8303_v44, 1  ;;  %v8317_v5 = vmax.f32 %v8315_v35, %v8316_v47  ;;  %v8329_v26 = vmax.f32 %v8327_v52, %v8328_v28  ;;  %v23300_v34 = vcombine.high %v19790_v63, %v19790_v63 }
 0x573   :  { %v8336_v9 = vmax.f32 %v8334_v56, %v8335_v23  ;;  %v20260_v16 = vmax.f32 %v8310_v58, %v8311_v54  ;;  %v8324_v31 = vmax.f32 %v8322_v57, %v8323_v42  ;;  %v8348_v35 = vsel %vm7997_vm11, %v19797_v3, -inf }
 0x574   :  { %v8341_v10 = vsel %vm7997_vm11, %v23300_v34, -inf  ;;  %v20258_v45 = vmax.f32 %v8303_v44, %v8304_v19  ;;  %v8318_v62 = vrot.slane %v8317_v5, 1  ;;  %v8330_v11 = vrot.slane %v8329_v26, 2 }
 0x575   :  { %v8342_v48 = vrot.slane %v8341_v10, 4  ;;  %23301 = vst [vmem:[#allocation52_spill] sm:$0xff] %v20260_v16  ;;  %v8337_v52 = vrot.slane %v8336_v9, 2  ;;  %v8349_v47 = vrot.slane %v8348_v35, 4  ;;  %v8325_v63 = vrot.slane %v8324_v31, 1 }
 0x576   :  { %v20264_v20 = vmax.f32 %v8317_v5, %v8318_v62  ;;  %v8331_v28 = vmax.f32 %v8329_v26, %v8330_v11  ;;  %v23303_v44 = vcombine.high %v19797_v3, %v19797_v3  ;;  %v8362_v58 = vsel %vm7997_vm11, %v19801_v49, -inf }
 0x577   :  { %v8343_v41 = vmax.f32 %v8341_v10, %v8342_v48  ;;  %v8338_v57 = vmax.f32 %v8336_v9, %v8337_v52  ;;  %v8350_v23 = vmax.f32 %v8348_v35, %v8349_v47  ;;  %v20272_v42 = vmax.f32 %v8324_v31, %v8325_v63 }
 0x578   :  { %23302 = vst [vmem:[#allocation53_spill] sm:$0xff] %v20264_v20  ;;  %v8355_v56 = vsel %vm7997_vm11, %v23303_v44, -inf  ;;  %v8332_v5 = vrot.slane %v8331_v28, 1  ;;  %v8363_v34 = vrot.slane %v8362_v58, 4  ;;  %v23305_v10 = vcombine.high %v19801_v49, %v19801_v49 }
 0x579   :  { %v8344_v19 = vrot.slane %v8343_v41, 2  ;;  %v8356_v54 = vrot.slane %v8355_v56, 4  ;;  %23304 = vst [vmem:[#allocation54_spill] sm:$0xff] %v20272_v42  ;;  %v8339_v62 = vrot.slane %v8338_v57, 1  ;;  %v8351_v48 = vrot.slane %v8350_v23, 2 }
 0x57a   :  { %v8369_v26 = vsel %vm7997_vm11, %v23305_v10, -inf  ;;  %v20278_v44 = vmax.f32 %v8331_v28, %v8332_v5  ;;  %v8364_v20 = vmax.f32 %v8362_v58, %v8363_v34  ;;  %v8376_v35 = vsel %vm7997_vm11, %v19808_v50, -inf }
 0x57b   :  { %v8345_v3 = vmax.f32 %v8343_v41, %v8344_v19  ;;  %v8357_v11 = vmax.f32 %v8355_v56, %v8356_v54  ;;  %v8370_v9 = vrot.slane %v8369_v26, 4  ;;  %v20282_v31 = vmax.f32 %v8338_v57, %v8339_v62 }
 0x57c   :  { %v8352_v47 = vmax.f32 %v8350_v23, %v8351_v48  ;;  %v8365_v42 = vrot.slane %v8364_v20, 2  ;;  %v8377_v16 = vrot.slane %v8376_v35, 4  ;;  %v23307_v41 = vcombine.high %v19808_v50, %v19808_v50 }
 0x57d   :  { %23306 = vst [vmem:[#allocation55_spill] sm:$0xff] %v20282_v31  ;;  %v8346_v52 = vrot.slane %v8345_v3, 1  ;;  %v8358_v63 = vrot.slane %v8357_v11, 2  ;;  %v8371_v49 = vmax.f32 %v8369_v26, %v8370_v9  ;;  %v8390_v23 = vsel %vm7997_vm11, %v19812_v15, -inf }
 0x57e   :  { %v8383_v56 = vsel %vm7997_vm11, %v23307_v41, -inf  ;;  %v8353_v58 = vrot.slane %v8352_v47, 1  ;;  %v8366_v5 = vmax.f32 %v8364_v20, %v8365_v42  ;;  %v8378_v57 = vmax.f32 %v8376_v35, %v8377_v16 }
 0x57f   :  { %v20288_v28 = vmax.f32 %v8345_v3, %v8346_v52  ;;  %v8359_v19 = vmax.f32 %v8357_v11, %v8358_v63  ;;  %v8384_v54 = vrot.slane %v8383_v56, 4  ;;  %v8372_v34 = vrot.slane %v8371_v49, 2 }
 0x580   :  { %v20292_v10 = vmax.f32 %v8352_v47, %v8353_v58  ;;  %v8391_v48 = vrot.slane %v8390_v23, 4  ;;  %v8367_v9 = vrot.slane %v8366_v5, 1  ;;  %v8379_v31 = vrot.slane %v8378_v57, 2 }
 0x581   :  { %v8360_v26 = vrot.slane %v8359_v19, 1  ;;  %v8385_v62 = vmax.f32 %v8383_v56, %v8384_v54  ;;  %v8373_v50 = vmax.f32 %v8371_v49, %v8372_v34  ;;  %v23308_v3 = vcombine.high %v19812_v15, %v19812_v15 }
 0x582   :  { %v8392_v16 = vmax.f32 %v8390_v23, %v8391_v48  ;;  %v20300_v35 = vmax.f32 %v8366_v5, %v8367_v9  ;;  %v8380_v63 = vmax.f32 %v8378_v57, %v8379_v31  ;;  %v8404_v41 = vsel %vm7997_vm11, %v19821_v17, -inf }
 0x583   :  { %v8397_v11 = vsel %vm7997_vm11, %v23308_v3, -inf  ;;  %v20298_v52 = vmax.f32 %v8359_v19, %v8360_v26  ;;  %v8386_v20 = vrot.slane %v8385_v62, 2  ;;  %v8374_v47 = vrot.slane %v8373_v50, 1 }
 0x584   :  { %v8398_v42 = vrot.slane %v8397_v11, 4  ;;  %23309 = vst [vmem:[#allocation56_spill] sm:$0xff] %v20300_v35  ;;  %v8393_v49 = vrot.slane %v8392_v16, 2  ;;  %v8405_v54 = vrot.slane %v8404_v41, 4  ;;  %v8381_v15 = vrot.slane %v8380_v63, 1 }
 0x585   :  { %v8387_v56 = vmax.f32 %v8385_v62, %v8386_v20  ;;  %v20304_v34 = vmax.f32 %v8373_v50, %v8374_v47  ;;  %v23311_v19 = vcombine.high %v19821_v17, %v19821_v17  ;;  %v8418_v5 = vsel %vm7997_vm11, %v19825_v18, -inf }
 0x586   :  { %v8399_v58 = vmax.f32 %v8397_v11, %v8398_v42  ;;  %v8394_v31 = vmax.f32 %v8392_v16, %v8393_v49  ;;  %v8406_v48 = vmax.f32 %v8404_v41, %v8405_v54  ;;  %v20312_v9 = vmax.f32 %v8380_v63, %v8381_v15 }
 0x587   :  { %23310 = vst [vmem:[#allocation57_spill] sm:$0xff] %v20304_v34  ;;  %v8411_v23 = vsel %vm7997_vm11, %v23311_v19, -inf  ;;  %v8388_v26 = vrot.slane %v8387_v56, 1  ;;  %v8419_v3 = vrot.slane %v8418_v5, 4  ;;  %v23313_v50 = vcombine.high %v19825_v18, %v19825_v18 }
 0x588   :  { %v8400_v57 = vrot.slane %v8399_v58, 2  ;;  %23312 = vst [vmem:[#allocation58_spill] sm:$0xff] %v20312_v9  ;;  %v8412_v62 = vrot.slane %v8411_v23, 4  ;;  %v8395_v17 = vrot.slane %v8394_v31, 1  ;;  %v8407_v47 = vrot.slane %v8406_v48, 2 }
 0x589   :  { %v8425_v11 = vsel %vm7997_vm11, %v23313_v50, -inf  ;;  %v20318_v20 = vmax.f32 %v8387_v56, %v8388_v26  ;;  %v8420_v34 = vmax.f32 %v8418_v5, %v8419_v3  ;;  %v8432_v16 = vsel %vm7997_vm11, %v19832_v53, -inf }
 0x58a   :  { %v8401_v42 = vmax.f32 %v8399_v58, %v8400_v57  ;;  %v8413_v19 = vmax.f32 %v8411_v23, %v8412_v62  ;;  %v8426_v35 = vrot.slane %v8425_v11, 4  ;;  %v20322_v63 = vmax.f32 %v8394_v31, %v8395_v17 }
 0x58b   :  { %v8408_v49 = vmax.f32 %v8406_v48, %v8407_v47  ;;  %v8433_v54 = vrot.slane %v8432_v16, 4  ;;  %v8421_v18 = vrot.slane %v8420_v34, 2  ;;  %v23315_v56 = vcombine.high %v19832_v53, %v19832_v53 }
 0x58c   :  { %23314 = vst [vmem:[#allocation59_spill] sm:$0xff] %v20322_v63  ;;  %v8402_v41 = vrot.slane %v8401_v42, 1  ;;  %v8414_v15 = vrot.slane %v8413_v19, 2  ;;  %v8427_v9 = vmax.f32 %v8425_v11, %v8426_v35  ;;  %v8446_v48 = vsel %vm7997_vm11, %v19842_v43, -inf }
 0x58d   :  { %v8439_v58 = vsel %vm7997_vm11, %v23315_v56, -inf  ;;  %v8409_v23 = vrot.slane %v8408_v49, 1  ;;  %v8434_v5 = vmax.f32 %v8432_v16, %v8433_v54  ;;  %v8422_v3 = vmax.f32 %v8420_v34, %v8421_v18 }
 0x58e   :  { %v20328_v26 = vmax.f32 %v8401_v42, %v8402_v41  ;;  %v8440_v57 = vrot.slane %v8439_v58, 4  ;;  %v8415_v62 = vmax.f32 %v8413_v19, %v8414_v15  ;;  %v8428_v31 = vrot.slane %v8427_v9, 2 }
 0x58f   :  { %v20332_v50 = vmax.f32 %v8408_v49, %v8409_v23  ;;  %v8435_v17 = vrot.slane %v8434_v5, 2  ;;  %v8447_v11 = vrot.slane %v8446_v48, 4  ;;  %v8423_v53 = vrot.slane %v8422_v3, 1 }
 0x590   :  { %23316 = vst [vmem:[#allocation60_spill] sm:$0xff] %v20328_v26  ;;  %v8441_v35 = vmax.f32 %v8439_v58, %v8440_v57  ;;  %v8416_v47 = vrot.slane %v8415_v62, 1  ;;  %v8429_v63 = vmax.f32 %v8427_v9, %v8428_v31  ;;  %v23318_v42 = vcombine.high %v19842_v43, %v19842_v43 }
 0x591   :  { %23317 = vst [vmem:[#allocation61_spill] sm:$0xff] %v20332_v50  ;;  %v8436_v41 = vmax.f32 %v8434_v5, %v8435_v17  ;;  %v8448_v34 = vmax.f32 %v8446_v48, %v8447_v11  ;;  %v20340_v18 = vmax.f32 %v8422_v3, %v8423_v53  ;;  %v8460_v56 = vsel %vm7997_vm11, %v19849_v29, -inf }
 0x592   :  { %v8453_v16 = vsel %vm7997_vm11, %v23318_v42, -inf  ;;  %v8442_v19 = vrot.slane %v8441_v35, 2  ;;  %v20338_v15 = vmax.f32 %v8415_v62, %v8416_v47  ;;  %v8430_v49 = vrot.slane %v8429_v63, 1 }
 0x593   :  { %v8454_v54 = vrot.slane %v8453_v16, 4  ;;  %23320 = vst [vmem:[#allocation63_spill] sm:$0xff] %v20340_v18  ;;  %v8437_v58 = vrot.slane %v8436_v41, 1  ;;  %v8449_v9 = vrot.slane %v8448_v34, 2  ;;  %v8461_v43 = vrot.slane %v8460_v56, 4 }
 0x594   :  { %23319 = vst [vmem:[#allocation62_spill] sm:$0xff] %v20338_v15  ;;  %v8443_v23 = vmax.f32 %v8441_v35, %v8442_v19  ;;  %v20344_v31 = vmax.f32 %v8429_v63, %v8430_v49  ;;  %v23322_v5 = vcombine.high %v19849_v29, %v19849_v29  ;;  %v8474_v62 = vsel %vm7997_vm11, %v19853_v40, -inf }
 0x595   :  { %v8455_v57 = vmax.f32 %v8453_v16, %v8454_v54  ;;  %v20352_v3 = vmax.f32 %v8436_v41, %v8437_v58  ;;  %v8450_v11 = vmax.f32 %v8448_v34, %v8449_v9  ;;  %v8462_v53 = vmax.f32 %v8460_v56, %v8461_v43 }
 0x596   :  { %23321 = vst [vmem:[#allocation64_spill] sm:$0xff] %v20344_v31  ;;  %v8467_v48 = vsel %vm7997_vm11, %v23322_v5, -inf  ;;  %v8444_v17 = vrot.slane %v8443_v23, 1  ;;  %v8475_v42 = vrot.slane %v8474_v62, 4  ;;  %v23324_v63 = vcombine.high %v19853_v40, %v19853_v40 }
 0x597   :  { %23323 = vst [vmem:[#allocation65_spill] sm:$0xff] %v20352_v3  ;;  %v8456_v47 = vrot.slane %v8455_v57, 2  ;;  %v8468_v35 = vrot.slane %v8467_v48, 4  ;;  %v8451_v29 = vrot.slane %v8450_v11, 1  ;;  %v8463_v5 = vrot.slane %v8462_v53, 2 }
 0x598   :  { %v8481_v16 = vsel %vm7997_vm11, %v23324_v63, -inf  ;;  %v20358_v19 = vmax.f32 %v8443_v23, %v8444_v17  ;;  %v8476_v41 = vmax.f32 %v8474_v62, %v8475_v42  ;;  %v8488_v34 = vsel %vm7997_vm11, %v19860_v46, -inf }
 0x599   :  { %v8457_v54 = vmax.f32 %v8455_v57, %v8456_v47  ;;  %v8482_v49 = vrot.slane %v8481_v16, 4  ;;  %v8469_v31 = vmax.f32 %v8467_v48, %v8468_v35  ;;  %v20362_v58 = vmax.f32 %v8450_v11, %v8451_v29 }
 0x59a   :  { %23325 = vst [vmem:[#allocation66_spill] sm:$0xff] %v20358_v19  ;;  %v8489_v43 = vrot.slane %v8488_v34, 4  ;;  %v8464_v3 = vmax.f32 %v8462_v53, %v8463_v5  ;;  %v8477_v18 = vrot.slane %v8476_v41, 2  ;;  %v23327_v23 = vcombine.high %v19860_v46, %v19860_v46 }
 0x59b   :  { %23326 = vst [vmem:[#allocation67_spill] sm:$0xff] %v20362_v58  ;;  %v8458_v56 = vrot.slane %v8457_v54, 1  ;;  %v8483_v9 = vmax.f32 %v8481_v16, %v8482_v49  ;;  %v8470_v40 = vrot.slane %v8469_v31, 2  ;;  %v8502_v63 = vsel %vm7997_vm11, %v19864_v39, -inf }
 0x59c   :  { %v8495_v57 = vsel %vm7997_vm11, %v23327_v23, -inf  ;;  %v8490_v62 = vmax.f32 %v8488_v34, %v8489_v43  ;;  %v8465_v35 = vrot.slane %v8464_v3, 1  ;;  %v8478_v11 = vmax.f32 %v8476_v41, %v8477_v18  ;;  %v23333_v23 = vld [vmem:[#allocation38_spill] sm:$0xff] }
 0x59d   :  { %v20368_v17 = vmax.f32 %v8457_v54, %v8458_v56  ;;  %v8484_v48 = vrot.slane %v8483_v9, 2  ;;  %v8496_v47 = vrot.slane %v8495_v57, 4  ;;  %v8471_v42 = vmax.f32 %v8469_v31, %v8470_v40 }
 0x59e   :  { %v8491_v53 = vrot.slane %v8490_v62, 2  ;;  %v8503_v49 = vrot.slane %v8502_v63, 4  ;;  %v20372_v5 = vmax.f32 %v8464_v3, %v8465_v35  ;;  %v8479_v58 = vrot.slane %v8478_v11, 1 }
 0x59f   :  { %23328 = vst [vmem:[#allocation68_spill] sm:$0xff] %v20368_v17  ;;  %v8485_v16 = vmax.f32 %v8483_v9, %v8484_v48  ;;  %v8497_v29 = vmax.f32 %v8495_v57, %v8496_v47  ;;  %v8472_v46 = vrot.slane %v8471_v42, 1  ;;  %v23330_v54 = vcombine.high %v19864_v39, %v19864_v39 }
 0x5a0   :  { %23329 = vst [vmem:[#allocation69_spill] sm:$0xff] %v20372_v5  ;;  %v8492_v43 = vmax.f32 %v8490_v62, %v8491_v53  ;;  %v8504_v18 = vmax.f32 %v8502_v63, %v8503_v49  ;;  %v20380_v40 = vmax.f32 %v8478_v11, %v8479_v58  ;;  %v8516_v3 = vsel %vm7997_vm11, %v23333_v23, -inf }
 0x5a1   :  { %v8509_v34 = vsel %vm7997_vm11, %v23330_v54, -inf  ;;  %v8486_v56 = vrot.slane %v8485_v16, 1  ;;  %v8498_v31 = vrot.slane %v8497_v29, 2  ;;  %v20378_v41 = vmax.f32 %v8471_v42, %v8472_v46  ;;  %v23336_v42 = vld [vmem:[#allocation39_spill] sm:$0xff] }
 0x5a2   :  { %23332 = vst [vmem:[#allocation71_spill] sm:$0xff] %v20380_v40  ;;  %v8510_v9 = vrot.slane %v8509_v34, 4  ;;  %v8493_v48 = vrot.slane %v8492_v43, 1  ;;  %v8505_v35 = vrot.slane %v8504_v18, 2  ;;  %v8517_v5 = vrot.slane %v8516_v3, 4 }
 0x5a3   :  { %23331 = vst [vmem:[#allocation70_spill] sm:$0xff] %v20378_v41  ;;  %v20384_v57 = vmax.f32 %v8485_v16, %v8486_v56  ;;  %v8499_v47 = vmax.f32 %v8497_v29, %v8498_v31  ;;  %v23335_v62 = vcombine.high %v23333_v23, %v23333_v23  ;;  %v8530_v58 = vsel %vm7997_vm11, %v23336_v42, -inf }
 0x5a4   :  { %v8511_v39 = vmax.f32 %v8509_v34, %v8510_v9  ;;  %v20392_v11 = vmax.f32 %v8492_v43, %v8493_v48  ;;  %v8506_v49 = vmax.f32 %v8504_v18, %v8505_v35  ;;  %v8518_v54 = vmax.f32 %v8516_v3, %v8517_v5  ;;  %v23340_v48 = vld [vmem:[#allocation40_spill] sm:$0xff] }
 0x5a5   :  { %23334 = vst [vmem:[#allocation38_spill] sm:$0xff] %v20384_v57  ;;  %v8523_v63 = vsel %vm7997_vm11, %v23335_v62, -inf  ;;  %v8500_v53 = vrot.slane %v8499_v47, 1  ;;  %v8531_v56 = vrot.slane %v8530_v58, 4  ;;  %v23338_v29 = vcombine.high %v23336_v42, %v23336_v42 }
 0x5a6   :  { %23337 = vst [vmem:[#allocation39_spill] sm:$0xff] %v20392_v11  ;;  %v8524_v46 = vrot.slane %v8523_v63, 4  ;;  %v8512_v16 = vrot.slane %v8511_v39, 2  ;;  %v8507_v9 = vrot.slane %v8506_v49, 1  ;;  %v8519_v40 = vrot.slane %v8518_v54, 2 }
 0x5a7   :  { %v8537_v34 = vsel %vm7997_vm11, %v23338_v29, -inf  ;;  %v20398_v31 = vmax.f32 %v8499_v47, %v8500_v53  ;;  %v8532_v43 = vmax.f32 %v8530_v58, %v8531_v56  ;;  %v8544_v18 = vsel %vm7997_vm11, %v23340_v48, -inf  ;;  %v23344_v29 = vld [vmem:[#allocation41_spill] sm:$0xff] }
 0x5a8   :  { %v8525_v23 = vmax.f32 %v8523_v63, %v8524_v46  ;;  %v8538_v62 = vrot.slane %v8537_v34, 4  ;;  %v8513_v57 = vmax.f32 %v8511_v39, %v8512_v16  ;;  %v20402_v35 = vmax.f32 %v8506_v49, %v8507_v9 }
 0x5a9   :  { %23339 = vst [vmem:[#allocation72_spill] sm:$0xff] %v20398_v31  ;;  %v8545_v11 = vrot.slane %v8544_v18, 4  ;;  %v8520_v42 = vmax.f32 %v8518_v54, %v8519_v40  ;;  %v8533_v17 = vrot.slane %v8532_v43, 2  ;;  %v23342_v47 = vcombine.high %v23340_v48, %v23340_v48 }
 0x5aa   :  { %23341 = vst [vmem:[#allocation40_spill] sm:$0xff] %v20402_v35  ;;  %v8526_v5 = vrot.slane %v8525_v23, 2  ;;  %v8539_v3 = vmax.f32 %v8537_v34, %v8538_v62  ;;  %v8514_v41 = vrot.slane %v8513_v57, 1  ;;  %v8558_v34 = vsel %vm7997_vm11, %v23344_v29, -inf }
 0x5ab   :  { %v8551_v63 = vsel %vm7997_vm11, %v23342_v47, -inf  ;;  %v8546_v46 = vmax.f32 %v8544_v18, %v8545_v11  ;;  %v8521_v56 = vrot.slane %v8520_v42, 1  ;;  %v8534_v49 = vmax.f32 %v8532_v43, %v8533_v17  ;;  %v23349_v47 = vld [vmem:[#allocation42_spill] sm:$0xff] }
 0x5ac   :  { %v8527_v53 = vmax.f32 %v8525_v23, %v8526_v5  ;;  %v8540_v39 = vrot.slane %v8539_v3, 2  ;;  %v8552_v58 = vrot.slane %v8551_v63, 4  ;;  %v20408_v16 = vmax.f32 %v8513_v57, %v8514_v41 }
 0x5ad   :  { %v8547_v40 = vrot.slane %v8546_v46, 2  ;;  %v20412_v35 = vmax.f32 %v8520_v42, %v8521_v56  ;;  %v8535_v48 = vrot.slane %v8534_v49, 1  ;;  %v8559_v31 = vrot.slane %v8558_v34, 4 }
 0x5ae   :  { %23343 = vst [vmem:[#allocation73_spill] sm:$0xff] %v20408_v16  ;;  %v8528_v9 = vrot.slane %v8527_v53, 1  ;;  %v8541_v62 = vmax.f32 %v8539_v3, %v8540_v39  ;;  %v8553_v54 = vmax.f32 %v8551_v63, %v8552_v58  ;;  %v23346_v23 = vcombine.high %v23344_v29, %v23344_v29 }
 0x5af   :  { %23345 = vst [vmem:[#allocation41_spill] sm:$0xff] %v20412_v35  ;;  %v8548_v17 = vmax.f32 %v8546_v46, %v8547_v40  ;;  %v20420_v18 = vmax.f32 %v8534_v49, %v8535_v48  ;;  %v8560_v5 = vmax.f32 %v8558_v34, %v8559_v31  ;;  %v8572_v42 = vsel %vm7997_vm11, %v23349_v47, -inf }
 0x5b0   :  { %v8565_v11 = vsel %vm7997_vm11, %v23346_v23, -inf  ;;  %v20418_v41 = vmax.f32 %v8527_v53, %v8528_v9  ;;  %v8542_v57 = vrot.slane %v8541_v62, 1  ;;  %v8554_v43 = vrot.slane %v8553_v54, 2  ;;  %v23352_v9 = vld [vmem:[#allocation10_spill] sm:$0xff] }
 0x5b1   :  { %23348 = vst [vmem:[#allocation75_spill] sm:$0xff] %v20420_v18  ;;  %v8566_v3 = vrot.slane %v8565_v11, 4  ;;  %v8549_v39 = vrot.slane %v8548_v17, 1  ;;  %v8573_v56 = vrot.slane %v8572_v42, 4  ;;  %v8561_v29 = vrot.slane %v8560_v5, 2 }
 0x5b2   :  { %23347 = vst [vmem:[#allocation74_spill] sm:$0xff] %v20418_v41  ;;  %v20424_v63 = vmax.f32 %v8541_v62, %v8542_v57  ;;  %v8555_v58 = vmax.f32 %v8553_v54, %v8554_v43  ;;  %v23351_v53 = vcombine.high %v23349_v47, %v23349_v47  ;;  %v8586_v49 = vsel %vm7997_vm11, %v23352_v9, -inf }
 0x5b3   :  { %v8567_v35 = vmax.f32 %v8565_v11, %v8566_v3  ;;  %v20432_v31 = vmax.f32 %v8548_v17, %v8549_v39  ;;  %v8574_v40 = vmax.f32 %v8572_v42, %v8573_v56  ;;  %v8562_v62 = vmax.f32 %v8560_v5, %v8561_v29  ;;  %v23356_v39 = vld [vmem:[#allocation25_spill] sm:$0xff] }
 0x5b4   :  { %23350 = vst [vmem:[#allocation42_spill] sm:$0xff] %v20424_v63  ;;  %v8579_v46 = vsel %vm7997_vm11, %v23351_v53, -inf  ;;  %v8556_v34 = vrot.slane %v8555_v58, 1  ;;  %v8587_v57 = vrot.slane %v8586_v49, 4  ;;  %v23354_v54 = vcombine.high %v23352_v9, %v23352_v9 }
 0x5b5   :  { %23353 = vst [vmem:[#allocation10_spill] sm:$0xff] %v20432_v31  ;;  %v8580_v48 = vrot.slane %v8579_v46, 4  ;;  %v8568_v23 = vrot.slane %v8567_v35, 2  ;;  %v8575_v3 = vrot.slane %v8574_v40, 2  ;;  %v8563_v63 = vrot.slane %v8562_v62, 1 }
 0x5b6   :  { %v8593_v11 = vsel %vm7997_vm11, %v23354_v54, -inf  ;;  %v20438_v43 = vmax.f32 %v8555_v58, %v8556_v34  ;;  %v8588_v17 = vmax.f32 %v8586_v49, %v8587_v57  ;;  %v8600_v42 = vsel %vm7997_vm11, %v23356_v39, -inf  ;;  %v23360_v54 = vld [vmem:[#allocation26_spill] sm:$0xff] }
 0x5b7   :  { %v8581_v47 = vmax.f32 %v8579_v46, %v8580_v48  ;;  %v8594_v53 = vrot.slane %v8593_v11, 4  ;;  %v8569_v18 = vmax.f32 %v8567_v35, %v8568_v23  ;;  %v8576_v56 = vmax.f32 %v8574_v40, %v8575_v3 }
 0x5b8   :  { %23355 = vst [vmem:[#allocation76_spill] sm:$0xff] %v20438_v43  ;;  %v8601_v31 = vrot.slane %v8600_v42, 4  ;;  %v20442_v41 = vmax.f32 %v8562_v62, %v8563_v63  ;;  %v8589_v16 = vrot.slane %v8588_v17, 2  ;;  %v23358_v58 = vcombine.high %v23356_v39, %v23356_v39 }
 0x5b9   :  { %v8582_v5 = vrot.slane %v8581_v47, 2  ;;  %v8595_v29 = vmax.f32 %v8593_v11, %v8594_v53  ;;  %v8570_v9 = vrot.slane %v8569_v18, 1  ;;  %v8577_v34 = vrot.slane %v8576_v56, 1 }
 0x5ba   :  { %23357 = vst [vmem:[#allocation25_spill] sm:$0xff] %v20442_v41  ;;  %v8607_v46 = vsel %vm7997_vm11, %v23358_v58, -inf  ;;  %v8602_v49 = vmax.f32 %v8600_v42, %v8601_v31  ;;  %v8590_v57 = vmax.f32 %v8588_v17, %v8589_v16  ;;  %v8614_v11 = vsel %vm7997_vm11, %v23360_v54, -inf  ;;  %v16648_v41 = vld [vmem:[#allocation3 + $0x280] sm:$0xff]  }
 0x5bb   :  { %v8583_v48 = vmax.f32 %v8581_v47, %v8582_v5  ;;  %v8596_v35 = vrot.slane %v8595_v29, 2  ;;  %v20448_v23 = vmax.f32 %v8569_v18, %v8570_v9  ;;  %v8608_v40 = vrot.slane %v8607_v46, 4  ;;  %15626 = vmatprep.subr.bf16.mxu1 %v16648_v41  ;;  %v23365_v9 = vld [vmem:[#allocation27_spill] sm:$0xff] }
 0x5bc   :  { %v20452_v63 = vmax.f32 %v8576_v56, %v8577_v34  ;;  %v8603_v53 = vrot.slane %v8602_v49, 2  ;;  %v8591_v39 = vrot.slane %v8590_v57, 1  ;;  %v8615_v58 = vrot.slane %v8614_v11, 4  ;;  %15627 = vmatpush3.bf16.msra.mxu1 %v16648_v41 }
 0x5bd   :  { %23359 = vst [vmem:[#allocation77_spill] sm:$0xff] %v20448_v23  ;;  %v8584_v62 = vrot.slane %v8583_v48, 1  ;;  %v8597_v3 = vmax.f32 %v8595_v29, %v8596_v35  ;;  %v8609_v43 = vmax.f32 %v8607_v46, %v8608_v40  ;;  %v23362_v47 = vcombine.high %v23360_v54, %v23360_v54 }
 0x5be   :  { %23361 = vst [vmem:[#allocation26_spill] sm:$0xff] %v20452_v63  ;;  %v8604_v17 = vmax.f32 %v8602_v49, %v8603_v53  ;;  %v20460_v56 = vmax.f32 %v8590_v57, %v8591_v39  ;;  %v8616_v29 = vmax.f32 %v8614_v11, %v8615_v58  ;;  %v8628_v34 = vsel %vm7997_vm11, %v23365_v9, -inf  ;;  %v23368_v53 = vld [vmem:[#allocation28_spill] sm:$0xff] }
 0x5bf   :  { %v8621_v18 = vsel %vm7997_vm11, %v23362_v47, -inf  ;;  %v20458_v31 = vmax.f32 %v8583_v48, %v8584_v62  ;;  %v8598_v16 = vrot.slane %v8597_v3, 1  ;;  %v8610_v5 = vrot.slane %v8609_v43, 2  ;;  %v16649_v47 = vld [vmem:[#allocation3 + $0x288] sm:$0xff]  }
 0x5c0   :  { %v8622_v42 = vrot.slane %v8621_v18, 4  ;;  %23364 = vst [vmem:[#allocation79_spill] sm:$0xff] %v20460_v56  ;;  %v8605_v35 = vrot.slane %v8604_v17, 1  ;;  %v8629_v54 = vrot.slane %v8628_v34, 4  ;;  %v8617_v62 = vrot.slane %v8616_v29, 2  ;;  %15628 = vmatprep.subr.bf16.mxu1 %v16649_v47 }
 0x5c1   :  { %23363 = vst [vmem:[#allocation78_spill] sm:$0xff] %v20458_v31  ;;  %v20464_v46 = vmax.f32 %v8597_v3, %v8598_v16  ;;  %v8611_v48 = vmax.f32 %v8609_v43, %v8610_v5  ;;  %v23367_v49 = vcombine.high %v23365_v9, %v23365_v9  ;;  %v8642_v11 = vsel %vm7997_vm11, %v23368_v53, -inf  ;;  %15629 = vmatpush3.bf16.msra.mxu1 %v16649_v47  ;;  %v16650_v31 = vld [vmem:[#allocation3 + $0x290] sm:$0xff]  }
 0x5c2   :  { %v8623_v40 = vmax.f32 %v8621_v18, %v8622_v42  ;;  %v20472_v39 = vmax.f32 %v8604_v17, %v8605_v35  ;;  %v8630_v41 = vmax.f32 %v8628_v34, %v8629_v54  ;;  %v8618_v18 = vmax.f32 %v8616_v29, %v8617_v62  ;;  %v23372_v54 = vld [vmem:[#allocation29_spill] sm:$0xff]  ;;  %15630 = vmatprep.subr.bf16.mxu1 %v16650_v31 }
 0x5c3   :  { %23366 = vst [vmem:[#allocation27_spill] sm:$0xff] %v20464_v46  ;;  %v8635_v57 = vsel %vm7997_vm11, %v23367_v49, -inf  ;;  %v8612_v16 = vrot.slane %v8611_v48, 1  ;;  %v8643_v42 = vrot.slane %v8642_v11, 4  ;;  %v23370_v43 = vcombine.high %v23368_v53, %v23368_v53 }
 0x5c4   :  { %23369 = vst [vmem:[#allocation28_spill] sm:$0xff] %v20472_v39  ;;  %v8624_v58 = vrot.slane %v8623_v40, 2  ;;  %v8636_v3 = vrot.slane %v8635_v57, 4  ;;  %v8631_v49 = vrot.slane %v8630_v41, 2  ;;  %v8619_v35 = vrot.slane %v8618_v18, 1 }
 0x5c5   :  { %v8649_v5 = vsel %vm7997_vm11, %v23370_v43, -inf  ;;  %v20478_v17 = vmax.f32 %v8611_v48, %v8612_v16  ;;  %v8644_v34 = vmax.f32 %v8642_v11, %v8643_v42  ;;  %v8656_v39 = vsel %vm7997_vm11, %v23372_v54, -inf  ;;  %15631 = vmatpush3.bf16.msra.mxu1 %v16650_v31  ;;  %v16651_v42 = vld [vmem:[#allocation3 + $0x298] sm:$0xff]  }
 0x5c6   :  { %v8625_v9 = vmax.f32 %v8623_v40, %v8624_v58  ;;  %v8637_v46 = vmax.f32 %v8635_v57, %v8636_v3  ;;  %v8650_v56 = vrot.slane %v8649_v5, 4  ;;  %v8632_v62 = vmax.f32 %v8630_v41, %v8631_v49  ;;  %15632 = vmatprep.subr.bf16.mxu1 %v16651_v42 }
 0x5c7   :  { %23371 = vst [vmem:[#allocation80_spill] sm:$0xff] %v20478_v17  ;;  %v20482_v53 = vmax.f32 %v8618_v18, %v8619_v35  ;;  %v8645_v47 = vrot.slane %v8644_v34, 2  ;;  %v8657_v40 = vrot.slane %v8656_v39, 4  ;;  %v23374_v57 = vcombine.high %v23372_v54, %v23372_v54 }
 0x5c8   :  { %v8626_v29 = vrot.slane %v8625_v9, 1  ;;  %v8638_v63 = vrot.slane %v8637_v46, 2  ;;  %v8651_v23 = vmax.f32 %v8649_v5, %v8650_v56  ;;  %v8633_v11 = vrot.slane %v8632_v62, 1  ;;  %v23376_v5 = vld [vmem:[#allocation30_spill] sm:$0xff] }
 0x5c9   :  { %23373 = vst [vmem:[#allocation29_spill] sm:$0xff] %v20482_v53  ;;  %v8663_v48 = vsel %vm7997_vm11, %v23374_v57, -inf  ;;  %v8646_v41 = vmax.f32 %v8644_v34, %v8645_v47  ;;  %v8658_v43 = vmax.f32 %v8656_v39, %v8657_v40  ;;  %v8670_v18 = vsel %vm7997_vm11, %v23376_v5, -inf  ;;  %15633 = vmatpush3.bf16.msra.mxu1 %v16651_v42 }
 0x5ca   :  { %v20488_v58 = vmax.f32 %v8625_v9, %v8626_v29  ;;  %v8639_v3 = vmax.f32 %v8637_v46, %v8638_v63  ;;  %v8652_v16 = vrot.slane %v8651_v23, 2  ;;  %v8664_v56 = vrot.slane %v8663_v48, 4 }
 0x5cb   :  { %v20492_v49 = vmax.f32 %v8632_v62, %v8633_v11  ;;  %v8671_v54 = vrot.slane %v8670_v18, 4  ;;  %v8647_v57 = vrot.slane %v8646_v41, 1  ;;  %v8659_v31 = vrot.slane %v8658_v43, 2  ;;  %v16652_v62 = vld [vmem:[#allocation3 + $0x2a0] sm:$0xff]  }
 0x5cc   :  { %23375 = vst [vmem:[#allocation81_spill] sm:$0xff] %v20488_v58  ;;  %v8640_v35 = vrot.slane %v8639_v3, 1  ;;  %v8653_v53 = vmax.f32 %v8651_v23, %v8652_v16  ;;  %v8665_v9 = vmax.f32 %v8663_v48, %v8664_v56  ;;  %v23378_v63 = vcombine.high %v23376_v5, %v23376_v5  ;;  %v23381_v16 = vld [vmem:[#allocation11_spill] sm:$0xff]  ;;  %15634 = vmatprep.subr.bf16.mxu1 %v16652_v62 }
 0x5cd   :  { %23377 = vst [vmem:[#allocation30_spill] sm:$0xff] %v20492_v49  ;;  %v8672_v29 = vmax.f32 %v8670_v18, %v8671_v54  ;;  %v20500_v40 = vmax.f32 %v8646_v41, %v8647_v57  ;;  %v8660_v23 = vmax.f32 %v8658_v43, %v8659_v31  ;;  %v8684_v49 = vsel %vm7997_vm11, %v23381_v16, -inf  ;;  %v23384_v41 = vld [vmem:[#allocation14_spill] sm:$0xff]  ;;  %15635 = vmatpush3.bf16.msra.mxu1 %v16652_v62 }
 0x5ce   :  { %v8677_v46 = vsel %vm7997_vm11, %v23378_v63, -inf  ;;  %v20498_v39 = vmax.f32 %v8639_v3, %v8640_v35  ;;  %v8654_v34 = vrot.slane %v8653_v53, 1  ;;  %v8666_v11 = vrot.slane %v8665_v9, 2  ;;  %v16653_v63 = vld [vmem:[#allocation3 + $0x2a8] sm:$0xff]  }
 0x5cf   :  { %v8678_v47 = vrot.slane %v8677_v46, 4  ;;  %23380 = vst [vmem:[#allocation83_spill] sm:$0xff] %v20500_v40  ;;  %v8673_v56 = vrot.slane %v8672_v29, 2  ;;  %v8685_v58 = vrot.slane %v8684_v49, 4  ;;  %v8661_v42 = vrot.slane %v8660_v23, 1  ;;  %15636 = vmatprep.subr.bf16.mxu1 %v16653_v63 }
 0x5d0   :  { %23379 = vst [vmem:[#allocation82_spill] sm:$0xff] %v20498_v39  ;;  %v20504_v48 = vmax.f32 %v8653_v53, %v8654_v34  ;;  %v8667_v3 = vmax.f32 %v8665_v9, %v8666_v11  ;;  %v23383_v18 = vcombine.high %v23381_v16, %v23381_v16  ;;  %v8698_v43 = vsel %vm7997_vm11, %v23384_v41, -inf }
 0x5d1   :  { %v8679_v5 = vmax.f32 %v8677_v46, %v8678_v47  ;;  %v8674_v54 = vmax.f32 %v8672_v29, %v8673_v56  ;;  %v8686_v31 = vmax.f32 %v8684_v49, %v8685_v58  ;;  %v20512_v34 = vmax.f32 %v8660_v23, %v8661_v42  ;;  %v23388_v49 = vld [vmem:[#allocation16_spill] sm:$0xff]  ;;  %15637 = vmatpush3.bf16.msra.mxu1 %v16653_v63  ;;  %v16654_v56 = vld [vmem:[#allocation3 + $0x2b0] sm:$0xff]  }
 0x5d2   :  { %23382 = vst [vmem:[#allocation11_spill] sm:$0xff] %v20504_v48  ;;  %v8691_v35 = vsel %vm7997_vm11, %v23383_v18, -inf  ;;  %v8668_v46 = vrot.slane %v8667_v3, 1  ;;  %v8699_v47 = vrot.slane %v8698_v43, 4  ;;  %v23386_v9 = vcombine.high %v23384_v41, %v23384_v41  ;;  %15638 = vmatprep.subr.bf16.mxu1 %v16654_v56 }
 0x5d3   :  { %v8680_v57 = vrot.slane %v8679_v5, 2  ;;  %v8692_v53 = vrot.slane %v8691_v35, 4  ;;  %23385 = vst [vmem:[#allocation14_spill] sm:$0xff] %v20512_v34  ;;  %v8675_v16 = vrot.slane %v8674_v54, 1  ;;  %v8687_v48 = vrot.slane %v8686_v31, 2 }
 0x5d4   :  { %v8705_v11 = vsel %vm7997_vm11, %v23386_v9, -inf  ;;  %v20518_v62 = vmax.f32 %v8667_v3, %v8668_v46  ;;  %v8700_v29 = vmax.f32 %v8698_v43, %v8699_v47  ;;  %v8712_v23 = vsel %vm7997_vm11, %v23388_v49, -inf  ;;  %v16655_v9 = vld [vmem:[#allocation3 + $0x2b8] sm:$0xff]  }
 0x5d5   :  { %v8681_v18 = vmax.f32 %v8679_v5, %v8680_v57  ;;  %v8693_v40 = vmax.f32 %v8691_v35, %v8692_v53  ;;  %v8706_v58 = vrot.slane %v8705_v11, 4  ;;  %v20522_v42 = vmax.f32 %v8674_v54, %v8675_v16  ;;  %15639 = vmatpush3.bf16.msra.mxu1 %v16654_v56 }
 0x5d6   :  { %23387 = vst [vmem:[#allocation84_spill] sm:$0xff] %v20518_v62  ;;  %v8688_v41 = vmax.f32 %v8686_v31, %v8687_v48  ;;  %v8701_v17 = vrot.slane %v8700_v29, 2  ;;  %v8713_v57 = vrot.slane %v8712_v23, 4  ;;  %v23390_v3 = vcombine.high %v23388_v49, %v23388_v49  ;;  %v23392_v48 = vld [vmem:[#allocation13_spill] sm:$0xff]  ;;  %15640 = vmatprep.subr.bf16.mxu1 %v16655_v9 }
 0x5d7   :  { %23389 = vst [vmem:[#allocation16_spill] sm:$0xff] %v20522_v42  ;;  %v8682_v34 = vrot.slane %v8681_v18, 1  ;;  %v8694_v39 = vrot.slane %v8693_v40, 2  ;;  %v8707_v5 = vmax.f32 %v8705_v11, %v8706_v58  ;;  %v8726_v31 = vsel %vm7997_vm11, %v23392_v48, -inf }
 0x5d8   :  { %v8719_v35 = vsel %vm7997_vm11, %v23390_v3, -inf  ;;  %v8689_v53 = vrot.slane %v8688_v41, 1  ;;  %v8702_v54 = vmax.f32 %v8700_v29, %v8701_v17  ;;  %v8714_v16 = vmax.f32 %v8712_v23, %v8713_v57 }
 0x5d9   :  { %v20528_v43 = vmax.f32 %v8681_v18, %v8682_v34  ;;  %v8695_v63 = vmax.f32 %v8693_v40, %v8694_v39  ;;  %v8720_v46 = vrot.slane %v8719_v35, 4  ;;  %v8708_v47 = vrot.slane %v8707_v5, 2  ;;  %v16662_v40 = vld [vmem:[#allocation3 + $0x240] sm:$0xff]   ;;  %15641 = vmatpush3.bf16.msra.mxu1 %v16655_v9 }
 0x5da   :  { %v20532_v11 = vmax.f32 %v8688_v41, %v8689_v53  ;;  %v8727_v49 = vrot.slane %v8726_v31, 4  ;;  %v8703_v3 = vrot.slane %v8702_v54, 1  ;;  %v8715_v34 = vrot.slane %v8714_v16, 2  ;;  %v23397_v53 = vld [vmem:[#allocation15_spill] sm:$0xff]  ;;  %15658 = vmatprep.subr.bf16.mxu1 %v16662_v40 }
 0x5db   :  { %23391 = vst [vmem:[#allocation85_spill] sm:$0xff] %v20528_v43  ;;  %v8696_v58 = vrot.slane %v8695_v63, 1  ;;  %v8721_v42 = vmax.f32 %v8719_v35, %v8720_v46  ;;  %v8709_v62 = vmax.f32 %v8707_v5, %v8708_v47  ;;  %v23394_v39 = vcombine.high %v23392_v48, %v23392_v48 }
 0x5dc   :  { %23393 = vst [vmem:[#allocation13_spill] sm:$0xff] %v20532_v11  ;;  %v8728_v23 = vmax.f32 %v8726_v31, %v8727_v49  ;;  %v20540_v41 = vmax.f32 %v8702_v54, %v8703_v3  ;;  %v8716_v35 = vmax.f32 %v8714_v16, %v8715_v34  ;;  %v8740_v46 = vsel %vm7997_vm11, %v23397_v53, -inf }
 0x5dd   :  { %v8733_v17 = vsel %vm7997_vm11, %v23394_v39, -inf  ;;  %v20538_v18 = vmax.f32 %v8695_v63, %v8696_v58  ;;  %v8722_v29 = vrot.slane %v8721_v42, 2  ;;  %v8710_v57 = vrot.slane %v8709_v62, 1  ;;  %v23400_v58 = vld [vmem:[#allocation18_spill] sm:$0xff] }
 0x5de   :  { %v8734_v56 = vrot.slane %v8733_v17, 4  ;;  %23396 = vst [vmem:[#allocation87_spill] sm:$0xff] %v20540_v41  ;;  %v8729_v47 = vrot.slane %v8728_v23, 2  ;;  %v8741_v48 = vrot.slane %v8740_v46, 4  ;;  %v8717_v63 = vrot.slane %v8716_v35, 1 }
 0x5df   :  { %23395 = vst [vmem:[#allocation86_spill] sm:$0xff] %v20538_v18  ;;  %v8723_v5 = vmax.f32 %v8721_v42, %v8722_v29  ;;  %v20544_v39 = vmax.f32 %v8709_v62, %v8710_v57  ;;  %v23399_v31 = vcombine.high %v23397_v53, %v23397_v53  ;;  %v8754_v16 = vsel %vm7997_vm11, %v23400_v58, -inf }
 0x5e0   :  { %v8735_v11 = vmax.f32 %v8733_v17, %v8734_v56  ;;  %v8730_v3 = vmax.f32 %v8728_v23, %v8729_v47  ;;  %v8742_v9 = vmax.f32 %v8740_v46, %v8741_v48  ;;  %v20552_v42 = vmax.f32 %v8716_v35, %v8717_v63  ;;  %v23404_v23 = vld [vmem:[#allocation20_spill] sm:$0xff] }
 0x5e1   :  { %23398 = vst [vmem:[#allocation15_spill] sm:$0xff] %v20544_v39  ;;  %v8747_v54 = vsel %vm7997_vm11, %v23399_v31, -inf  ;;  %v8724_v49 = vrot.slane %v8723_v5, 1  ;;  %v8755_v29 = vrot.slane %v8754_v16, 4  ;;  %v23402_v62 = vcombine.high %v23400_v58, %v23400_v58 }
 0x5e2   :  { %v8736_v34 = vrot.slane %v8735_v11, 2  ;;  %23401 = vst [vmem:[#allocation18_spill] sm:$0xff] %v20552_v42  ;;  %v8748_v17 = vrot.slane %v8747_v54, 4  ;;  %v8731_v57 = vrot.slane %v8730_v3, 1  ;;  %v8743_v31 = vrot.slane %v8742_v9, 2 }
 0x5e3   :  { %v8761_v40 = vsel %vm7997_vm11, %v23402_v62, -inf  ;;  %v20558_v56 = vmax.f32 %v8723_v5, %v8724_v49  ;;  %v8756_v41 = vmax.f32 %v8754_v16, %v8755_v29  ;;  %v8768_v46 = vsel %vm7997_vm11, %v23404_v23, -inf  ;;  %v23408_v62 = vld [vmem:[#allocation17_spill] sm:$0xff] }
 0x5e4   :  { %v8737_v53 = vmax.f32 %v8735_v11, %v8736_v34  ;;  %v8749_v39 = vmax.f32 %v8747_v54, %v8748_v17  ;;  %v8762_v18 = vrot.slane %v8761_v40, 4  ;;  %v20562_v35 = vmax.f32 %v8730_v3, %v8731_v57 }
 0x5e5   :  { %23403 = vst [vmem:[#allocation88_spill] sm:$0xff] %v20558_v56  ;;  %v8744_v48 = vmax.f32 %v8742_v9, %v8743_v31  ;;  %v8769_v63 = vrot.slane %v8768_v46, 4  ;;  %v8757_v58 = vrot.slane %v8756_v41, 2  ;;  %v23406_v5 = vcombine.high %v23404_v23, %v23404_v23 }
 0x5e6   :  { %23405 = vst [vmem:[#allocation20_spill] sm:$0xff] %v20562_v35  ;;  %v8738_v47 = vrot.slane %v8737_v53, 1  ;;  %v8750_v42 = vrot.slane %v8749_v39, 2  ;;  %v8763_v43 = vmax.f32 %v8761_v40, %v8762_v18  ;;  %v8782_v9 = vsel %vm7997_vm11, %v23408_v62, -inf }
 0x5e7   :  { %v8775_v11 = vsel %vm7997_vm11, %v23406_v5, -inf  ;;  %v8745_v54 = vrot.slane %v8744_v48, 1  ;;  %v8770_v16 = vmax.f32 %v8768_v46, %v8769_v63  ;;  %v8758_v29 = vmax.f32 %v8756_v41, %v8757_v58  ;;  %v23413_v5 = vld [vmem:[#allocation19_spill] sm:$0xff] }
 0x5e8   :  { %v20568_v49 = vmax.f32 %v8737_v53, %v8738_v47  ;;  %v8776_v34 = vrot.slane %v8775_v11, 4  ;;  %v8751_v17 = vmax.f32 %v8749_v39, %v8750_v42  ;;  %v8764_v3 = vrot.slane %v8763_v43, 2 }
 0x5e9   :  { %v20572_v57 = vmax.f32 %v8744_v48, %v8745_v54  ;;  %v8771_v31 = vrot.slane %v8770_v16, 2  ;;  %v8783_v40 = vrot.slane %v8782_v9, 4  ;;  %v8759_v23 = vrot.slane %v8758_v29, 1 }
 0x5ea   :  { %23407 = vst [vmem:[#allocation89_spill] sm:$0xff] %v20568_v49  ;;  %v8777_v18 = vmax.f32 %v8775_v11, %v8776_v34  ;;  %v8752_v35 = vrot.slane %v8751_v17, 1  ;;  %v8765_v56 = vmax.f32 %v8763_v43, %v8764_v3  ;;  %v23410_v53 = vcombine.high %v23408_v62, %v23408_v62 }
 0x5eb   :  { %23409 = vst [vmem:[#allocation17_spill] sm:$0xff] %v20572_v57  ;;  %v8772_v47 = vmax.f32 %v8770_v16, %v8771_v31  ;;  %v8784_v41 = vmax.f32 %v8782_v9, %v8783_v40  ;;  %v20580_v58 = vmax.f32 %v8758_v29, %v8759_v23  ;;  %v8796_v11 = vsel %vm7997_vm11, %v23413_v5, -inf }
 0x5ec   :  { %v8789_v46 = vsel %vm7997_vm11, %v23410_v53, -inf  ;;  %v8778_v39 = vrot.slane %v8777_v18, 2  ;;  %v20578_v63 = vmax.f32 %v8751_v17, %v8752_v35  ;;  %v8766_v48 = vrot.slane %v8765_v56, 1  ;;  %v23416_v35 = vld [vmem:[#allocation21_spill] sm:$0xff]  ;;  %v23490_v19 = vld [vmem:[#allocation88_spill] sm:$0xff] }
 0x5ed   :  { %v8790_v42 = vrot.slane %v8789_v46, 4  ;;  %23412 = vst [vmem:[#allocation91_spill] sm:$0xff] %v20580_v58  ;;  %v8773_v54 = vrot.slane %v8772_v47, 1  ;;  %v8785_v43 = vrot.slane %v8784_v41, 2  ;;  %v8797_v62 = vrot.slane %v8796_v11, 4  ;;  %v23491_v21 = vld [vmem:[#allocation20_spill] sm:$0xff] }
 0x5ee   :  { %23411 = vst [vmem:[#allocation90_spill] sm:$0xff] %v20578_v63  ;;  %v8779_v34 = vmax.f32 %v8777_v18, %v8778_v39  ;;  %v20584_v57 = vmax.f32 %v8765_v56, %v8766_v48  ;;  %v23415_v16 = vcombine.high %v23413_v5, %v23413_v5  ;;  %v8810_v17 = vsel %vm7997_vm11, %v23416_v35, -inf }
 0x5ef   :  { %v8791_v3 = vmax.f32 %v8789_v46, %v8790_v42  ;;  %v20592_v29 = vmax.f32 %v8772_v47, %v8773_v54  ;;  %v8786_v40 = vmax.f32 %v8784_v41, %v8785_v43  ;;  %v8798_v53 = vmax.f32 %v8796_v11, %v8797_v62  ;;  %v23419_v54 = vld [vmem:[#allocation23_spill] sm:$0xff] }
 0x5f0   :  { %23414 = vst [vmem:[#allocation19_spill] sm:$0xff] %v20584_v57  ;;  %v8803_v9 = vsel %vm7997_vm11, %v23415_v16, -inf  ;;  %v8780_v31 = vrot.slane %v8779_v34, 1  ;;  %v8811_v39 = vrot.slane %v8810_v17, 4  ;;  %v23418_v56 = vcombine.high %v23416_v35, %v23416_v35 }
 0x5f1   :  { %23417 = vst [vmem:[#allocation21_spill] sm:$0xff] %v20592_v29  ;;  %v8792_v23 = vrot.slane %v8791_v3, 2  ;;  %v8804_v18 = vrot.slane %v8803_v9, 4  ;;  %v8787_v48 = vrot.slane %v8786_v40, 1  ;;  %v8799_v57 = vrot.slane %v8798_v53, 2  ;;  %v23492_v26 = vld [vmem:[#allocation89_spill] sm:$0xff] }
 0x5f2   :  { %v8817_v46 = vsel %vm7997_vm11, %v23418_v56, -inf  ;;  %v20598_v42 = vmax.f32 %v8779_v34, %v8780_v31  ;;  %v8812_v47 = vmax.f32 %v8810_v17, %v8811_v39  ;;  %v8824_v41 = vsel %vm7997_vm11, %v23419_v54, -inf  ;;  %v23493_v50 = vld [vmem:[#allocation17_spill] sm:$0xff] }
 0x5f3   :  { %v8793_v5 = vmax.f32 %v8791_v3, %v8792_v23  ;;  %v8818_v16 = vrot.slane %v8817_v46, 4  ;;  %v8805_v58 = vmax.f32 %v8803_v9, %v8804_v18  ;;  %v20602_v43 = vmax.f32 %v8786_v40, %v8787_v48  ;;  %v23425_v48 = vld [vmem:[#allocation31_spill] sm:$0xff] }
 0x5f4   :  { %v8825_v29 = vrot.slane %v8824_v41, 4  ;;  %v8800_v63 = vmax.f32 %v8798_v53, %v8799_v57  ;;  %v8813_v49 = vrot.slane %v8812_v47, 2  ;;  %v23420_v34 = vcombine.high %v23419_v54, %v23419_v54 }
 0x5f5   :  { %v8794_v11 = vrot.slane %v8793_v5, 1  ;;  %v8819_v62 = vmax.f32 %v8817_v46, %v8818_v16  ;;  %v8806_v35 = vrot.slane %v8805_v58, 2  ;;  %v23494_v15 = vld [vmem:[#allocation90_spill] sm:$0xff] }
 0x5f6   :  { %v8831_v3 = vsel %vm7997_vm11, %v23420_v34, -inf  ;;  %v8826_v17 = vmax.f32 %v8824_v41, %v8825_v29  ;;  %v8801_v18 = vrot.slane %v8800_v63, 1  ;;  %v8814_v40 = vmax.f32 %v8812_v47, %v8813_v49  ;;  %v23422_v49 = vld [vmem:[#allocation43_spill] sm:$0xff]  ;;  %v23423_v34 = vld [vmem:[#allocation22_spill] sm:$0xff]  ;;  %v23428_v47 = vld [vmem:[#allocation33_spill] sm:$0xff] }
 0x5f7   :  { %v20608_v31 = vmax.f32 %v8793_v5, %v8794_v11  ;;  %v8820_v9 = vrot.slane %v8819_v62, 2  ;;  %v8832_v23 = vrot.slane %v8831_v3, 4  ;;  %v8807_v39 = vmax.f32 %v8805_v58, %v8806_v35 }
 0x5f8   :  { %v8827_v57 = vrot.slane %v8826_v17, 2  ;;  %v20614_v16 = vmax.f32 %v8800_v63, %v8801_v18  ;;  %v8815_v5 = vrot.slane %v8814_v40, 1  ;;  %v23424_v63 = vld [vmem:[#allocation24_spill] sm:$0xff]  ;;  %v23497_v56 = vld [vmem:[#allocation21_spill] sm:$0xff] }
 0x5f9   :  { %23421 = vst [vmem:[#allocation23_spill] sm:$0xff] %v20608_v31  ;;  %v8821_v46 = vmax.f32 %v8819_v62, %v8820_v9  ;;  %v8833_v53 = vmax.f32 %v8831_v3, %v8832_v23  ;;  %v8808_v54 = vrot.slane %v8807_v39, 1  ;;  %v23495_v9 = vld [vmem:[#allocation91_spill] sm:$0xff] }
 0x5fa   :  { %v8828_v11 = vmax.f32 %v8826_v17, %v8827_v57  ;;  %v20622_v62 = vmax.f32 %v8814_v40, %v8815_v5  ;;  %v23426_v57 = vld [vmem:[#allocation32_spill] sm:$0xff]  ;;  %v23430_v17 = vld [vmem:[#allocation35_spill] sm:$0xff]  ;;  %v23526_v40 = vld [vmem:[#allocation37_spill] sm:$0xff] }
 0x5fb   :  { %v8822_v41 = vrot.slane %v8821_v46, 1  ;;  %v8834_v58 = vrot.slane %v8833_v53, 2  ;;  %v20620_v35 = vmax.f32 %v8807_v39, %v8808_v54  ;;  %v23429_v54 = vld [vmem:[#allocation34_spill] sm:$0xff]  ;;  %v23496_v3 = vld [vmem:[#allocation19_spill] sm:$0xff]  ;;  %v23501_v39 = vpack.c.bf16 %v23422_v49, %v23422_v49 }
 0x5fc   :  { %v8829_v18 = vrot.slane %v8828_v11, 1  ;;  %v23505_v49 = vpack.c.bf16 %v23426_v57, %v23426_v57  ;;  %v23510_v57 = vpack.c.bf16 %v20098_v14, %v20098_v14  ;;  %v23514_v14 = vpack.c.bf16 %v23428_v47, %v23428_v47 }
 0x5fd   :  { %v20628_v23 = vmax.f32 %v8821_v46, %v8822_v41  ;;  %v8835_v29 = vmax.f32 %v8833_v53, %v8834_v58  ;;  %v23499_v53 = vpack.c.bf16 %v20048_v7, %v20048_v7  ;;  %v23500_v41 = vpack.c.bf16 %v20050_v24, %v20050_v24 }
 0x5fe   :  { %v20640_v5 = vmax.f32 %v8828_v11, %v8829_v18  ;;  %v23498_v11 = vpack.c.bf16 %v20046_v33, %v20046_v33  ;;  %v23502_v33 = vpack.c.bf16 %v23423_v34, %v23423_v34  ;;  %v23503_v7 = vpack.c.bf16 %v23424_v63, %v23424_v63 }
 0x5ff   :  { %v8836_v46 = vrot.slane %v8835_v29, 1  ;;  %v20875_v58 = vunpack.c.l.b16 %v23500_v41  ;;  %v23504_v24 = vpack.c.bf16 %v23425_v48, %v23425_v48  ;;  %v23507_v34 = vpack.c.bf16 %v20086_v13, %v20086_v13 }
 0x600   :  { %23427 = vst [vmem:[#allocation43_spill] sm:$0xff] %v20640_v5  ;;  %v20865_v31 = vunpack.c.l.b16 %v23498_v11  ;;  %v20880_v5 = vunpack.c.l.b16 %v23501_v39  ;;  %v20885_v11 = vunpack.c.l.b16 %v23502_v33  ;;  %v20900_v39 = vunpack.c.l.b16 %v23505_v49 }
 0x601   :  { %v20654_v18 = vmax.f32 %v8835_v29, %v8836_v46  ;;  %v23431_v29 = vld [vmem:[#allocation36_spill] sm:$0xff]  ;;  %v20870_v46 = vunpack.c.l.b16 %v23499_v53  ;;  %v20890_v53 = vunpack.c.l.b16 %v23503_v7  ;;  %v20895_v41 = vunpack.c.l.b16 %v23504_v24 }
 0x602   :  { %23506 = vst [vmem:[#allocation22_spill] sm:$0xff] %v20900_v39  ;;  %v20905_v33 = vunpack.c.l.b16 %v23507_v34  ;;  %v23508_v63 = vpack.c.bf16 %v20088_v25, %v20088_v25  ;;  %v23509_v48 = vpack.c.bf16 %v20092_v61, %v20092_v61  ;;  %v20920_v49 = vunpack.c.l.b16 %v23510_v57  ;;  %v23535_v39 = vld [vmem:[#allocation46_spill] sm:$0xff] }
 0x603   :  { %v23511_v13 = vpack.c.bf16 %v20100_v6, %v20100_v6  ;;  %v23512_v25 = vpack.c.bf16 %v20102_v30, %v20102_v30  ;;  %v23513_v61 = vpack.c.bf16 %v20112_v51, %v20112_v51  ;;  %v20940_v57 = vunpack.c.l.b16 %v23514_v14 }
 0x604   :  { %v20910_v7 = vunpack.c.l.b16 %v23508_v63  ;;  %v20915_v24 = vunpack.c.l.b16 %v23509_v48  ;;  %v23516_v6 = vpack.c.bf16 %v20126_v36, %v20126_v36  ;;  %v23517_v30 = vpack.c.bf16 %v20128_v32, %v20128_v32 }
 0x605   :  { %v20925_v34 = vunpack.c.l.b16 %v23511_v13  ;;  %v20930_v63 = vunpack.c.l.b16 %v23512_v25  ;;  %v20935_v48 = vunpack.c.l.b16 %v23513_v61  ;;  %23515 = vst [vmem:[#allocation24_spill] sm:$0xff] %v20940_v57  ;;  %v23518_v51 = vpack.c.bf16 %v20132_v0, %v20132_v0  ;;  %v23533_v57 = vld [vmem:[#allocation45_spill] sm:$0xff] }
 0x606   :  { %v20945_v13 = vunpack.c.l.b16 %v23516_v6  ;;  %v20950_v25 = vunpack.c.l.b16 %v23517_v30  ;;  %v23519_v47 = vpack.c.bf16 %v20134_v55, %v20134_v55  ;;  %v23520_v36 = vpack.c.bf16 %v20140_v12, %v20140_v12 }
 0x607   :  { %v20955_v61 = vunpack.c.l.b16 %v23518_v51  ;;  %v23521_v32 = vpack.c.bf16 %v23429_v54, %v23429_v54  ;;  %v23522_v0 = vpack.c.bf16 %v23430_v17, %v23430_v17  ;;  %v23524_v55 = vpack.c.bf16 %v23431_v29, %v23431_v29 }
 0x608   :  { %v20960_v14 = vunpack.c.l.b16 %v23519_v47  ;;  %v20965_v6 = vunpack.c.l.b16 %v23520_v36  ;;  %v23527_v12 = vpack.c.bf16 %v23526_v40, %v23526_v40  ;;  %v23528_v54 = vpack.c.bf16 %v20168_v59, %v20168_v59 }
 0x609   :  { %v20970_v30 = vunpack.c.l.b16 %v23521_v32  ;;  %v20975_v51 = vunpack.c.l.b16 %v23522_v0  ;;  %v20980_v47 = vunpack.c.l.b16 %v23524_v55  ;;  %v23529_v17 = vpack.c.bf16 %v20172_v27, %v20172_v27 }
 0x60a   :  { %v20985_v36 = vunpack.c.l.b16 %v23527_v12  ;;  %v20990_v32 = vunpack.c.l.b16 %v23528_v54  ;;  %v23530_v29 = vpack.c.bf16 %v20178_v38, %v20178_v38  ;;  %v23534_v59 = vpack.c.bf16 %v23533_v57, %v23533_v57 }
 0x60b   :  { %23523 = vst [vmem:[#allocation31_spill] sm:$0xff] %v20975_v51  ;;  %23525 = vst [vmem:[#allocation32_spill] sm:$0xff] %v20980_v47  ;;  %v20995_v0 = vunpack.c.l.b16 %v23529_v17  ;;  %v23531_v47 = vld [vmem:[#allocation44_spill] sm:$0xff]  ;;  %v23536_v27 = vpack.c.bf16 %v23535_v39, %v23535_v39  ;;  %v23537_v38 = vpack.c.bf16 %v20198_v37, %v20198_v37  ;;  %v23539_v51 = vld [vmem:[#allocation47_spill] sm:$0xff]  ;;  %v23542_v57 = vpack.c.bf16 %v20208_v1, %v20208_v1 }
 0x60c   :  { %v21000_v55 = vunpack.c.l.b16 %v23530_v29  ;;  %v23532_v40 = vpack.c.bf16 %v23531_v47, %v23531_v47  ;;  %v21010_v54 = vunpack.c.l.b16 %v23534_v59  ;;  %v23540_v47 = vpack.c.bf16 %v23539_v51, %v23539_v51 }
 0x60d   :  { %v21015_v17 = vunpack.c.l.b16 %v23536_v27  ;;  %v21020_v29 = vunpack.c.l.b16 %v23537_v38  ;;  %v21030_v59 = vunpack.c.l.b16 %v23542_v57  ;;  %v23544_v39 = vpack.c.bf16 %v20212_v4, %v20212_v4 }
 0x60e   :  { %v21005_v12 = vunpack.c.l.b16 %v23532_v40  ;;  %v21025_v40 = vunpack.c.l.b16 %v23540_v47  ;;  %v23545_v37 = vpack.c.bf16 %v20218_v8, %v20218_v8  ;;  %v23556_v8 = vpack.c.bf16 %v20238_v2, %v20238_v2 }
 0x60f   :  { %23538 = vst [vmem:[#allocation33_spill] sm:$0xff] %v21020_v29  ;;  %23543 = vst [vmem:[#allocation35_spill] sm:$0xff] %v21030_v59  ;;  %v21035_v27 = vunpack.c.l.b16 %v23544_v39  ;;  %v23547_v29 = vld [vmem:[#allocation48_spill] sm:$0xff]  ;;  %v23553_v59 = vld [vmem:[#allocation50_spill] sm:$0xff]  ;;  %v23562_v2 = vpack.c.bf16 %v20258_v45, %v20258_v45  ;;  %v23573_v45 = vpack.c.bf16 %v20278_v44, %v20278_v44  ;;  %v23579_v44 = vpack.c.bf16 %v20298_v52, %v20298_v52 }
 0x610   :  { %23541 = vst [vmem:[#allocation34_spill] sm:$0xff] %v21025_v40  ;;  %v21040_v38 = vunpack.c.l.b16 %v23545_v37  ;;  %v23548_v51 = vpack.c.bf16 %v23547_v29, %v23547_v29  ;;  %v23550_v40 = vld [vmem:[#allocation49_spill] sm:$0xff]  ;;  %v23554_v4 = vpack.c.bf16 %v23553_v59, %v23553_v59  ;;  %v21060_v37 = vunpack.c.l.b16 %v23556_v8 }
 0x611   :  { %v23551_v1 = vpack.c.bf16 %v23550_v40, %v23550_v40  ;;  %v23560_v40 = vpack.c.bf16 %v20248_v22, %v20248_v22  ;;  %v23561_v59 = vpack.c.bf16 %v20252_v60, %v20252_v60  ;;  %v21080_v8 = vunpack.c.l.b16 %v23562_v2 }
 0x612   :  { %23546 = vst [vmem:[#allocation36_spill] sm:$0xff] %v21040_v38  ;;  %v21045_v47 = vunpack.c.l.b16 %v23548_v51  ;;  %v21055_v39 = vunpack.c.l.b16 %v23554_v4  ;;  %23557 = vst [vmem:[#allocation17_spill] sm:$0xff] %v21060_v37  ;;  %v23558_v38 = vld [vmem:[#allocation51_spill] sm:$0xff]  ;;  %v23564_v37 = vld [vmem:[#allocation52_spill] sm:$0xff]  ;;  %v21100_v2 = vunpack.c.l.b16 %v23573_v45  ;;  %v21120_v45 = vunpack.c.l.b16 %v23579_v44 }
 0x613   :  { %v21050_v57 = vunpack.c.l.b16 %v23551_v1  ;;  %v23559_v29 = vpack.c.bf16 %v23558_v38, %v23558_v38  ;;  %v21070_v1 = vunpack.c.l.b16 %v23560_v40  ;;  %v21075_v4 = vunpack.c.l.b16 %v23561_v59  ;;  %23563 = vst [vmem:[#allocation90_spill] sm:$0xff] %v21080_v8  ;;  %v23608_v8 = vld [vmem:[#allocation65_spill] sm:$0xff] }
 0x614   :  { %23549 = vst [vmem:[#allocation88_spill] sm:$0xff] %v21045_v47  ;;  %23555 = vst [vmem:[#allocation89_spill] sm:$0xff] %v21055_v39  ;;  %v23565_v38 = vpack.c.bf16 %v23564_v37, %v23564_v37  ;;  %v23567_v39 = vld [vmem:[#allocation53_spill] sm:$0xff]  ;;  %v23575_v47 = vld [vmem:[#allocation55_spill] sm:$0xff]  ;;  %v23590_v52 = vpack.c.bf16 %v20318_v20, %v20318_v20 }
 0x615   :  { %23552 = vst [vmem:[#allocation20_spill] sm:$0xff] %v21050_v57  ;;  %v21065_v51 = vunpack.c.l.b16 %v23559_v29  ;;  %v23568_v22 = vpack.c.bf16 %v23567_v39, %v23567_v39  ;;  %v23570_v57 = vld [vmem:[#allocation54_spill] sm:$0xff]  ;;  %23574 = vst [vmem:[#allocation37_spill] sm:$0xff] %v21100_v2  ;;  %v23576_v37 = vpack.c.bf16 %v23575_v47, %v23575_v47  ;;  %v23577_v39 = vpack.c.bf16 %v20288_v28, %v20288_v28  ;;  %v23581_v2 = vld [vmem:[#allocation56_spill] sm:$0xff] }
 0x616   :  { %v21085_v29 = vunpack.c.l.b16 %v23565_v38  ;;  %v23571_v60 = vpack.c.bf16 %v23570_v57, %v23570_v57  ;;  %v23578_v57 = vpack.c.bf16 %v20292_v10, %v20292_v10  ;;  %23580 = vst [vmem:[#allocation44_spill] sm:$0xff] %v21120_v45  ;;  %v23582_v47 = vpack.c.bf16 %v23581_v2, %v23581_v2  ;;  %v23605_v45 = vld [vmem:[#allocation64_spill] sm:$0xff] }
 0x617   :  { %v21090_v40 = vunpack.c.l.b16 %v23568_v22  ;;  %v21105_v38 = vunpack.c.l.b16 %v23576_v37  ;;  %v21110_v22 = vunpack.c.l.b16 %v23577_v39  ;;  %v21140_v44 = vunpack.c.l.b16 %v23590_v52 }
 0x618   :  { %23566 = vst [vmem:[#allocation91_spill] sm:$0xff] %v21085_v29  ;;  %v21095_v59 = vunpack.c.l.b16 %v23571_v60  ;;  %v21115_v60 = vunpack.c.l.b16 %v23578_v57  ;;  %v21125_v37 = vunpack.c.l.b16 %v23582_v47  ;;  %v23592_v29 = vld [vmem:[#allocation59_spill] sm:$0xff] }
 0x619   :  { %23569 = vst [vmem:[#allocation19_spill] sm:$0xff] %v21090_v40  ;;  %v23587_v40 = vld [vmem:[#allocation58_spill] sm:$0xff]  ;;  %23591 = vst [vmem:[#allocation48_spill] sm:$0xff] %v21140_v44  ;;  %v23593_v2 = vpack.c.bf16 %v23592_v29, %v23592_v29  ;;  %v23602_v44 = vld [vmem:[#allocation63_spill] sm:$0xff] }
 0x61a   :  { %23572 = vst [vmem:[#allocation21_spill] sm:$0xff] %v21095_v59  ;;  %23583 = vst [vmem:[#allocation45_spill] sm:$0xff] %v21125_v37  ;;  %v23584_v59 = vld [vmem:[#allocation57_spill] sm:$0xff]  ;;  %v23588_v10 = vpack.c.bf16 %v23587_v40, %v23587_v40  ;;  %v23594_v37 = vld [vmem:[#allocation60_spill] sm:$0xff]  ;;  %v23603_v29 = vpack.c.bf16 %v23602_v44, %v23602_v44 }
 0x61b   :  { %v23585_v28 = vpack.c.bf16 %v23584_v59, %v23584_v59  ;;  %v21145_v47 = vunpack.c.l.b16 %v23593_v2  ;;  %v23595_v59 = vpack.c.bf16 %v23594_v37, %v23594_v37  ;;  %v23606_v37 = vpack.c.bf16 %v23605_v45, %v23605_v45 }
 0x61c   :  { %v21135_v57 = vunpack.c.l.b16 %v23588_v10  ;;  %v21165_v2 = vunpack.c.l.b16 %v23603_v29 }
 0x61d   :  { %v21130_v39 = vunpack.c.l.b16 %v23585_v28  ;;  %v21150_v28 = vunpack.c.l.b16 %v23595_v59  ;;  %v21170_v59 = vunpack.c.l.b16 %v23606_v37 }
 0x61e   :  { %23589 = vst [vmem:[#allocation47_spill] sm:$0xff] %v21135_v57  ;;  %v23599_v57 = vld [vmem:[#allocation62_spill] sm:$0xff]  ;;  %23604 = vst [vmem:[#allocation51_spill] sm:$0xff] %v21165_v2  ;;  %v23617_v2 = vld [vmem:[#allocation68_spill] sm:$0xff] }
 0x61f   :  { %23586 = vst [vmem:[#allocation46_spill] sm:$0xff] %v21130_v39  ;;  %v23596_v39 = vld [vmem:[#allocation61_spill] sm:$0xff]  ;;  %v23600_v20 = vpack.c.bf16 %v23599_v57, %v23599_v57  ;;  %23607 = vst [vmem:[#allocation52_spill] sm:$0xff] %v21170_v59  ;;  %v23618_v45 = vpack.c.bf16 %v23617_v2, %v23617_v2 }
 0x620   :  { %v23597_v40 = vpack.c.bf16 %v23596_v39, %v23596_v39  ;;  %v23609_v39 = vpack.c.bf16 %v23608_v8, %v23608_v8  ;;  %v23620_v59 = vld [vmem:[#allocation69_spill] sm:$0xff] }
 0x621   :  { %v21160_v52 = vunpack.c.l.b16 %v23600_v20  ;;  %v21190_v37 = vunpack.c.l.b16 %v23618_v45  ;;  %v23621_v8 = vpack.c.bf16 %v23620_v59, %v23620_v59 }
 0x622   :  { %v21155_v10 = vunpack.c.l.b16 %v23597_v40  ;;  %v21175_v40 = vunpack.c.l.b16 %v23609_v39 }
 0x623   :  { %23601 = vst [vmem:[#allocation50_spill] sm:$0xff] %v21160_v52  ;;  %v23614_v52 = vld [vmem:[#allocation67_spill] sm:$0xff]  ;;  %23619 = vst [vmem:[#allocation56_spill] sm:$0xff] %v21190_v37  ;;  %v21195_v39 = vunpack.c.l.b16 %v23621_v8 }
 0x624   :  { %23598 = vst [vmem:[#allocation49_spill] sm:$0xff] %v21155_v10  ;;  %23610 = vst [vmem:[#allocation53_spill] sm:$0xff] %v21175_v40  ;;  %v23611_v10 = vld [vmem:[#allocation66_spill] sm:$0xff]  ;;  %v23615_v44 = vpack.c.bf16 %v23614_v52, %v23614_v52  ;;  %v23632_v37 = vld [vmem:[#allocation39_spill] sm:$0xff] }
 0x625   :  { %v23612_v57 = vpack.c.bf16 %v23611_v10, %v23611_v10  ;;  %23622 = vst [vmem:[#allocation57_spill] sm:$0xff] %v21195_v39  ;;  %v23623_v40 = vld [vmem:[#allocation70_spill] sm:$0xff]  ;;  %v23633_v59 = vpack.c.bf16 %v23632_v37, %v23632_v37  ;;  %v23635_v39 = vld [vmem:[#allocation72_spill] sm:$0xff] }
 0x626   :  { %v21185_v29 = vunpack.c.l.b16 %v23615_v44  ;;  %v23624_v10 = vpack.c.bf16 %v23623_v40, %v23623_v40  ;;  %v23636_v40 = vpack.c.bf16 %v23635_v39, %v23635_v39 }
 0x627   :  { %v21180_v20 = vunpack.c.l.b16 %v23612_v57  ;;  %v21215_v8 = vunpack.c.l.b16 %v23633_v59 }
 0x628   :  { %23616 = vst [vmem:[#allocation55_spill] sm:$0xff] %v21185_v29  ;;  %v21200_v57 = vunpack.c.l.b16 %v23624_v10  ;;  %v23629_v29 = vld [vmem:[#allocation38_spill] sm:$0xff]  ;;  %v21220_v10 = vunpack.c.l.b16 %v23636_v40 }
 0x629   :  { %23613 = vst [vmem:[#allocation54_spill] sm:$0xff] %v21180_v20  ;;  %v23626_v20 = vld [vmem:[#allocation71_spill] sm:$0xff]  ;;  %v23630_v2 = vpack.c.bf16 %v23629_v29, %v23629_v29  ;;  %23634 = vst [vmem:[#allocation61_spill] sm:$0xff] %v21215_v8  ;;  %v23647_v8 = vld [vmem:[#allocation74_spill] sm:$0xff] }
 0x62a   :  { %23625 = vst [vmem:[#allocation58_spill] sm:$0xff] %v21200_v57  ;;  %v23627_v52 = vpack.c.bf16 %v23626_v20, %v23626_v20  ;;  %23637 = vst [vmem:[#allocation62_spill] sm:$0xff] %v21220_v10  ;;  %v23638_v57 = vld [vmem:[#allocation40_spill] sm:$0xff]  ;;  %v23648_v39 = vpack.c.bf16 %v23647_v8, %v23647_v8  ;;  %v23650_v10 = vld [vmem:[#allocation75_spill] sm:$0xff] }
 0x62b   :  { %v21210_v45 = vunpack.c.l.b16 %v23630_v2  ;;  %v23639_v20 = vpack.c.bf16 %v23638_v57, %v23638_v57  ;;  %v23651_v57 = vpack.c.bf16 %v23650_v10, %v23650_v10 }
 0x62c   :  { %v21205_v44 = vunpack.c.l.b16 %v23627_v52  ;;  %v21240_v40 = vunpack.c.l.b16 %v23648_v39 }
 0x62d   :  { %23631 = vst [vmem:[#allocation60_spill] sm:$0xff] %v21210_v45  ;;  %v21225_v52 = vunpack.c.l.b16 %v23639_v20  ;;  %v23644_v45 = vld [vmem:[#allocation41_spill] sm:$0xff]  ;;  %v21245_v20 = vunpack.c.l.b16 %v23651_v57 }
 0x62e   :  { %23628 = vst [vmem:[#allocation59_spill] sm:$0xff] %v21205_v44  ;;  %v23641_v44 = vld [vmem:[#allocation73_spill] sm:$0xff]  ;;  %v23645_v37 = vpack.c.bf16 %v23644_v45, %v23644_v45  ;;  %23649 = vst [vmem:[#allocation66_spill] sm:$0xff] %v21240_v40 }
 0x62f   :  { %23640 = vst [vmem:[#allocation63_spill] sm:$0xff] %v21225_v52  ;;  %v23642_v29 = vpack.c.bf16 %v23641_v44, %v23641_v44  ;;  %23652 = vst [vmem:[#allocation67_spill] sm:$0xff] %v21245_v20  ;;  %v23653_v52 = vld [vmem:[#allocation42_spill] sm:$0xff]  ;;  %v23662_v40 = vld [vmem:[#allocation25_spill] sm:$0xff] }
 0x630   :  { %v21235_v59 = vunpack.c.l.b16 %v23645_v37  ;;  %v23654_v44 = vpack.c.bf16 %v23653_v52, %v23653_v52  ;;  %v23663_v10 = vpack.c.bf16 %v23662_v40, %v23662_v40  ;;  %v23665_v20 = vld [vmem:[#allocation77_spill] sm:$0xff] }
 0x631   :  { %v21230_v2 = vunpack.c.l.b16 %v23642_v29  ;;  %v23666_v52 = vpack.c.bf16 %v23665_v20, %v23665_v20 }
 0x632   :  { %23646 = vst [vmem:[#allocation65_spill] sm:$0xff] %v21235_v59  ;;  %v21250_v29 = vunpack.c.l.b16 %v23654_v44  ;;  %v23659_v59 = vld [vmem:[#allocation76_spill] sm:$0xff]  ;;  %v21265_v57 = vunpack.c.l.b16 %v23663_v10 }
 0x633   :  { %23643 = vst [vmem:[#allocation64_spill] sm:$0xff] %v21230_v2  ;;  %v23656_v2 = vld [vmem:[#allocation10_spill] sm:$0xff]  ;;  %v23660_v8 = vpack.c.bf16 %v23659_v59, %v23659_v59  ;;  %v21270_v44 = vunpack.c.l.b16 %v23666_v52 }
 0x634   :  { %23655 = vst [vmem:[#allocation68_spill] sm:$0xff] %v21250_v29  ;;  %v23657_v45 = vpack.c.bf16 %v23656_v2, %v23656_v2  ;;  %23664 = vst [vmem:[#allocation71_spill] sm:$0xff] %v21265_v57  ;;  %v23668_v29 = vld [vmem:[#allocation26_spill] sm:$0xff]  ;;  %v23677_v57 = vld [vmem:[#allocation27_spill] sm:$0xff] }
 0x635   :  { %v21260_v39 = vunpack.c.l.b16 %v23660_v8  ;;  %23667 = vst [vmem:[#allocation38_spill] sm:$0xff] %v21270_v44  ;;  %v23669_v2 = vpack.c.bf16 %v23668_v29, %v23668_v29  ;;  %v23678_v20 = vpack.c.bf16 %v23677_v57, %v23677_v57  ;;  %v23680_v44 = vld [vmem:[#allocation28_spill] sm:$0xff] }
 0x636   :  { %v21255_v37 = vunpack.c.l.b16 %v23657_v45  ;;  %v23681_v29 = vpack.c.bf16 %v23680_v44, %v23680_v44 }
 0x637   :  { %23661 = vst [vmem:[#allocation70_spill] sm:$0xff] %v21260_v39  ;;  %v21275_v45 = vunpack.c.l.b16 %v23669_v2  ;;  %v23674_v39 = vld [vmem:[#allocation79_spill] sm:$0xff]  ;;  %v21290_v52 = vunpack.c.l.b16 %v23678_v20 }
 0x638   :  { %23658 = vst [vmem:[#allocation69_spill] sm:$0xff] %v21255_v37  ;;  %v23671_v37 = vld [vmem:[#allocation78_spill] sm:$0xff]  ;;  %v23675_v40 = vpack.c.bf16 %v23674_v39, %v23674_v39  ;;  %v21295_v2 = vunpack.c.l.b16 %v23681_v29 }
 0x639   :  { %23670 = vst [vmem:[#allocation39_spill] sm:$0xff] %v21275_v45  ;;  %v23672_v59 = vpack.c.bf16 %v23671_v37, %v23671_v37  ;;  %23679 = vst [vmem:[#allocation73_spill] sm:$0xff] %v21290_v52  ;;  %v23683_v45 = vld [vmem:[#allocation80_spill] sm:$0xff]  ;;  %v23692_v52 = vld [vmem:[#allocation30_spill] sm:$0xff] }
 0x63a   :  { %v21285_v10 = vunpack.c.l.b16 %v23675_v40  ;;  %23682 = vst [vmem:[#allocation41_spill] sm:$0xff] %v21295_v2  ;;  %v23684_v37 = vpack.c.bf16 %v23683_v45, %v23683_v45  ;;  %v23693_v44 = vpack.c.bf16 %v23692_v52, %v23692_v52  ;;  %v23695_v2 = vld [vmem:[#allocation82_spill] sm:$0xff] }
 0x63b   :  { %v21280_v8 = vunpack.c.l.b16 %v23672_v59  ;;  %v23696_v45 = vpack.c.bf16 %v23695_v2, %v23695_v2 }
 0x63c   :  { %23676 = vst [vmem:[#allocation40_spill] sm:$0xff] %v21285_v10  ;;  %v21300_v59 = vunpack.c.l.b16 %v23684_v37  ;;  %v23689_v10 = vld [vmem:[#allocation81_spill] sm:$0xff]  ;;  %v21315_v29 = vunpack.c.l.b16 %v23693_v44 }
 0x63d   :  { %23673 = vst [vmem:[#allocation72_spill] sm:$0xff] %v21280_v8  ;;  %v23686_v8 = vld [vmem:[#allocation29_spill] sm:$0xff]  ;;  %v23690_v57 = vpack.c.bf16 %v23689_v10, %v23689_v10  ;;  %v21320_v37 = vunpack.c.l.b16 %v23696_v45 }
 0x63e   :  { %23685 = vst [vmem:[#allocation74_spill] sm:$0xff] %v21300_v59  ;;  %v23687_v39 = vpack.c.bf16 %v23686_v8, %v23686_v8  ;;  %23694 = vst [vmem:[#allocation10_spill] sm:$0xff] %v21315_v29  ;;  %v23698_v59 = vld [vmem:[#allocation83_spill] sm:$0xff]  ;;  %v23707_v29 = vld [vmem:[#allocation84_spill] sm:$0xff] }
 0x63f   :  { %v21310_v20 = vunpack.c.l.b16 %v23690_v57  ;;  %23697 = vst [vmem:[#allocation76_spill] sm:$0xff] %v21320_v37  ;;  %v23699_v8 = vpack.c.bf16 %v23698_v59, %v23698_v59  ;;  %v23708_v2 = vpack.c.bf16 %v23707_v29, %v23707_v29  ;;  %v23710_v37 = vld [vmem:[#allocation16_spill] sm:$0xff] }
 0x640   :  { %v21305_v40 = vunpack.c.l.b16 %v23687_v39  ;;  %v23711_v59 = vpack.c.bf16 %v23710_v37, %v23710_v37 }
 0x641   :  { %23691 = vst [vmem:[#allocation42_spill] sm:$0xff] %v21310_v20  ;;  %v21325_v39 = vunpack.c.l.b16 %v23699_v8  ;;  %v23704_v20 = vld [vmem:[#allocation14_spill] sm:$0xff]  ;;  %v21340_v45 = vunpack.c.l.b16 %v23708_v2 }
 0x642   :  { %23688 = vst [vmem:[#allocation75_spill] sm:$0xff] %v21305_v40  ;;  %v23701_v40 = vld [vmem:[#allocation11_spill] sm:$0xff]  ;;  %v23705_v52 = vpack.c.bf16 %v23704_v20, %v23704_v20  ;;  %v21345_v8 = vunpack.c.l.b16 %v23711_v59 }
 0x643   :  { %23700 = vst [vmem:[#allocation25_spill] sm:$0xff] %v21325_v39  ;;  %v23702_v10 = vpack.c.bf16 %v23701_v40, %v23701_v40  ;;  %23709 = vst [vmem:[#allocation78_spill] sm:$0xff] %v21340_v45  ;;  %v23713_v39 = vld [vmem:[#allocation85_spill] sm:$0xff]  ;;  %v23720_v45 = vld [vmem:[#allocation87_spill] sm:$0xff] }
 0x644   :  { %v21335_v44 = vunpack.c.l.b16 %v23705_v52  ;;  %23712 = vst [vmem:[#allocation79_spill] sm:$0xff] %v21345_v8  ;;  %v23714_v40 = vpack.c.bf16 %v23713_v39, %v23713_v39  ;;  %v23721_v37 = vpack.c.bf16 %v23720_v45, %v23720_v45  ;;  %v23722_v8 = vld [vmem:[#allocation15_spill] sm:$0xff]  ;;  %v23728_v45 = vpack.c.bf16 %v23491_v21, %v23491_v21 }
 0x645   :  { %v21330_v57 = vunpack.c.l.b16 %v23702_v10  ;;  %v23723_v39 = vpack.c.bf16 %v23722_v8, %v23722_v8  ;;  %v23729_v8 = vpack.c.bf16 %v23492_v26, %v23492_v26  ;;  %v23732_v21 = vpack.c.bf16 %v23495_v9, %v23495_v9 }
 0x646   :  { %23706 = vst [vmem:[#allocation26_spill] sm:$0xff] %v21335_v44  ;;  %v21350_v10 = vunpack.c.l.b16 %v23714_v40  ;;  %v23718_v44 = vld [vmem:[#allocation86_spill] sm:$0xff]  ;;  %v21365_v59 = vunpack.c.l.b16 %v23721_v37  ;;  %v21385_v37 = vunpack.c.l.b16 %v23728_v45  ;;  %v23733_v26 = vpack.c.bf16 %v23496_v3, %v23496_v3 }
 0x647   :  { %23703 = vst [vmem:[#allocation77_spill] sm:$0xff] %v21330_v57  ;;  %v23716_v57 = vld [vmem:[#allocation13_spill] sm:$0xff]  ;;  %v23719_v29 = vpack.c.bf16 %v23718_v44, %v23718_v44  ;;  %v21370_v40 = vunpack.c.l.b16 %v23723_v39  ;;  %v23726_v44 = vpack.c.bf16 %v23490_v19, %v23490_v19  ;;  %v21390_v39 = vunpack.c.l.b16 %v23729_v8 }
 0x648   :  { %23715 = vst [vmem:[#allocation27_spill] sm:$0xff] %v21350_v10  ;;  %v23717_v20 = vpack.c.bf16 %v23716_v57, %v23716_v57  ;;  %v23724_v10 = vld [vmem:[#allocation18_spill] sm:$0xff]  ;;  %v23731_v19 = vpack.c.bf16 %v23494_v15, %v23494_v15  ;;  %v21405_v45 = vunpack.c.l.b16 %v23732_v21  ;;  %v21410_v8 = vunpack.c.l.b16 %v23733_v26 }
 0x649   :  { %v21360_v2 = vunpack.c.l.b16 %v23719_v29  ;;  %v23725_v57 = vpack.c.bf16 %v23724_v10, %v23724_v10  ;;  %v21380_v29 = vunpack.c.l.b16 %v23726_v44  ;;  %v23730_v10 = vpack.c.bf16 %v23493_v50, %v23493_v50 }
 0x64a   :  { %v21355_v52 = vunpack.c.l.b16 %v23717_v20  ;;  %v21400_v44 = vunpack.c.l.b16 %v23731_v19  ;;  %v23734_v50 = vpack.c.bf16 %v23497_v56, %v23497_v56  ;;  %v23735_v15 = vpack.c.bf16 %v20598_v42, %v20598_v42 }
 0x64b   :  { %v21375_v20 = vunpack.c.l.b16 %v23725_v57  ;;  %23727 = vst [vmem:[#allocation28_spill] sm:$0xff] %v21380_v29  ;;  %v21395_v57 = vunpack.c.l.b16 %v23730_v10  ;;  %v23737_v9 = vpack.c.bf16 %v20602_v43, %v20602_v43  ;;  %v23738_v29 = vld [vmem:[#allocation23_spill] sm:$0xff]  ;;  %v23740_v56 = vpack.c.bf16 %v20614_v16, %v20614_v16 }
 0x64c   :  { %v21415_v10 = vunpack.c.l.b16 %v23734_v50  ;;  %v21420_v19 = vunpack.c.l.b16 %v23735_v15  ;;  %v23739_v3 = vpack.c.bf16 %v23738_v29, %v23738_v29  ;;  %v23741_v42 = vpack.c.bf16 %v20620_v35, %v20620_v35 }
 0x64d   :  { %v21425_v21 = vunpack.c.l.b16 %v23737_v9  ;;  %v21435_v50 = vunpack.c.l.b16 %v23740_v56  ;;  %v23742_v43 = vpack.c.bf16 %v20622_v62, %v20622_v62  ;;  %v23743_v29 = vpack.c.bf16 %v20628_v23, %v20628_v23 }
 0x64e   :  { %23736 = vst [vmem:[#allocation80_spill] sm:$0xff] %v21420_v19  ;;  %v21430_v26 = vunpack.c.l.b16 %v23739_v3  ;;  %v21440_v15 = vunpack.c.l.b16 %v23741_v42  ;;  %v23744_v19 = vld [vmem:[#allocation43_spill] sm:$0xff]  ;;  %v23746_v35 = vpack.c.bf16 %v20654_v18, %v20654_v18  ;;  %v9360_v62 = vsel %vm9359_vm12, %v20870_v46, %v20865_v31 }
 0x64f   :  { %v21445_v9 = vunpack.c.l.b16 %v23742_v43  ;;  %v21450_v3 = vunpack.c.l.b16 %v23743_v29  ;;  %v23745_v16 = vpack.c.bf16 %v23744_v19, %v23744_v19  ;;  %v9373_v23 = vsel %vm9359_vm12, %v20910_v7, %v20905_v33 }
 0x650   :  { %v21460_v42 = vunpack.c.l.b16 %v23746_v35  ;;  %v9380_v43 = vsel %vm9359_vm12, %v20950_v25, %v20945_v13  ;;  %v9387_v19 = vsel %vm9359_vm12, %v20990_v32, %v20985_v36  ;;  %v9362_v18 = vsel %vm9361_vm13, %v20875_v58, %v9360_v62  ;;  %v23747_v32 = vld [vmem:[#allocation31_spill] sm:$0xff]  ;;  %v23752_v35 = vld [vmem:[#allocation34_spill] sm:$0xff] }
 0x651   :  { %v21455_v56 = vunpack.c.l.b16 %v23745_v16  ;;  %v9374_v29 = vsel %vm9361_vm13, %v20915_v24, %v9373_v23  ;;  %v9381_v31 = vsel %vm9361_vm13, %v20955_v61, %v9380_v43  ;;  %v9388_v46 = vsel %vm9361_vm13, %v20995_v0, %v9387_v19  ;;  %v23751_v16 = vld [vmem:[#allocation33_spill] sm:$0xff]  ;;  %v23753_v62 = vld [vmem:[#allocation35_spill] sm:$0xff] }
 0x652   :  { %v9364_v33 = vsel %vm9363_vm14, %v20880_v5, %v9362_v18  ;;  %v9375_v7 = vsel %vm9363_vm14, %v20920_v49, %v9374_v29  ;;  %v9382_v13 = vsel %vm9363_vm14, %v20960_v14, %v9381_v31  ;;  %v9389_v58 = vsel %vm9363_vm14, %v21000_v55, %v9388_v46  ;;  %v23748_v55 = vld [vmem:[#allocation22_spill] sm:$0xff]  ;;  %v23754_v46 = vld [vmem:[#allocation49_spill] sm:$0xff] }
 0x653   :  { %v9366_v24 = vsel %vm8913_vm3, %v20885_v11, %v9364_v33  ;;  %v9376_v25 = vsel %vm8913_vm3, %v20925_v34, %v9375_v7  ;;  %v9383_v61 = vsel %vm8913_vm3, %v20965_v6, %v9382_v13  ;;  %v9390_v5 = vsel %vm8913_vm3, %v21005_v12, %v9389_v58  ;;  %v23757_v7 = vld [vmem:[#allocation44_spill] sm:$0xff]  ;;  %v23760_v58 = vld [vmem:[#allocation91_spill] sm:$0xff] }
 0x654   :  { %v9368_v49 = vsel %vm9367_vm15, %v20890_v53, %v9366_v24  ;;  %v9377_v14 = vsel %vm9367_vm15, %v20930_v63, %v9376_v25  ;;  %v9384_v36 = vsel %vm9367_vm15, %v20970_v30, %v9383_v61  ;;  %v9391_v11 = vsel %vm9367_vm15, %v21010_v54, %v9390_v5  ;;  %v23749_v30 = vld [vmem:[#allocation24_spill] sm:$0xff]  ;;  %v23761_v24 = vld [vmem:[#allocation45_spill] sm:$0xff]  ;;  %v23762_v61 = vld [vmem:[#allocation51_spill] sm:$0xff] }
 0x655   :  { %v9370_v34 = vsel %vm9369_vm0, %v20895_v41, %v9368_v49  ;;  %v9378_v6 = vsel %vm9369_vm0, %v20935_v48, %v9377_v14  ;;  %v9385_v0 = vsel %vm9369_vm0, %v23747_v32, %v9384_v36  ;;  %v9392_v53 = vsel %vm9369_vm0, %v21015_v17, %v9391_v11  ;;  %v23750_v54 = vld [vmem:[#allocation32_spill] sm:$0xff]  ;;  %v23764_v36 = vld [vmem:[#allocation19_spill] sm:$0xff] }
 0x656   :  { %v21516_v63 = vsel %vm8895_vm6, %v23748_v55, %v9370_v34  ;;  %v21520_v12 = vsel %vm8895_vm6, %v23749_v30, %v9378_v6  ;;  %v21524_v41 = vsel %vm8895_vm6, %v23750_v54, %v9385_v0  ;;  %v21528_v48 = vsel %vm8895_vm6, %v23751_v16, %v9392_v53  ;;  %v23759_v13 = vld [vmem:[#allocation88_spill] sm:$0xff]  ;;  %v23765_v34 = vld [vmem:[#allocation46_spill] sm:$0xff]  ;;  %v23767_v53 = vld [vmem:[#allocation89_spill] sm:$0xff] }
 0x657   :  { %v9394_v17 = vsel %vm9359_vm12, %v23753_v62, %v23752_v35  ;;  %v9401_v23 = vsel %vm9359_vm12, %v21070_v1, %v21065_v51  ;;  %v9408_v43 = vsel %vm9359_vm12, %v21110_v22, %v21105_v38  ;;  %v9415_v19 = vsel %vm9359_vm12, %v21150_v28, %v21145_v47  ;;  %v23755_v1 = vld [vmem:[#allocation36_spill] sm:$0xff]  ;;  %v23756_v38 = vld [vmem:[#allocation90_spill] sm:$0xff]  ;;  %v23768_v30 = vld [vmem:[#allocation21_spill] sm:$0xff] }
 0x658   :  { %v9395_v18 = vsel %vm9361_vm13, %v21035_v27, %v9394_v17  ;;  %v9402_v29 = vsel %vm9361_vm13, %v21075_v4, %v9401_v23  ;;  %v9409_v31 = vsel %vm9361_vm13, %v21115_v60, %v9408_v43  ;;  %v9416_v51 = vsel %vm9361_vm13, %v23754_v46, %v9415_v19  ;;  %v23758_v28 = vld [vmem:[#allocation50_spill] sm:$0xff]  ;;  %v23763_v49 = vld [vmem:[#allocation20_spill] sm:$0xff]  ;;  %v23769_v16 = vld [vmem:[#allocation47_spill] sm:$0xff] }
 0x659   :  { %v9396_v33 = vsel %vm9363_vm14, %v23755_v1, %v9395_v18  ;;  %v9403_v22 = vsel %vm9363_vm14, %v23756_v38, %v9402_v29  ;;  %v9410_v47 = vsel %vm9363_vm14, %v23757_v7, %v9409_v31  ;;  %v9417_v27 = vsel %vm9363_vm14, %v23758_v28, %v9416_v51  ;;  %v23766_v32 = vld [vmem:[#allocation52_spill] sm:$0xff]  ;;  %v23770_v62 = vld [vmem:[#allocation53_spill] sm:$0xff]  ;;  %v23774_v46 = vld [vmem:[#allocation54_spill] sm:$0xff] }
 0x65a   :  { %v9397_v4 = vsel %vm8913_vm3, %v23759_v13, %v9396_v33  ;;  %v9404_v60 = vsel %vm8913_vm3, %v23760_v58, %v9403_v22  ;;  %v9411_v25 = vsel %vm8913_vm3, %v23761_v24, %v9410_v47  ;;  %v9418_v5 = vsel %vm8913_vm3, %v23762_v61, %v9417_v27  ;;  %v23771_v23 = vld [vmem:[#allocation17_spill] sm:$0xff]  ;;  %v23773_v29 = vld [vmem:[#allocation48_spill] sm:$0xff]  ;;  %v23775_v1 = vld [vmem:[#allocation55_spill] sm:$0xff] }
 0x65b   :  { %v9398_v14 = vsel %vm9367_vm15, %v23763_v49, %v9397_v4  ;;  %v9405_v11 = vsel %vm9367_vm15, %v23764_v36, %v9404_v60  ;;  %v9412_v6 = vsel %vm9367_vm15, %v23765_v34, %v9411_v25  ;;  %v9419_v0 = vsel %vm9367_vm15, %v23766_v32, %v9418_v5  ;;  %v23772_v19 = vld [vmem:[#allocation37_spill] sm:$0xff]  ;;  %v23776_v33 = vld [vmem:[#allocation56_spill] sm:$0xff]  ;;  %v23777_v22 = vld [vmem:[#allocation63_spill] sm:$0xff] }
 0x65c   :  { %v9399_v55 = vsel %vm9369_vm0, %v23767_v53, %v9398_v14  ;;  %v9406_v54 = vsel %vm9369_vm0, %v23768_v30, %v9405_v11  ;;  %v9413_v35 = vsel %vm9369_vm0, %v23769_v16, %v9412_v6  ;;  %v9420_v17 = vsel %vm9369_vm0, %v23770_v62, %v9419_v0  ;;  %v23778_v7 = vld [vmem:[#allocation64_spill] sm:$0xff]  ;;  %v23779_v28 = vld [vmem:[#allocation71_spill] sm:$0xff]  ;;  %v23780_v27 = vld [vmem:[#allocation38_spill] sm:$0xff] }
 0x65d   :  { %v21584_v43 = vsel %vm8895_vm6, %v23771_v23, %v9399_v55  ;;  %v21588_v18 = vsel %vm8895_vm6, %v23772_v19, %v9406_v54  ;;  %v21592_v31 = vsel %vm8895_vm6, %v23773_v29, %v9413_v35  ;;  %v21596_v51 = vsel %vm8895_vm6, %v23774_v46, %v9420_v17  ;;  %v23781_v4 = vld [vmem:[#allocation75_spill] sm:$0xff]  ;;  %v23782_v58 = vld [vmem:[#allocation42_spill] sm:$0xff]  ;;  %v23783_v24 = vld [vmem:[#allocation57_spill] sm:$0xff] }
 0x65e   :  { %v9422_v38 = vsel %vm9359_vm12, %v23776_v33, %v23775_v1  ;;  %v9429_v47 = vsel %vm9359_vm12, %v23778_v7, %v23777_v22  ;;  %v9436_v13 = vsel %vm9359_vm12, %v23780_v27, %v23779_v28  ;;  %v9443_v60 = vsel %vm9359_vm12, %v23782_v58, %v23781_v4  ;;  %v23784_v61 = vld [vmem:[#allocation65_spill] sm:$0xff]  ;;  %v23785_v49 = vld [vmem:[#allocation39_spill] sm:$0xff]  ;;  %v23786_v36 = vld [vmem:[#allocation10_spill] sm:$0xff] }
 0x65f   :  { %v9423_v25 = vsel %vm9361_vm13, %v23783_v24, %v9422_v38  ;;  %v9430_v5 = vsel %vm9361_vm13, %v23784_v61, %v9429_v47  ;;  %v9437_v14 = vsel %vm9361_vm13, %v23785_v49, %v9436_v13  ;;  %v9444_v11 = vsel %vm9361_vm13, %v23786_v36, %v9443_v60  ;;  %v23787_v34 = vld [vmem:[#allocation58_spill] sm:$0xff]  ;;  %v23789_v53 = vld [vmem:[#allocation72_spill] sm:$0xff]  ;;  %v23791_v16 = vld [vmem:[#allocation59_spill] sm:$0xff] }
 0x660   :  { %v9424_v6 = vsel %vm9363_vm14, %v23787_v34, %v9423_v25  ;;  %v23788_v32 = vld [vmem:[#allocation66_spill] sm:$0xff]  ;;  %v9438_v55 = vsel %vm9363_vm14, %v23789_v53, %v9437_v14  ;;  %v23790_v30 = vld [vmem:[#allocation76_spill] sm:$0xff]  ;;  %v23792_v62 = vld [vmem:[#allocation67_spill] sm:$0xff] }
 0x661   :  { %v9431_v0 = vsel %vm9363_vm14, %v23788_v32, %v9430_v5  ;;  %v9445_v54 = vsel %vm9363_vm14, %v23790_v30, %v9444_v11  ;;  %v9425_v35 = vsel %vm8913_vm3, %v23791_v16, %v9424_v6  ;;  %v23793_v23 = vld [vmem:[#allocation40_spill] sm:$0xff]  ;;  %v23794_v29 = vld [vmem:[#allocation25_spill] sm:$0xff]  ;;  %v23802_v61 = vld [vmem:[#allocation26_spill] sm:$0xff]  ;;  %v9464_v16 = vsel %vm9359_vm12, %v21430_v26, %v21425_v21 }
 0x662   :  { %v9432_v17 = vsel %vm8913_vm3, %v23792_v62, %v9431_v0  ;;  %v9439_v19 = vsel %vm8913_vm3, %v23793_v23, %v9438_v55  ;;  %v9446_v46 = vsel %vm8913_vm3, %v23794_v29, %v9445_v54  ;;  %v23795_v1 = vld [vmem:[#allocation60_spill] sm:$0xff]  ;;  %v23797_v7 = vld [vmem:[#allocation73_spill] sm:$0xff]  ;;  %v23803_v49 = vld [vmem:[#allocation62_spill] sm:$0xff]  ;;  %v9457_v54 = vsel %vm9359_vm12, %v21390_v39, %v21385_v37 }
 0x663   :  { %v9426_v33 = vsel %vm9367_vm15, %v23795_v1, %v9425_v35  ;;  %v23796_v38 = vld [vmem:[#allocation68_spill] sm:$0xff]  ;;  %v9440_v47 = vsel %vm9367_vm15, %v23797_v7, %v9439_v19  ;;  %v23798_v28 = vld [vmem:[#allocation77_spill] sm:$0xff]  ;;  %v23804_v36 = vld [vmem:[#allocation70_spill] sm:$0xff]  ;;  %v9478_v35 = vpack.c.b16 %v21516_v63, %v21516_v63  ;;  %v9465_v23 = vsel %vm9361_vm13, %v21435_v50, %v9464_v16 }
 0x664   :  { %v9433_v22 = vsel %vm9367_vm15, %v23796_v38, %v9432_v17  ;;  %v9447_v27 = vsel %vm9367_vm15, %v23798_v28, %v9446_v46  ;;  %v23799_v13 = vld [vmem:[#allocation61_spill] sm:$0xff]  ;;  %v23805_v34 = vld [vmem:[#allocation74_spill] sm:$0xff]  ;;  %v23807_v53 = vld [vmem:[#allocation79_spill] sm:$0xff]  ;;  %v9458_v17 = vsel %vm9361_vm13, %v21395_v57, %v9457_v54  ;;  %v9479_v19 = vpack.c.b16 %v21520_v12, %v21520_v12 }
 0x665   :  { %v9427_v4 = vsel %vm9369_vm0, %v23799_v13, %v9426_v33  ;;  %v23800_v58 = vld [vmem:[#allocation69_spill] sm:$0xff]  ;;  %v9448_v5 = vsel %vm9369_vm0, %v23802_v61, %v9447_v27  ;;  %v23806_v32 = vld [vmem:[#allocation78_spill] sm:$0xff]  ;;  %v23808_v55 = vld [vmem:[#allocation27_spill] sm:$0xff]  ;;  %v9459_v39 = vsel %vm9363_vm14, %v21400_v44, %v9458_v17  ;;  %v9466_v21 = vsel %vm9363_vm14, %v21440_v15, %v9465_v23  ;;  %9510 = vst [vmem:[#allocation2 + $0x20] sm:$0xf] %v9478_v35 }
 0x666   :  { %v9434_v60 = vsel %vm9369_vm0, %v23800_v58, %v9433_v22  ;;  %v23801_v24 = vld [vmem:[#allocation41_spill] sm:$0xff]  ;;  %v9428_v14 = vsel %vm8895_vm6, %v23803_v49, %v9427_v4  ;;  %v9449_v0 = vsel %vm8895_vm6, %v23806_v32, %v9448_v5  ;;  %v9450_v30 = vsel %vm9359_vm12, %v23808_v55, %v23807_v53  ;;  %9511 = vst [vmem:[#allocation2 + $0x38] sm:$0xf] %v9479_v19  ;;  %v23810_v29 = vld [vmem:[#allocation80_spill] sm:$0xff]  ;;  %v16666_v53 = vld [vmem:[#allocation3 + $0x248] sm:$0xff]  }
 0x667   :  { %v9441_v25 = vsel %vm9369_vm0, %v23801_v24, %v9440_v47  ;;  %v9435_v11 = vsel %vm8895_vm6, %v23804_v36, %v9434_v60  ;;  %v9451_v62 = vsel %vm9361_vm13, %v21355_v52, %v9450_v30  ;;  %v9480_v52 = vpack.c.b16 %v21524_v41, %v21524_v41  ;;  %v21709_v41 = vld [vmem:[#allocation2 + $0x1b8] sm:$0xf]  ;;  %v21721_v46 = vld [vmem:[#allocation2 + $0x1c] ss:$0 sps:$4 sm:$0x88]  }
 0x668   :  { %v9442_v6 = vsel %vm8895_vm6, %v23805_v34, %v9441_v25  ;;  %v9452_v37 = vsel %vm9363_vm14, %v21360_v2, %v9451_v62  ;;  %v9460_v26 = vsel %vm8913_vm3, %v21405_v45, %v9459_v39  ;;  %v9467_v50 = vsel %vm8913_vm3, %v21445_v9, %v9466_v21  ;;  %v9527_v45 = vld [vmem:[#allocation2 + $0x8] sm:$0xf] }
 0x669   :  { %v9453_v57 = vsel %vm8913_vm3, %v21365_v59, %v9452_v37  ;;  %v9481_v2 = vpack.c.b16 %v21528_v48, %v21528_v48  ;;  %v9461_v15 = vsel %vm9367_vm15, %v21410_v8, %v9460_v26  ;;  %v9468_v63 = vsel %vm9367_vm15, %v21450_v3, %v9467_v50  ;;  %9512 = vst [vmem:[#allocation2 + $0x50] sm:$0xf] %v9480_v52  ;;  %v21711_v3 = vld [vmem:[#allocation2 + $0x4] ss:$0 sps:$4 sm:$0x88]   ;;  %v23809_v48 = vld [vmem:[#allocation28_spill] sm:$0xff]  ;;  %vm21859_vm3 = vmor %vm335_vm1, %vm9654_vm2 }
 0x66a   :  { %v9454_v44 = vsel %vm9367_vm15, %v21370_v40, %v9453_v57  ;;  %v9482_v59 = vpack.c.b16 %v21584_v43, %v21584_v43  ;;  %v9462_v12 = vsel %vm9369_vm0, %v21415_v10, %v9461_v15  ;;  %v9469_v40 = vsel %vm9369_vm0, %v21455_v56, %v9468_v63  ;;  %v16962_v26 = vld [vmem:[#allocation3 + $0x240] sm:$0xff]  }
 0x66b   :  { %v9455_v9 = vsel %vm9369_vm0, %v21375_v20, %v9454_v44  ;;  %v9483_v8 = vpack.c.b16 %v21588_v18, %v21588_v18  ;;  %9513 = vst [vmem:[#allocation2 + $0x68] sm:$0xf] %v9481_v2  ;;  %v9463_v20 = vsel %vm8895_vm6, %v23810_v29, %v9462_v12  ;;  %v9470_v10 = vsel %vm8895_vm6, %v21460_v42, %v9469_v40  ;;  %v21723_v18 = vld [vmem:[#allocation2 + $0x34] ss:$0 sps:$4 sm:$0x88]  }
 0x66c   :  { %v9456_v43 = vsel %vm8895_vm6, %v23809_v48, %v9455_v9  ;;  %v9484_v56 = vpack.c.b16 %v21592_v31, %v21592_v31  ;;  %9514 = vst [vmem:[#allocation2 + $0x80] sm:$0xf] %v9482_v59  ;;  %v9485_v1 = vpack.c.b16 %v21596_v51, %v21596_v51  ;;  %v9486_v33 = vpack.c.b16 %v9428_v14, %v9428_v14  ;;  %v9529_v42 = vld [vmem:[#allocation2 + $0x20] sm:$0xf]  ;;  %v16670_v59 = vld [vmem:[#allocation3 + $0x250] sm:$0xff]  }
 0x66d   :  { %v9487_v38 = vpack.c.b16 %v9435_v11, %v9435_v11  ;;  %v9488_v22 = vpack.c.b16 %v9442_v6, %v9442_v6  ;;  %9515 = vst [vmem:[#allocation2 + $0x98] sm:$0xf] %v9483_v8  ;;  %v9489_v7 = vpack.c.b16 %v9449_v0, %v9449_v0  ;;  %v9490_v47 = vpack.c.b16 %v9456_v43, %v9456_v43  ;;  %v9531_v60 = vld [vmem:[#allocation2 + $0x38] sm:$0xf] }
 0x66e   :  { %v9491_v28 = vpack.c.b16 %v9463_v20, %v9463_v20  ;;  %v9492_v27 = vpack.c.b16 %v9470_v10, %v9470_v10  ;;  %9516 = vst [vmem:[#allocation2 + $0xb0] sm:$0xf] %v9484_v56  ;;  %9517 = vst [vmem:[#allocation2 + $0xc8] sm:$0xf] %v9485_v1  ;;  %v21727_v31 = vcombine.low %v9527_v45, %v9527_v45  ;;  %v9657_v51 = vshrl.u32 %v21711_v3, 16 }
 0x66f   :  { %9518 = vst [vmem:[#allocation2 + $0x1d0] sm:$0xf] %v9486_v33  ;;  %9519 = vst [vmem:[#allocation2 + $0x1e8] sm:$0xf] %v9487_v38  ;;  %v21731_v13 = vcombine.low %v21709_v41, %v21709_v41  ;;  %v21734_v4 = vcombine.low %v9529_v42, %v9529_v42  ;;  %v14065_v58 = vcombine.low %v9527_v45, %v9529_v42  ;;  %v9670_v24 = vshrl.u32 %v21721_v46, 16 }
 0x670   :  { %9520 = vst [vmem:[#allocation2 + $0x200] sm:$0xf] %v9488_v22  ;;  %9521 = vst [vmem:[#allocation2 + $0x218] sm:$0xf] %v9489_v7  ;;  %v9683_v25 = vshrl.u32 %v21723_v18, 16  ;;  %v9662_v61 = vshrl.u32 %v21727_v31, 16  ;;  %v21740_v14 = vcombine.low %v9531_v60, %v9531_v60 }
 0x671   :  { %9522 = vst [vmem:[#allocation2 + $0x230] sm:$0xf] %v9490_v47  ;;  %9523 = vst [vmem:[#allocation2 + $0x248] sm:$0xf] %v9491_v28  ;;  %v9665_v5 = vshll.u32 %v21727_v31, 16  ;;  %v9766_v36 = vshrl.u32 %v21731_v13, 16  ;;  %15642 = vmatprep.mubr.bf16.mxu1 %v14065_v58 }
 0x672   :  { %9524 = vst [vmem:[#allocation2 + $0x260] sm:$0xf] %v9492_v27  ;;  %v9533_v49 = vld [vmem:[#allocation2 + $0x50] sm:$0xf]  ;;  %v9675_v11 = vshrl.u32 %v21734_v4, 16  ;;  %v9678_v34 = vshll.u32 %v21734_v4, 16 }
 0x673   :  { %v21745_v6 = vcombine.low %v9533_v49, %v9533_v49  ;;  %v14066_v32 = vcombine.low %v9531_v60, %v9533_v49  ;;  %v9535_v0 = vld [vmem:[#allocation2 + $0x68] sm:$0xf]  ;;  %v21747_v55 = vrot.slane %v9662_v61, 7  ;;  %v9688_v30 = vshrl.u32 %v21740_v14, 16  ;;  %v9537_v16 = vld [vmem:[#allocation2 + $0x80] sm:$0xf] }
 0x674   :  { %v9691_v54 = vshll.u32 %v21740_v14, 16  ;;  %v21751_v35 = vcombine.low %v9535_v0, %v9535_v0  ;;  %v21753_v62 = vrot.slane %v9675_v11, 7  ;;  %v21757_v19 = vcombine.low %v9537_v16, %v9537_v16  ;;  %v9539_v37 = vld [vmem:[#allocation2 + $0x98] sm:$0xf] }
 0x675   :  { %v9701_v17 = vshrl.u32 %v21745_v6, 16  ;;  %v9704_v23 = vshll.u32 %v21745_v6, 16  ;;  %15643 = vmatmul.mubr.bf16.vlgmr.msra.gmra.mrb[64].mxu1 %v14066_v32  ;;  %v21759_v39 = vrot.slane %v9688_v30, 7  ;;  %v14067_v57 = vcombine.low %v9535_v0, %v9537_v16  ;;  %v9541_v50 = vld [vmem:[#allocation2 + $0xb0] sm:$0xf]  ;;  %v16674_v58 = vld [vmem:[#allocation3 + $0x258] sm:$0xff]  }
 0x676   :  { %v9714_v21 = vshrl.u32 %v21751_v35, 16  ;;  %v9717_v52 = vshll.u32 %v21751_v35, 16  ;;  %15659 = vmatpush3.bf16.msra.mxu1 %v16962_v26  ;;  %v9727_v44 = vshrl.u32 %v21757_v19, 16  ;;  %v9730_v15 = vshll.u32 %v21757_v19, 16  ;;  %v9545_v45 = vld [vmem:[#allocation2 + $0x1d0] sm:$0xf] }
 0x677   :  { %v21763_v2 = vrot.slane %v9701_v17, 7  ;;  %15660 = vmatprep.subr.bf16.mxu1 %v16666_v53  ;;  %v21767_v63 = vcombine.low %v9539_v37, %v9539_v37  ;;  %15646 = vmatprep.mubr.bf16.mxu1 %v14067_v57  ;;  %v21771_v12 = vcombine.low %v9541_v50, %v9541_v50  ;;  %v14068_v40 = vcombine.low %v9539_v37, %v9541_v50  ;;  %v21775_v48 = vld [vmem:[#allocation2 + $0x1e8] sm:$0xf]  ;;  %v21777_v43 = vld [vmem:[#allocation2 + $0x200] sm:$0xf] }
 0x678   :  { %v21769_v9 = vrot.slane %v9714_v21, 7  ;;  %v21773_v8 = vcombine.low %v9545_v45, %v9545_v45  ;;  %v21779_v29 = vrot.slane %v9727_v44, 7  ;;  %v21783_v56 = vrot.slane %v9766_v36, 7  ;;  %v21785_v1 = vld [vmem:[#allocation2 + $0x218] sm:$0xf]  ;;  %v16678_v44 = vld [vmem:[#allocation3 + $0x260] sm:$0xff]  }
 0x679   :  { %v9740_v20 = vshrl.u32 %v21767_v63, 16  ;;  %v9743_v10 = vshll.u32 %v21767_v63, 16  ;;  %v9753_v33 = vshrl.u32 %v21771_v12, 16  ;;  %v9756_v38 = vshll.u32 %v21771_v12, 16  ;;  %v21791_v47 = vld [vmem:[#allocation2 + $0x230] sm:$0xf] }
 0x67a   :  { %15661 = vmatpush3.bf16.msra.mxu1 %v16666_v53  ;;  %v9769_v22 = vshll.u32 %v21731_v13, 16  ;;  %v9779_v7 = vshrl.u32 %v21773_v8, 16  ;;  %v14069_v42 = vcombine.low %v21709_v41, %v9545_v45  ;;  %v21799_v60 = vcombine.low %v21775_v48, %v21775_v48  ;;  %v21801_v61 = vld [vmem:[#allocation2 + $0x248] sm:$0xf]  ;;  %v21823_v16 = vld [vmem:[#allocation2 + $0x260] sm:$0xf] }
 0x67b   :  { %v21793_v28 = vrot.slane %v9740_v20, 7  ;;  %15662 = vmatprep.subr.bf16.mxu1 %v16670_v59  ;;  %v21803_v49 = vrot.slane %v9753_v33, 7  ;;  %v21809_v11 = vcombine.low %v21777_v43, %v21777_v43  ;;  %v14070_v32 = vcombine.low %v21775_v48, %v21777_v43  ;;  %v16691_v26 = vld [vmem:[#allocation2 + $0x4c] ss:$0 sps:$4 sm:$0x88]  }
 0x67c   :  { %v21805_v36 = vrot.slane %v9779_v7, 7  ;;  %v9792_v41 = vshrl.u32 %v21799_v60, 16  ;;  %v21817_v53 = vcombine.low %v21785_v1, %v21785_v1  ;;  %v21821_v30 = vcombine.low %v21791_v47, %v21791_v47  ;;  %v16693_v33 = vld [vmem:[#allocation2 + $0x64] ss:$0 sps:$4 sm:$0x88]  }
 0x67d   :  { %15647 = vmatmul.mubr.bf16.gmra.mrb[68].mxu1 %v14068_v40  ;;  %v9805_v17 = vshrl.u32 %v21809_v11, 16  ;;  %v14071_v21 = vcombine.low %v21785_v1, %v21791_v47  ;;  %v21831_v57 = vcombine.low %v21801_v61, %v21801_v61  ;;  %v21843_v20 = vcombine.low %v21823_v16, %v21823_v16  ;;  %v16696_v0 = vld [vmem:[#allocation2 + $0x94] ss:$0 sps:$4 sm:$0x88]  }
 0x67e   :  { %15650 = vmatprep.mubr.bf16.mxu1 %v14069_v42  ;;  %15663 = vmatpush3.bf16.msra.mxu1 %v16670_v59  ;;  %v21833_v50 = vrot.slane %v9792_v41, 7  ;;  %v9818_v45 = vshrl.u32 %v21817_v53, 16  ;;  %v9831_v40 = vshrl.u32 %v21821_v30, 16  ;;  %v16682_v42 = vld [vmem:[#allocation3 + $0x268] sm:$0xff]   ;;  %v9680_v37 = vor.u32 %v9678_v34, %v21753_v62  ;;  %v16686_v62 = vld [vmem:[#allocation3 + $0x270] sm:$0xff]  }
 0x67f   :  { %15664 = vmatprep.subr.bf16.mxu1 %v16674_v58  ;;  %v21838_v48 = vrot.slane %v9805_v17, 7  ;;  %v9844_v1 = vshrl.u32 %v21831_v57, 16  ;;  %v16694_v17 = vld [vmem:[#allocation2 + $0x7c] ss:$0 sps:$4 sm:$0x88]   ;;  %v9857_v43 = vshrl.u32 %v21843_v20, 16  ;;  %v9693_v3 = vor.u32 %v9691_v54, %v21759_v39 }
 0x680   :  { %v21846_v7 = vrot.slane %v9818_v45, 7  ;;  %v21848_v47 = vrot.slane %v9831_v40, 7  ;;  %v14049_v40 = vrot.slane %v9657_v51, 11  ;;  %v14051_v41 = vrot.slane %v9683_v25, 11 }
 0x681   :  { %v21853_v59 = vrot.slane %v9844_v1, 7  ;;  %v14050_v1 = vrot.slane %v9670_v24, 11  ;;  %v21875_v27 = vrot.slane %v9857_v43, 7  ;;  %v9696_v51 = vshrl.u32 %v16691_v26, 16 }
 0x682   :  { %15665 = vmatpush3.bf16.msra.mxu1 %v16674_v58  ;;  %v9667_v58 = vor.u32 %v9665_v5, %v21747_v55  ;;  %v9706_v46 = vor.u32 %v9704_v23, %v21763_v2  ;;  %v16697_v31 = vld [vmem:[#allocation2 + $0xac] ss:$0 sps:$4 sm:$0x88]   ;;  %v9709_v24 = vshrl.u32 %v16693_v33, 16  ;;  %v9719_v25 = vor.u32 %v9717_v52, %v21769_v9 }
 0x683   :  { %15666 = vmatprep.subr.bf16.mxu1 %v16678_v44  ;;  %v9681_v18 = vsel %vm21859_vm3, %v14050_v1, %v9680_v37  ;;  %v16699_v5 = vld [vmem:[#allocation2 + $0x1b4] ss:$0 sps:$4 sm:$0x88]   ;;  %v9694_v34 = vsel %vm21859_vm3, %v14051_v41, %v9693_v3  ;;  %v14052_v6 = vrot.slane %v9696_v51, 11  ;;  %v9722_v55 = vshrl.u32 %v16694_v17, 16 }
 0x684   :  { %v9668_v4 = vsel %vm21859_vm3, %v14049_v40, %v9667_v58  ;;  %v16700_v54 = vld [vmem:[#allocation2 + $0x1cc] ss:$0 sps:$4 sm:$0x88]   ;;  %v14053_v23 = vrot.slane %v9709_v24, 11  ;;  %v9732_v39 = vor.u32 %v9730_v15, %v21779_v29  ;;  %v9735_v2 = vshrl.u32 %v16696_v0, 16  ;;  %v16692_v24 = vld [vmem:[#allocation3 + $0x2c0] sm:$0xff]  }
 0x685   :  { %15651 = vmatmul.mubr.bf16.gmra.mrb[72].mxu1 %v14070_v32  ;;  %v14081_v14 = vcombine.low %v9668_v4, %v9681_v18  ;;  %v9745_v35 = vor.u32 %v9743_v10, %v21793_v28  ;;  %v9707_v52 = vsel %vm21859_vm3, %v14052_v6, %v9706_v46  ;;  %v14054_v9 = vrot.slane %v9722_v55, 11  ;;  %v16703_v0 = vld [vmem:[#allocation2 + $0x1fc] ss:$0 sps:$4 sm:$0x88]  }
 0x686   :  { %15654 = vmatprep.mubr.bf16.mxu1 %v14071_v21  ;;  %15667 = vmatpush3.bf16.msra.mxu1 %v16678_v44  ;;  %v9748_v32 = vshrl.u32 %v16697_v31, 16  ;;  %v9758_v37 = vor.u32 %v9756_v38, %v21803_v49  ;;  %v16702_v21 = vld [vmem:[#allocation2 + $0x1e4] ss:$0 sps:$4 sm:$0x88]   ;;  %v21903_v26 = vcombine.low %v9694_v34, %v9707_v52  ;;  %v9720_v19 = vsel %vm21859_vm3, %v14053_v23, %v9719_v25  ;;  %v16689_v49 = vld [vmem:[#allocation3 + $0x278] sm:$0xff]  }
 0x687   :  { %15668 = vmatprep.subr.bf16.mxu1 %v16682_v42  ;;  %v14055_v15 = vrot.slane %v9735_v2, 11  ;;  %v9761_v29 = vshrl.u32 %v16699_v5, 16  ;;  %v9733_v63 = vsel %vm21859_vm3, %v14054_v9, %v9732_v39  ;;  %v9771_v28 = vor.u32 %v9769_v22, %v21783_v56  ;;  %v16705_v38 = vld [vmem:[#allocation2 + $0x214] ss:$0 sps:$4 sm:$0x88]  }
 0x688   :  { %v14056_v10 = vrot.slane %v9748_v32, 11  ;;  %v9774_v12 = vshrl.u32 %v16700_v54, 16  ;;  %v14083_v44 = vcombine.low %v9720_v19, %v9733_v63  ;;  %v16706_v17 = vld [vmem:[#allocation2 + $0x22c] ss:$0 sps:$4 sm:$0x88]   ;;  %v9787_v13 = vshrl.u32 %v16702_v21, 16 }
 0x689   :  { %v9746_v43 = vsel %vm21859_vm3, %v14055_v15, %v9745_v35  ;;  %v14057_v33 = vrot.slane %v9761_v29, 11  ;;  %v23814_v56 = vshll.u32 %v21799_v60, 16  ;;  %v16708_v1 = vld [vmem:[#allocation2 + $0x244] ss:$0 sps:$4 sm:$0x88]   ;;  %v23815_v3 = vcombine.low %v21801_v61, %v21823_v16 }
 0x68a   :  { %15669 = vmatpush3.bf16.msra.mxu1 %v16682_v42  ;;  %v23813_v42 = vshll.u32 %v21773_v8, 16  ;;  %v9759_v40 = vsel %vm21859_vm3, %v14056_v10, %v9758_v37  ;;  %v14058_v58 = vrot.slane %v9774_v12, 11  ;;  %v23816_v46 = vshll.u32 %v21809_v11, 16  ;;  %v16709_v4 = vld [vmem:[#allocation2 + $0x25c] ss:$0 sps:$4 sm:$0x88]  }
 0x68b   :  { %15670 = vmatprep.subr.bf16.mxu1 %v16686_v62  ;;  %v9797_v22 = vor.u32 %v23814_v56, %v21833_v50  ;;  %v21925_v51 = vcombine.low %v9746_v43, %v9759_v40  ;;  %v9772_v8 = vsel %vm21859_vm3, %v14057_v33, %v9771_v28  ;;  %v14059_v50 = vrot.slane %v9787_v13, 11  ;;  %v10238_v29 = vld [vmem:[#allocation2 + $0x38] sm:$0x1f]  ;;  %v10239_v43 = vld [vmem:[#allocation2 + $0x50] sm:$0x1f] }
 0x68c   :  { %v9784_v41 = vor.u32 %v23813_v42, %v21805_v36  ;;  %v9800_v36 = vshrl.u32 %v16703_v0, 16  ;;  %v9810_v31 = vor.u32 %v23816_v46, %v21838_v48  ;;  %v9813_v18 = vshrl.u32 %v16705_v38, 16  ;;  %v16698_v33 = vld [vmem:[#allocation3 + $0x2d0] sm:$0xff]  }
 0x68d   :  { %15655 = vmatmul.mubr.bf16.gmra.mrb[76].mxu1 %v23815_v3  ;;  %v23817_v61 = vshll.u32 %v21817_v53, 16  ;;  %v9826_v34 = vshrl.u32 %v16706_v17, 16  ;;  %v23818_v11 = vshll.u32 %v21821_v30, 16  ;;  %v9798_v6 = vsel %vm21859_vm3, %v14059_v50, %v9797_v22  ;;  %v16701_v22 = vld [vmem:[#allocation3 + $0x2d8] sm:$0xff]  }
 0x68e   :  { %15671 = vmatpush3.bf16.msra.mxu1 %v16686_v62  ;;  %15674 = vmatprep.mubr.bf16.mxu1 %v14081_v14  ;;  %v9785_v60 = vsel %vm21859_vm3, %v14058_v58, %v9784_v41  ;;  %v14060_v5 = vrot.slane %v9800_v36, 11  ;;  %v10236_v14 = vld [vmem:[#allocation2 + $0x8] sm:$0x1f]  ;;  %v14061_v55 = vrot.slane %v9813_v18, 11  ;;  %v9839_v54 = vshrl.u32 %v16708_v1, 16 }
 0x68f   :  { %v9823_v16 = vor.u32 %v23817_v61, %v21846_v7  ;;  %15672 = vmatprep.subr.bf16.mxu1 %v16689_v49  ;;  %v21937_v25 = vcombine.low %v9772_v8, %v9785_v60  ;;  %v9836_v48 = vor.u32 %v23818_v11, %v21848_v47  ;;  %v23819_v53 = vshll.u32 %v21831_v57, 16  ;;  %v10237_v62 = vld [vmem:[#allocation2 + $0x20] sm:$0x1f]  ;;  %v16695_v57 = vld [vmem:[#allocation3 + $0x2c8] sm:$0xff]  }
 0x690   :  { %v9811_v23 = vsel %vm21859_vm3, %v14060_v5, %v9810_v31  ;;  %v14062_v39 = vrot.slane %v9826_v34, 11  ;;  %v9852_v2 = vshrl.u32 %v16709_v4, 16  ;;  %v23820_v30 = vshll.u32 %v21843_v20, 16  ;;  %v21973_v50 = vld [vmem:[#allocation2 + $0x1c] ss:$0 sps:$4 sm:$0x88]  }
 0x691   :  { %v9849_v7 = vor.u32 %v23819_v53, %v21853_v59  ;;  %v21952_v35 = vcombine.low %v9798_v6, %v9811_v23  ;;  %v9824_v52 = vsel %vm21859_vm3, %v14061_v55, %v9823_v16  ;;  %v14063_v9 = vrot.slane %v9839_v54, 11  ;;  %v10240_v5 = vld [vmem:[#allocation2 + $0x68] sm:$0x1f]  ;;  %v10241_v6 = vld [vmem:[#allocation2 + $0x80] sm:$0x1f] }
 0x692   :  { %v9862_v47 = vor.u32 %v23820_v30, %v21875_v27  ;;  %15673 = vmatpush3.bf16.msra.mxu1 %v16689_v49  ;;  %v14097_v32 = vcombine.low %v10236_v14, %v10236_v14  ;;  %v9837_v59 = vsel %vm21859_vm3, %v14062_v39, %v9836_v48  ;;  %v14064_v37 = vrot.slane %v9852_v2, 11 }
 0x693   :  { %15690 = vmatprep.subr.bf16.mxu1 %v16692_v24  ;;  %v14098_v21 = vcombine.high %v10236_v14, %v10236_v14  ;;  %v14099_v19 = vcombine.low %v10237_v62, %v10237_v62  ;;  %v21958_v15 = vcombine.low %v9824_v52, %v9837_v59  ;;  %v9850_v27 = vsel %vm21859_vm3, %v14063_v9, %v9849_v7 }
 0x694   :  { %v14100_v20 = vcombine.high %v10237_v62, %v10237_v62  ;;  %vm10332_vm1 = vsmask.f32 3328  ;;  %v9863_v0 = vsel %vm21859_vm3, %v14064_v37, %v9862_v47  ;;  %v10336_v63 = vshrl.u32 %v14097_v32, 16 }
 0x695   :  { %15675 = vmatmul.mubr.bf16.vlgmr.msra.gmra.mrb[64].mxu1 %v21903_v26  ;;  %v10339_v10 = vshll.u32 %v14097_v32, 16  ;;  %v21965_v28 = vcombine.low %v9850_v27, %v9863_v0  ;;  %v10345_v12 = vshll.u32 %v14098_v21, 16  ;;  %v10350_v38 = vshrl.u32 %v14099_v19, 16  ;;  %vm21969_vm5 = vmor %vm10332_vm1, %vm10333_vm4 }
 0x696   :  { %15678 = vmatprep.mubr.bf16.mxu1 %v14083_v44  ;;  %15691 = vmatpush3.bf16.msra.mxu1 %v16692_v24  ;;  %v10353_v49 = vshll.u32 %v14099_v19, 16  ;;  %v10338_v42 = vrot.slane %v10336_v63, 4  ;;  %v10359_v17 = vshll.u32 %v14100_v20, 16  ;;  %v14101_v26 = vcombine.low %v10238_v29, %v10238_v29  ;;  %v10242_v20 = vld [vmem:[#allocation2 + $0x98] sm:$0x1f] }
 0x697   :  { %15692 = vmatprep.subr.bf16.mxu1 %v16695_v57  ;;  %v10341_v41 = vrot.slane %v10339_v10, 5  ;;  %v10347_v40 = vrot.slane %v10345_v12, 5  ;;  %v10352_v58 = vrot.slane %v10350_v38, 4  ;;  %v14102_v56 = vcombine.high %v10238_v29, %v10238_v29  ;;  %v10243_v12 = vld [vmem:[#allocation2 + $0xb0] sm:$0x1f]  ;;  %v16707_v38 = vld [vmem:[#allocation3 + $0x2e8] sm:$0xff]  }
 0x698   :  { %v10355_v13 = vrot.slane %v10353_v49, 5  ;;  %v10361_v44 = vrot.slane %v10359_v17, 5  ;;  %v14103_v3 = vcombine.low %v10239_v43, %v10239_v43  ;;  %v14104_v8 = vcombine.high %v10239_v43, %v10239_v43 }
 0x699   :  { %v10342_v1 = vor.u32 %v10341_v41, %v10338_v42  ;;  %v10364_v31 = vshrl.u32 %v14101_v26, 16  ;;  %v10367_v4 = vshll.u32 %v14101_v26, 16  ;;  %v10373_v60 = vshll.u32 %v14102_v56, 16  ;;  %v10244_v41 = vld [vmem:[#allocation2 + $0x1b8] sm:$0x1f] }
 0x69a   :  { %15693 = vmatpush3.bf16.msra.mxu1 %v16695_v57  ;;  %v10356_v46 = vor.u32 %v10355_v13, %v10352_v58  ;;  %v10378_v61 = vshrl.u32 %v14103_v3, 16  ;;  %v10381_v16 = vshll.u32 %v14103_v3, 16  ;;  %v10387_v24 = vshll.u32 %v14104_v8, 16 }
 0x69b   :  { %15694 = vmatprep.subr.bf16.mxu1 %v16698_v33  ;;  %v10343_v18 = vrot.slane %v10342_v1, 4  ;;  %v10366_v11 = vrot.slane %v10364_v31, 4  ;;  %v10369_v48 = vrot.slane %v10367_v4, 5  ;;  %v10375_v14 = vrot.slane %v10373_v60, 5  ;;  %v16710_v31 = vld [vmem:[#allocation3 + $0x2f0] sm:$0xff]  }
 0x69c   :  { %v10357_v34 = vrot.slane %v10356_v46, 4  ;;  %v10380_v54 = vrot.slane %v10378_v61, 4  ;;  %v10383_v53 = vrot.slane %v10381_v16, 5  ;;  %v10389_v7 = vrot.slane %v10387_v24, 5 }
 0x69d   :  { %15679 = vmatmul.mubr.bf16.gmra.mrb[68].mxu1 %v21925_v51  ;;  %v21978_v55 = vsel %vm21969_vm5, %v10343_v18, %v10347_v40  ;;  %v10370_v23 = vor.u32 %v10369_v48, %v10366_v11  ;;  %v14105_v39 = vcombine.low %v10240_v5, %v10240_v5  ;;  %v10898_v2 = vshrl.u32 %v21973_v50, 16  ;;  %v16704_v51 = vld [vmem:[#allocation3 + $0x2e0] sm:$0xff]  }
 0x69e   :  { %15682 = vmatprep.mubr.bf16.mxu1 %v21937_v25  ;;  %15695 = vmatpush3.bf16.msra.mxu1 %v16698_v33  ;;  %v21983_v62 = vsel %vm21969_vm5, %v10357_v34, %v10361_v44  ;;  %v10384_v47 = vor.u32 %v10383_v53, %v10380_v54  ;;  %v14106_v52 = vcombine.high %v10240_v5, %v10240_v5  ;;  %v10245_v34 = vld [vmem:[#allocation2 + $0x1d0] sm:$0x1f]  ;;  %v10251_v50 = vld [vmem:[#allocation2 + $0x260] sm:$0x1f] }
 0x69f   :  { %15696 = vmatprep.subr.bf16.mxu1 %v16701_v22  ;;  %v14129_v30 = vcombine.low %v21978_v55, %v21983_v62  ;;  %v14107_v9 = vcombine.low %v10241_v6, %v10241_v6  ;;  %v10371_v32 = vrot.slane %v10370_v23, 4  ;;  %v14108_v57 = vcombine.high %v10241_v6, %v10241_v6  ;;  %v10246_v6 = vld [vmem:[#allocation2 + $0x1e8] sm:$0x1f] }
 0x6a0   :  { %v10392_v25 = vshrl.u32 %v14105_v39, 16  ;;  %v10395_v59 = vshll.u32 %v14105_v39, 16  ;;  %v10385_v37 = vrot.slane %v10384_v47, 4  ;;  %v10401_v21 = vshll.u32 %v14106_v52, 16  ;;  %v16715_v39 = vld [vmem:[#allocation3 + $0x2f8] sm:$0xff]  }
 0x6a1   :  { %v10406_v19 = vshrl.u32 %v14107_v9, 16  ;;  %v10409_v27 = vshll.u32 %v14107_v9, 16  ;;  %v21990_v29 = vsel %vm21969_vm5, %v10371_v32, %v10375_v14  ;;  %v10415_v10 = vshll.u32 %v14108_v57, 16 }
 0x6a2   :  { %15697 = vmatpush3.bf16.msra.mxu1 %v16701_v22  ;;  %v10394_v0 = vrot.slane %v10392_v25, 4  ;;  %v10397_v63 = vrot.slane %v10395_v59, 5  ;;  %v21994_v49 = vsel %vm21969_vm5, %v10385_v37, %v10389_v7  ;;  %v10403_v43 = vrot.slane %v10401_v21, 5 }
 0x6a3   :  { %15698 = vmatprep.subr.bf16.mxu1 %v16704_v51  ;;  %v10408_v33 = vrot.slane %v10406_v19, 4  ;;  %v10411_v42 = vrot.slane %v10409_v27, 5  ;;  %v14130_v17 = vcombine.low %v21990_v29, %v21994_v49  ;;  %v10417_v40 = vrot.slane %v10415_v10, 5 }
 0x6a4   :  { %v10398_v26 = vor.u32 %v10397_v63, %v10394_v0  ;;  %v14109_v58 = vcombine.low %v10242_v20, %v10242_v20  ;;  %v14110_v56 = vcombine.high %v10242_v20, %v10242_v20  ;;  %v14111_v22 = vcombine.low %v10243_v12, %v10243_v12  ;;  %v10247_v20 = vld [vmem:[#allocation2 + $0x200] sm:$0x1f] }
 0x6a5   :  { %15683 = vmatmul.mubr.bf16.gmra.mrb[72].mxu1 %v21952_v35  ;;  %v10412_v13 = vor.u32 %v10411_v42, %v10408_v33  ;;  %v14112_v1 = vcombine.high %v10243_v12, %v10243_v12  ;;  %v14113_v46 = vcombine.low %v10244_v41, %v10244_v41  ;;  %v14114_v23 = vcombine.high %v10244_v41, %v10244_v41 }
 0x6a6   :  { %15686 = vmatprep.mubr.bf16.mxu1 %v21958_v15  ;;  %15699 = vmatpush3.bf16.msra.mxu1 %v16704_v51  ;;  %v10399_v44 = vrot.slane %v10398_v26, 4  ;;  %v10420_v3 = vshrl.u32 %v14109_v58, 16  ;;  %v10423_v8 = vshll.u32 %v14109_v58, 16  ;;  %v10429_v60 = vshll.u32 %v14110_v56, 16 }
 0x6a7   :  { %15700 = vmatprep.subr.bf16.mxu1 %v16707_v38  ;;  %v10413_v4 = vrot.slane %v10412_v13, 4  ;;  %v10434_v18 = vshrl.u32 %v14111_v22, 16  ;;  %v10437_v61 = vshll.u32 %v14111_v22, 16  ;;  %v10443_v5 = vshll.u32 %v14112_v1, 16 }
 0x6a8   :  { %v22002_v35 = vsel %vm21969_vm5, %v10399_v44, %v10403_v43  ;;  %v10422_v16 = vrot.slane %v10420_v3, 4  ;;  %v10425_v24 = vrot.slane %v10423_v8, 5  ;;  %v10431_v11 = vrot.slane %v10429_v60, 5  ;;  %v10248_v3 = vld [vmem:[#allocation2 + $0x218] sm:$0x1f]  ;;  %v16725_v8 = vld [vmem:[#allocation3 + $0x308] sm:$0xff]  }
 0x6a9   :  { %v22006_v15 = vsel %vm21969_vm5, %v10413_v4, %v10417_v40  ;;  %v10436_v48 = vrot.slane %v10434_v18, 4  ;;  %v10439_v14 = vrot.slane %v10437_v61, 5  ;;  %v10445_v7 = vrot.slane %v10443_v5, 5 }
 0x6aa   :  { %15701 = vmatpush3.bf16.msra.mxu1 %v16707_v38  ;;  %v14131_v54 = vcombine.low %v22002_v35, %v22006_v15  ;;  %v10426_v53 = vor.u32 %v10425_v24, %v10422_v16  ;;  %v14115_v47 = vcombine.low %v10245_v34, %v10245_v34  ;;  %v14116_v52 = vcombine.high %v10245_v34, %v10245_v34  ;;  %v16720_v38 = vld [vmem:[#allocation3 + $0x300] sm:$0xff]   ;;  %v10249_v24 = vld [vmem:[#allocation2 + $0x230] sm:$0x1f] }
 0x6ab   :  { %15702 = vmatprep.subr.bf16.mxu1 %v16710_v31  ;;  %v10440_v51 = vor.u32 %v10439_v14, %v10436_v48  ;;  %v10448_v9 = vshrl.u32 %v14113_v46, 16  ;;  %v10451_v57 = vshll.u32 %v14113_v46, 16  ;;  %v10457_v25 = vshll.u32 %v14114_v23, 16  ;;  %v10250_v48 = vld [vmem:[#allocation2 + $0x248] sm:$0x1f]  ;;  %v16730_v23 = vld [vmem:[#allocation3 + $0x310] sm:$0xff]  }
 0x6ac   :  { %v10427_v32 = vrot.slane %v10426_v53, 4  ;;  %v14117_v59 = vcombine.low %v10246_v6, %v10246_v6  ;;  %v10462_v19 = vshrl.u32 %v14115_v47, 16  ;;  %v10465_v27 = vshll.u32 %v14115_v47, 16 }
 0x6ad   :  { %15687 = vmatmul.mubr.bf16.gmra.mrb[76].mxu1 %v21965_v28  ;;  %v10441_v37 = vrot.slane %v10440_v51, 4  ;;  %v10450_v21 = vrot.slane %v10448_v9, 4  ;;  %v10453_v63 = vrot.slane %v10451_v57, 5  ;;  %v10459_v10 = vrot.slane %v10457_v25, 5 }
 0x6ae   :  { %15703 = vmatpush3.bf16.msra.mxu1 %v16710_v31  ;;  %15706 = vmatprep.mubr.bf16.mxu1 %v14129_v30  ;;  %v22016_v0 = vsel %vm21969_vm5, %v10427_v32, %v10431_v11  ;;  %v10471_v12 = vshll.u32 %v14116_v52, 16  ;;  %v10464_v43 = vrot.slane %v10462_v19, 4  ;;  %v10467_v33 = vrot.slane %v10465_v27, 5  ;;  %v16735_v19 = vld [vmem:[#allocation3 + $0x318] sm:$0xff]  }
 0x6af   :  { %15704 = vmatprep.subr.bf16.mxu1 %v16715_v39  ;;  %v22020_v28 = vsel %vm21969_vm5, %v10441_v37, %v10445_v7  ;;  %v14118_v42 = vcombine.high %v10246_v6, %v10246_v6  ;;  %v10454_v62 = vor.u32 %v10453_v63, %v10450_v21  ;;  %v14119_v41 = vcombine.low %v10247_v20, %v10247_v20 }
 0x6b0   :  { %v14132_v55 = vcombine.low %v22016_v0, %v22020_v28  ;;  %v10473_v30 = vrot.slane %v10471_v12, 5  ;;  %v10468_v26 = vor.u32 %v10467_v33, %v10464_v43  ;;  %v14120_v40 = vcombine.high %v10247_v20, %v10247_v20 }
 0x6b1   :  { %v10476_v58 = vshrl.u32 %v14117_v59, 16  ;;  %v10479_v13 = vshll.u32 %v14117_v59, 16  ;;  %v10455_v56 = vrot.slane %v10454_v62, 4  ;;  %v10485_v22 = vshll.u32 %v14118_v42, 16  ;;  %v16740_v62 = vld [vmem:[#allocation3 + $0x320] sm:$0xff]  }
 0x6b2   :  { %15705 = vmatpush3.bf16.msra.mxu1 %v16715_v39  ;;  %v10490_v1 = vshrl.u32 %v14119_v41, 16  ;;  %v10493_v44 = vshll.u32 %v14119_v41, 16  ;;  %v10469_v46 = vrot.slane %v10468_v26, 4  ;;  %v10499_v60 = vshll.u32 %v14120_v40, 16 }
 0x6b3   :  { %15722 = vmatprep.subr.bf16.mxu1 %v16720_v38  ;;  %v10478_v31 = vrot.slane %v10476_v58, 4  ;;  %v10481_v4 = vrot.slane %v10479_v13, 5  ;;  %v10460_v18 = vsel %vm21969_vm5, %v10455_v56, %v10459_v10  ;;  %v10487_v61 = vrot.slane %v10485_v22, 5  ;;  %v16753_v42 = vld [vmem:[#allocation2 + $0x34] ss:$0 sps:$4 sm:$0x88]  }
 0x6b4   :  { %v10492_v35 = vrot.slane %v10490_v1, 4  ;;  %v10495_v16 = vrot.slane %v10493_v44, 5  ;;  %v10474_v5 = vsel %vm21969_vm5, %v10469_v46, %v10473_v30  ;;  %v10501_v15 = vrot.slane %v10499_v60, 5  ;;  %v22045_v58 = vld [vmem:[#allocation2 + $0x20] sm:$0xf] }
 0x6b5   :  { %15707 = vmatmul.mubr.bf16.vlgmr.msra.gmra.mrb[64].mxu1 %v14130_v17  ;;  %v10482_v34 = vor.u32 %v10481_v4, %v10478_v31  ;;  %v14121_v11 = vcombine.low %v10248_v3, %v10248_v3  ;;  %v14133_v14 = vcombine.low %v10460_v18, %v10474_v5  ;;  %v14122_v53 = vcombine.high %v10248_v3, %v10248_v3  ;;  %v22047_v44 = vld [vmem:[#allocation2 + $0x38] sm:$0xf]  ;;  %v16756_v5 = vld [vmem:[#allocation2 + $0x4c] ss:$0 sps:$4 sm:$0x88]  }
 0x6b6   :  { %15710 = vmatprep.mubr.bf16.mxu1 %v14131_v54  ;;  %15723 = vmatpush3.bf16.msra.mxu1 %v16720_v38  ;;  %v10496_v6 = vor.u32 %v10495_v16, %v10492_v35  ;;  %v22033_v7 = vrot.slane %v10898_v2, 11  ;;  %v14123_v49 = vcombine.low %v10249_v24, %v10249_v24  ;;  %v14124_v17 = vcombine.high %v10249_v24, %v10249_v24  ;;  %v22059_v24 = vld [vmem:[#allocation2 + $0x68] sm:$0xf] }
 0x6b7   :  { %15724 = vmatprep.subr.bf16.mxu1 %v16725_v8  ;;  %v10483_v29 = vrot.slane %v10482_v34, 4  ;;  %v10504_v39 = vshrl.u32 %v14121_v11, 16  ;;  %v10507_v47 = vshll.u32 %v14121_v11, 16  ;;  %v10513_v52 = vshll.u32 %v14122_v53, 16 }
 0x6b8   :  { %v10497_v51 = vrot.slane %v10496_v6, 4  ;;  %v14125_v9 = vcombine.low %v10250_v48, %v10250_v48  ;;  %v10518_v57 = vshrl.u32 %v14123_v49, 16  ;;  %v10521_v25 = vshll.u32 %v14123_v49, 16  ;;  %v16745_v6 = vld [vmem:[#allocation3 + $0x328] sm:$0xff]  }
 0x6b9   :  { %v22037_v54 = vsel %vm21969_vm5, %v10483_v29, %v10487_v61  ;;  %v10506_v32 = vrot.slane %v10504_v39, 4  ;;  %v10509_v59 = vrot.slane %v10507_v47, 5  ;;  %v10515_v37 = vrot.slane %v10513_v52, 5  ;;  %v16761_v52 = vld [vmem:[#allocation2 + $0x7c] ss:$0 sps:$4 sm:$0x88]  }
 0x6ba   :  { %15725 = vmatpush3.bf16.msra.mxu1 %v16725_v8  ;;  %v10502_v2 = vsel %vm21969_vm5, %v10497_v51, %v10501_v15  ;;  %v10527_v21 = vshll.u32 %v14124_v17, 16  ;;  %v10520_v20 = vrot.slane %v10518_v57, 4  ;;  %v10523_v63 = vrot.slane %v10521_v25, 5  ;;  %v22067_v25 = vld [vmem:[#allocation2 + $0x80] sm:$0xf] }
 0x6bb   :  { %15726 = vmatprep.subr.bf16.mxu1 %v16730_v23  ;;  %v14134_v27 = vcombine.low %v22037_v54, %v10502_v2  ;;  %v14126_v10 = vcombine.high %v10250_v48, %v10250_v48  ;;  %v10510_v12 = vor.u32 %v10509_v59, %v10506_v32  ;;  %v14127_v43 = vcombine.low %v10251_v50, %v10251_v50 }
 0x6bc   :  { %v10529_v38 = vrot.slane %v10527_v21, 5  ;;  %v14128_v33 = vcombine.high %v10251_v50, %v10251_v50  ;;  %v10524_v30 = vor.u32 %v10523_v63, %v10520_v20  ;;  %v10532_v41 = vshrl.u32 %v14125_v9, 16  ;;  %v22071_v21 = vld [vmem:[#allocation2 + $0x98] sm:$0xf] }
 0x6bd   :  { %15711 = vmatmul.mubr.bf16.gmra.mrb[68].mxu1 %v14132_v55  ;;  %v10535_v26 = vshll.u32 %v14125_v9, 16  ;;  %v10541_v40 = vshll.u32 %v14126_v10, 16  ;;  %v10511_v13 = vrot.slane %v10510_v12, 4  ;;  %v10546_v56 = vshrl.u32 %v14127_v43, 16  ;;  %v22049_v55 = vld [vmem:[#allocation2 + $0x50] sm:$0xf] }
 0x6be   :  { %15714 = vmatprep.mubr.bf16.mxu1 %v14133_v14  ;;  %15727 = vmatpush3.bf16.msra.mxu1 %v16730_v23  ;;  %v10549_v22 = vshll.u32 %v14127_v43, 16  ;;  %v10555_v1 = vshll.u32 %v14128_v33, 16  ;;  %v10525_v3 = vrot.slane %v10524_v30, 4  ;;  %v10534_v8 = vrot.slane %v10532_v41, 4 }
 0x6bf   :  { %15728 = vmatprep.subr.bf16.mxu1 %v16735_v19  ;;  %v10537_v0 = vrot.slane %v10535_v26, 5  ;;  %v10543_v28 = vrot.slane %v10541_v40, 5  ;;  %v10516_v46 = vsel %vm21969_vm5, %v10511_v13, %v10515_v37  ;;  %v10548_v31 = vrot.slane %v10546_v56, 4  ;;  %v16758_v14 = vld [vmem:[#allocation2 + $0x64] ss:$0 sps:$4 sm:$0x88]  }
 0x6c0   :  { %v10551_v4 = vrot.slane %v10549_v22, 5  ;;  %v10557_v60 = vrot.slane %v10555_v1, 5  ;;  %v10530_v18 = vsel %vm21969_vm5, %v10525_v3, %v10529_v38  ;;  %v14146_v35 = vcombine.low %v22045_v58, %v22045_v58  ;;  %v16763_v12 = vld [vmem:[#allocation2 + $0x94] ss:$0 sps:$4 sm:$0x88]   ;;  %v16755_v22 = vld [vmem:[#allocation3 + $0x338] sm:$0xff]  }
 0x6c1   :  { %v10538_v61 = vor.u32 %v10537_v0, %v10534_v8  ;;  %v14148_v16 = vcombine.low %v22047_v44, %v22047_v44  ;;  %v14135_v34 = vcombine.low %v10516_v46, %v10530_v18  ;;  %v10911_v11 = vshrl.u32 %v16753_v42, 16  ;;  %v16766_v40 = vld [vmem:[#allocation2 + $0xac] ss:$0 sps:$4 sm:$0x88]   ;;  %v22082_v0 = vld [vmem:[#allocation2 + $0xb0] sm:$0xf] }
 0x6c2   :  { %15729 = vmatpush3.bf16.msra.mxu1 %v16735_v19  ;;  %v10552_v15 = vor.u32 %v10551_v4, %v10548_v31  ;;  %v14150_v48 = vcombine.low %v22049_v55, %v22049_v55  ;;  %v10903_v23 = vshrl.u32 %v14146_v35, 16  ;;  %v10906_v29 = vshll.u32 %v14146_v35, 16  ;;  %v16768_v13 = vld [vmem:[#allocation2 + $0xc4] ss:$0 sps:$4 sm:$0x88]  }
 0x6c3   :  { %15730 = vmatprep.subr.bf16.mxu1 %v16740_v62  ;;  %v10539_v53 = vrot.slane %v10538_v61, 4  ;;  %v10916_v49 = vshrl.u32 %v14148_v16, 16  ;;  %v14178_v39 = vrot.slane %v10911_v11, 11  ;;  %v10919_v51 = vshll.u32 %v14148_v16, 16  ;;  %v22084_v4 = vld [vmem:[#allocation2 + $0xc8] sm:$0xf] }
 0x6c4   :  { %v10553_v17 = vrot.slane %v10552_v15, 4  ;;  %v14152_v47 = vcombine.low %v22059_v24, %v22059_v24  ;;  %v10905_v54 = vrot.slane %v10903_v23, 7  ;;  %v10924_v57 = vshrl.u32 %v16756_v5, 16  ;;  %v16771_v11 = vld [vmem:[#allocation2 + $0x1cc] ss:$0 sps:$4 sm:$0x88]  }
 0x6c5   :  { %15715 = vmatmul.mubr.bf16.gmra.mrb[72].mxu1 %v14134_v27  ;;  %v10544_v9 = vsel %vm21969_vm5, %v10539_v53, %v10543_v28  ;;  %v10918_v32 = vrot.slane %v10916_v49, 7  ;;  %v10929_v2 = vshrl.u32 %v14150_v48, 16  ;;  %v10932_v59 = vshll.u32 %v14150_v48, 16  ;;  %v16750_v27 = vld [vmem:[#allocation3 + $0x330] sm:$0xff]   ;;  %v16760_v49 = vld [vmem:[#allocation3 + $0x340] sm:$0xff]  }
 0x6c6   :  { %15718 = vmatprep.mubr.bf16.mxu1 %v14135_v34  ;;  %15731 = vmatpush3.bf16.msra.mxu1 %v16740_v62  ;;  %v10558_v50 = vsel %vm21969_vm5, %v10553_v17, %v10557_v60  ;;  %v10937_v37 = vshrl.u32 %v16758_v14, 16  ;;  %v10908_v20 = vor.u32 %v10906_v29, %v10905_v54  ;;  %v14179_v10 = vrot.slane %v10924_v57, 11  ;;  %v16773_v23 = vld [vmem:[#allocation2 + $0x1e4] ss:$0 sps:$4 sm:$0x88]  }
 0x6c7   :  { %15732 = vmatprep.subr.bf16.mxu1 %v16745_v6  ;;  %v14136_v19 = vcombine.low %v10544_v9, %v10558_v50  ;;  %v10921_v63 = vor.u32 %v10919_v51, %v10918_v32  ;;  %v10931_v38 = vrot.slane %v10929_v2, 7  ;;  %v10942_v33 = vshrl.u32 %v14152_v47, 16  ;;  %v22098_v50 = vld [vmem:[#allocation2 + $0x200] sm:$0xf] }
 0x6c8   :  { %v14180_v43 = vrot.slane %v10937_v37, 11  ;;  %v10945_v42 = vshll.u32 %v14152_v47, 16  ;;  %v10909_v62 = vsel %vm21859_vm3, %v22033_v7, %v10908_v20  ;;  %v14154_v41 = vcombine.low %v22067_v25, %v22067_v25  ;;  %v22094_v47 = vld [vmem:[#allocation2 + $0x1d0] sm:$0xf] }
 0x6c9   :  { %v10922_v30 = vsel %vm21859_vm3, %v14178_v39, %v10921_v63  ;;  %v14156_v26 = vcombine.low %v22071_v21, %v22071_v21  ;;  %v10934_v1 = vor.u32 %v10932_v59, %v10931_v38  ;;  %v10944_v3 = vrot.slane %v10942_v33, 7  ;;  %v16765_v38 = vld [vmem:[#allocation3 + $0x348] sm:$0xff]  }
 0x6ca   :  { %15733 = vmatpush3.bf16.msra.mxu1 %v16745_v6  ;;  %v14193_v56 = vcombine.low %v10909_v62, %v10922_v30  ;;  %v10950_v8 = vshrl.u32 %v16761_v52, 16  ;;  %v10955_v7 = vshrl.u32 %v14154_v41, 16  ;;  %v10958_v28 = vshll.u32 %v14154_v41, 16  ;;  %v22096_v52 = vld [vmem:[#allocation2 + $0x1e8] sm:$0xf] }
 0x6cb   :  { %15734 = vmatprep.subr.bf16.mxu1 %v16750_v27  ;;  %v10963_v46 = vshrl.u32 %v16763_v12, 16  ;;  %v10968_v31 = vshrl.u32 %v14156_v26, 16  ;;  %v10935_v60 = vsel %vm21859_vm3, %v14179_v10, %v10934_v1  ;;  %v10947_v18 = vor.u32 %v10945_v42, %v10944_v3  ;;  %v16776_v12 = vld [vmem:[#allocation2 + $0x1fc] ss:$0 sps:$4 sm:$0x88]  }
 0x6cc   :  { %v14181_v61 = vrot.slane %v10950_v8, 11  ;;  %v10971_v35 = vshll.u32 %v14156_v26, 16  ;;  %v10957_v16 = vrot.slane %v10955_v7, 7  ;;  %v14158_v15 = vcombine.low %v22082_v0, %v22082_v0  ;;  %v22108_v62 = vld [vmem:[#allocation2 + $0x218] sm:$0xf] }
 0x6cd   :  { %15719 = vmatmul.mubr.bf16.gmra.mrb[76].mxu1 %v14136_v19  ;;  %v14182_v5 = vrot.slane %v10963_v46, 11  ;;  %v10970_v34 = vrot.slane %v10968_v31, 7  ;;  %v10948_v48 = vsel %vm21859_vm3, %v14180_v43, %v10947_v18  ;;  %v14160_v14 = vcombine.low %v22084_v4, %v22084_v4  ;;  %v16781_v7 = vld [vmem:[#allocation2 + $0x22c] ss:$0 sps:$4 sm:$0x88]  }
 0x6ce   :  { %15735 = vmatpush3.bf16.msra.mxu1 %v16750_v27  ;;  %15738 = vmatprep.mubr.bf16.mxu1 %v14193_v56  ;;  %v10976_v6 = vshrl.u32 %v16766_v40, 16  ;;  %v10989_v53 = vshrl.u32 %v16768_v13, 16  ;;  %v14194_v29 = vcombine.low %v10935_v60, %v10948_v48  ;;  %v10960_v17 = vor.u32 %v10958_v28, %v10957_v16  ;;  %v16778_v56 = vld [vmem:[#allocation2 + $0x214] ss:$0 sps:$4 sm:$0x88]  }
 0x6cf   :  { %15736 = vmatprep.subr.bf16.mxu1 %v16755_v22  ;;  %v10973_v39 = vor.u32 %v10971_v35, %v10970_v34  ;;  %v10981_v51 = vshrl.u32 %v14158_v15, 16  ;;  %v10984_v54 = vshll.u32 %v14158_v15, 16  ;;  %v10994_v57 = vshrl.u32 %v14160_v14, 16  ;;  %v22118_v18 = vld [vmem:[#allocation2 + $0x230] sm:$0xf] }
 0x6d0   :  { %v14183_v9 = vrot.slane %v10976_v6, 11  ;;  %v14184_v32 = vrot.slane %v10989_v53, 11  ;;  %v10961_v2 = vsel %vm21859_vm3, %v14181_v61, %v10960_v17  ;;  %v10997_v19 = vshll.u32 %v14160_v14, 16  ;;  %v16770_v35 = vld [vmem:[#allocation3 + $0x350] sm:$0xff]   ;;  %v22120_v6 = vld [vmem:[#allocation2 + $0x248] sm:$0xf] }
 0x6d1   :  { %v10974_v59 = vsel %vm21859_vm3, %v14182_v5, %v10973_v39  ;;  %v10983_v37 = vrot.slane %v10981_v51, 7  ;;  %v10996_v20 = vrot.slane %v10994_v57, 7  ;;  %v14162_v63 = vcombine.low %v22094_v47, %v22094_v47  ;;  %v16783_v34 = vld [vmem:[#allocation2 + $0x244] ss:$0 sps:$4 sm:$0x88]   ;;  %v16775_v57 = vld [vmem:[#allocation3 + $0x358] sm:$0xff]  }
 0x6d2   :  { %15737 = vmatpush3.bf16.msra.mxu1 %v16755_v22  ;;  %v14195_v27 = vcombine.low %v10961_v2, %v10974_v59  ;;  %v14164_v10 = vcombine.low %v22096_v52, %v22096_v52  ;;  %v11002_v33 = vshrl.u32 %v16771_v11, 16  ;;  %v11015_v42 = vshrl.u32 %v16773_v23, 16 }
 0x6d3   :  { %15754 = vmatprep.subr.bf16.mxu1 %v16760_v49  ;;  %v10986_v43 = vor.u32 %v10984_v54, %v10983_v37  ;;  %v14166_v30 = vcombine.low %v22098_v50, %v22098_v50  ;;  %v10999_v41 = vor.u32 %v10997_v19, %v10996_v20  ;;  %v11007_v26 = vshrl.u32 %v14162_v63, 16  ;;  %v22128_v54 = vld [vmem:[#allocation2 + $0x278] sm:$0xf] }
 0x6d4   :  { %v11010_v40 = vshll.u32 %v14162_v63, 16  ;;  %v11020_v13 = vshrl.u32 %v14164_v10, 16  ;;  %v14185_v1 = vrot.slane %v11002_v33, 11  ;;  %v14186_v3 = vrot.slane %v11015_v42, 11 }
 0x6d5   :  { %15739 = vmatmul.mubr.bf16.vlgmr.msra.gmra.mrb[64].mxu1 %v14194_v29  ;;  %v10987_v22 = vsel %vm21859_vm3, %v14183_v9, %v10986_v43  ;;  %v11023_v8 = vshll.u32 %v14164_v10, 16  ;;  %v11000_v28 = vsel %vm21859_vm3, %v14184_v32, %v10999_v41  ;;  %v11009_v46 = vrot.slane %v11007_v26, 7  ;;  %v16786_v32 = vld [vmem:[#allocation2 + $0x25c] ss:$0 sps:$4 sm:$0x88]  }
 0x6d6   :  { %15742 = vmatprep.mubr.bf16.mxu1 %v14195_v27  ;;  %15755 = vmatpush3.bf16.msra.mxu1 %v16760_v49  ;;  %v11022_v31 = vrot.slane %v11020_v13, 7  ;;  %v14168_v60 = vcombine.low %v22108_v62, %v22108_v62  ;;  %v14196_v61 = vcombine.low %v10987_v22, %v11000_v28  ;;  %v11028_v16 = vshrl.u32 %v16776_v12, 16  ;;  %v22132_v27 = vld [vmem:[#allocation2 + $0x260] sm:$0xf] }
 0x6d7   :  { %15756 = vmatprep.subr.bf16.mxu1 %v16765_v38  ;;  %v11033_v5 = vshrl.u32 %v14166_v30, 16  ;;  %v11012_v15 = vor.u32 %v11010_v40, %v11009_v46  ;;  %v11041_v48 = vshrl.u32 %v16778_v56, 16  ;;  %v11036_v29 = vshll.u32 %v14166_v30, 16  ;;  %v16780_v56 = vld [vmem:[#allocation3 + $0x360] sm:$0xff]  }
 0x6d8   :  { %v11025_v11 = vor.u32 %v11023_v8, %v11022_v31  ;;  %v11046_v14 = vshrl.u32 %v14168_v60, 16  ;;  %v14187_v53 = vrot.slane %v11028_v16, 11  ;;  %v14170_v49 = vcombine.low %v22118_v18, %v22118_v18 }
 0x6d9   :  { %v11035_v23 = vrot.slane %v11033_v5, 7  ;;  %v11013_v17 = vsel %vm21859_vm3, %v14185_v1, %v11012_v15  ;;  %v11049_v9 = vshll.u32 %v14168_v60, 16  ;;  %v14188_v59 = vrot.slane %v11041_v48, 11  ;;  %v16785_v15 = vld [vmem:[#allocation3 + $0x368] sm:$0xff]  }
 0x6da   :  { %15757 = vmatpush3.bf16.msra.mxu1 %v16765_v38  ;;  %v11026_v39 = vsel %vm21859_vm3, %v14186_v3, %v11025_v11  ;;  %v11048_v51 = vrot.slane %v11046_v14, 7  ;;  %v14172_v37 = vcombine.low %v22120_v6, %v22120_v6  ;;  %v11054_v19 = vshrl.u32 %v16781_v7, 16  ;;  %v16788_v38 = vld [vmem:[#allocation2 + $0x274] ss:$0 sps:$4 sm:$0x88]  }
 0x6db   :  { %15758 = vmatprep.subr.bf16.mxu1 %v16770_v35  ;;  %v11038_v2 = vor.u32 %v11036_v29, %v11035_v23  ;;  %v14197_v20 = vcombine.low %v11013_v17, %v11026_v39  ;;  %v11059_v10 = vshrl.u32 %v14170_v49, 16  ;;  %v11067_v12 = vshrl.u32 %v16783_v34, 16  ;;  %v11510_v39 = vld [vmem:[#allocation2 + $0x38] sm:$0x1f] }
 0x6dc   :  { %v11051_v63 = vor.u32 %v11049_v9, %v11048_v51  ;;  %v11062_v33 = vshll.u32 %v14170_v49, 16  ;;  %v11072_v42 = vshrl.u32 %v14172_v37, 16  ;;  %v14189_v30 = vrot.slane %v11054_v19, 11  ;;  %v11509_v49 = vld [vmem:[#allocation2 + $0x20] sm:$0x1f]  ;;  %v16790_v51 = vld [vmem:[#allocation3 + $0x370] sm:$0xff]  }
 0x6dd   :  { %15743 = vmatmul.mubr.bf16.gmra.mrb[68].mxu1 %v14196_v61  ;;  %v11039_v43 = vsel %vm21859_vm3, %v14187_v53, %v11038_v2  ;;  %v11061_v41 = vrot.slane %v11059_v10, 7  ;;  %v11075_v26 = vshll.u32 %v14172_v37, 16  ;;  %v14174_v40 = vcombine.low %v22132_v27, %v22132_v27  ;;  %v16792_v19 = vld [vmem:[#allocation3 + $0x378] sm:$0xff]  }
 0x6de   :  { %15746 = vmatprep.mubr.bf16.mxu1 %v14197_v20  ;;  %15759 = vmatpush3.bf16.msra.mxu1 %v16770_v35  ;;  %v11052_v13 = vsel %vm21859_vm3, %v14188_v59, %v11051_v63  ;;  %v14190_v22 = vrot.slane %v11067_v12, 11  ;;  %v11074_v1 = vrot.slane %v11072_v42, 7  ;;  %v14176_v3 = vcombine.low %v22128_v54, %v22128_v54  ;;  %v22150_v59 = vld [vmem:[#allocation2 + $0x50] sm:$0x1f]  ;;  %v16794_v42 = vld [vmem:[#allocation3 + $0x380] sm:$0xff]  }
 0x6df   :  { %15760 = vmatprep.subr.bf16.mxu1 %v16775_v57  ;;  %v11064_v8 = vor.u32 %v11062_v33, %v11061_v41  ;;  %v11080_v7 = vshrl.u32 %v16786_v32, 16  ;;  %v11085_v28 = vshrl.u32 %v14174_v40, 16  ;;  %v11093_v46 = vshrl.u32 %v16788_v38, 16 }
 0x6e0   :  { %v11077_v31 = vor.u32 %v11075_v26, %v11074_v1  ;;  %v11098_v60 = vshrl.u32 %v14176_v3, 16  ;;  %v11088_v16 = vshll.u32 %v14174_v40, 16  ;;  %v14198_v5 = vcombine.low %v11039_v43, %v11052_v13  ;;  %v22154_v43 = vld [vmem:[#allocation2 + $0x68] sm:$0x1f]  ;;  %v22160_v1 = vld [vmem:[#allocation2 + $0x80] sm:$0x1f] }
 0x6e1   :  { %v11065_v61 = vsel %vm21859_vm3, %v14189_v30, %v11064_v8  ;;  %v11087_v35 = vrot.slane %v11085_v28, 7  ;;  %v11101_v48 = vshll.u32 %v14176_v3, 16  ;;  %v14191_v53 = vrot.slane %v11080_v7, 11  ;;  %v16796_v7 = vld [vmem:[#allocation3 + $0x388] sm:$0xff]  }
 0x6e2   :  { %15761 = vmatpush3.bf16.msra.mxu1 %v16775_v57  ;;  %v11078_v34 = vsel %vm21859_vm3, %v14190_v22, %v11077_v31  ;;  %v11100_v11 = vrot.slane %v11098_v60, 7  ;;  %v14192_v29 = vrot.slane %v11093_v46, 11  ;;  %v14225_v9 = vcombine.low %v11509_v49, %v11509_v49  ;;  %v22168_v46 = vld [vmem:[#allocation2 + $0x98] sm:$0x1f] }
 0x6e3   :  { %15762 = vmatprep.subr.bf16.mxu1 %v16780_v56  ;;  %v14199_v14 = vcombine.low %v11065_v61, %v11078_v34  ;;  %v11090_v23 = vor.u32 %v11088_v16, %v11087_v35  ;;  %v14227_v2 = vcombine.low %v11510_v39, %v11510_v39  ;;  %v14209_v63 = vcombine.low %v22045_v58, %v22047_v44 }
 0x6e4   :  { %v11103_v17 = vor.u32 %v11101_v48, %v11100_v11  ;;  %v11606_v20 = vshrl.u32 %v14225_v9, 16  ;;  %v11609_v10 = vshll.u32 %v14225_v9, 16  ;;  %v14229_v33 = vcombine.low %v22150_v59, %v22150_v59 }
 0x6e5   :  { %15747 = vmatmul.mubr.bf16.gmra.mrb[72].mxu1 %v14198_v5  ;;  %v11091_v32 = vsel %vm21859_vm3, %v14191_v53, %v11090_v23  ;;  %v11620_v12 = vshrl.u32 %v14227_v2, 16  ;;  %v11623_v38 = vshll.u32 %v14227_v2, 16  ;;  %v14231_v58 = vcombine.low %v22154_v43, %v22154_v43 }
 0x6e6   :  { %15750 = vmatprep.mubr.bf16.mxu1 %v14199_v14  ;;  %15763 = vmatpush3.bf16.msra.mxu1 %v16780_v56  ;;  %v11104_v57 = vsel %vm21859_vm3, %v14192_v29, %v11103_v17  ;;  %v11608_v30 = vrot.slane %v11606_v20, 4  ;;  %v11611_v41 = vrot.slane %v11609_v10, 5  ;;  %v14226_v44 = vcombine.high %v11509_v49, %v11509_v49  ;;  %v22188_v14 = vld [vmem:[#allocation2 + $0x34] ss:$0 sps:$4 sm:$0x88]  }
 0x6e7   :  { %15764 = vmatprep.subr.bf16.mxu1 %v16785_v15  ;;  %v14200_v37 = vcombine.low %v11091_v32, %v11104_v57  ;;  %v11622_v26 = vrot.slane %v11620_v12, 4  ;;  %v11625_v40 = vrot.slane %v11623_v38, 5  ;;  %v11634_v13 = vshrl.u32 %v14229_v33, 16  ;;  %v22190_v17 = vld [vmem:[#allocation2 + $0xc8] sm:$0x1f] }
 0x6e8   :  { %v11637_v56 = vshll.u32 %v14229_v33, 16  ;;  %v14228_v22 = vcombine.high %v11510_v39, %v11510_v39  ;;  %v14210_v3 = vcombine.low %v22049_v55, %v22059_v24  ;;  %v14211_v8 = vcombine.low %v22067_v25, %v22071_v21 }
 0x6e9   :  { %v14212_v28 = vcombine.low %v22082_v0, %v22084_v4  ;;  %v11612_v31 = vor.u32 %v11611_v41, %v11608_v30  ;;  %v11626_v60 = vor.u32 %v11625_v40, %v11622_v26  ;;  %v11648_v61 = vshrl.u32 %v14231_v58, 16  ;;  %v16798_v4 = vld [vmem:[#allocation3 + $0x390] sm:$0xff]  }
 0x6ea   :  { %15765 = vmatpush3.bf16.msra.mxu1 %v16785_v15  ;;  %v11651_v35 = vshll.u32 %v14231_v58, 16  ;;  %v11615_v16 = vshll.u32 %v14226_v44, 16  ;;  %v11636_v5 = vrot.slane %v11634_v13, 4  ;;  %v11639_v34 = vrot.slane %v11637_v56, 5  ;;  %v22207_v30 = vld [vmem:[#allocation2 + $0x1d0] sm:$0x1f] }
 0x6eb   :  { %15766 = vmatprep.subr.bf16.mxu1 %v16790_v51  ;;  %v14233_v55 = vcombine.low %v22160_v1, %v22160_v1  ;;  %v14213_v24 = vcombine.low %v22094_v47, %v22096_v52  ;;  %v14214_v25 = vcombine.low %v22098_v50, %v22108_v62  ;;  %v11629_v21 = vshll.u32 %v14228_v22, 16  ;;  %v22186_v52 = vld [vmem:[#allocation2 + $0xb0] sm:$0x1f]  ;;  %v22211_v44 = vld [vmem:[#allocation2 + $0x1e8] sm:$0x1f] }
 0x6ec   :  { %v14235_v0 = vcombine.low %v22168_v46, %v22168_v46  ;;  %v14215_v15 = vcombine.low %v22118_v18, %v22120_v6  ;;  %v14216_v11 = vcombine.low %v22132_v27, %v22128_v54  ;;  %v14230_v48 = vcombine.high %v22150_v59, %v22150_v59  ;;  %v22248_v50 = vld [vmem:[#allocation2 + $0x230] sm:$0x1f] }
 0x6ed   :  { %15751 = vmatmul.mubr.bf16.gmra.mrb[76].mxu1 %v14200_v37  ;;  %v14232_v47 = vcombine.high %v22154_v43, %v22154_v43  ;;  %v11613_v53 = vrot.slane %v11612_v31, 4  ;;  %v11627_v23 = vrot.slane %v11626_v60, 4  ;;  %v11650_v29 = vrot.slane %v11648_v61, 4  ;;  %v16806_v62 = vld [vmem:[#allocation3 + $0x3b0] sm:$0xff]  }
 0x6ee   :  { %15767 = vmatpush3.bf16.msra.mxu1 %v16790_v51  ;;  %15770 = vmatprep.mubr.bf16.mxu1 %v14209_v63  ;;  %v11653_v49 = vrot.slane %v11651_v35, 5  ;;  %v11617_v39 = vrot.slane %v11615_v16, 5  ;;  %v11640_v51 = vor.u32 %v11639_v34, %v11636_v5  ;;  %v11662_v9 = vshrl.u32 %v14233_v55, 16 }
 0x6ef   :  { %15768 = vmatprep.subr.bf16.mxu1 %v16792_v19  ;;  %v11665_v32 = vshll.u32 %v14233_v55, 16  ;;  %v11631_v57 = vrot.slane %v11629_v21, 5  ;;  %v11676_v2 = vshrl.u32 %v14235_v0, 16  ;;  %v11679_v59 = vshll.u32 %v14235_v0, 16 }
 0x6f0   :  { %v14237_v37 = vcombine.low %v22186_v52, %v22186_v52  ;;  %v11643_v20 = vshll.u32 %v14230_v48, 16  ;;  %v11657_v63 = vshll.u32 %v14232_v47, 16  ;;  %v14239_v10 = vcombine.low %v22190_v17, %v22190_v17  ;;  %v22229_v47 = vld [vmem:[#allocation2 + $0x218] sm:$0x1f] }
 0x6f1   :  { %v12168_v12 = vshrl.u32 %v22188_v14, 16  ;;  %v22199_v38 = vsel %vm21969_vm5, %v11613_v53, %v11617_v39  ;;  %v22203_v43 = vsel %vm21969_vm5, %v11627_v23, %v11631_v57  ;;  %v11654_v33 = vor.u32 %v11653_v49, %v11650_v29  ;;  %v16804_v53 = vld [vmem:[#allocation3 + $0x3a8] sm:$0xff]  }
 0x6f2   :  { %15769 = vmatpush3.bf16.msra.mxu1 %v16792_v19  ;;  %v16800_v19 = vld [vmem:[#allocation3 + $0x398] sm:$0xff]   ;;  %v11641_v41 = vrot.slane %v11640_v51, 4  ;;  %v14236_v26 = vcombine.high %v22168_v46, %v22168_v46  ;;  %v11664_v40 = vrot.slane %v11662_v9, 4  ;;  %v11667_v58 = vrot.slane %v11665_v32, 5 }
 0x6f3   :  { %15786 = vmatprep.subr.bf16.mxu1 %v16794_v42  ;;  %v11678_v13 = vrot.slane %v11676_v2, 4  ;;  %v11681_v56 = vrot.slane %v11679_v59, 5  ;;  %v11690_v22 = vshrl.u32 %v14237_v37, 16  ;;  %v11707_v31 = vshll.u32 %v14239_v10, 16 }
 0x6f4   :  { %v14257_v46 = vcombine.low %v22199_v38, %v22203_v43  ;;  %v11655_v60 = vrot.slane %v11654_v33, 4  ;;  %v11659_v61 = vrot.slane %v11657_v63, 5  ;;  %v14243_v35 = vcombine.low %v22211_v44, %v22211_v44 }
 0x6f5   :  { %15771 = vmatmul.mubr.bf16.vlgmr.msra.gmra.mrb[64].mxu1 %v14210_v3  ;;  %v11693_v3 = vshll.u32 %v14237_v37, 16  ;;  %v11668_v5 = vor.u32 %v11667_v58, %v11664_v40  ;;  %v22223_v55 = vshll.u32 %v14236_v26, 16  ;;  %v11682_v21 = vor.u32 %v11681_v56, %v11678_v13  ;;  %v22252_v26 = vld [vmem:[#allocation2 + $0x248] sm:$0x1f] }
 0x6f6   :  { %15774 = vmatprep.mubr.bf16.mxu1 %v14211_v8  ;;  %15787 = vmatpush3.bf16.msra.mxu1 %v16794_v42  ;;  %v14234_v42 = vcombine.high %v22160_v1, %v22160_v1  ;;  %v16802_v8 = vld [vmem:[#allocation3 + $0x3a0] sm:$0xff]   ;;  %v11645_v1 = vrot.slane %v11643_v20, 5  ;;  %v14238_v0 = vcombine.high %v22186_v52, %v22186_v52  ;;  %v11709_v29 = vrot.slane %v11707_v31, 5 }
 0x6f7   :  { %15788 = vmatprep.subr.bf16.mxu1 %v16796_v7  ;;  %v11695_v48 = vrot.slane %v11693_v3, 5  ;;  %v22233_v51 = vsel %vm21969_vm5, %v11655_v60, %v11659_v61  ;;  %v11732_v9 = vshrl.u32 %v14243_v35, 16  ;;  %v11735_v32 = vshll.u32 %v14243_v35, 16 }
 0x6f8   :  { %v22221_v16 = vsel %vm21969_vm5, %v11641_v41, %v11645_v1  ;;  %v11671_v34 = vshll.u32 %v14234_v42, 16  ;;  %v11669_v52 = vrot.slane %v11668_v5, 4  ;;  %v11687_v59 = vrot.slane %v22223_v55, 5  ;;  %v16811_v1 = vld [vmem:[#allocation3 + $0x3b8] sm:$0xff]  }
 0x6f9   :  { %v14247_v37 = vcombine.low %v22229_v47, %v22229_v47  ;;  %v14240_v20 = vcombine.high %v22190_v17, %v22190_v17  ;;  %v14242_v33 = vcombine.high %v22207_v30, %v22207_v30  ;;  %v11734_v18 = vrot.slane %v11732_v9, 4 }
 0x6fa   :  { %15789 = vmatpush3.bf16.msra.mxu1 %v16796_v7  ;;  %v11704_v7 = vshrl.u32 %v14239_v10, 16  ;;  %v11673_v2 = vrot.slane %v11671_v34, 5  ;;  %v11699_v10 = vshll.u32 %v14238_v0, 16  ;;  %v11737_v6 = vrot.slane %v11735_v32, 5 }
 0x6fb   :  { %15790 = vmatprep.subr.bf16.mxu1 %v16798_v4  ;;  %v11760_v58 = vshrl.u32 %v14247_v37, 16  ;;  %v11763_v13 = vshll.u32 %v14247_v37, 16  ;;  %v14249_v56 = vcombine.low %v22248_v50, %v22248_v50  ;;  %v14244_v3 = vcombine.high %v22211_v44, %v22211_v44 }
 0x6fc   :  { %v11706_v23 = vrot.slane %v11704_v7, 4  ;;  %v22256_v17 = vsel %vm21969_vm5, %v11669_v52, %v11673_v2  ;;  %v11738_v35 = vor.u32 %v11737_v6, %v11734_v18  ;;  %v14250_v18 = vcombine.high %v22248_v50, %v22248_v50  ;;  %v22301_v6 = vld [vmem:[#allocation2 + $0x38] sm:$0xf]  ;;  %v22309_v50 = vld [vmem:[#allocation2 + $0x68] sm:$0xf] }
 0x6fd   :  { %15775 = vmatmul.mubr.bf16.gmra.mrb[68].mxu1 %v14212_v28  ;;  %v14241_v28 = vcombine.low %v22207_v30, %v22207_v30  ;;  %v11713_v30 = vshll.u32 %v14240_v20, 16  ;;  %v11762_v44 = vrot.slane %v11760_v58, 4  ;;  %v11765_v55 = vrot.slane %v11763_v13, 5 }
 0x6fe   :  { %15778 = vmatprep.mubr.bf16.mxu1 %v14213_v24  ;;  %15791 = vmatpush3.bf16.msra.mxu1 %v16798_v4  ;;  %v22225_v24 = vld [vmem:[#allocation2 + $0x200] sm:$0x1f]  ;;  %v11692_v4 = vrot.slane %v11690_v22, 4  ;;  %v11701_v22 = vrot.slane %v11699_v10, 5  ;;  %v11777_v0 = vshll.u32 %v14249_v56, 16  ;;  %v11739_v9 = vrot.slane %v11738_v35, 4 }
 0x6ff   :  { %15792 = vmatprep.subr.bf16.mxu1 %v16800_v19  ;;  %v11718_v49 = vshrl.u32 %v14241_v28, 16  ;;  %v11721_v39 = vshll.u32 %v14241_v28, 16  ;;  %v14245_v57 = vcombine.low %v22225_v24, %v22225_v24  ;;  %v11727_v28 = vshll.u32 %v14242_v33, 16  ;;  %v16821_v10 = vld [vmem:[#allocation3 + $0x3c8] sm:$0xff]  }
 0x700   :  { %v11696_v63 = vor.u32 %v11695_v48, %v11692_v4  ;;  %v14246_v60 = vcombine.high %v22225_v24, %v22225_v24  ;;  %v11715_v4 = vrot.slane %v11713_v30, 5  ;;  %v14248_v24 = vcombine.high %v22229_v47, %v22229_v47  ;;  %v16826_v30 = vld [vmem:[#allocation3 + $0x3d0] sm:$0xff]  }
 0x701   :  { %v11720_v42 = vrot.slane %v11718_v49, 4  ;;  %v11723_v41 = vrot.slane %v11721_v39, 5  ;;  %v11749_v40 = vshll.u32 %v14245_v57, 16  ;;  %v22280_v49 = vld [vmem:[#allocation2 + $0x260] sm:$0x1f]  ;;  %v11766_v32 = vor.u32 %v11765_v55, %v11762_v44 }
 0x702   :  { %15793 = vmatpush3.bf16.msra.mxu1 %v16800_v19  ;;  %v11683_v19 = vrot.slane %v11682_v21, 4  ;;  %v11697_v7 = vrot.slane %v11696_v63, 4  ;;  %v11774_v21 = vshrl.u32 %v14249_v56, 16  ;;  %v11755_v47 = vshll.u32 %v14246_v60, 16  ;;  %v22286_v39 = vld [vmem:[#allocation2 + $0x278] sm:$0x1f] }
 0x703   :  { %15794 = vmatprep.subr.bf16.mxu1 %v16802_v8  ;;  %v11724_v61 = vor.u32 %v11723_v41, %v11720_v42  ;;  %v11751_v34 = vrot.slane %v11749_v40, 5  ;;  %v11779_v52 = vrot.slane %v11777_v0, 5  ;;  %v11769_v2 = vshll.u32 %v14248_v24, 16 }
 0x704   :  { %v11688_v54 = vsel %vm21969_vm5, %v11683_v19, %v11687_v59  ;;  %v22278_v27 = vsel %vm21969_vm5, %v11697_v7, %v11701_v22  ;;  %v14253_v19 = vcombine.low %v22280_v49, %v22280_v49  ;;  %v14258_v20 = vcombine.low %v22221_v16, %v22233_v51  ;;  %v22315_v7 = vld [vmem:[#allocation2 + $0x80] sm:$0xf] }
 0x705   :  { %15779 = vmatmul.mubr.bf16.gmra.mrb[72].mxu1 %v14214_v25  ;;  %v11710_v25 = vor.u32 %v11709_v29, %v11706_v23  ;;  %v16816_v23 = vld [vmem:[#allocation3 + $0x3c0] sm:$0xff]   ;;  %v11741_v29 = vshll.u32 %v14244_v3, 16  ;;  %v11725_v43 = vrot.slane %v11724_v61, 4  ;;  %v14259_v63 = vcombine.low %v22256_v17, %v11688_v54  ;;  %v22305_v17 = vld [vmem:[#allocation2 + $0x50] sm:$0xf] }
 0x706   :  { %15782 = vmatprep.mubr.bf16.mxu1 %v14215_v15  ;;  %15795 = vmatpush3.bf16.msra.mxu1 %v16802_v8  ;;  %v11746_v15 = vshrl.u32 %v14245_v57, 16  ;;  %v14251_v8 = vcombine.low %v22252_v26, %v22252_v26  ;;  %v11776_v57 = vrot.slane %v11774_v21, 4  ;;  %v11757_v16 = vrot.slane %v11755_v47, 5 }
 0x707   :  { %15796 = vmatprep.subr.bf16.mxu1 %v16804_v53  ;;  %v11711_v31 = vrot.slane %v11710_v25, 4  ;;  %v14255_v25 = vcombine.low %v22286_v39, %v22286_v39  ;;  %v11743_v42 = vrot.slane %v11741_v29, 5  ;;  %v11767_v51 = vrot.slane %v11766_v32, 4  ;;  %v22348_v32 = vld [vmem:[#allocation2 + $0x98] sm:$0xf] }
 0x708   :  { %v11748_v5 = vrot.slane %v11746_v15, 4  ;;  %v11788_v48 = vshrl.u32 %v14251_v8, 16  ;;  %v14252_v15 = vcombine.high %v22252_v26, %v22252_v26  ;;  %v11780_v40 = vor.u32 %v11779_v52, %v11776_v57 }
 0x709   :  { %v22284_v38 = vsel %vm21969_vm5, %v11711_v31, %v11715_v4  ;;  %v11744_v58 = vsel %vm21969_vm5, %v11739_v9, %v11743_v42  ;;  %v11771_v13 = vrot.slane %v11769_v2, 5  ;;  %v11802_v22 = vshrl.u32 %v14253_v19, 16  ;;  %v16849_v4 = vld [vmem:[#allocation2 + $0x4c] ss:$0 sps:$4 sm:$0x88]  }
 0x70a   :  { %15797 = vmatpush3.bf16.msra.mxu1 %v16804_v53  ;;  %v11791_v53 = vshll.u32 %v14251_v8, 16  ;;  %v11790_v59 = vrot.slane %v11788_v48, 4  ;;  %v11805_v3 = vshll.u32 %v14253_v19, 16  ;;  %v11816_v8 = vshrl.u32 %v14255_v25, 16  ;;  %v16831_v48 = vld [vmem:[#allocation3 + $0x3d8] sm:$0xff]   ;;  %v16836_v19 = vld [vmem:[#allocation3 + $0x3e0] sm:$0xff]  }
 0x70b   :  { %15798 = vmatprep.subr.bf16.mxu1 %v16806_v62  ;;  %v22313_v26 = vcombine.low %v22301_v6, %v22301_v6  ;;  %v14254_v60 = vcombine.high %v22280_v49, %v22280_v49  ;;  %v22325_v61 = vcombine.low %v22305_v17, %v22305_v17  ;;  %v22329_v35 = vsel %vm21969_vm5, %v11767_v51, %v11771_v13  ;;  %v22371_v51 = vld [vmem:[#allocation2 + $0xc8] sm:$0xf] }
 0x70c   :  { %v11793_v37 = vrot.slane %v11791_v53, 5  ;;  %v22333_v44 = vcombine.low %v22309_v50, %v22309_v50  ;;  %v14256_v21 = vcombine.high %v22286_v39, %v22286_v39  ;;  %v11804_v0 = vrot.slane %v11802_v22, 4  ;;  %v16841_v22 = vld [vmem:[#allocation3 + $0x3e8] sm:$0xff]  }
 0x70d   :  { %15783 = vmatmul.mubr.bf16.gmra.mrb[76].mxu1 %v14216_v11  ;;  %v11729_v11 = vrot.slane %v11727_v28, 5  ;;  %v11783_v28 = vshll.u32 %v14250_v18, 16  ;;  %v22339_v24 = vcombine.low %v22315_v7, %v22315_v7  ;;  %v11807_v53 = vrot.slane %v11805_v3, 5 }
 0x70e   :  { %15799 = vmatpush3.bf16.msra.mxu1 %v16806_v62  ;;  %15802 = vmatprep.mubr.bf16.mxu1 %v14257_v46  ;;  %v11752_v46 = vor.u32 %v11751_v34, %v11748_v5  ;;  %v14260_v62 = vcombine.low %v22278_v27, %v22284_v38  ;;  %v11794_v56 = vor.u32 %v11793_v37, %v11790_v59  ;;  %v11781_v5 = vrot.slane %v11780_v40, 4  ;;  %v22357_v37 = vld [vmem:[#allocation2 + $0xb0] sm:$0xf] }
 0x70f   :  { %15800 = vmatprep.subr.bf16.mxu1 %v16811_v1  ;;  %v11730_v33 = vsel %vm21969_vm5, %v11725_v43, %v11729_v11  ;;  %v11797_v34 = vshll.u32 %v14252_v15, 16  ;;  %v12173_v27 = vshrl.u32 %v22313_v26, 16  ;;  %v16852_v11 = vld [vmem:[#allocation2 + $0x64] ss:$0 sps:$4 sm:$0x88]   ;;  %v11785_v49 = vrot.slane %v11783_v28, 5 }
 0x710   :  { %v11753_v41 = vrot.slane %v11752_v46, 4  ;;  %v11795_v55 = vrot.slane %v11794_v56, 4  ;;  %v14261_v29 = vcombine.low %v11730_v33, %v11744_v58  ;;  %v22342_v38 = vshll.u32 %v14254_v60, 16  ;;  %v16854_v46 = vld [vmem:[#allocation2 + $0x7c] ss:$0 sps:$4 sm:$0x88]  }
 0x711   :  { %v12186_v43 = vshrl.u32 %v22325_v61, 16  ;;  %v11799_v39 = vrot.slane %v11797_v34, 5  ;;  %v12199_v9 = vshrl.u32 %v22333_v44, 16  ;;  %v11786_v57 = vsel %vm21969_vm5, %v11781_v5, %v11785_v49  ;;  %v16857_v56 = vld [vmem:[#allocation2 + $0x94] ss:$0 sps:$4 sm:$0x88]  }
 0x712   :  { %15801 = vmatpush3.bf16.msra.mxu1 %v16811_v1  ;;  %v11819_v1 = vshll.u32 %v14255_v25, 16  ;;  %v22319_v31 = vsel %vm21969_vm5, %v11753_v41, %v11757_v16  ;;  %v11825_v52 = vshll.u32 %v14256_v21, 16  ;;  %v22354_v2 = vrot.slane %v12168_v12, 11 }
 0x713   :  { %15818 = vmatprep.subr.bf16.mxu1 %v16816_v23  ;;  %v14262_v47 = vcombine.low %v22319_v31, %v22329_v35  ;;  %v12212_v59 = vshrl.u32 %v22339_v24, 16  ;;  %v11813_v25 = vrot.slane %v22342_v38, 5  ;;  %v12181_v33 = vshrl.u32 %v16849_v4, 16  ;;  %v22375_v31 = vld [vmem:[#allocation2 + $0xe0] sm:$0xf] }
 0x714   :  { %v11821_v54 = vrot.slane %v11819_v1, 5  ;;  %v12188_v42 = vrot.slane %v12186_v43, 7  ;;  %v22364_v14 = vcombine.low %v22348_v32, %v22348_v32  ;;  %v12176_v12 = vshll.u32 %v22313_v26, 16  ;;  %v16859_v26 = vld [vmem:[#allocation2 + $0xac] ss:$0 sps:$4 sm:$0x88]  }
 0x715   :  { %15803 = vmatmul.mubr.bf16.vlgmr.msra.gmra.mrb[64].mxu1 %v14258_v20  ;;  %v11800_v20 = vsel %vm21969_vm5, %v11795_v55, %v11799_v39  ;;  %v12194_v41 = vshrl.u32 %v16852_v11, 16  ;;  %v12201_v18 = vrot.slane %v12199_v9, 7  ;;  %v22369_v16 = vcombine.low %v22357_v37, %v22357_v37  ;;  %v22382_v4 = vld [vmem:[#allocation2 + $0x200] sm:$0xf] }
 0x716   :  { %15806 = vmatprep.mubr.bf16.mxu1 %v14259_v63  ;;  %15819 = vmatpush3.bf16.msra.mxu1 %v16816_v23  ;;  %v11818_v23 = vrot.slane %v11816_v8, 4  ;;  %v11808_v63 = vor.u32 %v11807_v53, %v11804_v0  ;;  %v14263_v15 = vcombine.low %v11786_v57, %v11800_v20  ;;  %v12189_v40 = vshll.u32 %v22325_v61, 16  ;;  %v22379_v61 = vld [vmem:[#allocation2 + $0x1e8] sm:$0xf] }
 0x717   :  { %15820 = vmatprep.subr.bf16.mxu1 %v16821_v10  ;;  %v12207_v58 = vshrl.u32 %v16854_v46, 16  ;;  %v12214_v13 = vrot.slane %v12212_v59, 7  ;;  %v12202_v1 = vshll.u32 %v22333_v44, 16  ;;  %v14306_v28 = vrot.slane %v12181_v33, 11  ;;  %v16851_v33 = vld [vmem:[#allocation3 + $0x3f8] sm:$0xff]  }
 0x718   :  { %v12191_v60 = vor.u32 %v12189_v40, %v12188_v42  ;;  %v12215_v35 = vshll.u32 %v22339_v24, 16  ;;  %v12225_v5 = vshrl.u32 %v22364_v14, 16  ;;  %v11827_v34 = vrot.slane %v11825_v52, 5 }
 0x719   :  { %v14307_v55 = vrot.slane %v12194_v41, 11  ;;  %v12204_v21 = vor.u32 %v12202_v1, %v12201_v18  ;;  %v12238_v0 = vshrl.u32 %v22369_v16, 16  ;;  %v14308_v44 = vrot.slane %v12207_v58, 11  ;;  %v22421_v58 = vld [vmem:[#allocation2 + $0x230] sm:$0xf] }
 0x71a   :  { %15821 = vmatpush3.bf16.msra.mxu1 %v16821_v10  ;;  %v11822_v10 = vor.u32 %v11821_v54, %v11818_v23  ;;  %v22386_v53 = vcombine.low %v22371_v51, %v22371_v51  ;;  %v22390_v24 = vcombine.low %v22375_v31, %v22375_v31  ;;  %v22401_v49 = vcombine.low %v22379_v61, %v22379_v61 }
 0x71b   :  { %15822 = vmatprep.subr.bf16.mxu1 %v16826_v30  ;;  %v12192_v38 = vsel %vm21859_vm3, %v14306_v28, %v12191_v60  ;;  %v12220_v43 = vshrl.u32 %v16857_v56, 16  ;;  %v12227_v46 = vrot.slane %v12225_v5, 7  ;;  %v22407_v39 = vcombine.low %v22382_v4, %v22382_v4  ;;  %v22427_v28 = vld [vmem:[#allocation2 + $0x260] sm:$0xf] }
 0x71c   :  { %v11823_v3 = vrot.slane %v11822_v10, 4  ;;  %v12205_v9 = vsel %vm21859_vm3, %v14307_v55, %v12204_v21  ;;  %v12233_v57 = vshrl.u32 %v16859_v26, 16  ;;  %v12240_v52 = vrot.slane %v12238_v0, 7  ;;  %v22416_v10 = vld [vmem:[#allocation2 + $0x218] sm:$0xf]  ;;  %v16856_v60 = vld [vmem:[#allocation3 + $0x400] sm:$0xff]  }
 0x71d   :  { %15807 = vmatmul.mubr.bf16.gmra.mrb[68].mxu1 %v14260_v62  ;;  %v12175_v62 = vrot.slane %v12173_v27, 7  ;;  %v16846_v27 = vld [vmem:[#allocation3 + $0x3f0] sm:$0xff]   ;;  %v12251_v20 = vshrl.u32 %v22386_v53, 16  ;;  %v12241_v42 = vshll.u32 %v22369_v16, 16  ;;  %v12277_v41 = vshrl.u32 %v22401_v49, 16 }
 0x71e   :  { %15810 = vmatprep.mubr.bf16.mxu1 %v14261_v29  ;;  %15823 = vmatpush3.bf16.msra.mxu1 %v16826_v30  ;;  %v11809_v30 = vrot.slane %v11808_v63, 4  ;;  %v11828_v54 = vsel %vm21969_vm5, %v11823_v3, %v11827_v34  ;;  %v16862_v29 = vld [vmem:[#allocation2 + $0xc4] ss:$0 sps:$4 sm:$0x88]   ;;  %v12264_v63 = vshrl.u32 %v22390_v24, 16  ;;  %v14309_v18 = vrot.slane %v12220_v43, 11 }
 0x71f   :  { %15824 = vmatprep.subr.bf16.mxu1 %v16831_v48  ;;  %v12178_v8 = vor.u32 %v12176_v12, %v12175_v62  ;;  %v16869_v12 = vld [vmem:[#allocation2 + $0x1fc] ss:$0 sps:$4 sm:$0x88]   ;;  %v12246_v40 = vshrl.u32 %v16862_v29, 16  ;;  %v14310_v56 = vrot.slane %v12233_v57, 11  ;;  %v12253_v16 = vrot.slane %v12251_v20, 7 }
 0x720   :  { %v11814_v23 = vsel %vm21969_vm5, %v11809_v30, %v11813_v25  ;;  %v22423_v3 = vld [vmem:[#allocation2 + $0x248] sm:$0xf]  ;;  %v12266_v1 = vrot.slane %v12264_v63, 7  ;;  %v12267_v26 = vshll.u32 %v22390_v24, 16  ;;  %v12279_v5 = vrot.slane %v12277_v41, 7 }
 0x721   :  { %v12179_v11 = vsel %vm21859_vm3, %v22354_v2, %v12178_v8  ;;  %v16867_v2 = vld [vmem:[#allocation2 + $0x1e4] ss:$0 sps:$4 sm:$0x88]   ;;  %v14264_v62 = vcombine.low %v11814_v23, %v11828_v54  ;;  %v12254_v8 = vshll.u32 %v22386_v53, 16  ;;  %v14294_v34 = vcombine.low %v22416_v10, %v22416_v10  ;;  %v22445_v63 = vld [vmem:[#allocation2 + $0x278] sm:$0xf] }
 0x722   :  { %15825 = vmatpush3.bf16.msra.mxu1 %v16831_v48  ;;  %v12217_v48 = vor.u32 %v12215_v35, %v12214_v13  ;;  %v14321_v25 = vcombine.low %v12179_v11, %v12192_v38  ;;  %v12272_v35 = vshrl.u32 %v16867_v2, 16  ;;  %v14296_v55 = vcombine.low %v22421_v58, %v22421_v58  ;;  %v16872_v23 = vld [vmem:[#allocation2 + $0x214] ss:$0 sps:$4 sm:$0x88]  }
 0x723   :  { %15826 = vmatprep.subr.bf16.mxu1 %v16836_v19  ;;  %v14311_v0 = vrot.slane %v12246_v40, 11  ;;  %v12280_v24 = vshll.u32 %v22401_v49, 16  ;;  %v14298_v54 = vcombine.low %v22423_v3, %v22423_v3  ;;  %v12256_v11 = vor.u32 %v12254_v8, %v12253_v16  ;;  %v16877_v2 = vld [vmem:[#allocation2 + $0x244] ss:$0 sps:$4 sm:$0x88]  }
 0x724   :  { %v12218_v59 = vsel %vm21859_vm3, %v14308_v44, %v12217_v48  ;;  %v12285_v44 = vshrl.u32 %v16869_v12, 16  ;;  %v12269_v38 = vor.u32 %v12267_v26, %v12266_v1  ;;  %v12293_v43 = vshll.u32 %v22407_v39, 16 }
 0x725   :  { %15811 = vmatmul.mubr.bf16.gmra.mrb[72].mxu1 %v14262_v47  ;;  %v16864_v47 = vld [vmem:[#allocation2 + $0xdc] ss:$0 sps:$4 sm:$0x88]   ;;  %v14322_v13 = vcombine.low %v12205_v9, %v12218_v59  ;;  %v14313_v9 = vrot.slane %v12272_v35, 11  ;;  %v12282_v57 = vor.u32 %v12280_v24, %v12279_v5  ;;  %v12303_v49 = vshrl.u32 %v14294_v34, 16 }
 0x726   :  { %15814 = vmatprep.mubr.bf16.mxu1 %v14263_v15  ;;  %15827 = vmatpush3.bf16.msra.mxu1 %v16836_v19  ;;  %v12228_v19 = vshll.u32 %v22364_v14, 16  ;;  %v12290_v14 = vshrl.u32 %v22407_v39, 16  ;;  %v12259_v30 = vshrl.u32 %v16864_v47, 16  ;;  %v16861_v47 = vld [vmem:[#allocation3 + $0x408] sm:$0xff]   ;;  %v12298_v41 = vshrl.u32 %v16872_v23, 16 }
 0x727   :  { %15828 = vmatprep.subr.bf16.mxu1 %v16841_v22  ;;  %v12283_v40 = vsel %vm21859_vm3, %v14313_v9, %v12282_v57  ;;  %v14302_v16 = vcombine.low %v22445_v63, %v22445_v63  ;;  %v12324_v1 = vshrl.u32 %v16877_v2, 16  ;;  %v16882_v24 = vld [vmem:[#allocation2 + $0x274] ss:$0 sps:$4 sm:$0x88]  }
 0x728   :  { %v12230_v15 = vor.u32 %v12228_v19, %v12227_v46  ;;  %v12292_v48 = vrot.slane %v12290_v14, 7  ;;  %v14312_v29 = vrot.slane %v12259_v30, 11  ;;  %v16874_v46 = vld [vmem:[#allocation2 + $0x22c] ss:$0 sps:$4 sm:$0x88]   ;;  %v14314_v19 = vrot.slane %v12285_v44, 11 }
 0x729   :  { %v12305_v14 = vrot.slane %v12303_v49, 7  ;;  %v12319_v30 = vshll.u32 %v14296_v55, 16  ;;  %v12350_v49 = vshrl.u32 %v16882_v24, 16 }
 0x72a   :  { %15829 = vmatpush3.bf16.msra.mxu1 %v16841_v22  ;;  %v12243_v22 = vor.u32 %v12241_v42, %v12240_v52  ;;  %v12231_v21 = vsel %vm21859_vm3, %v14309_v18, %v12230_v15  ;;  %v12316_v52 = vshrl.u32 %v14296_v55, 16  ;;  %v12295_v20 = vor.u32 %v12293_v43, %v12292_v48  ;;  %v16866_v15 = vld [vmem:[#allocation3 + $0x410] sm:$0xff]  }
 0x72b   :  { %15830 = vmatprep.subr.bf16.mxu1 %v16846_v27  ;;  %v12257_v42 = vsel %vm21859_vm3, %v14311_v0, %v12256_v11  ;;  %v12270_v12 = vsel %vm21859_vm3, %v14312_v29, %v12269_v38  ;;  %v12311_v18 = vshrl.u32 %v16874_v46, 16  ;;  %v16884_v11 = vld [vmem:[#allocation2 + $0x28c] ss:$0 sps:$4 sm:$0x88]   ;;  %v12355_v29 = vshrl.u32 %v14302_v16, 16 }
 0x72c   :  { %v12244_v53 = vsel %vm21859_vm3, %v14310_v56, %v12243_v22  ;;  %v12318_v56 = vrot.slane %v12316_v52, 7  ;;  %v12296_v22 = vsel %vm21859_vm3, %v14314_v19, %v12295_v20  ;;  %v14324_v5 = vcombine.low %v12257_v42, %v12270_v12  ;;  %v16881_v42 = vld [vmem:[#allocation3 + $0x428] sm:$0xff]  }
 0x72d   :  { %15815 = vmatmul.mubr.bf16.gmra.mrb[76].mxu1 %v14264_v62  ;;  %v14323_v59 = vcombine.low %v12231_v21, %v12244_v53  ;;  %v22447_v62 = vld [vmem:[#allocation2 + $0x290] sm:$0xf]  ;;  %v14315_v21 = vrot.slane %v12298_v41, 11  ;;  %v14316_v0 = vrot.slane %v12311_v18, 11  ;;  %v12332_v53 = vshll.u32 %v14298_v54, 16 }
 0x72e   :  { %15831 = vmatpush3.bf16.msra.mxu1 %v16846_v27  ;;  %15834 = vmatprep.mubr.bf16.mxu1 %v14321_v25  ;;  %v22442_v27 = vcombine.low %v22427_v28, %v22427_v28  ;;  %v16879_v25 = vld [vmem:[#allocation2 + $0x25c] ss:$0 sps:$4 sm:$0x88]   ;;  %v14304_v8 = vcombine.low %v22447_v62, %v22447_v62  ;;  %v12321_v48 = vor.u32 %v12319_v30, %v12318_v56  ;;  %v14317_v43 = vrot.slane %v12324_v1, 11  ;;  %v12780_v1 = vld [vmem:[#allocation2 + $0x50] sm:$0x1f] }
 0x72f   :  { %15832 = vmatprep.subr.bf16.mxu1 %v16851_v33  ;;  %v14325_v23 = vcombine.low %v12283_v40, %v12296_v22  ;;  %v12357_v52 = vrot.slane %v12355_v29, 7  ;;  %v12363_v2 = vshrl.u32 %v16884_v11, 16  ;;  %v14319_v12 = vrot.slane %v12350_v49, 11  ;;  %v16888_v30 = vld [vmem:[#allocation3 + $0x438] sm:$0xff]  }
 0x730   :  { %v12342_v39 = vshrl.u32 %v22442_v27, 16  ;;  %v12345_v55 = vshll.u32 %v22442_v27, 16  ;;  %v12368_v38 = vshrl.u32 %v14304_v8, 16  ;;  %v16876_v27 = vld [vmem:[#allocation3 + $0x420] sm:$0xff]   ;;  %v12371_v19 = vshll.u32 %v14304_v8, 16 }
 0x731   :  { %v12779_v8 = vld [vmem:[#allocation2 + $0x38] sm:$0x1f]  ;;  %v14355_v45 = vcombine.low %v12780_v1, %v12780_v1 }
 0x732   :  { %15833 = vmatpush3.bf16.msra.mxu1 %v16851_v33  ;;  %v12329_v33 = vshrl.u32 %v14298_v54, 16  ;;  %v12344_v35 = vrot.slane %v12342_v39, 7  ;;  %v12322_v54 = vsel %vm21859_vm3, %v14316_v0, %v12321_v48 }
 0x733   :  { %15850 = vmatprep.subr.bf16.mxu1 %v16856_v60  ;;  %v12890_v48 = vshrl.u32 %v14355_v45, 16 }
 0x734   :  { %v12331_v26 = vrot.slane %v12329_v33, 7  ;;  %v12358_v33 = vshll.u32 %v14302_v16, 16  ;;  %v14337_v16 = vcombine.low %v22301_v6, %v22305_v17  ;;  %v14338_v6 = vcombine.low %v22309_v50, %v22315_v7  ;;  %v16892_v17 = vld [vmem:[#allocation3 + $0x448] sm:$0xff]  }
 0x735   :  { %15835 = vmatmul.mubr.bf16.vlgmr.msra.gmra.mrb[64].mxu1 %v14322_v13  ;;  %v12306_v13 = vshll.u32 %v14294_v34, 16  ;;  %v16871_v34 = vld [vmem:[#allocation3 + $0x418] sm:$0xff]   ;;  %v14356_v50 = vcombine.high %v12780_v1, %v12780_v1 }
 0x736   :  { %15838 = vmatprep.mubr.bf16.mxu1 %v14323_v59  ;;  %15851 = vmatpush3.bf16.msra.mxu1 %v16856_v60  ;;  %v12337_v60 = vshrl.u32 %v16879_v25, 16  ;;  %v12334_v46 = vor.u32 %v12332_v53, %v12331_v26  ;;  %v12370_v59 = vrot.slane %v12368_v38, 7  ;;  %v12360_v18 = vor.u32 %v12358_v33, %v12357_v52  ;;  %v12781_v26 = vld [vmem:[#allocation2 + $0x68] sm:$0x1f]  ;;  %v22485_v38 = vld [vmem:[#allocation2 + $0x98] sm:$0x1f] }
 0x737   :  { %15852 = vmatprep.subr.bf16.mxu1 %v16861_v47  ;;  %v12308_v44 = vor.u32 %v12306_v13, %v12305_v14  ;;  %v16886_v14 = vld [vmem:[#allocation3 + $0x430] sm:$0xff]   ;;  %v12893_v53 = vshll.u32 %v14355_v45, 16  ;;  %v14358_v7 = vcombine.high %v12781_v26, %v12781_v26  ;;  %v14361_v49 = vcombine.low %v22485_v38, %v22485_v38 }
 0x738   :  { %v14318_v9 = vrot.slane %v12337_v60, 11  ;;  %v12335_v20 = vsel %vm21859_vm3, %v14317_v43, %v12334_v46  ;;  %v12373_v40 = vor.u32 %v12371_v19, %v12370_v59  ;;  %v12361_v13 = vsel %vm21859_vm3, %v14319_v12, %v12360_v18  ;;  %v22477_v60 = vld [vmem:[#allocation2 + $0x80] sm:$0x1f]  ;;  %v22487_v46 = vld [vmem:[#allocation2 + $0xb0] sm:$0x1f] }
 0x739   :  { %v12309_v57 = vsel %vm21859_vm3, %v14315_v21, %v12308_v44  ;;  %v14357_v21 = vcombine.low %v12781_v26, %v12781_v26  ;;  %v14359_v0 = vcombine.low %v22477_v60, %v22477_v60  ;;  %v14354_v43 = vcombine.high %v12779_v8, %v12779_v8  ;;  %v22501_v18 = vld [vmem:[#allocation2 + $0xc8] sm:$0x1f] }
 0x73a   :  { %15853 = vmatpush3.bf16.msra.mxu1 %v16861_v47  ;;  %v12347_v47 = vor.u32 %v12345_v55, %v12344_v35  ;;  %v14326_v39 = vcombine.low %v12309_v57, %v12322_v54  ;;  %v16890_v35 = vld [vmem:[#allocation3 + $0x440] sm:$0xff]   ;;  %v14339_v55 = vcombine.low %v22348_v32, %v22357_v37  ;;  %v12892_v54 = vrot.slane %v12890_v48, 4 }
 0x73b   :  { %15854 = vmatprep.subr.bf16.mxu1 %v16866_v15  ;;  %v12904_v24 = vshrl.u32 %v14357_v21, 16  ;;  %v12918_v11 = vshrl.u32 %v14359_v0, 16  ;;  %v12921_v29 = vshll.u32 %v14359_v0, 16  ;;  %v12895_v32 = vrot.slane %v12893_v53, 5 }
 0x73c   :  { %v12348_v25 = vsel %vm21859_vm3, %v14318_v9, %v12347_v47  ;;  %v16894_v9 = vld [vmem:[#allocation3 + $0x450] sm:$0xff]   ;;  %v14340_v52 = vcombine.low %v22371_v51, %v22375_v31  ;;  %v14363_v19 = vcombine.low %v22487_v46, %v22487_v46  ;;  %v12899_v33 = vshll.u32 %v14356_v50, 16 }
 0x73d   :  { %15839 = vmatmul.mubr.bf16.gmra.mrb[68].mxu1 %v14324_v5  ;;  %v14327_v41 = vcombine.low %v12335_v20, %v12348_v25  ;;  %v14353_v5 = vcombine.low %v12779_v8, %v12779_v8  ;;  %v12906_v37 = vrot.slane %v12904_v24, 4  ;;  %v12923_v59 = vrot.slane %v12921_v29, 5 }
 0x73e   :  { %15842 = vmatprep.mubr.bf16.mxu1 %v14325_v23  ;;  %15855 = vmatpush3.bf16.msra.mxu1 %v16866_v15  ;;  %v14320_v15 = vrot.slane %v12363_v2, 11  ;;  %v12907_v23 = vshll.u32 %v14357_v21, 16  ;;  %v12920_v2 = vrot.slane %v12918_v11, 4  ;;  %v14341_v20 = vcombine.low %v22379_v61, %v22382_v4  ;;  %v16900_v11 = vld [vmem:[#allocation3 + $0x468] sm:$0xff]  }
 0x73f   :  { %15856 = vmatprep.subr.bf16.mxu1 %v16871_v34  ;;  %v12879_v44 = vshll.u32 %v14353_v5, 16  ;;  %v12885_v25 = vshll.u32 %v14354_v43, 16  ;;  %v14342_v12 = vcombine.low %v22416_v10, %v22421_v58  ;;  %v12896_v31 = vor.u32 %v12895_v32, %v12892_v54 }
 0x740   :  { %v12374_v56 = vsel %vm21859_vm3, %v14320_v15, %v12373_v40  ;;  %v14343_v15 = vcombine.low %v22423_v3, %v22427_v28  ;;  %v12932_v61 = vshrl.u32 %v14361_v49, 16  ;;  %v12935_v4 = vshll.u32 %v14361_v49, 16  ;;  %v16898_v28 = vld [vmem:[#allocation3 + $0x460] sm:$0xff]  }
 0x741   :  { %v14328_v22 = vcombine.low %v12361_v13, %v12374_v56  ;;  %v12881_v57 = vrot.slane %v12879_v44, 5  ;;  %v12924_v13 = vor.u32 %v12923_v59, %v12920_v2  ;;  %v12946_v56 = vshrl.u32 %v14363_v19, 16  ;;  %v16902_v59 = vld [vmem:[#allocation3 + $0x470] sm:$0xff]  }
 0x742   :  { %15857 = vmatpush3.bf16.msra.mxu1 %v16871_v34  ;;  %v12876_v34 = vshrl.u32 %v14353_v5, 16  ;;  %v12887_v10 = vrot.slane %v12885_v25, 5  ;;  %v12901_v58 = vrot.slane %v12899_v33, 5  ;;  %v14365_v3 = vcombine.low %v22501_v18, %v22501_v18 }
 0x743   :  { %15858 = vmatprep.subr.bf16.mxu1 %v16876_v27  ;;  %v12897_v1 = vrot.slane %v12896_v31, 4  ;;  %v12934_v45 = vrot.slane %v12932_v61, 4  ;;  %v12937_v21 = vrot.slane %v12935_v4, 5  ;;  %v12948_v44 = vrot.slane %v12946_v56, 4 }
 0x744   :  { %v12878_v47 = vrot.slane %v12876_v34, 4  ;;  %v14364_v34 = vcombine.high %v22487_v46, %v22487_v46  ;;  %v12963_v24 = vshll.u32 %v14365_v3, 16 }
 0x745   :  { %15843 = vmatmul.mubr.bf16.gmra.mrb[72].mxu1 %v14326_v39  ;;  %v14360_v39 = vcombine.high %v22477_v60, %v22477_v60  ;;  %v14362_v60 = vcombine.high %v22485_v38, %v22485_v38  ;;  %v12902_v38 = vsel %vm21969_vm5, %v12897_v1, %v12901_v58  ;;  %v12938_v46 = vor.u32 %v12937_v21, %v12934_v45  ;;  %v16907_v58 = vld [vmem:[#allocation3 + $0x478] sm:$0xff]  }
 0x746   :  { %15846 = vmatprep.mubr.bf16.mxu1 %v14327_v41  ;;  %15859 = vmatpush3.bf16.msra.mxu1 %v16876_v27  ;;  %v12909_v27 = vrot.slane %v12907_v23, 5  ;;  %v12882_v51 = vor.u32 %v12881_v57, %v12878_v47  ;;  %v12913_v41 = vshll.u32 %v14358_v7, 16  ;;  %v12955_v32 = vshll.u32 %v14364_v34, 16 }
 0x747   :  { %15860 = vmatprep.subr.bf16.mxu1 %v16881_v42  ;;  %v12941_v43 = vshll.u32 %v14362_v60, 16  ;;  %v12965_v49 = vrot.slane %v12963_v24, 5 }
 0x748   :  { %v12910_v40 = vor.u32 %v12909_v27, %v12906_v37  ;;  %v12883_v8 = vrot.slane %v12882_v51, 4  ;;  %v12915_v26 = vrot.slane %v12913_v41, 5  ;;  %v14366_v37 = vcombine.high %v22501_v18, %v22501_v18  ;;  %v22543_v41 = vld [vmem:[#allocation2 + $0x230] sm:$0x1f] }
 0x74a   :  { %15861 = vmatpush3.bf16.msra.mxu1 %v16881_v42  ;;  %v16896_v42 = vld [vmem:[#allocation3 + $0x458] sm:$0xff]   ;;  %v12911_v5 = vrot.slane %v12910_v40, 4  ;;  %v12888_v29 = vsel %vm21969_vm5, %v12883_v8, %v12887_v10  ;;  %v12957_v40 = vrot.slane %v12955_v32, 5  ;;  %v12969_v61 = vshll.u32 %v14366_v37, 16  ;;  %v22549_v10 = vld [vmem:[#allocation2 + $0x248] sm:$0x1f] }
 0x74b   :  { %15862 = vmatprep.subr.bf16.mxu1 %v16886_v14  ;;  %v14375_v8 = vcombine.low %v22543_v41, %v22543_v41  ;;  %v14377_v21 = vcombine.low %v22549_v10, %v22549_v10 }
 0x74c   :  { %v22531_v7 = vsel %vm21969_vm5, %v12911_v5, %v12915_v26  ;;  %v12971_v45 = vrot.slane %v12969_v61, 5 }
 0x74d   :  { %15847 = vmatmul.mubr.bf16.gmra.mrb[76].mxu1 %v14328_v22  ;;  %v12949_v22 = vshll.u32 %v14363_v19, 16  ;;  %v14385_v19 = vcombine.low %v12888_v29, %v12902_v38  ;;  %v13044_v29 = vshrl.u32 %v14377_v21, 16  ;;  %v13047_v38 = vshll.u32 %v14377_v21, 16 }
 0x74e   :  { %15863 = vmatpush3.bf16.msra.mxu1 %v16886_v14  ;;  %15866 = vmatprep.mubr.bf16.mxu1 %v14337_v16  ;;  %v14344_v14 = vcombine.low %v22445_v63, %v22447_v62  ;;  %v12927_v16 = vshll.u32 %v14360_v39, 16  ;;  %v22539_v39 = vld [vmem:[#allocation2 + $0x218] sm:$0x1f]  ;;  %v13030_v62 = vshrl.u32 %v14375_v8, 16 }
 0x74f   :  { %15864 = vmatprep.subr.bf16.mxu1 %v16888_v30  ;;  %v12951_v48 = vrot.slane %v12949_v22, 5  ;;  %v14373_v22 = vcombine.low %v22539_v39, %v22539_v39 }
 0x750   :  { %v12929_v53 = vrot.slane %v12927_v16, 5  ;;  %v13032_v37 = vrot.slane %v13030_v62, 4 }
 0x751   :  { %v12952_v54 = vor.u32 %v12951_v48, %v12948_v44  ;;  %v13016_v44 = vshrl.u32 %v14373_v22, 16 }
 0x752   :  { %15865 = vmatpush3.bf16.msra.mxu1 %v16888_v30  ;;  %v22507_v30 = vld [vmem:[#allocation2 + $0xe0] sm:$0x1f] }
 0x753   :  { %15882 = vmatprep.subr.bf16.mxu1 %v16890_v35  ;;  %v14367_v0 = vcombine.low %v22507_v30, %v22507_v30 }
 0x755   :  { %15867 = vmatmul.mubr.bf16.vlgmr.msra.gmra.mrb[64].mxu1 %v14338_v6  ;;  %v22517_v6 = vld [vmem:[#allocation2 + $0x200] sm:$0x1f]  ;;  %v12977_v47 = vshll.u32 %v14367_v0, 16 }
 0x756   :  { %15870 = vmatprep.mubr.bf16.mxu1 %v14339_v55  ;;  %15883 = vmatpush3.bf16.msra.mxu1 %v16890_v35  ;;  %v22513_v35 = vld [vmem:[#allocation2 + $0x1e8] sm:$0x1f]  ;;  %v12960_v55 = vshrl.u32 %v14365_v3, 16  ;;  %v14371_v50 = vcombine.low %v22517_v6, %v22517_v6  ;;  %v14372_v5 = vcombine.high %v22517_v6, %v22517_v6  ;;  %v13019_v6 = vshll.u32 %v14373_v22, 16 }
 0x757   :  { %15884 = vmatprep.subr.bf16.mxu1 %v16892_v17  ;;  %v14369_v23 = vcombine.low %v22513_v35, %v22513_v35  ;;  %v12979_v31 = vrot.slane %v12977_v47, 5  ;;  %v14370_v16 = vcombine.high %v22513_v35, %v22513_v35  ;;  %v13018_v47 = vrot.slane %v13016_v44, 4 }
 0x758   :  { %v12962_v27 = vrot.slane %v12960_v55, 4  ;;  %v13002_v25 = vshrl.u32 %v14371_v50, 16  ;;  %v13005_v33 = vshll.u32 %v14371_v50, 16 }
 0x759   :  { %v12991_v2 = vshll.u32 %v14369_v23, 16  ;;  %v12997_v48 = vshll.u32 %v14370_v16, 16 }
 0x75a   :  { %15885 = vmatpush3.bf16.msra.mxu1 %v16892_v17  ;;  %v12925_v17 = vrot.slane %v12924_v13, 4  ;;  %v12966_v4 = vor.u32 %v12965_v49, %v12962_v27  ;;  %v13004_v3 = vrot.slane %v13002_v25, 4 }
 0x75b   :  { %15886 = vmatprep.subr.bf16.mxu1 %v16894_v9  ;;  %v12993_v56 = vrot.slane %v12991_v2, 5 }
 0x75c   :  { %v22535_v57 = vsel %vm21969_vm5, %v12925_v17, %v12929_v53  ;;  %v12967_v17 = vrot.slane %v12966_v4, 4 }
 0x75d   :  { %15871 = vmatmul.mubr.bf16.gmra.mrb[68].mxu1 %v14340_v52  ;;  %v12988_v52 = vshrl.u32 %v14369_v23, 16  ;;  %v14386_v18 = vcombine.low %v22531_v7, %v22535_v57  ;;  %v13011_v23 = vshll.u32 %v14372_v5, 16  ;;  %v12794_v7 = vld [vmem:[#allocation2 + $0x290] sm:$0x1f]  ;;  %v13021_v57 = vrot.slane %v13019_v6, 5 }
 0x75e   :  { %15874 = vmatprep.mubr.bf16.mxu1 %v14341_v20  ;;  %15887 = vmatpush3.bf16.msra.mxu1 %v16894_v9  ;;  %v12974_v9 = vshrl.u32 %v14367_v0, 16  ;;  %v12943_v20 = vrot.slane %v12941_v43, 5  ;;  %v14384_v5 = vcombine.high %v12794_v7, %v12794_v7 }
 0x75f   :  { %15888 = vmatprep.subr.bf16.mxu1 %v16896_v42  ;;  %v12990_v13 = vrot.slane %v12988_v52, 4  ;;  %v13013_v49 = vrot.slane %v13011_v23, 5  ;;  %v14374_v52 = vcombine.high %v22539_v39, %v22539_v39  ;;  %v13022_v39 = vor.u32 %v13021_v57, %v13018_v47 }
 0x760   :  { %v12976_v51 = vrot.slane %v12974_v9, 4 }
 0x761   :  { %v12994_v34 = vor.u32 %v12993_v56, %v12990_v13  ;;  %v13025_v22 = vshll.u32 %v14374_v52, 16 }
 0x762   :  { %15889 = vmatpush3.bf16.msra.mxu1 %v16896_v42  ;;  %v12939_v42 = vrot.slane %v12938_v46, 4  ;;  %v12980_v26 = vor.u32 %v12979_v31, %v12976_v51  ;;  %v12972_v46 = vsel %vm21969_vm5, %v12967_v17, %v12971_v45  ;;  %v14376_v51 = vcombine.high %v22543_v41, %v22543_v41 }
 0x763   :  { %15890 = vmatprep.subr.bf16.mxu1 %v16898_v28  ;;  %v12995_v9 = vrot.slane %v12994_v34, 4 }
 0x764   :  { %v12944_v1 = vsel %vm21969_vm5, %v12939_v42, %v12943_v20  ;;  %v12981_v55 = vrot.slane %v12980_v26, 4  ;;  %v13049_v20 = vrot.slane %v13047_v38, 5 }
 0x765   :  { %15875 = vmatmul.mubr.bf16.gmra.mrb[72].mxu1 %v14342_v12  ;;  %v14368_v12 = vcombine.high %v22507_v30, %v22507_v30  ;;  %v22551_v30 = vld [vmem:[#allocation2 + $0x260] sm:$0x1f] }
 0x766   :  { %15878 = vmatprep.mubr.bf16.mxu1 %v14343_v15  ;;  %15891 = vmatpush3.bf16.msra.mxu1 %v16898_v28  ;;  %v12953_v15 = vrot.slane %v12952_v54, 4  ;;  %v13007_v28 = vrot.slane %v13005_v33, 5  ;;  %v14379_v0 = vcombine.low %v22551_v30, %v22551_v30  ;;  %v12999_v54 = vrot.slane %v12997_v48, 5 }
 0x767   :  { %15892 = vmatprep.subr.bf16.mxu1 %v16900_v11  ;;  %v12983_v60 = vshll.u32 %v14368_v12, 16 }
 0x768   :  { %v12958_v35 = vsel %vm21969_vm5, %v12953_v15, %v12957_v40  ;;  %v13008_v63 = vor.u32 %v13007_v28, %v13004_v3  ;;  %v13058_v43 = vshrl.u32 %v14379_v0, 16  ;;  %v13061_v50 = vshll.u32 %v14379_v0, 16 }
 0x769   :  { %v14387_v53 = vcombine.low %v12944_v1, %v12958_v35  ;;  %v12985_v24 = vrot.slane %v12983_v60, 5  ;;  %v13000_v12 = vsel %vm21969_vm5, %v12995_v9, %v12999_v54  ;;  %v14380_v40 = vcombine.high %v22551_v30, %v22551_v30 }
 0x76a   :  { %15893 = vmatpush3.bf16.msra.mxu1 %v16900_v11  ;;  %v22570_v11 = vld [vmem:[#allocation2 + $0x278] sm:$0x1f]  ;;  %v13009_v32 = vrot.slane %v13008_v63, 4  ;;  %v13060_v25 = vrot.slane %v13058_v43, 4  ;;  %v13063_v33 = vrot.slane %v13061_v50, 5  ;;  %v13023_v28 = vrot.slane %v13022_v39, 4 }
 0x76b   :  { %15894 = vmatprep.subr.bf16.mxu1 %v16902_v59  ;;  %v14381_v2 = vcombine.low %v22570_v11, %v22570_v11  ;;  %v12986_v42 = vsel %vm21969_vm5, %v12981_v55, %v12985_v24  ;;  %v13067_v60 = vshll.u32 %v14380_v40, 16  ;;  %v13027_v30 = vrot.slane %v13025_v22, 5 }
 0x76c   :  { %v13014_v31 = vsel %vm21969_vm5, %v13009_v32, %v13013_v49  ;;  %v13064_v16 = vor.u32 %v13063_v33, %v13060_v25  ;;  %v14388_v3 = vcombine.low %v12972_v46, %v12986_v42  ;;  %v14382_v44 = vcombine.high %v22570_v11, %v22570_v11 }
 0x76d   :  { %15879 = vmatmul.mubr.bf16.gmra.mrb[76].mxu1 %v14344_v14  ;;  %v13033_v14 = vshll.u32 %v14375_v8, 16  ;;  %v13072_v61 = vshrl.u32 %v14381_v2, 16  ;;  %v13075_v4 = vshll.u32 %v14381_v2, 16  ;;  %v14389_v41 = vcombine.low %v13000_v12, %v13014_v31 }
 0x76e   :  { %15895 = vmatpush3.bf16.msra.mxu1 %v16902_v59  ;;  %15898 = vmatprep.mubr.bf16.mxu1 %v14385_v19  ;;  %v14383_v59 = vcombine.low %v12794_v7, %v12794_v7  ;;  %v13046_v19 = vrot.slane %v13044_v29, 4  ;;  %v13039_v8 = vshll.u32 %v14376_v51, 16  ;;  %v13065_v17 = vrot.slane %v13064_v16, 4 }
 0x76f   :  { %15896 = vmatprep.subr.bf16.mxu1 %v16907_v58  ;;  %v13035_v27 = vrot.slane %v13033_v14, 5  ;;  %v13074_v35 = vrot.slane %v13072_v61, 4  ;;  %v13028_v6 = vsel %vm21969_vm5, %v13023_v28, %v13027_v30  ;;  %v13069_v63 = vrot.slane %v13067_v60, 5 }
 0x770   :  { %v13086_v13 = vshrl.u32 %v14383_v59, 16  ;;  %v13089_v56 = vshll.u32 %v14383_v59, 16  ;;  %v13041_v34 = vrot.slane %v13039_v8, 5  ;;  %v13095_v55 = vshll.u32 %v14384_v5, 16 }
 0x771   :  { %v13036_v15 = vor.u32 %v13035_v27, %v13032_v37  ;;  %v13070_v23 = vsel %vm21969_vm5, %v13065_v17, %v13069_v63  ;;  %v13081_v29 = vshll.u32 %v14382_v44, 16 }
 0x772   :  { %15897 = vmatpush3.bf16.msra.mxu1 %v16907_v58  ;;  %v13050_v58 = vor.u32 %v13049_v20, %v13046_v19  ;;  %v13088_v45 = vrot.slane %v13086_v13, 4  ;;  %v13091_v21 = vrot.slane %v13089_v56, 5  ;;  %v13097_v7 = vrot.slane %v13095_v55, 5 }
 0x773   :  { %v13037_v1 = vrot.slane %v13036_v15, 4  ;;  %v13083_v46 = vrot.slane %v13081_v29, 5 }
 0x774   :  { %v13051_v0 = vrot.slane %v13050_v58, 4 }
 0x775   :  { %15899 = vmatmul.mubr.bf16.vlgmr.msra.gmra.mrb[64].mxu1 %v14386_v18  ;;  %v14378_v18 = vcombine.high %v22549_v10, %v22549_v10  ;;  %v13077_v10 = vrot.slane %v13075_v4, 5  ;;  %v13042_v62 = vsel %vm21969_vm5, %v13037_v1, %v13041_v34 }
 0x776   :  { %15902 = vmatprep.mubr.bf16.mxu1 %v14387_v53  ;;  %v13092_v53 = vor.u32 %v13091_v21, %v13088_v45  ;;  %v14390_v38 = vcombine.low %v13028_v6, %v13042_v62 }
 0x777   :  { %v13053_v26 = vshll.u32 %v14378_v18, 16  ;;  %v13078_v14 = vor.u32 %v13077_v10, %v13074_v35 }
 0x778   :  { %v13093_v50 = vrot.slane %v13092_v53, 4 }
 0x779   :  { %v13055_v48 = vrot.slane %v13053_v26, 5  ;;  %v13079_v43 = vrot.slane %v13078_v14, 4 }
 0x77a   :  { %v13098_v47 = vsel %vm21969_vm5, %v13093_v50, %v13097_v7 }
 0x77b   :  { %v13056_v24 = vsel %vm21969_vm5, %v13051_v0, %v13055_v48  ;;  %v13084_v9 = vsel %vm21969_vm5, %v13079_v43, %v13083_v46 }
 0x77c   :  { %v14391_v11 = vcombine.low %v13056_v24, %v13070_v23  ;;  %v14392_v57 = vcombine.low %v13084_v9, %v13098_v47 }
 0x77d   :  { %15903 = vmatmul.mubr.bf16.gmra.mrb[68].mxu1 %v14388_v3 }
 0x77e   :  { %15906 = vmatprep.mubr.bf16.mxu1 %v14389_v41 }
 0x785   :  { %15907 = vmatmul.mubr.bf16.gmra.mrb[72].mxu1 %v14390_v38 }
 0x786   :  { %15910 = vmatprep.mubr.bf16.mxu1 %v14391_v11 }
 0x78d   :  { %15911 = vmatmul.mubr.bf16.gmra.mrb[76].mxu1 %v14392_v57 }
 0x848   :  { %v15900_v54 = vpop.f32.mrb[64].mxu1 }
 0x849   :  { %v13230_v32 = vpop.f32.mrb[65].mxu1 }
 0x84a   :  { %v15901_v37 = vpop.f32.mrb[66].mxu1 }
 0x84b   :  { %v13233_v27 = vpop.f32.mrb[67].mxu1 }
 0x84c   :  { %v13309_v49 = vadd.f32 %v13233_v27, %v13230_v32 }
 0x84e   :  { %v13310_v52 = vadd.f32 %v15900_v54, %v13309_v49 }
 0x850   :  { %v15904_v2 = vpop.f32.mrb[68].mxu1  ;;  %v13311_v59 = vadd.f32 %v15901_v37, %v13310_v52 }
 0x851   :  { %v13246_v19 = vpop.f32.mrb[69].mxu1 }
 0x852   :  { %v13312_v20 = vadd.f32 %v13311_v59, %v13246_v19  ;;  %v15905_v25 = vpop.f32.mrb[70].mxu1 }
 0x853   :  { %v13249_v33 = vpop.f32.mrb[71].mxu1 }
 0x854   :  { %v13313_v42 = vadd.f32 %v13312_v20, %v13249_v33 }
 0x856   :  { %v13314_v12 = vadd.f32 %v15904_v2, %v13313_v42 }
 0x858   :  { %v15908_v51 = vpop.f32.mrb[72].mxu1  ;;  %v13315_v39 = vadd.f32 %v15905_v25, %v13314_v12 }
 0x859   :  { %v13262_v36 = vpop.f32.mrb[73].mxu1 }
 0x85a   :  { %v13316_v31 = vadd.f32 %v13315_v39, %v13262_v36  ;;  %v15909_v15 = vpop.f32.mrb[74].mxu1 }
 0x85b   :  { %v13265_v18 = vpop.f32.mrb[75].mxu1 }
 0x85c   :  { %v13317_v40 = vadd.f32 %v13316_v31, %v13265_v18 }
 0x85e   :  { %v13318_v61 = vadd.f32 %v15908_v51, %v13317_v40 }
 0x860   :  { %v15912_v4 = vpop.f32.mrb[76].mxu1  ;;  %v13319_v13 = vadd.f32 %v15909_v15, %v13318_v61 }
 0x861   :  { %v13278_v56 = vpop.f32.mrb[77].mxu1 }
 0x862   :  { %v13320_v22 = vadd.f32 %v13319_v13, %v13278_v56  ;;  %v15913_v58 = vpop.f32.mrb[78].mxu1 }
 0x863   :  { %v13281_v16 = vpop.f32.mrb[79].mxu1 }
 0x864   :  { %v13321_v3 = vadd.f32 %v13320_v22, %v13281_v16 }
 0x866   :  { %v13322_v41 = vadd.f32 %v15912_v4, %v13321_v3 }
 0x868   :  { %v13323_v28 = vadd.f32 %v15913_v58, %v13322_v41  ;;  %v13386_v41 = vld [vmem:[%s22859_s2 + $0x1] sm:$0x1]  ;;  %s17016_s2 = smov [#allocation6]  }
 0x86a   :  { %v13324_v8 = vrot.slane %v13323_v28, 4 }
 0x86c   :  { %v13325_v1 = vadd.f32 %v13324_v8, %v13323_v28 }
 0x86e   :  { %v13326_v26 = vrot.slane %v13325_v1, 2 }
 0x870   :  { %v13327_v60 = vadd.f32 %v13326_v26, %v13325_v1  ;;  %v23823_v1 = vld [vmem:[#allocation12_spill] sm:$0xff] }
 0x871   :  { %v23824_v26 = vsub.s32 0, %v23823_v1 }
 0x872   :  { %v13328_v5 = vrot.slane %v13327_v60, 1 }
 0x874   :  { %v13329_v35 = vadd.f32 %v13328_v5, %v13327_v60 }
 0x876   :  { %v13331_v10 = vmul.f32 0.0078125, %v13329_v35 }
 0x878   :  { %v13332_v45 = vsub.f32 %v13230_v32, %v13331_v10  ;;  %v13333_v21 = vsub.f32 %v13233_v27, %v13331_v10  ;;  %v13334_v30 = vsub.f32 %v15900_v54, %v13331_v10  ;;  %v13335_v0 = vsub.f32 %v15901_v37, %v13331_v10 }
 0x879   :  { %v13336_v17 = vsub.f32 %v13246_v19, %v13331_v10  ;;  %v13337_v34 = vsub.f32 %v13249_v33, %v13331_v10  ;;  %v13338_v44 = vsub.f32 %v15904_v2, %v13331_v10  ;;  %v13339_v6 = vsub.f32 %v15905_v25, %v13331_v10 }
 0x87a   :  { %v13340_v48 = vsub.f32 %v13262_v36, %v13331_v10  ;;  %v13341_v63 = vsub.f32 %v13265_v18, %v13331_v10  ;;  %v13342_v62 = vsub.f32 %v15908_v51, %v13331_v10  ;;  %v13343_v14 = vsub.f32 %v15909_v15, %v13331_v10 }
 0x87b   :  { %v13344_v53 = vsub.f32 %v13278_v56, %v13331_v10  ;;  %v13345_v55 = vsub.f32 %v13281_v16, %v13331_v10  ;;  %v13346_v24 = vsub.f32 %v15912_v4, %v13331_v10  ;;  %v13347_v23 = vsub.f32 %v15913_v58, %v13331_v10 }
 0x87c   :  { %v13348_v29 = vmul.f32 %v13332_v45, %v13332_v45  ;;  %v13349_v38 = vmul.f32 %v13333_v21, %v13333_v21  ;;  %v13350_v11 = vmul.f32 %v13334_v30, %v13334_v30  ;;  %v13351_v50 = vmul.f32 %v13335_v0, %v13335_v0 }
 0x87d   :  { %v13352_v46 = vmul.f32 %v13336_v17, %v13336_v17  ;;  %v13353_v47 = vmul.f32 %v13337_v34, %v13337_v34  ;;  %v13354_v54 = vmul.f32 %v13338_v44, %v13338_v44  ;;  %v13355_v37 = vmul.f32 %v13339_v6, %v13339_v6 }
 0x87e   :  { %v13364_v43 = vadd.f32 %v13349_v38, %v13348_v29  ;;  %v13356_v49 = vmul.f32 %v13340_v48, %v13340_v48  ;;  %v13357_v2 = vmul.f32 %v13341_v63, %v13341_v63  ;;  %v13358_v19 = vmul.f32 %v13342_v62, %v13342_v62 }
 0x87f   :  { %v13359_v25 = vmul.f32 %v13343_v14, %v13343_v14  ;;  %v13360_v42 = vmul.f32 %v13344_v53, %v13344_v53  ;;  %v13361_v51 = vmul.f32 %v13345_v55, %v13345_v55  ;;  %v13362_v36 = vmul.f32 %v13346_v24, %v13346_v24 }
 0x880   :  { %v13365_v7 = vadd.f32 %v13364_v43, %v13350_v11  ;;  %v13363_v15 = vmul.f32 %v13347_v23, %v13347_v23 }
 0x882   :  { %v13366_v9 = vadd.f32 %v13365_v7, %v13351_v50  ;;  %v14401_v7 = vld [vmem:[%s22860_s3 + $0x1] ss:$0 sm:$0xff]  ;;  %s13932_s3 = sshll.u32 %s17016_s2, 4  ;;  %s13933_s3 = int_to_ptr.vmem [resolvable:$true] %s13932_s3 }
 0x883   :  { %s16985_s12 = scalar_lea.vmem %s13933_s3, 512  ;;  %p16990_p9 = scmp.lt.s32.totalorder %s13933_s3, %s13933_s3 }
 0x884   :  { %v13367_v57 = vadd.f32 %v13366_v9, %v13352_v46  ;;  %p16986_p8 = scmp.ne.s32.totalorder %s13933_s3, %s16985_s12  ;;  %p16991_p10 = scmp.lt.s32.totalorder %s16985_s12, %s16985_s12 }
 0x886   :  { %v13368_v32 = vadd.f32 %v13367_v57, %v13353_v47  ;;  %p16992_p11 = por %p16991_p10, %p16990_p9 }
 0x888   :  { %v13369_v27 = vadd.f32 %v13368_v32, %v13354_v54  ;;  %p16993_p12 = pnand %p16992_p11, %p16986_p8 }
 0x88a   :  { %v13370_v52 = vadd.f32 %v13369_v27, %v13355_v37 }
 0x88c   :  { %v13371_v59 = vadd.f32 %v13370_v52, %v13356_v49 }
 0x88e   :  { %v13372_v20 = vadd.f32 %v13371_v59, %v13357_v2 }
 0x890   :  { %v13373_v33 = vadd.f32 %v13372_v20, %v13358_v19 }
 0x892   :  { %v13374_v12 = vadd.f32 %v13373_v33, %v13359_v25 }
 0x894   :  { %v13375_v39 = vadd.f32 %v13374_v12, %v13360_v42 }
 0x896   :  { %v13376_v31 = vadd.f32 %v13375_v39, %v13361_v51 }
 0x898   :  { %v13377_v18 = vadd.f32 %v13376_v31, %v13362_v36 }
 0x89a   :  { %v13378_v40 = vadd.f32 %v13377_v18, %v13363_v15 }
 0x89c   :  { %v13379_v61 = vrot.slane %v13378_v40, 4 }
 0x89e   :  { %v13380_v4 = vadd.f32 %v13379_v61, %v13378_v40 }
 0x8a0   :  { %v13381_v13 = vrot.slane %v13380_v4, 2 }
 0x8a2   :  { %v13382_v56 = vadd.f32 %v13381_v13, %v13380_v4 }
 0x8a4   :  { %v13383_v22 = vrot.slane %v13382_v56, 1 }
 0x8a6   :  { %v13384_v58 = vadd.f32 %v13383_v22, %v13382_v56 }
 0x8a8   :  { %v13385_v16 = vmul.f32 0.0078125, %v13384_v58 }
 0x8aa   :  { %v13387_v3 = vadd.f32 1e-05, %v13385_v16 }
 0x8ac   :  { %16938 = vrsqrt.f32 %v13387_v3  ;;  %v23825_v3 = vld [vmem:[#allocation9_spill] sm:$0xff] }
 0x8b6   :  { %v16939_v28 = vpop.eup %16938 }
 0x8b7   :  { %v13389_v8 = vmul.f32 %v16939_v28, %v13386_v41 }
 0x8b9   :  { %v13393_v60 = vrot.slane %v13389_v8, %v23824_v26 }
 0x8bb   :  { %v13394_v5 = vmul.f32 %v13393_v60, %v13332_v45  ;;  %v13395_v35 = vmul.f32 %v13393_v60, %v13333_v21  ;;  %v13396_v10 = vmul.f32 %v13393_v60, %v13334_v30  ;;  %v13397_v29 = vmul.f32 %v13393_v60, %v13335_v0 }
 0x8bc   :  { %v13398_v38 = vmul.f32 %v13393_v60, %v13336_v17  ;;  %v13399_v11 = vmul.f32 %v13393_v60, %v13337_v34  ;;  %v13400_v43 = vmul.f32 %v13393_v60, %v13338_v44  ;;  %v13401_v50 = vmul.f32 %v13393_v60, %v13339_v6 }
 0x8bd   :  { %v13402_v46 = vmul.f32 %v13393_v60, %v13340_v48  ;;  %v13403_v9 = vmul.f32 %v13393_v60, %v13341_v63  ;;  %v13404_v47 = vmul.f32 %v13393_v60, %v13342_v62  ;;  %v13405_v57 = vmul.f32 %v13393_v60, %v13343_v14 }
 0x8be   :  { %v13406_v54 = vmul.f32 %v13393_v60, %v13344_v53  ;;  %v13407_v32 = vmul.f32 %v13393_v60, %v13345_v55  ;;  %v13408_v37 = vmul.f32 %v13393_v60, %v13346_v24  ;;  %v13409_v27 = vmul.f32 %v13393_v60, %v13347_v23 }
 0x8bf   :  { %v13415_v45 = vadd.f32 %v14401_v7, %v13394_v5  ;;  %v13416_v21 = vadd.f32 %v14401_v7, %v13395_v35  ;;  %v13417_v30 = vadd.f32 %v14401_v7, %v13396_v10  ;;  %v13418_v0 = vadd.f32 %v14401_v7, %v13397_v29 }
 0x8c0   :  { %v13419_v17 = vadd.f32 %v14401_v7, %v13398_v38  ;;  %v13420_v34 = vadd.f32 %v14401_v7, %v13399_v11  ;;  %v13421_v44 = vadd.f32 %v14401_v7, %v13400_v43  ;;  %v13422_v6 = vadd.f32 %v14401_v7, %v13401_v50 }
 0x8c1   :  { %v13423_v49 = vadd.f32 %v14401_v7, %v13402_v46  ;;  %v13424_v52 = vadd.f32 %v14401_v7, %v13403_v9  ;;  %v13425_v2 = vadd.f32 %v14401_v7, %v13404_v47  ;;  %v13426_v59 = vadd.f32 %v14401_v7, %v13405_v57 }
 0x8c2   :  { %v13427_v48 = vadd.f32 %v14401_v7, %v13406_v54  ;;  %v13428_v63 = vadd.f32 %v14401_v7, %v13407_v32  ;;  %v13429_v62 = vadd.f32 %v14401_v7, %v13408_v37  ;;  %v13430_v14 = vadd.f32 %v14401_v7, %v13409_v27 }
 0x8c3   :  { %v13431_v53 = vmax.f32 %v13415_v45, 0.0  ;;  %v13432_v55 = vmax.f32 %v13416_v21, 0.0  ;;  %v13433_v24 = vmax.f32 %v13417_v30, 0.0  ;;  %v13434_v23 = vmax.f32 %v13418_v0, 0.0 }
 0x8c4   :  { %v13435_v19 = vmax.f32 %v13419_v17, 0.0  ;;  %v13436_v20 = vmax.f32 %v13420_v34, 0.0  ;;  %v13437_v25 = vmax.f32 %v13421_v44, 0.0  ;;  %v13438_v33 = vmax.f32 %v13422_v6, 0.0 }
 0x8c5   :  { %v13439_v42 = vmax.f32 %v13423_v49, 0.0  ;;  %v13440_v12 = vmax.f32 %v13424_v52, 0.0  ;;  %v13441_v51 = vmax.f32 %v13425_v2, 0.0  ;;  %v13442_v39 = vmax.f32 %v13426_v59, 0.0 }
 0x8c6   :  { %v13443_v36 = vmax.f32 %v13427_v48, 0.0  ;;  %v13444_v31 = vmax.f32 %v13428_v63, 0.0  ;;  %v13445_v15 = vmax.f32 %v13429_v62, 0.0  ;;  %v13446_v18 = vmax.f32 %v13430_v14, 0.0 }
 0x8c7   :  { %v22612_v40 = vmax.f32 %v13431_v53, %v13432_v55  ;;  %v22614_v61 = vmax.f32 %v13433_v24, %v13434_v23  ;;  %v13449_v4 = vmax.f32 %v13435_v19, %v13436_v20  ;;  %v13450_v13 = vmax.f32 %v13437_v25, %v13438_v33 }
 0x8c8   :  { %v13451_v56 = vmax.f32 %v13439_v42, %v13440_v12  ;;  %v13452_v22 = vmax.f32 %v13441_v51, %v13442_v39  ;;  %v13453_v58 = vmax.f32 %v13443_v36, %v13444_v31  ;;  %v13454_v16 = vmax.f32 %v13445_v15, %v13446_v18 }
 0x8c9   :  { %v22618_v41 = vrot.slane %v22612_v40, %v23825_v3  ;;  %v13480_v28 = vcombine.high %v22614_v61, %v22614_v61  ;;  %v22624_v8 = vrot.slane %v22614_v61, %v23825_v3  ;;  %v13497_v1 = vcombine.high %v13449_v4, %v13449_v4 }
 0x8ca   :  { %v13504_v26 = vrot.slane %v13449_v4, %v23825_v3  ;;  %v13514_v60 = vcombine.high %v13450_v13, %v13450_v13  ;;  %v13521_v5 = vrot.slane %v13450_v13, %v23825_v3  ;;  %v13531_v35 = vcombine.high %v13451_v56, %v13451_v56 }
 0x8cb   :  { %v13495_v10 = vcombine.high %v22624_v8, %v22624_v8  ;;  %v22631_v29 = vrot.slane %v13497_v1, %v23825_v3  ;;  %v13538_v38 = vrot.slane %v13451_v56, %v23825_v3  ;;  %v13548_v11 = vcombine.high %v13452_v22, %v13452_v22 }
 0x8cc   :  { %v13512_v43 = vcombine.high %v13504_v26, %v13504_v26  ;;  %v22635_v50 = vrot.slane %v13514_v60, %v23825_v3  ;;  %v13529_v7 = vcombine.high %v13521_v5, %v13521_v5  ;;  %v13545_v46 = vrot.slane %v13531_v35, %v23825_v3 }
 0x8cd   :  { %v13546_v9 = vcombine.high %v13538_v38, %v13538_v38  ;;  %v13555_v47 = vrot.slane %v13452_v22, %v23825_v3  ;;  %v22640_v57 = vrot.slane %v13548_v11, %v23825_v3  ;;  %v13565_v54 = vcombine.high %v13453_v58, %v13453_v58 }
 0x8ce   :  { %v13530_v32 = vcombine.high %v22635_v50, %v22635_v50  ;;  %v13547_v37 = vcombine.high %v13545_v46, %v13545_v46  ;;  %v22645_v27 = vrot.slane %v13453_v58, %v23825_v3  ;;  %v13582_v45 = vcombine.high %v13454_v16, %v13454_v16 }
 0x8cf   :  { %v13563_v21 = vcombine.high %v13555_v47, %v13555_v47  ;;  %v13564_v30 = vcombine.high %v22640_v57, %v22640_v57  ;;  %v22650_v0 = vrot.slane %v13565_v54, %v23825_v3  ;;  %v22653_v17 = vrot.slane %v13454_v16, %v23825_v3 }
 0x8d0   :  { %v13580_v34 = vcombine.high %v22645_v27, %v22645_v27  ;;  %v22658_v44 = vrot.slane %v13582_v45, %v23825_v3  ;;  %v22662_v6 = vsel %vm7997_vm11, %v22624_v8, -inf  ;;  %v13687_v49 = vsel %vm7997_vm11, %v13504_v26, -inf }
 0x8d1   :  { %v13581_v52 = vcombine.high %v22650_v0, %v22650_v0  ;;  %v13597_v2 = vcombine.high %v22653_v17, %v22653_v17  ;;  %v13660_v59 = vrot.slane %v22662_v6, 4  ;;  %v13688_v48 = vrot.slane %v13687_v49, 4 }
 0x8d2   :  { %v13598_v63 = vcombine.high %v22658_v44, %v22658_v44  ;;  %v13694_v62 = vsel %vm7997_vm11, %v13512_v43, -inf  ;;  %v22675_v14 = vsel %vm7997_vm11, %v22631_v29, -inf  ;;  %v13715_v53 = vsel %vm7997_vm11, %v13521_v5, -inf }
 0x8d3   :  { %v22678_v55 = vmax.f32 %v13687_v49, %v13688_v48  ;;  %v13695_v24 = vrot.slane %v13694_v62, 4  ;;  %v13702_v23 = vrot.slane %v22675_v14, 4  ;;  %v13716_v19 = vrot.slane %v13715_v53, 4 }
 0x8d4   :  { %v13722_v20 = vsel %vm7997_vm11, %v13529_v7, -inf  ;;  %v13729_v25 = vsel %vm7997_vm11, %v22635_v50, -inf  ;;  %v13743_v33 = vsel %vm7997_vm11, %v13538_v38, -inf  ;;  %v13750_v42 = vsel %vm7997_vm11, %v13546_v9, -inf }
 0x8d5   :  { %v13690_v12 = vrot.slane %v22678_v55, 2  ;;  %v22687_v51 = vmax.f32 %v13694_v62, %v13695_v24  ;;  %v13717_v39 = vmax.f32 %v13715_v53, %v13716_v19  ;;  %v13723_v36 = vrot.slane %v13722_v20, 4 }
 0x8d6   :  { %v13730_v31 = vrot.slane %v13729_v25, 4  ;;  %v13744_v15 = vrot.slane %v13743_v33, 4  ;;  %v13751_v18 = vrot.slane %v13750_v42, 4  ;;  %v13757_v4 = vsel %vm7997_vm11, %v13545_v46, -inf }
 0x8d7   :  { %v13718_v13 = vrot.slane %v13717_v39, 2  ;;  %v13724_v56 = vmax.f32 %v13722_v20, %v13723_v36  ;;  %v13758_v22 = vrot.slane %v13757_v4, 4  ;;  %v13764_v58 = vsel %vm7997_vm11, %v13547_v37, -inf }
 0x8d8   :  { %v22691_v16 = vmax.f32 %v13729_v25, %v13730_v31  ;;  %v13745_v1 = vmax.f32 %v13743_v33, %v13744_v15  ;;  %v13752_v26 = vmax.f32 %v13750_v42, %v13751_v18  ;;  %v13765_v60 = vrot.slane %v13764_v58, 4 }
 0x8d9   :  { %v22693_v5 = vmax.f32 %v13717_v39, %v13718_v13  ;;  %v13725_v35 = vrot.slane %v13724_v56, 2  ;;  %v13759_v38 = vmax.f32 %v13757_v4, %v13758_v22  ;;  %v13771_v11 = vsel %vm7997_vm11, %v13555_v47, -inf }
 0x8da   :  { %v13732_v43 = vrot.slane %v22691_v16, 2  ;;  %v13746_v7 = vrot.slane %v13745_v1, 2  ;;  %v13753_v46 = vrot.slane %v13752_v26, 2  ;;  %v22697_v9 = vmax.f32 %v13764_v58, %v13765_v60 }
 0x8db   :  { %v13720_v54 = vrot.slane %v22693_v5, 1  ;;  %v22700_v37 = vmax.f32 %v13724_v56, %v13725_v35  ;;  %v13760_v45 = vrot.slane %v13759_v38, 2  ;;  %v13772_v49 = vrot.slane %v13771_v11, 4 }
 0x8dc   :  { %v13747_v48 = vmax.f32 %v13745_v1, %v13746_v7  ;;  %v13754_v62 = vmax.f32 %v13752_v26, %v13753_v46  ;;  %v13778_v53 = vsel %vm7997_vm11, %v13563_v21, -inf  ;;  %v13785_v24 = vsel %vm7997_vm11, %v22640_v57, -inf }
 0x8dd   :  { %v22705_v47 = vmax.f32 %v13759_v38, %v13760_v45  ;;  %v13773_v19 = vmax.f32 %v13771_v11, %v13772_v49  ;;  %v13779_v20 = vrot.slane %v13778_v53, 4  ;;  %v13786_v25 = vrot.slane %v13785_v24, 4 }
 0x8de   :  { %v13748_v33 = vrot.slane %v13747_v48, 1  ;;  %v13755_v42 = vrot.slane %v13754_v62, 1  ;;  %v13792_v39 = vsel %vm7997_vm11, %v13564_v30, -inf  ;;  %v13799_v36 = vsel %vm7997_vm11, %v22645_v27, -inf }
 0x8df   :  { %v13762_v31 = vrot.slane %v22705_v47, 1  ;;  %v13774_v15 = vrot.slane %v13773_v19, 2  ;;  %v13780_v18 = vmax.f32 %v13778_v53, %v13779_v20  ;;  %v13787_v21 = vmax.f32 %v13785_v24, %v13786_v25 }
 0x8e0   :  { %v22711_v4 = vmax.f32 %v13747_v48, %v13748_v33  ;;  %v22713_v57 = vmax.f32 %v13754_v62, %v13755_v42  ;;  %v13793_v13 = vrot.slane %v13792_v39, 4  ;;  %v13800_v56 = vrot.slane %v13799_v36, 4 }
 0x8e1   :  { %v13775_v22 = vmax.f32 %v13773_v19, %v13774_v15  ;;  %v13781_v58 = vrot.slane %v13780_v18, 2  ;;  %v13788_v1 = vrot.slane %v13787_v21, 2  ;;  %v13806_v30 = vsel %vm7997_vm11, %v13580_v34, -inf }
 0x8e2   :  { %v13794_v26 = vmax.f32 %v13792_v39, %v13793_v13  ;;  %v13801_v60 = vmax.f32 %v13799_v36, %v13800_v56  ;;  %v13807_v35 = vrot.slane %v13806_v30, 4  ;;  %v13813_v38 = vsel %vm7997_vm11, %v22650_v0, -inf }
 0x8e3   :  { %v13776_v11 = vrot.slane %v13775_v22, 1  ;;  %v13782_v7 = vmax.f32 %v13780_v18, %v13781_v58  ;;  %v13789_v46 = vmax.f32 %v13787_v21, %v13788_v1  ;;  %v13814_v45 = vrot.slane %v13813_v38, 4 }
 0x8e4   :  { %v13795_v49 = vrot.slane %v13794_v26, 2  ;;  %v13802_v48 = vrot.slane %v13801_v60, 2  ;;  %v13808_v62 = vmax.f32 %v13806_v30, %v13807_v35  ;;  %v13820_v27 = vsel %vm7997_vm11, %v13581_v52, -inf }
 0x8e5   :  { %v22725_v53 = vmax.f32 %v13775_v22, %v13776_v11  ;;  %v13783_v34 = vrot.slane %v13782_v7, 1  ;;  %v13790_v24 = vrot.slane %v13789_v46, 1  ;;  %v13815_v19 = vmax.f32 %v13813_v38, %v13814_v45 }
 0x8e6   :  { %v22727_v20 = vmax.f32 %v13794_v26, %v13795_v49  ;;  %v13803_v25 = vmax.f32 %v13801_v60, %v13802_v48  ;;  %v13809_v33 = vrot.slane %v13808_v62, 2  ;;  %v13821_v42 = vrot.slane %v13820_v27, 4 }
 0x8e7   :  { %v22729_v39 = vmax.f32 %v13782_v7, %v13783_v34  ;;  %v22731_v36 = vmax.f32 %v13789_v46, %v13790_v24  ;;  %v13816_v15 = vrot.slane %v13815_v19, 2  ;;  %v13827_v0 = vsel %vm7997_vm11, %v22653_v17, -inf }
 0x8e8   :  { %v13804_v18 = vrot.slane %v13803_v25, 1  ;;  %v13810_v52 = vmax.f32 %v13808_v62, %v13809_v33  ;;  %v13822_v21 = vmax.f32 %v13820_v27, %v13821_v42  ;;  %v13828_v13 = vrot.slane %v13827_v0, 4 }
 0x8e9   :  { %v13817_v56 = vmax.f32 %v13815_v19, %v13816_v15  ;;  %v13834_v22 = vsel %vm7997_vm11, %v13597_v2, -inf  ;;  %v13841_v58 = vsel %vm7997_vm11, %v22658_v44, -inf  ;;  %v13848_v1 = vsel %vm7997_vm11, %v13598_v63, -inf }
 0x8ea   :  { %v13805_v30 = vmax.f32 %v13803_v25, %v13804_v18  ;;  %v13811_v26 = vrot.slane %v13810_v52, 1  ;;  %v13823_v60 = vrot.slane %v13822_v21, 2  ;;  %v13829_v35 = vmax.f32 %v13827_v0, %v13828_v13 }
 0x8eb   :  { %v13818_v38 = vrot.slane %v13817_v56, 1  ;;  %v13835_v11 = vrot.slane %v13834_v22, 4  ;;  %v13842_v7 = vrot.slane %v13841_v58, 4  ;;  %v13849_v46 = vrot.slane %v13848_v1, 4 }
 0x8ec   :  { %v13812_v45 = vmax.f32 %v13810_v52, %v13811_v26  ;;  %v13824_v17 = vmax.f32 %v13822_v21, %v13823_v60  ;;  %v13830_v49 = vrot.slane %v13829_v35, 2  ;;  %v13463_v2 = vcombine.high %v22612_v40, %v22612_v40 }
 0x8ed   :  { %v13819_v48 = vmax.f32 %v13817_v56, %v13818_v38  ;;  %v13836_v62 = vmax.f32 %v13834_v22, %v13835_v11  ;;  %v13843_v27 = vmax.f32 %v13841_v58, %v13842_v7  ;;  %v13850_v44 = vmax.f32 %v13848_v1, %v13849_v46 }
 0x8ee   :  { %v13825_v34 = vrot.slane %v13824_v17, 1  ;;  %v13831_v63 = vmax.f32 %v13829_v35, %v13830_v49  ;;  %v13905_v24 = vsel %vm9359_vm12, %v13812_v45, %v13805_v30  ;;  %v13477_v19 = vrot.slane %v13463_v2, %v23825_v3 }
 0x8ef   :  { %v13837_v25 = vrot.slane %v13836_v62, 2  ;;  %v13844_v33 = vrot.slane %v13843_v27, 2  ;;  %v13851_v42 = vrot.slane %v13850_v44, 2  ;;  %v13906_v15 = vsel %vm9361_vm13, %v13819_v48, %v13905_v24 }
 0x8f0   :  { %v13826_v0 = vmax.f32 %v13824_v17, %v13825_v34  ;;  %v13832_v18 = vrot.slane %v13831_v63, 1  ;;  %v13478_v40 = vcombine.high %v22618_v41, %v22618_v41  ;;  %v13479_v52 = vcombine.high %v13477_v19, %v13477_v19 }
 0x8f1   :  { %v13838_v21 = vmax.f32 %v13836_v62, %v13837_v25  ;;  %v13845_v13 = vmax.f32 %v13843_v27, %v13844_v33  ;;  %v22752_v56 = vmax.f32 %v13850_v44, %v13851_v42  ;;  %v13494_v22 = vrot.slane %v13480_v28, %v23825_v3 }
 0x8f2   :  { %v22758_v58 = vmax.f32 %v13831_v63, %v13832_v18  ;;  %v13907_v1 = vsel %vm9363_vm14, %v13826_v0, %v13906_v15  ;;  %v13513_v30 = vcombine.high %v22631_v29, %v22631_v29  ;;  %v13631_v26 = vsel %vm7997_vm11, %v22618_v41, -inf }
 0x8f3   :  { %v13839_v60 = vrot.slane %v13838_v21, 1  ;;  %v13846_v35 = vrot.slane %v13845_v13, 1  ;;  %v13853_v38 = vrot.slane %v22752_v56, 1  ;;  %13925 = vst [vmem:[#allocation6 + $0x18] sm:$0xf] %v13907_v1  ;;  %v13496_v11 = vcombine.high %v13494_v22, %v13494_v22 }
 0x8f4   :  { %v13632_v7 = vrot.slane %v13631_v26, 4  ;;  %v13638_v61 = vsel %vm7997_vm11, %v13478_v40, -inf  ;;  %v13645_v3 = vsel %vm7997_vm11, %v13477_v19, -inf  ;;  %v13652_v28 = vsel %vm7997_vm11, %v13479_v52, -inf }
 0x8f5   :  { %v22769_v46 = vmax.f32 %v13838_v21, %v13839_v60  ;;  %v22771_v45 = vmax.f32 %v13845_v13, %v13846_v35  ;;  %v13639_v29 = vrot.slane %v13638_v61, 4  ;;  %v13646_v17 = vrot.slane %v13645_v3, 4 }
 0x8f6   :  { %v13633_v41 = vmax.f32 %v13631_v26, %v13632_v7  ;;  %v13653_v49 = vrot.slane %v13652_v28, 4  ;;  %v13661_v2 = vmax.f32 %v22662_v6, %v13660_v59  ;;  %v13666_v48 = vsel %vm7997_vm11, %v13495_v10, -inf }
 0x8f7   :  { %v13640_v62 = vmax.f32 %v13638_v61, %v13639_v29  ;;  %v13647_v27 = vmax.f32 %v13645_v3, %v13646_v17  ;;  %v13667_v44 = vrot.slane %v13666_v48, 4  ;;  %v13673_v34 = vsel %vm7997_vm11, %v13494_v22, -inf }
 0x8f8   :  { %v13634_v63 = vrot.slane %v13633_v41, 2  ;;  %v13654_v24 = vmax.f32 %v13652_v28, %v13653_v49  ;;  %v13662_v19 = vrot.slane %v13661_v2, 2  ;;  %v13674_v25 = vrot.slane %v13673_v34, 4 }
 0x8f9   :  { %v13641_v33 = vrot.slane %v13640_v62, 2  ;;  %v13648_v42 = vrot.slane %v13647_v27, 2  ;;  %v13668_v15 = vmax.f32 %v13666_v48, %v13667_v44  ;;  %v13680_v0 = vsel %vm7997_vm11, %v13496_v11, -inf }
 0x8fa   :  { %v13635_v6 = vmax.f32 %v13633_v41, %v13634_v63  ;;  %v13655_v59 = vrot.slane %v13654_v24, 2  ;;  %v13663_v18 = vmax.f32 %v13661_v2, %v13662_v19  ;;  %v13675_v8 = vmax.f32 %v13673_v34, %v13674_v25 }
 0x8fb   :  { %v13642_v40 = vmax.f32 %v13640_v62, %v13641_v33  ;;  %v13649_v10 = vmax.f32 %v13647_v27, %v13648_v42  ;;  %v13669_v52 = vrot.slane %v13668_v15, 2  ;;  %v13681_v21 = vrot.slane %v13680_v0, 4 }
 0x8fc   :  { %v13636_v13 = vrot.slane %v13635_v6, 1  ;;  %v13656_v1 = vmax.f32 %v13654_v24, %v13655_v59  ;;  %v13664_v22 = vrot.slane %v13663_v18, 1  ;;  %v13676_v26 = vrot.slane %v13675_v8, 2 }
 0x8fd   :  { %v13643_v60 = vrot.slane %v13642_v40, 1  ;;  %v13650_v35 = vrot.slane %v13649_v10, 1  ;;  %v13670_v7 = vmax.f32 %v13668_v15, %v13669_v52  ;;  %v13682_v61 = vmax.f32 %v13680_v0, %v13681_v21 }
 0x8fe   :  { %v13637_v3 = vmax.f32 %v13635_v6, %v13636_v13  ;;  %v13657_v28 = vrot.slane %v13656_v1, 1  ;;  %v13665_v29 = vmax.f32 %v13663_v18, %v13664_v22  ;;  %v13677_v11 = vmax.f32 %v13675_v8, %v13676_v26 }
 0x8ff   :  { %v13644_v17 = vmax.f32 %v13642_v40, %v13643_v60  ;;  %v13651_v41 = vmax.f32 %v13649_v10, %v13650_v35  ;;  %v13671_v49 = vrot.slane %v13670_v7, 1  ;;  %v13683_v2 = vrot.slane %v13682_v61, 2 }
 0x900   :  { %v13658_v48 = vmax.f32 %v13656_v1, %v13657_v28  ;;  %v13678_v62 = vrot.slane %v13677_v11, 1  ;;  %v13691_v27 = vmax.f32 %v22678_v55, %v13690_v12  ;;  %v13697_v44 = vrot.slane %v22687_v51, 2 }
 0x901   :  { %v13672_v34 = vmax.f32 %v13670_v7, %v13671_v49  ;;  %v13684_v63 = vmax.f32 %v13682_v61, %v13683_v2  ;;  %v13703_v24 = vmax.f32 %v22675_v14, %v13702_v23  ;;  %v13708_v19 = vsel %vm7997_vm11, %v13513_v30, -inf }
 0x902   :  { %v13679_v25 = vmax.f32 %v13677_v11, %v13678_v62  ;;  %v13692_v33 = vrot.slane %v13691_v27, 1  ;;  %v13698_v42 = vmax.f32 %v22687_v51, %v13697_v44  ;;  %v13709_v15 = vrot.slane %v13708_v19, 4 }
 0x903   :  { %v13685_v0 = vrot.slane %v13684_v63, 1  ;;  %v13704_v6 = vrot.slane %v13703_v24, 2  ;;  %v13721_v55 = vmax.f32 %v22693_v5, %v13720_v54  ;;  %v13727_v12 = vrot.slane %v22700_v37, 1 }
 0x904   :  { %v13693_v59 = vmax.f32 %v13691_v27, %v13692_v33  ;;  %v13699_v18 = vrot.slane %v13698_v42, 1  ;;  %v13710_v8 = vmax.f32 %v13708_v19, %v13709_v15  ;;  %v13733_v14 = vmax.f32 %v22691_v16, %v13732_v43 }
 0x905   :  { %v13686_v23 = vmax.f32 %v13684_v63, %v13685_v0  ;;  %v13705_v30 = vmax.f32 %v13703_v24, %v13704_v6  ;;  %v13728_v51 = vmax.f32 %v22700_v37, %v13727_v12  ;;  %v13736_v40 = vsel %vm7997_vm11, %v13530_v32, -inf }
 0x906   :  { %v13700_v10 = vmax.f32 %v13698_v42, %v13699_v18  ;;  %v13711_v5 = vrot.slane %v13710_v8, 2  ;;  %v13734_v54 = vrot.slane %v13733_v14, 1  ;;  %v13737_v52 = vrot.slane %v13736_v40, 4 }
 0x907   :  { %v13706_v21 = vrot.slane %v13705_v30, 1  ;;  %v13763_v13 = vmax.f32 %v22705_v47, %v13762_v31  ;;  %v13767_v16 = vrot.slane %v22697_v9, 2  ;;  %v13797_v43 = vrot.slane %v22727_v20, 1 }
 0x908   :  { %v13712_v1 = vmax.f32 %v13710_v8, %v13711_v5  ;;  %v13735_v37 = vmax.f32 %v13733_v14, %v13734_v54  ;;  %v13738_v22 = vmax.f32 %v13736_v40, %v13737_v52  ;;  %v13854_v50 = vmax.f32 %v22752_v56, %v13853_v38 }
 0x909   :  { %v13707_v32 = vmax.f32 %v13705_v30, %v13706_v21  ;;  %v13768_v26 = vmax.f32 %v22697_v9, %v13767_v16  ;;  %v13798_v60 = vmax.f32 %v22727_v20, %v13797_v43  ;;  %v13887_v35 = vsel %vm9359_vm12, %v13644_v17, %v13637_v3 }
 0x90a   :  { %v13713_v7 = vrot.slane %v13712_v1, 1  ;;  %v13739_v47 = vrot.slane %v13738_v22, 2  ;;  %v13888_v31 = vsel %vm9361_vm13, %v13651_v41, %v13887_v35  ;;  %v13890_v61 = vsel %vm9359_vm12, %v13672_v34, %v13665_v29 }
 0x90b   :  { %v13769_v28 = vrot.slane %v13768_v26, 1  ;;  %v13889_v11 = vsel %vm9363_vm14, %v13658_v48, %v13888_v31  ;;  %v13891_v49 = vsel %vm9361_vm13, %v13679_v25, %v13890_v61  ;;  %v13893_v56 = vsel %vm9359_vm12, %v13700_v10, %v13693_v59 }
 0x90c   :  { %v13714_v38 = vmax.f32 %v13712_v1, %v13713_v7  ;;  %v13740_v2 = vmax.f32 %v13738_v22, %v13739_v47  ;;  %v13892_v9 = vsel %vm9363_vm14, %v13686_v23, %v13891_v49  ;;  %v13894_v20 = vsel %vm9361_vm13, %v13707_v32, %v13893_v56  ;;  %13919 = vst [vmem:[#allocation6] sm:$0xf] %v13889_v11 }
 0x90d   :  { %v13770_v3 = vmax.f32 %v13768_v26, %v13769_v28  ;;  %v13896_v17 = vsel %vm9359_vm12, %v13728_v51, %v13721_v55  ;;  %v13899_v29 = vsel %vm9359_vm12, %v22713_v57, %v22711_v4  ;;  %v13902_v41 = vsel %vm9359_vm12, %v22729_v39, %v22725_v53  ;;  %13920 = vst [vmem:[#allocation6 + $0x4] sm:$0xf] %v13892_v9 }
 0x90e   :  { %v13741_v48 = vrot.slane %v13740_v2, 1  ;;  %v13895_v62 = vsel %vm9363_vm14, %v13714_v38, %v13894_v20  ;;  %v13900_v27 = vsel %vm9361_vm13, %v13763_v13, %v13899_v29  ;;  %v13897_v44 = vsel %vm9361_vm13, %v13735_v37, %v13896_v17 }
 0x90f   :  { %v13901_v34 = vsel %vm9363_vm14, %v13770_v3, %v13900_v27  ;;  %v13903_v63 = vsel %vm9361_vm13, %v22731_v36, %v13902_v41  ;;  %v13908_v4 = vsel %vm9359_vm12, %v22769_v46, %v22758_v58  ;;  %13921 = vst [vmem:[#allocation6 + $0x8] sm:$0xf] %v13895_v62 }
 0x910   :  { %v13742_v57 = vmax.f32 %v13740_v2, %v13741_v48  ;;  %v13904_v53 = vsel %vm9363_vm14, %v13798_v60, %v13903_v63  ;;  %v13909_v39 = vsel %vm9361_vm13, %v22771_v45, %v13908_v4  ;;  %13923 = vst [vmem:[#allocation6 + $0x10] sm:$0xf] %v13901_v34 }
 0x911   :  { %v13910_v24 = vsel %vm9363_vm14, %v13854_v50, %v13909_v39  ;;  %13924 = vst [vmem:[#allocation6 + $0x14] sm:$0xf] %v13904_v53 }
 0x912   :  { %v13898_v19 = vsel %vm9363_vm14, %v13742_v57, %v13897_v44  ;;  %13926 = vst [vmem:[#allocation6 + $0x1c] sm:$0xf] %v13910_v24 }
 0x913   :  { %13922 = vst [vmem:[#allocation6 + $0xc] sm:$0xf] %v13898_v19 }
 0x914   :  { %16996 = shalt.err (!%p16993_p12)
}
 0x915   :  { %s16997_s15 = scalar_lea.hbm %s22861_s4, 512 }
 0x916   :  { %p16998_p13 = scmp.ne.s32.totalorder %s22861_s4, %s16997_s15  ;;  %p17001_p0 = scmp.lt.u32.totalorder %s16997_s15, %s22861_s4 }
 0x918   :  { %p17003_p1 = pnand %p17001_p0, %p16998_p13 }
 0x91a   :  { %17006 = shalt.err (!%p17003_p1)
}
 0x91b   :  { %13938 = dma.vmem_to_hbm [thread:$0]  %s13933_s3, 512, %s22861_s4, [#allocation5], %s17012_s25, %s17012_s25, %s17013_s26  }
 0x91c   :  { %17009 = dma.done.wait [#allocation5], 512  }
 0x91d   :  { %17010 = vsyncadd [#allocation5], 4294966784 }
 0x91e   :  { %13942 = vsyncpa [#allocation4], 1 }
 0x91f   :  { %13943 = vsyncpa [#allocation5], 1 }

</bundles_post_ra>
